<compile_context>
chip_gen: v6e
topology: v6e:2x2x1
jax: 0.10.0
libtpu: 0.0.40
codegen_flags: <defaults>
</compile_context>

<pallas_src>
import jax
import jax.numpy as jnp
from jax.experimental import pallas as pl
from jax.experimental.pallas import tpu as pltpu


def _round_up(n, m):
    return ((n + m - 1) // m) * m


# Row layout of the packed per-feature vector table (16, 6F), f32.
_ROW_B1, _ROW_S2, _ROW_T2, _ROW_B2, _ROW_B3 = 0, 1, 2, 3, 4
_ROW_S4, _ROW_T4, _ROW_B4, _ROW_S5, _ROW_T5, _ROW_B5 = 5, 6, 7, 8, 9, 10
_VEC_ROWS = 16  # padded to a sublane multiple


# ----------------------------------------------------------------------------
# Pallas kernel: fused LinearBlock forward for one (TM, F) node tile
# ----------------------------------------------------------------------------
def linearblock_kernel(alpha_ref, x_ref, vec_ref,
                       w1_ref, w2_ref, w3_ref, w4_ref, w5_ref,
                       out_ref, acc_ref):
    # PReLU slopes live in SMEM; hoist the scalar reads once per tile.
    a2 = alpha_ref[0]
    a3 = alpha_ref[1]
    a4 = alpha_ref[2]
    a5 = alpha_ref[3]

    F = x_ref.shape[1]

    # Per-feature vectors, read from the packed VMEM-resident table.
    b1 = vec_ref[_ROW_B1:_ROW_B1 + 1, :]
    s2 = vec_ref[_ROW_S2:_ROW_S2 + 1, :]
    t2 = vec_ref[_ROW_T2:_ROW_T2 + 1, :]
    b2 = vec_ref[_ROW_B2:_ROW_B2 + 1, :]   # BN3 already folded in
    b3 = vec_ref[_ROW_B3:_ROW_B3 + 1, :]
    s4 = vec_ref[_ROW_S4:_ROW_S4 + 1, :]
    t4 = vec_ref[_ROW_T4:_ROW_T4 + 1, :]
    b4 = vec_ref[_ROW_B4:_ROW_B4 + 1, :]
    s5 = vec_ref[_ROW_S5:_ROW_S5 + 1, :]
    t5 = vec_ref[_ROW_T5:_ROW_T5 + 1, :]
    b5 = vec_ref[_ROW_B5:_ROW_B5 + 1, :F]

    def lin(z, w_ref, b):
        # bf16 operands into the MXU, f32 accumulation, f32 bias add.
        return jnp.dot(z.astype(jnp.bfloat16), w_ref[...],
                       preferred_element_type=jnp.float32) + b

    def prelu(z, a):
        return jnp.where(z >= 0.0, z, a * z)

    def bn_prelu(z, s, t, a):
        # folded eval-mode BatchNorm1d (per-feature affine) then PReLU
        return prelu(z * s + t, a)

    # lin1: BatchNorm1d folded into w1/b1 -> Linear(F -> 6F)
    acc_ref[...] = lin(x_ref[...], w1_ref, b1)

    # x = (lin3(lin2(x)) + x) / 2
    # BN3 is folded into w2/b2 (exact: lin2 output feeds only BN3->PReLU3->Lin3)
    t = lin(bn_prelu(acc_ref[...], s2, t2, a2), w2_ref, b2)
    t = lin(prelu(t, a3), w3_ref, b3)
    acc_ref[...] = (t + acc_ref[...]) * 0.5

    # x = (lin4(x) + x) / 2
    u = lin(bn_prelu(acc_ref[...], s4, t4, a4), w4_ref, b4)
    acc_ref[...] = (u + acc_ref[...]) * 0.5

    # lin5: BN -> PReLU -> Linear(6F -> F)
    out_ref[...] = lin(bn_prelu(acc_ref[...], s5, t5, a5),
                       w5_ref, b5).astype(out_ref.dtype)


# ----------------------------------------------------------------------------
# Wrapper: tiled pallas_call with single-buffered VMEM-resident weights
# ----------------------------------------------------------------------------
def _choose_tm(n_rows, tile_m):
    """Pick the node-tile height.

    * Small N: one tile (rounded to a sublane multiple of 8).
    * Large N: a 256-row multiple (MXU-friendly on all chips, also a multiple
      of 128 for v5e) chosen so the grid has >= 2 steps, letting
      dimension_semantics=("parallel",) shard tiles across v7x's two TCs.
    """
    if n_rows <= 256:
        return _round_up(max(n_rows, 8), 8)
    half = _round_up(pl.cdiv(n_rows, 2), 256)
    return int(min(tile_m, half))


def linear_block(x, params, *, tile_m=512):
    """Fused LinearBlock forward. x: (N, F) f32.  Returns (N, F) f32."""
    N, F = x.shape
    alpha, vec, weights = params
    w1, w2, w3, w4, w5 = weights
    snd = w1.shape[1]
    assert snd == 6 * F

    # Tile over nodes; pad N so every tile is full (rows are independent).
    tm = _choose_tm(N, tile_m)
    n_pad = _round_up(N, tm)
    x_p = jnp.pad(x, ((0, n_pad - N), (0, 0))) if n_pad != N else x
    grid = (n_pad // tm,)

    tile_map = lambda i: (i, 0)
    const_map = lambda i: (0, 0)
    single = pl.Buffered(buffer_count=1)   # block never changes -> 1 buffer

    in_specs = [
        pl.BlockSpec(memory_space=pltpu.MemorySpace.SMEM),      # alpha (4,)
        pl.BlockSpec((tm, F), tile_map),                        # x tile
        pl.BlockSpec(vec.shape, const_map, pipeline_mode=single),  # vec table
    ]
    for w in weights:
        in_specs.append(pl.BlockSpec(w.shape, const_map, pipeline_mode=single))

    # Right-sized VMEM budget (with headroom): single-buffered bf16 weights,
    # the packed vector table, double-buffered x/out tiles, f32 accumulator.
    weight_bytes = sum(int(w.size) * 2 for w in weights)
    vec_bytes = _VEC_ROWS * snd * 4
    io_bytes = 2 * (tm * F * 4) * 2
    acc_bytes = tm * snd * 4
    vmem_limit = int((weight_bytes + vec_bytes + io_bytes + acc_bytes) * 1.75) \
        + (8 << 20)

    # Advisory cost hint for the XLA scheduler.
    w_elems = F * snd + 3 * snd * snd + snd * F
    flops = 2 * n_pad * w_elems
    bytes_accessed = 2 * w_elems + 2 * n_pad * F * 4 + _VEC_ROWS * snd * 4

    out = pl.pallas_call(
        linearblock_kernel,
        out_shape=jax.ShapeDtypeStruct((n_pad, F), jnp.float32),
        grid=grid,
        in_specs=in_specs,
        out_specs=pl.BlockSpec((tm, F), tile_map),
        scratch_shapes=[pltpu.VMEM((tm, snd), jnp.float32)],
        compiler_params=pltpu.CompilerParams(
            dimension_semantics=("parallel",),
            vmem_limit_bytes=vmem_limit),
        cost_estimate=pl.CostEstimate(flops=flops, transcendentals=0,
                                      bytes_accessed=bytes_accessed),
    )(alpha, x_p, vec, *weights)
    return out[:N] if n_pad != N else out


# ----------------------------------------------------------------------------
# Parameter initialization (deterministic, synthetic — no checkpoint load)
# ----------------------------------------------------------------------------
def _bn_folded(key, dim, eps=1e-5):
    k1, k2, k3, k4 = jax.random.split(key, 4)
    gamma = 1.0 + 0.1 * jax.random.normal(k1, (dim,))
    beta = 0.1 * jax.random.normal(k2, (dim,))
    running_mean = 0.1 * jax.random.normal(k3, (dim,))
    running_var = 1.0 + 0.1 * jax.random.uniform(k4, (dim,))
    scale = gamma / jnp.sqrt(running_var + eps)
    shift = beta - running_mean * scale
    return scale.astype(jnp.float32), shift.astype(jnp.float32)


def _linear_params(key, d_in, d_out):
    # PyTorch nn.Linear init: U(-1/sqrt(in), 1/sqrt(in)); stored pre-transposed (in, out)
    k1, k2 = jax.random.split(key)
    bound = 1.0 / (d_in ** 0.5)
    w = jax.random.uniform(k1, (d_in, d_out), minval=-bound, maxval=bound)
    b = jax.random.uniform(k2, (d_out,), minval=-bound, maxval=bound)
    return w.astype(jnp.float32), b.astype(jnp.float32)


def _pack_vectors(rows, snd):
    out = jnp.zeros((_VEC_ROWS, snd), jnp.float32)
    for i, v in enumerate(rows):
        v = jnp.asarray(v, jnp.float32).reshape(-1)
        out = out.at[i, : v.shape[0]].set(v)
    return out


def init_linearblock_params(key, n_feats, eps=1e-5):
    """Build synthetic LinearBlock params, fold/pack them for the kernel."""
    snd = 6 * n_feats
    dims = [(n_feats, snd), (snd, snd), (snd, snd), (snd, snd), (snd, n_feats)]
    keys = jax.random.split(key, 2 * len(dims))
    raw = []
    for i, (d_in, d_out) in enumerate(dims):
        s, t = _bn_folded(keys[2 * i], d_in, eps)
        w, b = _linear_params(keys[2 * i + 1], d_in, d_out)
        raw.append((s, t, w, b))

    (s1, t1, w1, b1) = raw[0]
    (s2, t2, w2, b2) = raw[1]
    (s3, t3, w3, b3) = raw[2]
    (s4, t4, w4, b4) = raw[3]
    (s5, t5, w5, b5) = raw[4]

    # Fold eval-mode BN1 into Linear1 (exact: no PReLU in between).
    w1f = s1[:, None] * w1
    b1f = t1 @ w1 + b1

    # Fold eval-mode BN3 into Linear2's output columns (exact: lin2's raw
    # output feeds only BN3 -> PReLU3 -> Linear3, no residual tap).
    w2f = w2 * s3[None, :]
    b2f = b2 * s3 + t3

    vec = _pack_vectors([b1f, s2, t2, b2f, b3, s4, t4, b4, s5, t5, b5], snd)
    weights = tuple(w.astype(jnp.bfloat16) for w in (w1f, w2f, w3, w4, w5))

    # PReLU default init: single learnable alpha = 0.25 (lin2..lin5).
    alpha = jnp.full((4,), 0.25, dtype=jnp.float32)
    return alpha, vec, weights


# ----------------------------------------------------------------------------
# Pure-JAX reference (same folded params / bf16 casts) for validation
# ----------------------------------------------------------------------------
def linear_block_reference(x, params):
    alpha, vec, (w1, w2, w3, w4, w5) = params
    F = x.shape[1]
    b1, s2, t2, b2, b3 = vec[_ROW_B1], vec[_ROW_S2], vec[_ROW_T2], vec[_ROW_B2], vec[_ROW_B3]
    s4, t4, b4, s5, t5 = vec[_ROW_S4], vec[_ROW_T4], vec[_ROW_B4], vec[_ROW_S5], vec[_ROW_T5]
    b5 = vec[_ROW_B5, :F]
    a2, a3, a4, a5 = alpha[0], alpha[1], alpha[2], alpha[3]

    def lin(z, w, b):
        return jnp.dot(z.astype(jnp.bfloat16), w,
                       preferred_element_type=jnp.float32) + b

    def prelu(z, a):
        return jnp.where(z >= 0.0, z, a * z)

    h = lin(x, w1, b1)
    t = lin(prelu(h * s2 + t2, a2), w2, b2)
    t = lin(prelu(t, a3), w3, b3)
    h = (t + h) * 0.5
    u = lin(prelu(h * s4 + t4, a4), w4, b4)
    h = (u + h) * 0.5
    return lin(prelu(h * s5 + t5, a5), w5, b5)


# ----------------------------------------------------------------------------
# LSEblock forward
# ----------------------------------------------------------------------------
def lse_block_forward(x, edge_index, edge_attr, node_type_index, params,
                      num_layers=3):
    # TODO(synk): NHGNN is not defined in the reference source; the message-passing
    # layers cannot be translated, so x / edge_attr pass through unchanged.
    for _ in range(num_layers):
        x, edge_attr = x, edge_attr
    return linear_block(x, params)


if __name__ == "__main__":
    key = jax.random.PRNGKey(0)
    hidden_dim = 128    # module default -> lane-dense 6F = 768
    num_nodes = 64
    num_edges = 128
    num_node_type = 13

    k_x, k_ei, k_ea, k_nt, k_p = jax.random.split(key, 5)
    x = jax.random.normal(k_x, (num_nodes, hidden_dim), dtype=jnp.float32)
    edge_index = jax.random.randint(k_ei, (2, num_edges), 0, num_nodes)
    edge_attr = jax.random.normal(k_ea, (num_edges, hidden_dim), dtype=jnp.float32)
    node_type_index = jax.random.randint(k_nt, (num_nodes,), 0, num_node_type)

    params = init_linearblock_params(k_p, hidden_dim)

    out = lse_block_forward(x, edge_index, edge_attr, node_type_index, params)
    out = jax.block_until_ready(out)

    assert out.shape == (num_nodes, hidden_dim)
    assert out.dtype == jnp.float32
    assert bool(jnp.all(jnp.isfinite(out)))

    ref = linear_block_reference(x, params)
    max_err = float(jnp.max(jnp.abs(out - ref)))
    assert max_err < 5e-2, f"max abs error vs reference: {max_err}"

    print("KERNEL_OK")
</pallas_src>

<mosaic_0001>
module attributes {stable_mosaic.version = 11 : i64} {
  func.func @linearblock_kernel(%arg0: i32, %arg1: memref<4xf32, #tpu.memory_space<smem>>, %arg2: memref<64x128xf32, #tpu.memory_space<vmem>>, %arg3: memref<16x768xf32, #tpu.memory_space<vmem>>, %arg4: memref<128x768xbf16, #tpu.memory_space<vmem>>, %arg5: memref<768x768xbf16, #tpu.memory_space<vmem>>, %arg6: memref<768x768xbf16, #tpu.memory_space<vmem>>, %arg7: memref<768x768xbf16, #tpu.memory_space<vmem>>, %arg8: memref<768x128xbf16, #tpu.memory_space<vmem>>, %arg9: memref<64x128xf32, #tpu.memory_space<vmem>>, %arg10: memref<64x768xf32, #tpu.memory_space<vmem>>) attributes {dimension_semantics = [#tpu.dimension_semantics<parallel>], iteration_bounds = array<i64: 1>, scalar_prefetch = 0 : i64, scratch_operands = 1 : i64, tpu.core_type = #tpu.core_type<tc>, window_params = [{transform_indices = @transform_0, window_bounds = array<i64: 4>}, {transform_indices = @transform_1, window_bounds = array<i64: 64, 128>}, {pipeline_mode = #tpu.pipeline_mode<synchronous>, transform_indices = @transform_2, window_bounds = array<i64: 16, 768>}, {pipeline_mode = #tpu.pipeline_mode<synchronous>, transform_indices = @transform_3, window_bounds = array<i64: 128, 768>}, {pipeline_mode = #tpu.pipeline_mode<synchronous>, transform_indices = @transform_4, window_bounds = array<i64: 768, 768>}, {pipeline_mode = #tpu.pipeline_mode<synchronous>, transform_indices = @transform_5, window_bounds = array<i64: 768, 768>}, {pipeline_mode = #tpu.pipeline_mode<synchronous>, transform_indices = @transform_6, window_bounds = array<i64: 768, 768>}, {pipeline_mode = #tpu.pipeline_mode<synchronous>, transform_indices = @transform_7, window_bounds = array<i64: 768, 128>}, {transform_indices = @transform_8, window_bounds = array<i64: 64, 128>}]} {
    %c0 = arith.constant 0 : index
    %0 = memref.load %arg1[%c0] : memref<4xf32, #tpu.memory_space<smem>>
    %c1 = arith.constant 1 : index
    %1 = memref.load %arg1[%c1] : memref<4xf32, #tpu.memory_space<smem>>
    %c2 = arith.constant 2 : index
    %2 = memref.load %arg1[%c2] : memref<4xf32, #tpu.memory_space<smem>>
    %c3 = arith.constant 3 : index
    %3 = memref.load %arg1[%c3] : memref<4xf32, #tpu.memory_space<smem>>
    %c0_0 = arith.constant 0 : index
    %c0_1 = arith.constant 0 : index
    %4 = vector.load %arg3[%c0_0, %c0_1] : memref<16x768xf32, #tpu.memory_space<vmem>>, vector<1x768xf32>
    %c1_2 = arith.constant 1 : index
    %c0_3 = arith.constant 0 : index
    %5 = vector.load %arg3[%c1_2, %c0_3] : memref<16x768xf32, #tpu.memory_space<vmem>>, vector<1x768xf32>
    %c2_4 = arith.constant 2 : index
    %c0_5 = arith.constant 0 : index
    %6 = vector.load %arg3[%c2_4, %c0_5] : memref<16x768xf32, #tpu.memory_space<vmem>>, vector<1x768xf32>
    %c3_6 = arith.constant 3 : index
    %c0_7 = arith.constant 0 : index
    %7 = vector.load %arg3[%c3_6, %c0_7] : memref<16x768xf32, #tpu.memory_space<vmem>>, vector<1x768xf32>
    %c4 = arith.constant 4 : index
    %c0_8 = arith.constant 0 : index
    %8 = vector.load %arg3[%c4, %c0_8] : memref<16x768xf32, #tpu.memory_space<vmem>>, vector<1x768xf32>
    %c5 = arith.constant 5 : index
    %c0_9 = arith.constant 0 : index
    %9 = vector.load %arg3[%c5, %c0_9] : memref<16x768xf32, #tpu.memory_space<vmem>>, vector<1x768xf32>
    %c6 = arith.constant 6 : index
    %c0_10 = arith.constant 0 : index
    %10 = vector.load %arg3[%c6, %c0_10] : memref<16x768xf32, #tpu.memory_space<vmem>>, vector<1x768xf32>
    %c7 = arith.constant 7 : index
    %c0_11 = arith.constant 0 : index
    %11 = vector.load %arg3[%c7, %c0_11] : memref<16x768xf32, #tpu.memory_space<vmem>>, vector<1x768xf32>
    %c8 = arith.constant 8 : index
    %c0_12 = arith.constant 0 : index
    %12 = vector.load %arg3[%c8, %c0_12] : memref<16x768xf32, #tpu.memory_space<vmem>>, vector<1x768xf32>
    %c9 = arith.constant 9 : index
    %c0_13 = arith.constant 0 : index
    %13 = vector.load %arg3[%c9, %c0_13] : memref<16x768xf32, #tpu.memory_space<vmem>>, vector<1x768xf32>
    %c10 = arith.constant 10 : index
    %c0_14 = arith.constant 0 : index
    %14 = vector.load %arg3[%c10, %c0_14] : memref<16x768xf32, #tpu.memory_space<vmem>>, vector<1x128xf32>
    %c0_15 = arith.constant 0 : index
    %c0_16 = arith.constant 0 : index
    %15 = vector.load %arg2[%c0_15, %c0_16] : memref<64x128xf32, #tpu.memory_space<vmem>>, vector<64x128xf32>
    %16 = arith.truncf %15 : vector<64x128xf32> to vector<64x128xbf16>
    %c0_17 = arith.constant 0 : index
    %c0_18 = arith.constant 0 : index
    %17 = vector.load %arg4[%c0_17, %c0_18] : memref<128x768xbf16, #tpu.memory_space<vmem>>, vector<128x768xbf16>
    %cst = arith.constant dense<0.000000e+00> : vector<64x768xf32>
    %18 = tpu.matmul %16, %17, %cst {dimension_numbers = #tpu.dot_dimension_numbers<[1], [0], [0], [1], [0, 0, 1, 1], [], []>} : vector<64x128xbf16>, vector<128x768xbf16>, vector<64x768xf32> -> vector<64x768xf32>
    %19 = vector.broadcast %4 : vector<1x768xf32> to vector<64x768xf32>
    %20 = arith.addf %18, %19 : vector<64x768xf32>
    %c0_19 = arith.constant 0 : index
    %c0_20 = arith.constant 0 : index
    %21 = vector.load %arg10[%c0_19, %c0_20] : memref<64x768xf32, #tpu.memory_space<vmem>>, vector<64x768xf32>
    tpu.vector_store %arg10[%c0_19, %c0_20], %20 {strides = array<i32>} : memref<64x768xf32, #tpu.memory_space<vmem>>, vector<64x768xf32>,
    %c0_21 = arith.constant 0 : index
    %c0_22 = arith.constant 0 : index
    %22 = vector.load %arg10[%c0_21, %c0_22] : memref<64x768xf32, #tpu.memory_space<vmem>>, vector<64x768xf32>
    %23 = vector.broadcast %5 : vector<1x768xf32> to vector<64x768xf32>
    %24 = arith.mulf %22, %23 : vector<64x768xf32>
    %25 = vector.broadcast %6 : vector<1x768xf32> to vector<64x768xf32>
    %26 = arith.addf %24, %25 : vector<64x768xf32>
    %cst_23 = arith.constant 0.000000e+00 : f32
    %27 = vector.broadcast %cst_23 : f32 to vector<64x768xf32>
    %28 = arith.cmpf oge, %26, %27 : vector<64x768xf32>
    %29 = vector.broadcast %0 : f32 to vector<64x768xf32>
    %30 = arith.mulf %29, %26 : vector<64x768xf32>
    %31 = arith.select %28, %26, %30 : vector<64x768xi1>, vector<64x768xf32>
    %32 = arith.truncf %31 : vector<64x768xf32> to vector<64x768xbf16>
    %c0_24 = arith.constant 0 : index
    %c0_25 = arith.constant 0 : index
    %33 = vector.load %arg5[%c0_24, %c0_25] : memref<768x768xbf16, #tpu.memory_space<vmem>>, vector<768x768xbf16>
    %cst_26 = arith.constant dense<0.000000e+00> : vector<64x768xf32>
    %34 = tpu.matmul %32, %33, %cst_26 {dimension_numbers = #tpu.dot_dimension_numbers<[1], [0], [0], [1], [0, 0, 1, 1], [], []>} : vector<64x768xbf16>, vector<768x768xbf16>, vector<64x768xf32> -> vector<64x768xf32>
    %35 = vector.broadcast %7 : vector<1x768xf32> to vector<64x768xf32>
    %36 = arith.addf %34, %35 : vector<64x768xf32>
    %cst_27 = arith.constant 0.000000e+00 : f32
    %37 = vector.broadcast %cst_27 : f32 to vector<64x768xf32>
    %38 = arith.cmpf oge, %36, %37 : vector<64x768xf32>
    %39 = vector.broadcast %1 : f32 to vector<64x768xf32>
    %40 = arith.mulf %39, %36 : vector<64x768xf32>
    %41 = arith.select %38, %36, %40 : vector<64x768xi1>, vector<64x768xf32>
    %42 = arith.truncf %41 : vector<64x768xf32> to vector<64x768xbf16>
    %c0_28 = arith.constant 0 : index
    %c0_29 = arith.constant 0 : index
    %43 = vector.load %arg6[%c0_28, %c0_29] : memref<768x768xbf16, #tpu.memory_space<vmem>>, vector<768x768xbf16>
    %cst_30 = arith.constant dense<0.000000e+00> : vector<64x768xf32>
    %44 = tpu.matmul %42, %43, %cst_30 {dimension_numbers = #tpu.dot_dimension_numbers<[1], [0], [0], [1], [0, 0, 1, 1], [], []>} : vector<64x768xbf16>, vector<768x768xbf16>, vector<64x768xf32> -> vector<64x768xf32>
    %45 = vector.broadcast %8 : vector<1x768xf32> to vector<64x768xf32>
    %46 = arith.addf %44, %45 : vector<64x768xf32>
    %c0_31 = arith.constant 0 : index
    %c0_32 = arith.constant 0 : index
    %47 = vector.load %arg10[%c0_31, %c0_32] : memref<64x768xf32, #tpu.memory_space<vmem>>, vector<64x768xf32>
    %48 = arith.addf %46, %47 : vector<64x768xf32>
    %cst_33 = arith.constant 5.000000e-01 : f32
    %49 = vector.broadcast %cst_33 : f32 to vector<64x768xf32>
    %50 = arith.mulf %48, %49 : vector<64x768xf32>
    %c0_34 = arith.constant 0 : index
    %c0_35 = arith.constant 0 : index
    %51 = vector.load %arg10[%c0_34, %c0_35] : memref<64x768xf32, #tpu.memory_space<vmem>>, vector<64x768xf32>
    tpu.vector_store %arg10[%c0_34, %c0_35], %50 {strides = array<i32>} : memref<64x768xf32, #tpu.memory_space<vmem>>, vector<64x768xf32>,
    %c0_36 = arith.constant 0 : index
    %c0_37 = arith.constant 0 : index
    %52 = vector.load %arg10[%c0_36, %c0_37] : memref<64x768xf32, #tpu.memory_space<vmem>>, vector<64x768xf32>
    %53 = vector.broadcast %9 : vector<1x768xf32> to vector<64x768xf32>
    %54 = arith.mulf %52, %53 : vector<64x768xf32>
    %55 = vector.broadcast %10 : vector<1x768xf32> to vector<64x768xf32>
    %56 = arith.addf %54, %55 : vector<64x768xf32>
    %cst_38 = arith.constant 0.000000e+00 : f32
    %57 = vector.broadcast %cst_38 : f32 to vector<64x768xf32>
    %58 = arith.cmpf oge, %56, %57 : vector<64x768xf32>
    %59 = vector.broadcast %2 : f32 to vector<64x768xf32>
    %60 = arith.mulf %59, %56 : vector<64x768xf32>
    %61 = arith.select %58, %56, %60 : vector<64x768xi1>, vector<64x768xf32>
    %62 = arith.truncf %61 : vector<64x768xf32> to vector<64x768xbf16>
    %c0_39 = arith.constant 0 : index
    %c0_40 = arith.constant 0 : index
    %63 = vector.load %arg7[%c0_39, %c0_40] : memref<768x768xbf16, #tpu.memory_space<vmem>>, vector<768x768xbf16>
    %cst_41 = arith.constant dense<0.000000e+00> : vector<64x768xf32>
    %64 = tpu.matmul %62, %63, %cst_41 {dimension_numbers = #tpu.dot_dimension_numbers<[1], [0], [0], [1], [0, 0, 1, 1], [], []>} : vector<64x768xbf16>, vector<768x768xbf16>, vector<64x768xf32> -> vector<64x768xf32>
    %65 = vector.broadcast %11 : vector<1x768xf32> to vector<64x768xf32>
    %66 = arith.addf %64, %65 : vector<64x768xf32>
    %c0_42 = arith.constant 0 : index
    %c0_43 = arith.constant 0 : index
    %67 = vector.load %arg10[%c0_42, %c0_43] : memref<64x768xf32, #tpu.memory_space<vmem>>, vector<64x768xf32>
    %68 = arith.addf %66, %67 : vector<64x768xf32>
    %cst_44 = arith.constant 5.000000e-01 : f32
    %69 = vector.broadcast %cst_44 : f32 to vector<64x768xf32>
    %70 = arith.mulf %68, %69 : vector<64x768xf32>
    %c0_45 = arith.constant 0 : index
    %c0_46 = arith.constant 0 : index
    %71 = vector.load %arg10[%c0_45, %c0_46] : memref<64x768xf32, #tpu.memory_space<vmem>>, vector<64x768xf32>
    tpu.vector_store %arg10[%c0_45, %c0_46], %70 {strides = array<i32>} : memref<64x768xf32, #tpu.memory_space<vmem>>, vector<64x768xf32>,
    %c0_47 = arith.constant 0 : index
    %c0_48 = arith.constant 0 : index
    %72 = vector.load %arg10[%c0_47, %c0_48] : memref<64x768xf32, #tpu.memory_space<vmem>>, vector<64x768xf32>
    %73 = vector.broadcast %12 : vector<1x768xf32> to vector<64x768xf32>
    %74 = arith.mulf %72, %73 : vector<64x768xf32>
    %75 = vector.broadcast %13 : vector<1x768xf32> to vector<64x768xf32>
    %76 = arith.addf %74, %75 : vector<64x768xf32>
    %cst_49 = arith.constant 0.000000e+00 : f32
    %77 = vector.broadcast %cst_49 : f32 to vector<64x768xf32>
    %78 = arith.cmpf oge, %76, %77 : vector<64x768xf32>
    %79 = vector.broadcast %3 : f32 to vector<64x768xf32>
    %80 = arith.mulf %79, %76 : vector<64x768xf32>
    %81 = arith.select %78, %76, %80 : vector<64x768xi1>, vector<64x768xf32>
    %82 = arith.truncf %81 : vector<64x768xf32> to vector<64x768xbf16>
    %c0_50 = arith.constant 0 : index
    %c0_51 = arith.constant 0 : index
    %83 = vector.load %arg8[%c0_50, %c0_51] : memref<768x128xbf16, #tpu.memory_space<vmem>>, vector<768x128xbf16>
    %cst_52 = arith.constant dense<0.000000e+00> : vector<64x128xf32>
    %84 = tpu.matmul %82, %83, %cst_52 {dimension_numbers = #tpu.dot_dimension_numbers<[1], [0], [0], [1], [0, 0, 1, 1], [], []>} : vector<64x768xbf16>, vector<768x128xbf16>, vector<64x128xf32> -> vector<64x128xf32>
    %85 = vector.broadcast %14 : vector<1x128xf32> to vector<64x128xf32>
    %86 = arith.addf %84, %85 : vector<64x128xf32>
    %c0_53 = arith.constant 0 : index
    %c0_54 = arith.constant 0 : index
    %87 = vector.load %arg9[%c0_53, %c0_54] : memref<64x128xf32, #tpu.memory_space<vmem>>, vector<64x128xf32>
    tpu.vector_store %arg9[%c0_53, %c0_54], %86 {strides = array<i32>} : memref<64x128xf32, #tpu.memory_space<vmem>>, vector<64x128xf32>,
    return
  }
  func.func @transform_0(%arg0: i32) -> i32 {
    %c0_i32 = arith.constant 0 : i32
    %c0_i32_0 = arith.constant 0 : i32
    return %c0_i32 : i32
  }
  func.func @transform_1(%arg0: i32) -> (i32, i32) {
    %c0_i32 = arith.constant 0 : i32
    %c0_i32_0 = arith.constant 0 : i32
    return %arg0, %c0_i32 : i32, i32
  }
  func.func @transform_2(%arg0: i32) -> (i32, i32) {
    %c0_i32 = arith.constant 0 : i32
    %c0_i32_0 = arith.constant 0 : i32
    %c0_i32_1 = arith.constant 0 : i32
    return %c0_i32, %c0_i32_0 : i32, i32
  }
  func.func @transform_3(%arg0: i32) -> (i32, i32) {
    %c0_i32 = arith.constant 0 : i32
    %c0_i32_0 = arith.constant 0 : i32
    %c0_i32_1 = arith.constant 0 : i32
    return %c0_i32, %c0_i32_0 : i32, i32
  }
  func.func @transform_4(%arg0: i32) -> (i32, i32) {
    %c0_i32 = arith.constant 0 : i32
    %c0_i32_0 = arith.constant 0 : i32
    %c0_i32_1 = arith.constant 0 : i32
    return %c0_i32, %c0_i32_0 : i32, i32
  }
  func.func @transform_5(%arg0: i32) -> (i32, i32) {
    %c0_i32 = arith.constant 0 : i32
    %c0_i32_0 = arith.constant 0 : i32
    %c0_i32_1 = arith.constant 0 : i32
    return %c0_i32, %c0_i32_0 : i32, i32
  }
  func.func @transform_6(%arg0: i32) -> (i32, i32) {
    %c0_i32 = arith.constant 0 : i32
    %c0_i32_0 = arith.constant 0 : i32
    %c0_i32_1 = arith.constant 0 : i32
    return %c0_i32, %c0_i32_0 : i32, i32
  }
  func.func @transform_7(%arg0: i32) -> (i32, i32) {
    %c0_i32 = arith.constant 0 : i32
    %c0_i32_0 = arith.constant 0 : i32
    %c0_i32_1 = arith.constant 0 : i32
    return %c0_i32, %c0_i32_0 : i32, i32
  }
  func.func @transform_8(%arg0: i32) -> (i32, i32) {
    %c0_i32 = arith.constant 0 : i32
    %c0_i32_0 = arith.constant 0 : i32
    return %arg0, %c0_i32 : i32, i32
  }
}

</mosaic_0001>

<bundles_post_ra>
// kernel: tpu_custom_call.1
= control target key start
LH: loop header
LB: loop body
LE: loop exit
PB: predicated region body
PF: predicated region fallthrough
CT: control target
= control target key end

     0   :  { %13 = vsyncpa [#allocation6], 0  ;;  %s15773_s0 = inlined_call_operand.hbm [shape: f32[4], index: 0, kind: input, shape index: {}]   ;;  %s15774_s1 = inlined_call_operand.hbm [shape: f32[64,128], index: 1, kind: input, shape index: {}]   ;;  %s15775_s2 = inlined_call_operand.hbm [shape: f32[16,768], index: 2, kind: input, shape index: {}]   ;;  %s15776_s3 = inlined_call_operand.hbm [shape: bf16[128,768], index: 3, kind: input, shape index: {}]   ;;  %s15777_s4 = inlined_call_operand.hbm [shape: bf16[768,768], index: 4, kind: input, shape index: {}]   ;;  %s15778_s5 = inlined_call_operand.hbm [shape: bf16[768,768], index: 5, kind: input, shape index: {}]   ;;  %s15779_s6 = inlined_call_operand.hbm [shape: bf16[768,768], index: 6, kind: input, shape index: {}]   ;;  %s15780_s7 = inlined_call_operand.hbm [shape: bf16[768,128], index: 7, kind: input, shape index: {}]   ;;  %s15781_s8 = inlined_call_operand.hbm [shape: f32[64,128], index: 8, kind: output, shape index: {}]  }
   0x1   :  { %14 = vsyncpa [#allocation4], 0 }
   0x2   :  { %15 = vsyncpa [#allocation9], 0 }
   0x3   :  { %16 = vsyncpa [#allocation12], 0 }
   0x4   :  { %17 = vsyncpa [#allocation15], 0 }
   0x5   :  { %18 = vsyncpa [#allocation5], 0  ;;  %s12914_s27 = smov [#allocation8]  }
   0x6   :  { %s44_s28 = sshll.u32 %s12914_s27, 4  ;;  %s45_s28 = int_to_ptr.vmem [resolvable:$true] %s44_s28 }
   0x7   :  { %s12742_s29 = scalar_lea.vmem %s45_s28, 1536  ;;  %p12747_p1 = scmp.lt.s32.totalorder %s45_s28, %s45_s28 }
   0x8   :  { %p12743_p0 = scmp.ne.s32.totalorder %s45_s28, %s12742_s29  ;;  %p12748_p2 = scmp.lt.s32.totalorder %s12742_s29, %s12742_s29 }
   0xa   :  { %p12749_p3 = por %p12748_p2, %p12747_p1 }
   0xc   :  { %p12750_p4 = pnand %p12749_p3, %p12743_p0 }
   0xe   :  { %12753 = shalt.err (!%p12750_p4)
}
   0xf   :  { %s12915_s30 = smov 768   ;;  %s12916_s9 = smov 48  }
  0x10   :  { %50 = dma.hbm_to_vmem [thread:$0]  %s15775_s2, 1536, %s45_s28, [#allocation9], %s12915_s30, %s12915_s30, %s12916_s9  }
  0x11   :  { %s12917_s12 = smov [#allocation11]   ;;  %s12918_s14 = smov [#allocation14]  }
  0x12   :  { %s68_s13 = sshll.u32 %s12917_s12, 4  ;;  %s92_s15 = sshll.u32 %s12918_s14, 4  ;;  %s69_s13 = int_to_ptr.vmem [resolvable:$true] %s68_s13  ;;  %s93_s15 = int_to_ptr.vmem [resolvable:$true] %s92_s15 }
  0x13   :  { %s12762_s16 = scalar_lea.vmem %s69_s13, 36864  ;;  %p12767_p6 = scmp.lt.s32.totalorder %s69_s13, %s69_s13 }
  0x14   :  { %p12763_p5 = scmp.ne.s32.totalorder %s69_s13, %s12762_s16  ;;  %p12768_p7 = scmp.lt.s32.totalorder %s12762_s16, %s12762_s16 }
  0x16   :  { %p12769_p8 = por %p12768_p7, %p12767_p6 }
  0x18   :  { %p12770_p9 = pnand %p12769_p8, %p12763_p5 }
  0x1a   :  { %12773 = shalt.err (!%p12770_p9)
}
  0x1b   :  { %s12919_s17 = smov 384   ;;  %s12920_s18 = smov 24  }
  0x1c   :  { %74 = dma.hbm_to_vmem [thread:$0]  %s15777_s4, 36864, %s69_s13, [#allocation12], %s12919_s17, %s12919_s17, %s12920_s18  }
  0x1d   :  { %s12782_s2 = scalar_lea.vmem %s93_s15, 36864  ;;  %p12787_p11 = scmp.lt.s32.totalorder %s93_s15, %s93_s15 }
  0x1e   :  { %p12783_p10 = scmp.ne.s32.totalorder %s93_s15, %s12782_s2  ;;  %p12788_p12 = scmp.lt.s32.totalorder %s12782_s2, %s12782_s2 }
  0x20   :  { %p12789_p13 = por %p12788_p12, %p12787_p11 }
  0x22   :  { %p12790_p0 = pnand %p12789_p13, %p12783_p10 }
  0x24   :  { %12793 = shalt.err (!%p12790_p0)
}
  0x25   :  { %98 = dma.hbm_to_vmem [thread:$0]  %s15779_s6, 36864, %s93_s15, [#allocation15], %s12919_s17, %s12919_s17, %s12920_s18  }
  0x26   :  { %s12921_s23 = smov [#allocation3]   ;;  %s12922_s4 = smov [#allocation7]  }
  0x27   :  { %26 = dma.hbm_to_smem %s15773_s0, 16, %s12921_s23, [#allocation6]  }
  0x28   :  { %s32_s26 = sshll.u32 %s12922_s4, 4  ;;  %s33_s26 = int_to_ptr.vmem [resolvable:$true] %s32_s26 }
  0x29   :  { %s12810_s27 = scalar_lea.vmem %s33_s26, 1024  ;;  %p12815_p2 = scmp.lt.s32.totalorder %s33_s26, %s33_s26 }
  0x2a   :  { %p12811_p1 = scmp.ne.s32.totalorder %s33_s26, %s12810_s27  ;;  %p12816_p3 = scmp.lt.s32.totalorder %s12810_s27, %s12810_s27 }
  0x2c   :  { %p12817_p4 = por %p12816_p3, %p12815_p2 }
  0x2e   :  { %p12818_p5 = pnand %p12817_p4, %p12811_p1 }
  0x30   :  { %12821 = shalt.err (!%p12818_p5)
}
  0x31   :  { %s12923_s28 = smov 128   ;;  %s12924_s29 = smov 8  }
  0x32   :  { %38 = dma.hbm_to_vmem [thread:$0]  %s15774_s1, 1024, %s33_s26, [#allocation4], %s12923_s28, %s12923_s28, %s12924_s29  }
  0x33   :  { %s12925_s0 = smov [#allocation10]   ;;  %s12926_s10 = smov [#allocation13]  }
  0x34   :  { %s56_s9 = sshll.u32 %s12925_s0, 4  ;;  %s80_s11 = sshll.u32 %s12926_s10, 4  ;;  %s57_s9 = int_to_ptr.vmem [resolvable:$true] %s56_s9  ;;  %s81_s11 = int_to_ptr.vmem [resolvable:$true] %s80_s11 }
  0x35   :  { %s12830_s12 = scalar_lea.vmem %s57_s9, 6144  ;;  %p12835_p7 = scmp.lt.s32.totalorder %s57_s9, %s57_s9 }
  0x36   :  { %p12831_p6 = scmp.ne.s32.totalorder %s57_s9, %s12830_s12  ;;  %p12836_p8 = scmp.lt.s32.totalorder %s12830_s12, %s12830_s12 }
  0x38   :  { %p12837_p9 = por %p12836_p8, %p12835_p7 }
  0x3a   :  { %p12838_p10 = pnand %p12837_p9, %p12831_p6 }
  0x3c   :  { %12841 = shalt.err (!%p12838_p10)
}
  0x3d   :  { %62 = dma.hbm_to_vmem [thread:$0]  %s15776_s3, 6144, %s57_s9, [#allocation9], %s12919_s17, %s12919_s17, %s12920_s18  }
  0x3e   :  { %s12850_s1 = scalar_lea.vmem %s81_s11, 36864  ;;  %p12855_p12 = scmp.lt.s32.totalorder %s81_s11, %s81_s11 }
  0x3f   :  { %p12851_p11 = scmp.ne.s32.totalorder %s81_s11, %s12850_s1  ;;  %p12856_p13 = scmp.lt.s32.totalorder %s12850_s1, %s12850_s1 }
  0x41   :  { %p12857_p0 = por %p12856_p13, %p12855_p12 }
  0x43   :  { %p12858_p1 = pnand %p12857_p0, %p12851_p11 }
  0x45   :  { %12861 = shalt.err (!%p12858_p1)
}
  0x46   :  { %86 = dma.hbm_to_vmem [thread:$0]  %s15778_s5, 36864, %s81_s11, [#allocation12], %s12919_s17, %s12919_s17, %s12920_s18  }
  0x47   :  { %s12927_s19 = smov [#allocation16]  }
  0x48   :  { %s104_s20 = sshll.u32 %s12927_s19, 4  ;;  %s105_s20 = int_to_ptr.vmem [resolvable:$true] %s104_s20 }
  0x49   :  { %s12870_s2 = scalar_lea.vmem %s105_s20, 6144  ;;  %p12875_p3 = scmp.lt.s32.totalorder %s105_s20, %s105_s20 }
  0x4a   :  { %p12871_p2 = scmp.ne.s32.totalorder %s105_s20, %s12870_s2  ;;  %p12876_p4 = scmp.lt.s32.totalorder %s12870_s2, %s12870_s2 }
  0x4c   :  { %p12877_p5 = por %p12876_p4, %p12875_p3 }
  0x4e   :  { %p12878_p6 = pnand %p12877_p5, %p12871_p2 }
  0x50   :  { %12881 = shalt.err (!%p12878_p6)
}
  0x51   :  { %s12928_s3 = smov 64   ;;  %s12929_s21 = smov 4  }
  0x52   :  { %110 = dma.hbm_to_vmem [thread:$0]  %s15780_s7, 6144, %s105_s20, [#allocation15], %s12928_s3, %s12928_s3, %s12929_s21  }
  0x53   :  { %12902 = dma.done.wait [#allocation6], 16  }
  0x54   :  { %12903 = vsyncadd [#allocation6], 4294967280 }
  0x55   :  { %12904 = dma.done.wait [#allocation4], 1024  }
  0x56   :  { %12905 = vsyncadd [#allocation4], 4294966272 }
  0x57   :  { %12906 = dma.done.wait [#allocation9], 7680  }
  0x58   :  { %12907 = vsyncadd [#allocation9], 4294959616 }
  0x59   :  { %12908 = dma.done.wait [#allocation12], 73728  }
  0x5a   :  { %12909 = vsyncadd [#allocation12], 4294893568 }
  0x5b   :  { %12910 = dma.done.wait [#allocation15], 43008  }
  0x5c   :  { %12911 = vsyncadd [#allocation15], 4294924288 }
  0x5d   :  { %135 = sfence }
  0x5e   :  { %v11318_v0 = vld [vmem:[#allocation10 + $0x154] ss:$24 sps:$4 sm:$0xff]   ;;  %v12930_v2 = vmov 0   ;;  %v11322_v3 = vld [vmem:[#allocation10 + $0x150] ss:$24 sps:$4 sm:$0xff]   ;;  %v181_v33 = vld [vmem:[#allocation7] sm:$0xff] }
  0x5f   :  { %v11320_v1 = vld [vmem:[#allocation10 + $0x15c] ss:$24 sps:$4 sm:$0xff]   ;;  %544 = vmatprep.mubr.bf16.mxu0 %v12930_v2  ;;  %617 = vmatprep.mubr.bf16.mxu1 %v12930_v2  ;;  %v11323_v4 = vld [vmem:[#allocation10 + $0x158] ss:$24 sps:$4 sm:$0xff]   ;;  %v11326_v6 = vld [vmem:[#allocation10 + $0x12c] ss:$24 sps:$4 sm:$0xff]  }
  0x60   :  { %512 = vmatprep.subr.bf16.mxu0 %v11318_v0  ;;  %585 = vmatprep.subr.bf16.mxu1 %v11320_v1  ;;  %v11324_v5 = vld [vmem:[#allocation10 + $0x124] ss:$24 sps:$4 sm:$0xff]   ;;  %v11328_v7 = vld [vmem:[#allocation10 + $0x120] ss:$24 sps:$4 sm:$0xff]   ;;  %v11330_v9 = vld [vmem:[#allocation10 + $0xf4] ss:$24 sps:$4 sm:$0xff]  }
  0x61   :  { %513 = vmatpush1.bf16.msra.mxu0 %v11322_v3  ;;  %586 = vmatpush1.bf16.msra.mxu1 %v11323_v4  ;;  %v11329_v8 = vld [vmem:[#allocation10 + $0x128] ss:$24 sps:$4 sm:$0xff]   ;;  %v11332_v10 = vld [vmem:[#allocation10 + $0xfc] ss:$24 sps:$4 sm:$0xff]   ;;  %v11335_v12 = vld [vmem:[#allocation10 + $0xf8] ss:$24 sps:$4 sm:$0xff]  }
  0x62   :  { %514 = vmatprep.subr.bf16.mxu0 %v11324_v5  ;;  %587 = vmatprep.subr.bf16.mxu1 %v11326_v6  ;;  %v11334_v11 = vld [vmem:[#allocation10 + $0xf0] ss:$24 sps:$4 sm:$0xff]   ;;  %v11336_v13 = vld [vmem:[#allocation10 + $0xc4] ss:$24 sps:$4 sm:$0xff]   ;;  %v11340_v15 = vld [vmem:[#allocation10 + $0xc0] ss:$24 sps:$4 sm:$0xff]  }
  0x63   :  { %v11338_v14 = vld [vmem:[#allocation10 + $0xcc] ss:$24 sps:$4 sm:$0xff]   ;;  %v11341_v16 = vld [vmem:[#allocation10 + $0xc8] ss:$24 sps:$4 sm:$0xff]   ;;  %v11344_v18 = vld [vmem:[#allocation10 + $0x9c] ss:$24 sps:$4 sm:$0xff]  }
  0x64   :  { %v11342_v17 = vld [vmem:[#allocation10 + $0x94] ss:$24 sps:$4 sm:$0xff]   ;;  %v11346_v19 = vld [vmem:[#allocation10 + $0x90] ss:$24 sps:$4 sm:$0xff]   ;;  %v11348_v21 = vld [vmem:[#allocation10 + $0x64] ss:$24 sps:$4 sm:$0xff]  }
  0x65   :  { %515 = vmatpush1.bf16.msra.mxu0 %v11328_v7  ;;  %588 = vmatpush1.bf16.msra.mxu1 %v11329_v8  ;;  %v11347_v20 = vld [vmem:[#allocation10 + $0x98] ss:$24 sps:$4 sm:$0xff]   ;;  %v11350_v22 = vld [vmem:[#allocation10 + $0x6c] ss:$24 sps:$4 sm:$0xff]   ;;  %v11353_v24 = vld [vmem:[#allocation10 + $0x68] ss:$24 sps:$4 sm:$0xff]  }
  0x66   :  { %516 = vmatprep.subr.bf16.mxu0 %v11330_v9  ;;  %589 = vmatprep.subr.bf16.mxu1 %v11332_v10  ;;  %v11352_v23 = vld [vmem:[#allocation10 + $0x60] ss:$24 sps:$4 sm:$0xff]   ;;  %v11354_v25 = vld [vmem:[#allocation10 + $0x34] ss:$24 sps:$4 sm:$0xff]   ;;  %v11358_v27 = vld [vmem:[#allocation10 + $0x30] ss:$24 sps:$4 sm:$0xff]  }
  0x67   :  { %v11356_v26 = vld [vmem:[#allocation10 + $0x3c] ss:$24 sps:$4 sm:$0xff]   ;;  %v11359_v28 = vld [vmem:[#allocation10 + $0x38] ss:$24 sps:$4 sm:$0xff]   ;;  %v11362_v30 = vld [vmem:[#allocation10 + $0xc] ss:$24 sps:$4 sm:$0xff]  }
  0x68   :  { %v11360_v29 = vld [vmem:[#allocation10 + $0x4] ss:$24 sps:$4 sm:$0xff]   ;;  %v11364_v31 = vld [vmem:[#allocation10] ss:$24 sps:$4 sm:$0xff]   ;;  %v182_v34 = vld [vmem:[#allocation7 + $0x8] sm:$0xff]  ;;  %s137_s5 = sld [smem:[#allocation3]] }
  0x69   :  { %517 = vmatpush1.bf16.msra.mxu0 %v11334_v11  ;;  %590 = vmatpush1.bf16.msra.mxu1 %v11335_v12  ;;  %v11365_v32 = vld [vmem:[#allocation10 + $0x8] ss:$24 sps:$4 sm:$0xff]   ;;  %v11368_v35 = vld [vmem:[#allocation10 + $0x164] ss:$24 sps:$4 sm:$0xff]   ;;  %v13018_v36 = vpack.c.bf16 %v182_v34, %v181_v33  ;;  %v183_v38 = vld [vmem:[#allocation7 + $0x10] sm:$0xff]  ;;  %s10217_s7 = sld [smem:[#allocation3 + $0x1]] }
  0x6a   :  { %518 = vmatprep.subr.bf16.mxu0 %v11336_v13  ;;  %591 = vmatprep.subr.bf16.mxu1 %v11338_v14  ;;  %v11366_v37 = vld [vmem:[#allocation10 + $0x160] ss:$24 sps:$4 sm:$0xff]   ;;  %v11371_v40 = vld [vmem:[#allocation10 + $0x134] ss:$24 sps:$4 sm:$0xff]   ;;  %v11390_v41 = vld [vmem:[#allocation11 + $0x150] ss:$24 sps:$4 sm:$0xff]  }
  0x6b   :  { %v184_v39 = vld [vmem:[#allocation7 + $0x18] sm:$0xff]  ;;  %v11392_v42 = vld [vmem:[#allocation11 + $0x154] ss:$24 sps:$4 sm:$0xff]   ;;  %v11369_v43 = vld [vmem:[#allocation10 + $0x130] ss:$24 sps:$4 sm:$0xff]   ;;  %s14385_s17 = sld [smem:[#allocation3 + $0x2]] }
  0x6c   :  { %v11374_v44 = vld [vmem:[#allocation10 + $0x104] ss:$24 sps:$4 sm:$0xff]   ;;  %v11396_v45 = vld [vmem:[#allocation11 + $0x120] ss:$24 sps:$4 sm:$0xff]   ;;  %v13024_v47 = vpack.c.bf16 %v184_v39, %v183_v38  ;;  %v11404_v49 = vld [vmem:[#allocation11 + $0xf4] ss:$24 sps:$4 sm:$0xff]  }
  0x6d   :  { %519 = vmatpush1.bf16.msra.mxu0 %v11340_v15  ;;  %592 = vmatpush1.bf16.msra.mxu1 %v11341_v16  ;;  %v11398_v46 = vld [vmem:[#allocation11 + $0x124] ss:$24 sps:$4 sm:$0xff]   ;;  %v11372_v48 = vld [vmem:[#allocation10 + $0x100] ss:$24 sps:$4 sm:$0xff]   ;;  %v11377_v50 = vld [vmem:[#allocation10 + $0xd4] ss:$24 sps:$4 sm:$0xff]  }
  0x6e   :  { %520 = vmatprep.subr.bf16.mxu0 %v11342_v17  ;;  %593 = vmatprep.subr.bf16.mxu1 %v11344_v18  ;;  %v11402_v51 = vld [vmem:[#allocation11 + $0xf0] ss:$24 sps:$4 sm:$0xff]   ;;  %v185_v52 = vld [vmem:[#allocation7 + $0x20] sm:$0xff]  ;;  %v11416_v60 = vld [vmem:[#allocation11 + $0x94] ss:$24 sps:$4 sm:$0xff]   ;;  %s15325_s18 = sld [smem:[#allocation3 + $0x3]] }
  0x6f   :  { %v11410_v53 = vld [vmem:[#allocation11 + $0xc4] ss:$24 sps:$4 sm:$0xff]   ;;  %v186_v54 = vld [vmem:[#allocation7 + $0x28] sm:$0xff]  ;;  %v11408_v57 = vld [vmem:[#allocation11 + $0xc0] ss:$24 sps:$4 sm:$0xff]   ;;  %s12931_s24 = smov [#allocation17]  }
  0x70   :  { %v11375_v55 = vld [vmem:[#allocation10 + $0xd0] ss:$24 sps:$4 sm:$0xff]   ;;  %v11380_v56 = vld [vmem:[#allocation10 + $0xa4] ss:$24 sps:$4 sm:$0xff]   ;;  %v13030_v58 = vpack.c.bf16 %v186_v54, %v185_v52  ;;  %v11378_v59 = vld [vmem:[#allocation10 + $0xa0] ss:$24 sps:$4 sm:$0xff]  }
  0x71   :  { %521 = vmatpush1.bf16.msra.mxu0 %v11346_v19  ;;  %594 = vmatpush1.bf16.msra.mxu1 %v11347_v20  ;;  %v11383_v61 = vld [vmem:[#allocation10 + $0x74] ss:$24 sps:$4 sm:$0xff]   ;;  %v11414_v62 = vld [vmem:[#allocation11 + $0x90] ss:$24 sps:$4 sm:$0xff]   ;;  %v11422_v0 = vld [vmem:[#allocation11 + $0x64] ss:$24 sps:$4 sm:$0xff]  }
  0x72   :  { %522 = vmatprep.subr.bf16.mxu0 %v11348_v21  ;;  %595 = vmatprep.subr.bf16.mxu1 %v11350_v22  ;;  %v187_v63 = vld [vmem:[#allocation7 + $0x30] sm:$0xff]  ;;  %v188_v1 = vld [vmem:[#allocation7 + $0x38] sm:$0xff]  ;;  %s10201_s25 = sshll.u32 %s12931_s24, 4  ;;  %s10202_s25 = int_to_ptr.vmem [resolvable:$true] %s10201_s25 }
  0x73   :  { %v11381_v3 = vld [vmem:[#allocation10 + $0x70] ss:$24 sps:$4 sm:$0xff]   ;;  %v11386_v4 = vld [vmem:[#allocation10 + $0x44] ss:$24 sps:$4 sm:$0xff]   ;;  %v11420_v5 = vld [vmem:[#allocation11 + $0x60] ss:$24 sps:$4 sm:$0xff]   ;;  %v13036_v6 = vpack.c.bf16 %v188_v1, %v187_v63  ;;  %v242_v63 = vlaneseq  ;;  %p12887_p8 = scmp.lt.s32.totalorder %s10202_s25, %s10202_s25 }
  0x74   :  { %v11428_v7 = vld [vmem:[#allocation11 + $0x34] ss:$24 sps:$4 sm:$0xff]   ;;  %v11384_v8 = vld [vmem:[#allocation10 + $0x40] ss:$24 sps:$4 sm:$0xff]   ;;  %v11426_v10 = vld [vmem:[#allocation11 + $0x30] ss:$24 sps:$4 sm:$0xff]  }
  0x75   :  { %523 = vmatpush1.bf16.msra.mxu0 %v11352_v23  ;;  %596 = vmatpush1.bf16.msra.mxu1 %v11353_v24  ;;  %v11389_v9 = vld [vmem:[#allocation10 + $0x14] ss:$24 sps:$4 sm:$0xff]   ;;  %v11434_v11 = vld [vmem:[#allocation11 + $0x4] ss:$24 sps:$4 sm:$0xff]   ;;  %v11387_v12 = vld [vmem:[#allocation10 + $0x10] ss:$24 sps:$4 sm:$0xff]  }
  0x76   :  { %524 = vmatprep.subr.bf16.mxu0 %v11354_v25  ;;  %597 = vmatprep.subr.bf16.mxu1 %v11356_v26  ;;  %v11395_v13 = vld [vmem:[#allocation11 + $0x454] ss:$24 sps:$4 sm:$0xff]   ;;  %v11432_v14 = vld [vmem:[#allocation11] ss:$24 sps:$4 sm:$0xff]   ;;  %v11393_v16 = vld [vmem:[#allocation11 + $0x450] ss:$24 sps:$4 sm:$0xff]  }
  0x77   :  { %v11440_v15 = vld [vmem:[#allocation11 + $0x2d4] ss:$24 sps:$4 sm:$0xff]   ;;  %v11401_v17 = vld [vmem:[#allocation11 + $0x424] ss:$24 sps:$4 sm:$0xff]   ;;  %v11438_v18 = vld [vmem:[#allocation11 + $0x2d0] ss:$24 sps:$4 sm:$0xff]  }
  0x78   :  { %v11446_v19 = vld [vmem:[#allocation11 + $0x2a4] ss:$24 sps:$4 sm:$0xff]   ;;  %v11399_v20 = vld [vmem:[#allocation11 + $0x420] ss:$24 sps:$4 sm:$0xff]   ;;  %v11407_v21 = vld [vmem:[#allocation11 + $0x3f4] ss:$24 sps:$4 sm:$0xff]  }
  0x79   :  { %525 = vmatpush1.bf16.msra.mxu0 %v11358_v27  ;;  %598 = vmatpush1.bf16.msra.mxu1 %v11359_v28  ;;  %v11444_v22 = vld [vmem:[#allocation11 + $0x2a0] ss:$24 sps:$4 sm:$0xff]   ;;  %v11452_v23 = vld [vmem:[#allocation11 + $0x274] ss:$24 sps:$4 sm:$0xff]   ;;  %v11405_v24 = vld [vmem:[#allocation11 + $0x3f0] ss:$24 sps:$4 sm:$0xff]  }
  0x7a   :  { %526 = vmatprep.subr.bf16.mxu0 %v11360_v29  ;;  %599 = vmatprep.subr.bf16.mxu1 %v11362_v30  ;;  %v11413_v25 = vld [vmem:[#allocation11 + $0x3c4] ss:$24 sps:$4 sm:$0xff]   ;;  %v11450_v26 = vld [vmem:[#allocation11 + $0x270] ss:$24 sps:$4 sm:$0xff]   ;;  %v11411_v28 = vld [vmem:[#allocation11 + $0x3c0] ss:$24 sps:$4 sm:$0xff]  }
  0x7b   :  { %v11458_v27 = vld [vmem:[#allocation11 + $0x244] ss:$24 sps:$4 sm:$0xff]   ;;  %v11419_v29 = vld [vmem:[#allocation11 + $0x394] ss:$24 sps:$4 sm:$0xff]   ;;  %v11456_v30 = vld [vmem:[#allocation11 + $0x240] ss:$24 sps:$4 sm:$0xff]  }
  0x7c   :  { %v11423_v33 = vld [vmem:[#allocation11 + $0x360] ss:$24 sps:$4 sm:$0xff]   ;;  %v11431_v34 = vld [vmem:[#allocation11 + $0x334] ss:$24 sps:$4 sm:$0xff]   ;;  %v11441_v39 = vld [vmem:[#allocation11 + $0x5d0] ss:$24 sps:$4 sm:$0xff]  }
  0x7d   :  { %527 = vmatpush1.bf16.msra.mxu0 %v11364_v31  ;;  %600 = vmatpush1.bf16.msra.mxu1 %v11365_v32  ;;  %v11417_v31 = vld [vmem:[#allocation11 + $0x390] ss:$24 sps:$4 sm:$0xff]   ;;  %v11425_v32 = vld [vmem:[#allocation11 + $0x364] ss:$24 sps:$4 sm:$0xff]   ;;  %v11443_v38 = vld [vmem:[#allocation11 + $0x5d4] ss:$24 sps:$4 sm:$0xff]  }
  0x7e   :  { %658 = vmatprep.subr.bf16.mxu0 %v11368_v35  ;;  %2913 = vmatprep.subr.bf16.mxu1 %v11392_v42  ;;  %v11429_v35 = vld [vmem:[#allocation11 + $0x330] ss:$24 sps:$4 sm:$0xff]   ;;  %v11464_v42 = vld [vmem:[#allocation11 + $0x214] ss:$24 sps:$4 sm:$0xff]   ;;  %v11473_v54 = vld [vmem:[#allocation11 + $0x4e4] ss:$24 sps:$4 sm:$0xff]  }
  0x7f   :  { %v11465_v52 = vld [vmem:[#allocation11 + $0x510] ss:$24 sps:$4 sm:$0xff]   ;;  %s12882_s4 = scalar_lea.vmem %s10202_s25, 1024 }
  0x80   :  { %545 = vmatmul.mubr.bf16.vlgmr.msra.gmra.mxu0 %v13018_v36  ;;  %618 = vmatmul.mubr.bf16.vlgmr.msra.gmra.mxu1 %v13018_v36  ;;  %v142_v1 = vld [vmem:[#allocation8] ss:$8 sm:$0x30]  ;;  %p12883_p7 = scmp.ne.s32.totalorder %s10202_s25, %s12882_s4  ;;  %p12888_p9 = scmp.lt.s32.totalorder %s12882_s4, %s12882_s4 }
  0x81   :  { %627 = vmatprep.mubr.bf16.mxu1 %v12930_v2  ;;  %554 = vmatprep.mubr.bf16.mxu0 %v12930_v2 }
  0x82   :  { %659 = vmatpush1.bf16.msra.mxu0 %v11366_v37  ;;  %2914 = vmatpush1.bf16.msra.mxu1 %v11390_v41  ;;  %v11435_v37 = vld [vmem:[#allocation11 + $0x300] ss:$24 sps:$4 sm:$0xff]   ;;  %p12889_p10 = por %p12888_p9, %p12887_p8 }
  0x83   :  { %660 = vmatprep.subr.bf16.mxu0 %v11371_v40  ;;  %2915 = vmatprep.subr.bf16.mxu1 %v11398_v46  ;;  %v11449_v40 = vld [vmem:[#allocation11 + $0x5a4] ss:$24 sps:$4 sm:$0xff]   ;;  %v11447_v41 = vld [vmem:[#allocation11 + $0x5a0] ss:$24 sps:$4 sm:$0xff]  }
  0x84   :  { %v11461_v46 = vld [vmem:[#allocation11 + $0x544] ss:$24 sps:$4 sm:$0xff]   ;;  %p12890_p11 = pnand %p12889_p10, %p12883_p7 }
  0x86   :  { %661 = vmatpush1.bf16.msra.mxu0 %v11369_v43  ;;  %2916 = vmatpush1.bf16.msra.mxu1 %v11396_v45  ;;  %v11462_v43 = vld [vmem:[#allocation11 + $0x210] ss:$24 sps:$4 sm:$0xff]   ;;  %v11470_v45 = vld [vmem:[#allocation11 + $0x1e4] ss:$24 sps:$4 sm:$0xff]  }
  0x87   :  { %662 = vmatprep.subr.bf16.mxu0 %v11374_v44  ;;  %2917 = vmatprep.subr.bf16.mxu1 %v11404_v49  ;;  %v11453_v44 = vld [vmem:[#allocation11 + $0x570] ss:$24 sps:$4 sm:$0xff]   ;;  %v11476_v49 = vld [vmem:[#allocation11 + $0x1b4] ss:$24 sps:$4 sm:$0xff]  }
  0x88   :  { %628 = vmatmul.mubr.bf16.gmra.mxu1 %v13024_v47  ;;  %555 = vmatmul.mubr.bf16.gmra.mxu0 %v13024_v47 }
  0x89   :  { %637 = vmatprep.mubr.bf16.mxu1 %v12930_v2  ;;  %564 = vmatprep.mubr.bf16.mxu0 %v12930_v2 }
  0x8a   :  { %663 = vmatpush1.bf16.msra.mxu0 %v11372_v48  ;;  %2918 = vmatpush1.bf16.msra.mxu1 %v11402_v51  ;;  %v11459_v48 = vld [vmem:[#allocation11 + $0x540] ss:$24 sps:$4 sm:$0xff]   ;;  %v11474_v51 = vld [vmem:[#allocation11 + $0x1b0] ss:$24 sps:$4 sm:$0xff]  }
  0x8b   :  { %664 = vmatprep.subr.bf16.mxu0 %v11377_v50  ;;  %2919 = vmatprep.subr.bf16.mxu1 %v11410_v53  ;;  %v11467_v50 = vld [vmem:[#allocation11 + $0x514] ss:$24 sps:$4 sm:$0xff]   ;;  %v11482_v53 = vld [vmem:[#allocation11 + $0x184] ss:$24 sps:$4 sm:$0xff]  }
  0x8e   :  { %665 = vmatpush1.bf16.msra.mxu0 %v11375_v55  ;;  %2920 = vmatpush1.bf16.msra.mxu1 %v11408_v57  ;;  %v11480_v55 = vld [vmem:[#allocation11 + $0x180] ss:$24 sps:$4 sm:$0xff]   ;;  %v11479_v57 = vld [vmem:[#allocation11 + $0x4b4] ss:$24 sps:$4 sm:$0xff]  }
  0x8f   :  { %666 = vmatprep.subr.bf16.mxu0 %v11380_v56  ;;  %2921 = vmatprep.subr.bf16.mxu1 %v11416_v60  ;;  %v11471_v56 = vld [vmem:[#allocation11 + $0x4e0] ss:$24 sps:$4 sm:$0xff]   ;;  %v11488_v60 = vld [vmem:[#allocation11 + $0x754] ss:$24 sps:$4 sm:$0xff]  }
  0x90   :  { %638 = vmatmul.mubr.bf16.gmra.mxu1 %v13030_v58  ;;  %565 = vmatmul.mubr.bf16.gmra.mxu0 %v13030_v58 }
  0x91   :  { %647 = vmatprep.mubr.bf16.mxu1 %v12930_v2  ;;  %574 = vmatprep.mubr.bf16.mxu0 %v12930_v2 }
  0x92   :  { %667 = vmatpush1.bf16.msra.mxu0 %v11378_v59  ;;  %2922 = vmatpush1.bf16.msra.mxu1 %v11414_v62  ;;  %v11485_v59 = vld [vmem:[#allocation11 + $0x484] ss:$24 sps:$4 sm:$0xff]  }
  0x93   :  { %668 = vmatprep.subr.bf16.mxu0 %v11383_v61  ;;  %2923 = vmatprep.subr.bf16.mxu1 %v11422_v0  ;;  %v11483_v61 = vld [vmem:[#allocation11 + $0x480] ss:$24 sps:$4 sm:$0xff]   ;;  %v11491_v62 = vld [vmem:[#allocation11 + $0x15c] ss:$24 sps:$4 sm:$0xff]  }
  0x94   :  { %v141_v0 = vld [vmem:[#allocation8] ss:$8 sm:$0xf] }
  0x96   :  { %669 = vmatpush1.bf16.msra.mxu0 %v11381_v3  ;;  %2924 = vmatpush1.bf16.msra.mxu1 %v11420_v5  ;;  %v13048_v3 = vshrl.u32 %v242_v63, 7  ;;  %v146_v5 = vld [vmem:[#allocation8 + $0x1] ss:$8 sm:$0x30] }
  0x97   :  { %670 = vmatprep.subr.bf16.mxu0 %v11386_v4  ;;  %2925 = vmatprep.subr.bf16.mxu1 %v11428_v7  ;;  %v145_v4 = vld [vmem:[#allocation8 + $0x1] ss:$8 sm:$0xf]  ;;  %v150_v7 = vld [vmem:[#allocation8 + $0x2] ss:$8 sm:$0x30] }
  0x98   :  { %648 = vmatmul.mubr.bf16.gmra.mxu1 %v13036_v6  ;;  %575 = vmatmul.mubr.bf16.gmra.mxu0 %v13036_v6 }
  0x99   :  { %690 = vmatprep.mubr.bf16.mxu0 %v12930_v2 }
  0x9a   :  { %671 = vmatpush1.bf16.msra.mxu0 %v11384_v8  ;;  %2926 = vmatpush1.bf16.msra.mxu1 %v11426_v10  ;;  %v13050_v8 = vor.u32 %v142_v1, %v141_v0  ;;  %v13056_v10 = vsub.s32 2, %v13048_v3 }
  0x9b   :  { %672 = vmatprep.subr.bf16.mxu0 %v11389_v9  ;;  %2927 = vmatprep.subr.bf16.mxu1 %v11434_v11  ;;  %v13053_v9 = vsub.s32 0, %v13048_v3  ;;  %v13058_v11 = vor.u32 %v146_v5, %v145_v4 }
  0x9c   :  { %15897 = vst [vmem:[#allocation25_spill] sm:$0xff] %v13056_v10 }
  0x9d   :  { %15896 = vst [vmem:[#allocation24_spill] sm:$0xff] %v13053_v9 }
  0x9e   :  { %673 = vmatpush1.bf16.msra.mxu0 %v11387_v12  ;;  %2928 = vmatpush1.bf16.msra.mxu1 %v11432_v14  ;;  %v13061_v12 = vsub.s32 1, %v13048_v3 }
  0x9f   :  { %2986 = vmatprep.subr.bf16.mxu0 %v11395_v13  ;;  %2929 = vmatprep.subr.bf16.mxu1 %v11440_v15  ;;  %v13064_v13 = vsub.s32 3, %v13048_v3  ;;  %v13070_v15 = vrot.slane %v13050_v8, %v13053_v9 }
  0xa0   :  { %15898 = vst [vmem:[#allocation26_spill] sm:$0xff] %v13061_v12 }
  0xa1   :  { %691 = vmatmul.mubr.bf16.vlgmr.msra.gmra.mxu0 %v13018_v36  ;;  %v11437_v36 = vld [vmem:[#allocation11 + $0x304] ss:$24 sps:$4 sm:$0xff]   ;;  %15899 = vst [vmem:[#allocation27_spill] sm:$0xff] %v13064_v13 }
  0xa2   :  { %700 = vmatprep.mubr.bf16.mxu0 %v12930_v2  ;;  %2987 = vmatpush1.bf16.msra.mxu0 %v11393_v16  ;;  %v13074_v16 = vrot.slane %v13050_v8, %v13056_v10 }
  0xa3   :  { %2988 = vmatprep.subr.bf16.mxu0 %v11401_v17  ;;  %2930 = vmatpush2.bf16.msra.mxu1 %v11438_v18  ;;  %v13078_v17 = vrot.slane %v13058_v11, %v13053_v9  ;;  %v13082_v18 = vrot.slane %v13058_v11, %v13056_v10 }
  0xa4   :  { %2931 = vmatprep.subr.bf16.mxu1 %v11446_v19  ;;  %v13086_v19 = vrot.slane %v13050_v8, %v13061_v12 }
  0xa6   :  { %2989 = vmatpush1.bf16.msra.mxu0 %v11399_v20  ;;  %v13090_v20 = vrot.slane %v13050_v8, %v13064_v13 }
  0xa7   :  { %2990 = vmatprep.subr.bf16.mxu0 %v11407_v21  ;;  %2932 = vmatpush2.bf16.msra.mxu1 %v11444_v22 }
  0xa8   :  { %2933 = vmatprep.subr.bf16.mxu1 %v11452_v23 }
  0xa9   :  { %701 = vmatmul.mubr.bf16.gmra.mxu0 %v13024_v47  ;;  %v11468_v47 = vld [vmem:[#allocation11 + $0x1e0] ss:$24 sps:$4 sm:$0xff]  }
  0xaa   :  { %710 = vmatprep.mubr.bf16.mxu0 %v12930_v2  ;;  %2991 = vmatpush1.bf16.msra.mxu0 %v11405_v24  ;;  %v13098_v24 = vrot.slane %v13058_v11, %v13061_v12 }
  0xab   :  { %2992 = vmatprep.subr.bf16.mxu0 %v11413_v25  ;;  %2934 = vmatpush2.bf16.msra.mxu1 %v11450_v26 }
  0xac   :  { %2935 = vmatprep.subr.bf16.mxu1 %v11458_v27 }
  0xae   :  { %2993 = vmatpush1.bf16.msra.mxu0 %v11411_v28  ;;  %v13112_v28 = vrot.slane %v13058_v11, %v13064_v13 }
  0xaf   :  { %2994 = vmatprep.subr.bf16.mxu0 %v11419_v29  ;;  %2936 = vmatpush2.bf16.msra.mxu1 %v11456_v30 }
  0xb0   :  { %2937 = vmatprep.subr.bf16.mxu1 %v11464_v42 }
  0xb1   :  { %711 = vmatmul.mubr.bf16.gmra.mxu0 %v13030_v58  ;;  %v11477_v58 = vld [vmem:[#allocation11 + $0x4b0] ss:$24 sps:$4 sm:$0xff]  }
  0xb2   :  { %720 = vmatprep.mubr.bf16.mxu0 %v12930_v2  ;;  %2995 = vmatpush1.bf16.msra.mxu0 %v11417_v31  ;;  %v11455_v2 = vld [vmem:[#allocation11 + $0x574] ss:$24 sps:$4 sm:$0xff]   ;;  %v13115_v31 = vsub.s32 5, %v13048_v3 }
  0xb3   :  { %2996 = vmatprep.subr.bf16.mxu0 %v11425_v32  ;;  %2938 = vmatpush2.bf16.msra.mxu1 %v11462_v43 }
  0xb4   :  { %2939 = vmatprep.subr.bf16.mxu1 %v11470_v45  ;;  %15902 = vst [vmem:[#allocation30_spill] sm:$0xff] %v13115_v31 }
  0xb6   :  { %2997 = vmatpush1.bf16.msra.mxu0 %v11423_v33 }
  0xb7   :  { %2998 = vmatprep.subr.bf16.mxu0 %v11431_v34  ;;  %2940 = vmatpush2.bf16.msra.mxu1 %v11468_v47 }
  0xb8   :  { %2941 = vmatprep.subr.bf16.mxu1 %v11476_v49  ;;  %v13155_v49 = vrot.slane %v13058_v11, %v13115_v31 }
  0xb9   :  { %721 = vmatmul.mubr.bf16.gmra.mxu0 %v13036_v6  ;;  %v149_v6 = vld [vmem:[#allocation8 + $0x2] ss:$8 sm:$0xf] }
  0xba   :  { %2999 = vmatpush1.bf16.msra.mxu0 %v11429_v35  ;;  %v13066_v14 = vor.u32 %v150_v7, %v149_v6 }
  0xbb   :  { %3000 = vmatprep.subr.bf16.mxu0 %v11437_v36  ;;  %2942 = vmatpush2.bf16.msra.mxu1 %v11474_v51  ;;  %v13127_v36 = vstv %s137_s5 }
  0xbc   :  { %2943 = vmatprep.subr.bf16.mxu1 %v11482_v53  ;;  %v13094_v22 = vrot.slane %v13066_v14, %v13053_v9  ;;  %v13108_v27 = vrot.slane %v13066_v14, %v13056_v10  ;;  %v11504_v10 = vld [vmem:[#allocation11 + $0x6c0] ss:$24 sps:$4 sm:$0xff]  }
  0xbe   :  { %3001 = vmatpush1.bf16.msra.mxu0 %v11435_v37  ;;  %v13131_v37 = vrot.slane %v13066_v14, %v13061_v12 }
  0xbf   :  { %3002 = vmatprep.subr.bf16.mxu0 %v11443_v38  ;;  %2944 = vmatpush2.bf16.msra.mxu1 %v11480_v55  ;;  %v13135_v38 = vrot.slane %v13066_v14, %v13064_v13 }
  0xc0   :  { %3059 = vmatprep.subr.bf16.mxu1 %v11488_v60 }
  0xc2   :  { %3003 = vmatpush2.bf16.msra.mxu0 %v11441_v39 }
  0xc3   :  { %3004 = vmatprep.subr.bf16.mxu0 %v11449_v40 }
  0xc6   :  { %3005 = vmatpush2.bf16.msra.mxu0 %v11447_v41 }
  0xc7   :  { %3006 = vmatprep.subr.bf16.mxu0 %v11455_v2 }
  0xca   :  { %3007 = vmatpush2.bf16.msra.mxu0 %v11453_v44 }
  0xcb   :  { %3008 = vmatprep.subr.bf16.mxu0 %v11461_v46 }
  0xce   :  { %3009 = vmatpush2.bf16.msra.mxu0 %v11459_v48  ;;  %v13151_v48 = vrot.slane %v13050_v8, %v13115_v31 }
  0xcf   :  { %3010 = vmatprep.subr.bf16.mxu0 %v11467_v50 }
  0xd2   :  { %3011 = vmatpush2.bf16.msra.mxu0 %v11465_v52 }
  0xd3   :  { %3012 = vmatprep.subr.bf16.mxu0 %v11473_v54 }
  0xd6   :  { %3013 = vmatpush2.bf16.msra.mxu0 %v11471_v56 }
  0xd7   :  { %3014 = vmatprep.subr.bf16.mxu0 %v11479_v57 }
  0xda   :  { %3015 = vmatpush2.bf16.msra.mxu0 %v11477_v58 }
  0xdb   :  { %3016 = vmatprep.subr.bf16.mxu0 %v11485_v59 }
  0xde   :  { %3017 = vmatpush2.bf16.msra.mxu0 %v11483_v61 }
  0xdf   :  { %3132 = vmatprep.subr.bf16.mxu0 %v11491_v62 }
 0x140   :  { %v546_v21 = vpop.f32.mrf.mxu0  ;;  %v619_v23 = vpop.f32.mrf.mxu1 }
 0x141   :  { %v13101_v25 = vadd.f32 %v546_v21, %v13070_v15  ;;  %v13104_v26 = vadd.f32 %v619_v23, %v13074_v16 }
 0x142   :  { %v548_v29 = vpop.f32.mrf.mxu0  ;;  %v621_v30 = vpop.f32.mrf.mxu1 }
 0x143   :  { %15900 = vst [vmem:[#allocation28_spill] sm:$0xff] %v13101_v25  ;;  %15901 = vst [vmem:[#allocation29_spill] sm:$0xff] %v13104_v26  ;;  %v858_v32 = vmul.f32 %v13078_v17, %v13101_v25  ;;  %v860_v33 = vmul.f32 %v13082_v18, %v13104_v26  ;;  %v13122_v34 = vadd.f32 %v548_v29, %v13086_v19 }
 0x144   :  { %v13125_v35 = vadd.f32 %v621_v30, %v13090_v20  ;;  %v550_v39 = vpop.f32.mrf.mxu0  ;;  %v623_v40 = vpop.f32.mrf.mxu1 }
 0x145   :  { %15903 = vst [vmem:[#allocation31_spill] sm:$0xff] %v13122_v34  ;;  %v937_v41 = vadd.f32 %v13094_v22, %v858_v32  ;;  %v939_v42 = vadd.f32 %v13108_v27, %v860_v33  ;;  %v859_v2 = vmul.f32 %v13098_v24, %v13122_v34  ;;  %v13144_v44 = vadd.f32 %v550_v39, %v13070_v15 }
 0x146   :  { %15904 = vst [vmem:[#allocation32_spill] sm:$0xff] %v13125_v35  ;;  %v861_v43 = vmul.f32 %v13112_v28, %v13125_v35  ;;  %v13147_v45 = vadd.f32 %v623_v40, %v13074_v16  ;;  %v552_v46 = vpop.f32.mrf.mxu0  ;;  %v625_v47 = vpop.f32.mrf.mxu1  ;;  %v11497_v35 = vld [vmem:[#allocation11 + $0x12c] ss:$24 sps:$4 sm:$0xff]  }
 0x147   :  { %15905 = vst [vmem:[#allocation33_spill] sm:$0xff] %v13144_v44  ;;  %vm985_vm0 = vcmp.ge.f32.partialorder %v937_v41, 0.0  ;;  %v1034_v50 = vmul.f32 %v13127_v36, %v937_v41  ;;  %vm987_vm1 = vcmp.ge.f32.partialorder %v939_v42, 0.0  ;;  %v1036_v51 = vmul.f32 %v13127_v36, %v939_v42 }
 0x148   :  { %15906 = vst [vmem:[#allocation34_spill] sm:$0xff] %v13147_v45  ;;  %v938_v52 = vadd.f32 %v13131_v37, %v859_v2  ;;  %v13161_v53 = vadd.f32 %v13135_v38, %v861_v43  ;;  %v864_v54 = vmul.f32 %v13078_v17, %v13144_v44  ;;  %v866_v55 = vmul.f32 %v13082_v18, %v13147_v45  ;;  %v629_v56 = vpop.f32.mrf.mxu1  ;;  %v13167_v57 = vpop.f32.mrf.mxu0 }
 0x149   :  { %v1082_v58 = vsel %vm985_vm0, %v937_v41, %v1034_v50  ;;  %v1084_v59 = vsel %vm987_vm1, %v939_v42, %v1036_v51  ;;  %v13170_v60 = vadd.f32 %v552_v46, %v13086_v19  ;;  %v13173_v61 = vadd.f32 %v625_v47, %v13090_v20 }
 0x14a   :  { %v1035_v62 = vmul.f32 %v13127_v36, %v938_v52  ;;  %v1037_v63 = vmul.f32 %v13127_v36, %v13161_v53  ;;  %v943_v0 = vadd.f32 %v13094_v22, %v864_v54  ;;  %v945_v1 = vadd.f32 %v13108_v27, %v866_v55  ;;  %v631_v4 = vpop.f32.mrf.mxu1  ;;  %v13180_v5 = vpop.f32.mrf.mxu0 }
 0x14b   :  { %15907 = vst [vmem:[#allocation35_spill] sm:$0xff] %v13170_v60  ;;  %15908 = vst [vmem:[#allocation36_spill] sm:$0xff] %v13173_v61  ;;  %v865_v6 = vmul.f32 %v13098_v24, %v13170_v60  ;;  %v867_v7 = vmul.f32 %v13112_v28, %v13173_v61  ;;  %v13187_v21 = vadd.f32 %v629_v56, %v13074_v16  ;;  %vm986_vm4 = vcmp.ge.f32.partialorder %v938_v52, 0.0 }
 0x14c   :  { %v13190_v23 = vadd.f32 %v631_v4, %v13090_v20  ;;  %vm991_vm2 = vcmp.ge.f32.partialorder %v943_v0, 0.0  ;;  %v1040_v29 = vmul.f32 %v13127_v36, %v943_v0  ;;  %vm993_vm3 = vcmp.ge.f32.partialorder %v945_v1, 0.0  ;;  %v633_v32 = vpop.f32.mrf.mxu1  ;;  %v13194_v33 = vpop.f32.mrf.mxu0 }
 0x14d   :  { %15909 = vst [vmem:[#allocation37_spill] sm:$0xff] %v13187_v21  ;;  %v1042_v30 = vmul.f32 %v13127_v36, %v945_v1  ;;  %v944_v39 = vadd.f32 %v13131_v37, %v865_v6  ;;  %v946_v40 = vadd.f32 %v13135_v38, %v867_v7  ;;  %v872_v41 = vmul.f32 %v13082_v18, %v13187_v21 }
 0x14e   :  { %15910 = vst [vmem:[#allocation38_spill] sm:$0xff] %v13190_v23  ;;  %v873_v42 = vmul.f32 %v13112_v28, %v13190_v23  ;;  %v1088_v2 = vsel %vm991_vm2, %v943_v0, %v1040_v29  ;;  %v13203_v46 = vadd.f32 %v633_v32, %v13074_v16  ;;  %v635_v47 = vpop.f32.mrf.mxu1  ;;  %v13205_v50 = vpop.f32.mrf.mxu0  ;;  %vm988_vm6 = vcmp.ge.f32.partialorder %v13161_v53, 0.0  ;;  %v11494_v23 = vld [vmem:[#allocation11 + $0x724] ss:$24 sps:$4 sm:$0xff]  }
 0x14f   :  { %v1090_v43 = vsel %vm993_vm3, %v945_v1, %v1042_v30  ;;  %v13207_v51 = vpack.c.bf16 %v1088_v2, %v1082_v58  ;;  %v13212_v55 = vadd.f32 %v13108_v27, %v872_v41  ;;  %v13218_v1 = vadd.f32 %v635_v47, %v13090_v20 }
 0x150   :  { %15911 = vst [vmem:[#allocation39_spill] sm:$0xff] %v13203_v46  ;;  %v13209_v54 = vpack.c.bf16 %v1090_v43, %v1084_v59  ;;  %v952_v56 = vadd.f32 %v13135_v38, %v873_v42  ;;  %v878_v0 = vmul.f32 %v13082_v18, %v13203_v46  ;;  %v639_v4 = vpop.f32.mrf.mxu1  ;;  %vm992_vm5 = vcmp.ge.f32.partialorder %v944_v39, 0.0  ;;  %v13221_v7 = vpop.f32.mrf.mxu0 }
 0x151   :  { %15912 = vst [vmem:[#allocation40_spill] sm:$0xff] %v13218_v1  ;;  %v1041_v6 = vmul.f32 %v13127_v36, %v944_v39  ;;  %v13225_v58 = vmul.f32 %v13127_v36, %v13212_v55  ;;  %v13229_v29 = vadd.f32 %v639_v4, %v13074_v16  ;;  %v1083_v30 = vsel %vm986_vm4, %v938_v52, %v1035_v62  ;;  %v11486_v52 = vld [vmem:[#allocation11 + $0x750] ss:$24 sps:$4 sm:$0xff]  }
 0x152   :  { %v1049_v59 = vmul.f32 %v13127_v36, %v952_v56  ;;  %v13232_v32 = vadd.f32 %v13108_v27, %v878_v0  ;;  %v879_v41 = vmul.f32 %v13112_v28, %v13218_v1  ;;  %v641_v42 = vpop.f32.mrf.mxu1  ;;  %v13237_v43 = vpop.f32.mrf.mxu0  ;;  %vm994_vm7 = vcmp.ge.f32.partialorder %v946_v40, 0.0 }
 0x153   :  { %15913 = vst [vmem:[#allocation41_spill] sm:$0xff] %v13229_v29  ;;  %v1089_v2 = vsel %vm992_vm5, %v944_v39, %v1041_v6  ;;  %v884_v47 = vmul.f32 %v13082_v18, %v13229_v29  ;;  %v13242_v46 = vadd.f32 %v641_v42, %v13090_v20  ;;  %v1043_v0 = vmul.f32 %v13127_v36, %v946_v40 }
 0x154   :  { %v13244_v4 = vpack.c.bf16 %v1089_v2, %v1083_v30  ;;  %v13248_v62 = vmul.f32 %v13127_v36, %v13232_v32  ;;  %v958_v39 = vadd.f32 %v13135_v38, %v879_v41  ;;  %v1085_v6 = vsel %vm988_vm6, %v13161_v53, %v1037_v63  ;;  %v643_v1 = vpop.f32.mrf.mxu1  ;;  %v13253_v29 = vpop.f32.mrf.mxu0  ;;  %v11489_v2 = vld [vmem:[#allocation11 + $0x158] ss:$24 sps:$4 sm:$0xff]  }
 0x155   :  { %15914 = vst [vmem:[#allocation42_spill] sm:$0xff] %v13242_v46  ;;  %v13256_v42 = vadd.f32 %v13108_v27, %v884_v47  ;;  %v885_v30 = vmul.f32 %v13112_v28, %v13242_v46  ;;  %v13262_v21 = vadd.f32 %v643_v1, %v13074_v16  ;;  %v11492_v41 = vld [vmem:[#allocation11 + $0x720] ss:$24 sps:$4 sm:$0xff]   ;;  %v13266_v53 = vadd.f32 %v13167_v57, %v13070_v15 }
 0x156   :  { %2945 = vmatprep.mubr.bf16.mxu1 %v13244_v4  ;;  %v1091_v63 = vsel %vm994_vm7, %v946_v40, %v1043_v0  ;;  %v645_v47 = vpop.f32.mrf.mxu1  ;;  %vm1000_vm8 = vcmp.ge.f32.partialorder %v952_v56, 0.0  ;;  %vm1006_vm9 = vcmp.ge.f32.partialorder %v958_v39, 0.0  ;;  %v1055_v46 = vmul.f32 %v13127_v36, %v958_v39  ;;  %v13271_v61 = vpop.f32.mrf.mxu0 }
 0x157   :  { %15915 = vst [vmem:[#allocation43_spill] sm:$0xff] %v13262_v21  ;;  %15916 = vst [vmem:[#allocation44_spill] sm:$0xff] %v13266_v53  ;;  %2946 = vmatmul.mubr.bf16.vlgmr.msra.gmra.mxu1 %v13207_v51  ;;  %v13275_v1 = vmul.f32 %v13127_v36, %v13256_v42  ;;  %v13278_v45 = vadd.f32 %v13135_v38, %v885_v30  ;;  %v13280_v57 = vpack.c.bf16 %v1091_v63, %v1085_v6  ;;  %v11500_v63 = vld [vmem:[#allocation11 + $0x6f4] ss:$24 sps:$4 sm:$0xff]  }
 0x158   :  { %3060 = vmatpush1.bf16.msra.mxu1 %v11486_v52  ;;  %v890_v40 = vmul.f32 %v13082_v18, %v13262_v21  ;;  %v13285_v0 = vadd.f32 %v645_v47, %v13090_v20  ;;  %v649_v26 = vpop.f32.mrf.mxu1  ;;  %v870_v60 = vmul.f32 %v13078_v17, %v13266_v53  ;;  %v1097_v44 = vsel %vm1000_vm8, %v952_v56, %v1049_v59  ;;  %v13289_v25 = vpop.f32.mrf.mxu0  ;;  %v11506_v21 = vld [vmem:[#allocation11 + $0x6c4] ss:$24 sps:$4 sm:$0xff]  }
 0x159   :  { %3061 = vmatprep.subr.bf16.mxu1 %v11494_v23  ;;  %v1103_v34 = vsel %vm1006_vm9, %v958_v39, %v1055_v46  ;;  %v13293_v6 = vmul.f32 %v13127_v36, %v13278_v45  ;;  %3018 = vmatprep.mubr.bf16.mxu0 %v13280_v57  ;;  %v13300_v23 = vadd.f32 %v649_v26, %v13074_v16  ;;  %vm999_vm10 = vcmp.ge.f32.partialorder %v13212_v55, 0.0 }
 0x15a   :  { %15917 = vst [vmem:[#allocation45_spill] sm:$0xff] %v13285_v0  ;;  %v13297_v52 = vadd.f32 %v13108_v27, %v890_v40  ;;  %v13302_v30 = vpack.c.bf16 %v1103_v34, %v1097_v44  ;;  %3019 = vmatmul.mubr.bf16.vlgmr.msra.gmra.mxu0 %v13209_v54  ;;  %v891_v46 = vmul.f32 %v13112_v28, %v13285_v0  ;;  %v651_v59 = vpop.f32.mrf.mxu1  ;;  %v13315_v26 = vpop.f32.mrf.mxu0  ;;  %v11495_v44 = vld [vmem:[#allocation11 + $0x128] ss:$24 sps:$4 sm:$0xff]   ;;  %vm1005_vm11 = vcmp.ge.f32.partialorder %v13232_v32, 0.0  ;;  %v11503_v0 = vld [vmem:[#allocation11 + $0xfc] ss:$24 sps:$4 sm:$0xff]  }
 0x15b   :  { %15918 = vst [vmem:[#allocation46_spill] sm:$0xff] %v13300_v23  ;;  %v13308_v56 = vadd.f32 %v13094_v22, %v870_v60  ;;  %v13312_v39 = vadd.f32 %v13180_v5, %v13086_v19  ;;  %3133 = vmatpush1.bf16.msra.mxu0 %v11489_v2  ;;  %v896_v60 = vmul.f32 %v13082_v18, %v13300_v23  ;;  %v11498_v40 = vld [vmem:[#allocation11 + $0x6f0] ss:$24 sps:$4 sm:$0xff]   ;;  %vm1012_vm12 = vcmp.ge.f32.partialorder %v13278_v45, 0.0 }
 0x15c   :  { %v13319_v34 = vmul.f32 %v13127_v36, %v13297_v52  ;;  %3062 = vmatpush1.bf16.msra.mxu1 %v11492_v41  ;;  %v13324_v47 = vadd.f32 %v651_v59, %v13090_v20  ;;  %v970_v5 = vadd.f32 %v13135_v38, %v891_v46  ;;  %3134 = vmatprep.subr.bf16.mxu0 %v11497_v35  ;;  %v653_v23 = vpop.f32.mrf.mxu1  ;;  %v13336_v59 = vpop.f32.mrf.mxu0  ;;  %v11501_v46 = vld [vmem:[#allocation11 + $0xf8] ss:$24 sps:$4 sm:$0xff]   ;;  %vm1011_vm14 = vcmp.ge.f32.partialorder %v13256_v42, 0.0 }
 0x15d   :  { %15919 = vst [vmem:[#allocation47_spill] sm:$0xff] %v13312_v39  ;;  %v13330_v2 = vmul.f32 %v13127_v36, %v13308_v56  ;;  %3028 = vmatprep.mubr.bf16.mxu0 %v13302_v30  ;;  %v871_v41 = vmul.f32 %v13098_v24, %v13312_v39  ;;  %v13339_v53 = vadd.f32 %v13108_v27, %v896_v60  ;;  %vm1017_vm15 = vcmp.ge.f32.partialorder %v13297_v52, 0.0 }
 0x15e   :  { %15920 = vst [vmem:[#allocation48_spill] sm:$0xff] %v13324_v47  ;;  %v897_v35 = vmul.f32 %v13112_v28, %v13324_v47  ;;  %3063 = vmatprep.subr.bf16.mxu1 %v11500_v63  ;;  %v1096_v13 = vsel %vm999_vm10, %v13212_v55, %v13225_v58  ;;  %v1102_v39 = vsel %vm1005_vm11, %v13232_v32, %v13248_v62  ;;  %v655_v12 = vpop.f32.mrf.mxu1  ;;  %vm1018_vm13 = vcmp.ge.f32.partialorder %v970_v5, 0.0 }
 0x15f   :  { %v13352_v9 = vadd.f32 %v13131_v37, %v871_v41  ;;  %v13354_v60 = vpack.c.bf16 %v1102_v39, %v1096_v13  ;;  %v13357_v47 = vadd.f32 %v653_v23, %v13074_v16  ;;  %v13361_v63 = vadd.f32 %v13194_v33, %v13070_v15  ;;  %3135 = vmatpush1.bf16.msra.mxu0 %v11495_v44  ;;  %v13373_v16 = vpop.f32.mrf.mxu0  ;;  %v11509_v23 = vld [vmem:[#allocation11 + $0xcc] ss:$24 sps:$4 sm:$0xff]   ;;  %v11507_v41 = vld [vmem:[#allocation11 + $0xc8] ss:$24 sps:$4 sm:$0xff]  }
 0x160   :  { %v13365_v55 = vmul.f32 %v13127_v36, %v13339_v53  ;;  %v13368_v58 = vadd.f32 %v13135_v38, %v897_v35  ;;  %3064 = vmatpush1.bf16.msra.mxu1 %v11498_v40  ;;  %v13371_v13 = vadd.f32 %v655_v12, %v13090_v20  ;;  %3136 = vmatprep.subr.bf16.mxu0 %v11503_v0  ;;  %v11512_v39 = vld [vmem:[#allocation11 + $0x694] ss:$24 sps:$4 sm:$0xff]   ;;  %vm1023_vm4 = vcmp.ge.f32.partialorder %v13339_v53, 0.0 }
 0x161   :  { %15921 = vst [vmem:[#allocation49_spill] sm:$0xff] %v13357_v47  ;;  %15922 = vst [vmem:[#allocation50_spill] sm:$0xff] %v13361_v63  ;;  %v13377_v33 = vmul.f32 %v13127_v36, %v13352_v9  ;;  %v902_v32 = vmul.f32 %v13082_v18, %v13357_v47  ;;  %v876_v62 = vmul.f32 %v13078_v17, %v13361_v63  ;;  %3065 = vmatprep.subr.bf16.mxu1 %v11506_v21  ;;  %v13396_v44 = vpop.f32.mrf.mxu0 }
 0x162   :  { %15923 = vst [vmem:[#allocation51_spill] sm:$0xff] %v13371_v13  ;;  %v1073_v12 = vmul.f32 %v13127_v36, %v13368_v58  ;;  %v903_v20 = vmul.f32 %v13112_v28, %v13371_v13  ;;  %v13390_v0 = vadd.f32 %v13205_v50, %v13086_v19  ;;  %v13394_v18 = vadd.f32 %v13221_v7, %v13070_v15 }
 0x163   :  { %3029 = vmatmul.mubr.bf16.gmra.mxu0 %v13354_v60  ;;  %v13400_v21 = vadd.f32 %v13108_v27, %v902_v32  ;;  %v13403_v40 = vadd.f32 %v13094_v22, %v876_v62  ;;  %v1067_v28 = vmul.f32 %v13127_v36, %v970_v5  ;;  %v1109_v50 = vsel %vm1012_vm12, %v13278_v45, %v13293_v6  ;;  %v11510_v32 = vld [vmem:[#allocation11 + $0x690] ss:$24 sps:$4 sm:$0xff]   ;;  %v13416_v62 = vpop.f32.mrf.mxu0  ;;  %v11518_v6 = vld [vmem:[#allocation11 + $0x664] ss:$24 sps:$4 sm:$0xff]  }
 0x164   :  { %15924 = vst [vmem:[#allocation52_spill] sm:$0xff] %v13390_v0  ;;  %15925 = vst [vmem:[#allocation53_spill] sm:$0xff] %v13394_v18  ;;  %3137 = vmatpush1.bf16.msra.mxu0 %v11501_v46  ;;  %v982_v7 = vadd.f32 %v13135_v38, %v903_v20  ;;  %v877_v35 = vmul.f32 %v13098_v24, %v13390_v0  ;;  %3066 = vmatpush1.bf16.msra.mxu1 %v11504_v10  ;;  %v11515_v10 = vld [vmem:[#allocation11 + $0x9c] ss:$24 sps:$4 sm:$0xff]   ;;  %vm1024_vm0 = vcmp.ge.f32.partialorder %v13368_v58, 0.0 }
 0x165   :  { %v882_v27 = vmul.f32 %v13078_v17, %v13394_v18  ;;  %v13420_v13 = vmul.f32 %v13127_v36, %v13400_v21  ;;  %v13424_v38 = vmul.f32 %v13127_v36, %v13403_v40  ;;  %3138 = vmatprep.subr.bf16.mxu0 %v11509_v23  ;;  %v1115_v45 = vsel %vm1018_vm13, %v970_v5, %v1067_v28  ;;  %v11513_v18 = vld [vmem:[#allocation11 + $0x98] ss:$24 sps:$4 sm:$0xff]   ;;  %v13438_v23 = vpop.f32.mrf.mxu0 }
 0x166   :  { %3067 = vmatprep.subr.bf16.mxu1 %v11512_v39  ;;  %v956_v46 = vadd.f32 %v13131_v37, %v877_v35  ;;  %v13432_v47 = vpack.c.bf16 %v1115_v45, %v1109_v50  ;;  %v13436_v0 = vadd.f32 %v13237_v43, %v13086_v19  ;;  %v1108_v5 = vsel %vm1011_vm14, %v13256_v42, %v13275_v1 }
 0x167   :  { %v13430_v20 = vadd.f32 %v13094_v22, %v882_v27  ;;  %v1114_v39 = vsel %vm1017_vm15, %v13297_v52, %v13319_v34  ;;  %v13450_v28 = vadd.f32 %v13253_v29, %v13070_v15  ;;  %v13454_v43 = vadd.f32 %v13271_v61, %v13086_v19  ;;  %v13465_v52 = vpop.f32.mrf.mxu0  ;;  %v11516_v29 = vld [vmem:[#allocation11 + $0x660] ss:$24 sps:$4 sm:$0xff]   ;;  %v11521_v34 = vld [vmem:[#allocation11 + $0x6c] ss:$24 sps:$4 sm:$0xff]  }
 0x168   :  { %15926 = vst [vmem:[#allocation54_spill] sm:$0xff] %v13436_v0  ;;  %3139 = vmatpush1.bf16.msra.mxu0 %v11507_v41  ;;  %3038 = vmatprep.mubr.bf16.mxu0 %v13432_v47  ;;  %v883_v42 = vmul.f32 %v13098_v24, %v13436_v0  ;;  %v13463_v1 = vpack.c.bf16 %v1114_v39, %v1108_v5  ;;  %vm1030_vm1 = vcmp.ge.f32.partialorder %v982_v7, 0.0  ;;  %vm998_vm2 = vcmp.ge.f32.partialorder %v13352_v9, 0.0 }
 0x169   :  { %15927 = vst [vmem:[#allocation55_spill] sm:$0xff] %v13450_v28  ;;  %15928 = vst [vmem:[#allocation56_spill] sm:$0xff] %v13454_v43  ;;  %v13458_v50 = vmul.f32 %v13127_v36, %v13430_v20  ;;  %3140 = vmatprep.subr.bf16.mxu0 %v11515_v10  ;;  %3068 = vmatpush1.bf16.msra.mxu1 %v11510_v32  ;;  %v888_v61 = vmul.f32 %v13078_v17, %v13450_v28  ;;  %v11524_v10 = vld [vmem:[#allocation11 + $0x634] ss:$24 sps:$4 sm:$0xff]   ;;  %v13486_v39 = vpop.f32.mrf.mxu0  ;;  %vm1004_vm3 = vcmp.ge.f32.partialorder %v956_v46, 0.0 }
 0x16a   :  { %15929 = vst [vmem:[#allocation57_spill] sm:$0xff] %v13463_v1  ;;  %v889_v41 = vmul.f32 %v13098_v24, %v13454_v43  ;;  %v13473_v35 = vadd.f32 %v13289_v25, %v13070_v15  ;;  %v13476_v27 = vadd.f32 %v13131_v37, %v883_v42  ;;  %3069 = vmatprep.subr.bf16.mxu1 %v11518_v6  ;;  %v11522_v42 = vld [vmem:[#allocation11 + $0x630] ss:$24 sps:$4 sm:$0xff]   ;;  %v11527_v43 = vld [vmem:[#allocation11 + $0x3c] ss:$24 sps:$4 sm:$0xff]   ;;  %vm1029_vm5 = vcmp.ge.f32.partialorder %v13400_v21, 0.0 }
 0x16b   :  { %v1079_v45 = vmul.f32 %v13127_v36, %v982_v7  ;;  %v1121_v32 = vsel %vm1024_vm0, %v13368_v58, %v1073_v12  ;;  %v13484_v5 = vadd.f32 %v13315_v26, %v13086_v19  ;;  %3039 = vmatmul.mubr.bf16.gmra.mxu0 %v13463_v1  ;;  %v13490_v25 = vadd.f32 %v13094_v22, %v888_v61  ;;  %v11519_v58 = vld [vmem:[#allocation11 + $0x68] ss:$24 sps:$4 sm:$0xff]   ;;  %v13500_v0 = vpop.f32.mrf.mxu0 }
 0x16c   :  { %15930 = vst [vmem:[#allocation58_spill] sm:$0xff] %v13473_v35  ;;  %v894_v6 = vmul.f32 %v13078_v17, %v13473_v35  ;;  %3141 = vmatpush1.bf16.msra.mxu0 %v11513_v18  ;;  %v968_v12 = vadd.f32 %v13131_v37, %v889_v41  ;;  %v1053_v61 = vmul.f32 %v13127_v36, %v956_v46  ;;  %vm997_vm6 = vcmp.ge.f32.partialorder %v13308_v56, 0.0 }
 0x16d   :  { %15931 = vst [vmem:[#allocation59_spill] sm:$0xff] %v13484_v5  ;;  %v1127_v26 = vsel %vm1030_vm1, %v982_v7, %v1079_v45  ;;  %v895_v28 = vmul.f32 %v13098_v24, %v13484_v5  ;;  %v1059_v35 = vmul.f32 %v13127_v36, %v13476_v27  ;;  %v1064_v18 = vmul.f32 %v13127_v36, %v13490_v25  ;;  %v11530_v7 = vld [vmem:[#allocation11 + $0x604] ss:$24 sps:$4 sm:$0xff]   ;;  %v11525_v45 = vld [vmem:[#allocation11 + $0x38] ss:$24 sps:$4 sm:$0xff]  }
 0x16e   :  { %3142 = vmatprep.subr.bf16.mxu0 %v11521_v34  ;;  %3070 = vmatpush1.bf16.msra.mxu1 %v11516_v29  ;;  %v13506_v41 = vpack.c.bf16 %v1127_v26, %v1121_v32  ;;  %v1095_v63 = vsel %vm998_vm2, %v13352_v9, %v13377_v33  ;;  %v1101_v1 = vsel %vm1004_vm3, %v956_v46, %v1053_v61  ;;  %v13518_v29 = vpop.f32.mrf.mxu0  ;;  %vm1003_vm7 = vcmp.ge.f32.partialorder %v13403_v40, 0.0 }
 0x16f   :  { %3071 = vmatprep.subr.bf16.mxu1 %v11524_v10  ;;  %v13510_v5 = vadd.f32 %v13131_v37, %v895_v28  ;;  %v13521_v34 = vadd.f32 %v13094_v22, %v894_v6  ;;  %v13524_v32 = vpack.c.bf16 %v1101_v1, %v1095_v63  ;;  %v1120_v28 = vsel %vm1023_vm4, %v13339_v53, %v13365_v55  ;;  %v11528_v1 = vld [vmem:[#allocation11 + $0x600] ss:$24 sps:$4 sm:$0xff]   ;;  %v11536_v6 = vld [vmem:[#allocation11 + $0x8d4] ss:$24 sps:$4 sm:$0xff]  }
 0x170   :  { %3048 = vmatprep.mubr.bf16.mxu0 %v13506_v41  ;;  %v1126_v10 = vsel %vm1029_vm5, %v13400_v21, %v13420_v13  ;;  %3143 = vmatpush1.bf16.msra.mxu0 %v11519_v58  ;;  %v13536_v46 = vpop.f32.mrf.mxu0  ;;  %v1094_v53 = vsel %vm997_vm6, %v13308_v56, %v13330_v2  ;;  %v1100_v63 = vsel %vm1003_vm7, %v13403_v40, %v13424_v38  ;;  %v11533_v13 = vld [vmem:[#allocation11 + $0xc] ss:$24 sps:$4 sm:$0xff]   ;;  %vm1010_vm8 = vcmp.ge.f32.partialorder %v13476_v27, 0.0 }
 0x171   :  { %v1071_v9 = vmul.f32 %v13127_v36, %v13510_v5  ;;  %v13532_v33 = vpack.c.bf16 %v1126_v10, %v1120_v28  ;;  %3144 = vmatprep.subr.bf16.mxu0 %v11527_v43  ;;  %2955 = vmatprep.mubr.bf16.mxu1 %v13524_v32  ;;  %v13545_v55 = vadd.f32 %v13336_v59, %v13070_v15  ;;  %vm1016_vm9 = vcmp.ge.f32.partialorder %v968_v12, 0.0  ;;  %v11548_v10 = vld [vmem:[#allocation11 + $0x874] ss:$24 sps:$4 sm:$0xff]  }
 0x172   :  { %3072 = vmatpush1.bf16.msra.mxu1 %v11522_v42  ;;  %v13548_v21 = vpack.c.bf16 %v1100_v63, %v1094_v53  ;;  %v13552_v43 = vadd.f32 %v13373_v16, %v13086_v19  ;;  %v1065_v56 = vmul.f32 %v13127_v36, %v968_v12  ;;  %v1107_v2 = vsel %vm1010_vm8, %v13476_v27, %v1059_v35  ;;  %v11531_v19 = vld [vmem:[#allocation11 + $0x8] ss:$24 sps:$4 sm:$0xff]   ;;  %v11539_v27 = vld [vmem:[#allocation11 + $0x2dc] ss:$24 sps:$4 sm:$0xff]  }
 0x173   :  { %15932 = vst [vmem:[#allocation60_spill] sm:$0xff] %v13545_v55  ;;  %3049 = vmatmul.mubr.bf16.gmra.mxu0 %v13532_v33  ;;  %v900_v15 = vmul.f32 %v13078_v17, %v13545_v55  ;;  %3073 = vmatprep.subr.bf16.mxu1 %v11530_v7  ;;  %vm1009_vm10 = vcmp.ge.f32.partialorder %v13430_v20, 0.0  ;;  %vm1015_vm11 = vcmp.ge.f32.partialorder %v13490_v25, 0.0  ;;  %v11534_v16 = vld [vmem:[#allocation11 + $0x8d0] ss:$24 sps:$4 sm:$0xff]   ;;  %v13566_v17 = vpop.f32.mrf.mxu0  ;;  %vm1022_vm12 = vcmp.ge.f32.partialorder %v13510_v5, 0.0 }
 0x174   :  { %15933 = vst [vmem:[#allocation61_spill] sm:$0xff] %v13552_v43  ;;  %3145 = vmatpush1.bf16.msra.mxu0 %v11525_v45  ;;  %2956 = vmatmul.mubr.bf16.gmra.mxu1 %v13548_v21  ;;  %v901_v59 = vmul.f32 %v13098_v24, %v13552_v43  ;;  %v1113_v40 = vsel %vm1016_vm9, %v968_v12, %v1065_v56  ;;  %v11542_v42 = vld [vmem:[#allocation11 + $0x8a4] ss:$24 sps:$4 sm:$0xff]   ;;  %v11537_v12 = vld [vmem:[#allocation11 + $0x2d8] ss:$24 sps:$4 sm:$0xff]   ;;  %vm1021_vm14 = vcmp.ge.f32.partialorder %v13521_v34, 0.0 }
 0x175   :  { %v1106_v38 = vsel %vm1009_vm10, %v13430_v20, %v13458_v50  ;;  %3164 = vmatprep.mubr.bf16.mxu0 %v13244_v4  ;;  %v979_v35 = vadd.f32 %v13094_v22, %v900_v15  ;;  %3146 = vmatprep.subr.bf16.mxu0 %v11533_v13  ;;  %v13570_v58 = vpack.c.bf16 %v1113_v40, %v1107_v2  ;;  %v13593_v7 = vpop.f32.mrf.mxu0  ;;  %v11546_v56 = vld [vmem:[#allocation11 + $0x870] ss:$24 sps:$4 sm:$0xff]   ;;  %v11551_v2 = vld [vmem:[#allocation11 + $0x27c] ss:$24 sps:$4 sm:$0xff]  }
 0x176   :  { %v1112_v26 = vsel %vm1015_vm11, %v13490_v25, %v1064_v18  ;;  %v980_v24 = vadd.f32 %v13131_v37, %v901_v59  ;;  %3074 = vmatpush1.bf16.msra.mxu1 %v11528_v1  ;;  %v13577_v20 = vadd.f32 %v13416_v62, %v13151_v48  ;;  %v13581_v50 = vrot.slane %v13066_v14, %v13115_v31  ;;  %v11540_v37 = vld [vmem:[#allocation11 + $0x8a0] ss:$24 sps:$4 sm:$0xff]   ;;  %v11554_v40 = vld [vmem:[#allocation11 + $0x844] ss:$24 sps:$4 sm:$0xff]  }
 0x177   :  { %3075 = vmatprep.subr.bf16.mxu1 %v11536_v6  ;;  %2965 = vmatprep.mubr.bf16.mxu1 %v13570_v58  ;;  %v13584_v22 = vpack.c.bf16 %v1112_v26, %v1106_v38  ;;  %v13587_v25 = vsub.s32 4, %v13048_v3  ;;  %v1119_v18 = vsel %vm1022_vm12, %v13510_v5, %v1071_v9  ;;  %v1070_v45 = vmul.f32 %v13127_v36, %v13521_v34  ;;  %v11545_v3 = vld [vmem:[#allocation11 + $0x2ac] ss:$24 sps:$4 sm:$0xff]   ;;  %v11543_v1 = vld [vmem:[#allocation11 + $0x2a8] ss:$24 sps:$4 sm:$0xff]   ;;  %v13614_v15 = vpop.f32.mrf.mxu0 }
 0x178   :  { %15934 = vst [vmem:[#allocation62_spill] sm:$0xff] %v13577_v20  ;;  %3147 = vmatpush1.bf16.msra.mxu0 %v11531_v19  ;;  %v863_v61 = vmul.f32 %v13155_v49, %v13577_v20  ;;  %vm1028_vm13 = vcmp.ge.f32.partialorder %v980_v24, 0.0  ;;  %v1077_v62 = vmul.f32 %v13127_v36, %v980_v24  ;;  %v1076_v28 = vmul.f32 %v13127_v36, %v979_v35  ;;  %v11549_v38 = vld [vmem:[#allocation11 + $0x278] ss:$24 sps:$4 sm:$0xff]   ;;  %v12059_v55 = vld [vmem:[#allocation13 + $0x788] ss:$24 sps:$4 sm:$0xff]  }
 0x179   :  { %15935 = vst [vmem:[#allocation63_spill] sm:$0xff] %v13587_v25  ;;  %3148 = vmatprep.subr.bf16.mxu0 %v11539_v27  ;;  %v13600_v53 = vadd.f32 %v13465_v52, %v13151_v48  ;;  %vm1027_vm15 = vcmp.ge.f32.partialorder %v979_v35, 0.0  ;;  %v13611_v52 = vrot.slane %v13050_v8, %v13587_v25  ;;  %v1118_v19 = vsel %vm1021_vm14, %v13521_v34, %v1070_v45  ;;  %v11552_v26 = vld [vmem:[#allocation11 + $0x840] ss:$24 sps:$4 sm:$0xff]  }
 0x17a   :  { %3076 = vmatpush2.bf16.msra.mxu1 %v11534_v16  ;;  %v942_v63 = vadd.f32 %v13581_v50, %v863_v61  ;;  %v1125_v13 = vsel %vm1028_vm13, %v980_v24, %v1077_v62  ;;  %v1124_v59 = vsel %vm1027_vm15, %v979_v35, %v1076_v28  ;;  %v13628_v35 = vrot.slane %v13058_v11, %v13587_v25  ;;  %v11555_v11 = vld [vmem:[#allocation11 + $0x248] ss:$24 sps:$4 sm:$0xff]  }
 0x17b   :  { %15936 = vst [vmem:[#allocation64_spill] sm:$0xff] %v13600_v53  ;;  %3077 = vmatprep.subr.bf16.mxu1 %v11542_v42  ;;  %v13604_v5 = vpack.c.bf16 %v1125_v13, %v1119_v18  ;;  %v869_v9 = vmul.f32 %v13155_v49, %v13600_v53  ;;  %v13620_v27 = vpack.c.bf16 %v1124_v59, %v1118_v19  ;;  %v11557_v42 = vld [vmem:[#allocation11 + $0x24c] ss:$24 sps:$4 sm:$0xff]   ;;  %v11558_v28 = vld [vmem:[#allocation11 + $0x810] ss:$24 sps:$4 sm:$0xff]   ;;  %v13906_v53 = vstv %s10217_s7 }
 0x17c   :  { %3149 = vmatpush2.bf16.msra.mxu0 %v11537_v12  ;;  %2966 = vmatmul.mubr.bf16.gmra.mxu1 %v13584_v22  ;;  %v1039_v6 = vmul.f32 %v13127_v36, %v942_v63  ;;  %vm990_vm0 = vcmp.ge.f32.partialorder %v942_v63, 0.0  ;;  %v718_v12 = vpop.f32.mrf.mxu0  ;;  %v13624_v34 = vadd.f32 %v13396_v44, %v13611_v52  ;;  %v13632_v62 = vadd.f32 %v13438_v23, %v13611_v52  ;;  %v11572_v19 = vld [vmem:[#allocation11 + $0x7b4] ss:$24 sps:$4 sm:$0xff]  }
 0x17d   :  { %3150 = vmatprep.subr.bf16.mxu0 %v11545_v3  ;;  %2975 = vmatprep.mubr.bf16.mxu1 %v13604_v5  ;;  %v948_v16 = vadd.f32 %v13581_v50, %v869_v9  ;;  %v13638_v45 = vadd.f32 %v13500_v0, %v13151_v48  ;;  %v13642_v44 = vadd.f32 %v13536_v46, %v13151_v48  ;;  %v11563_v0 = vld [vmem:[#allocation11 + $0x21c] ss:$24 sps:$4 sm:$0xff]  }
 0x17e   :  { %3078 = vmatpush2.bf16.msra.mxu1 %v11540_v37  ;;  %v1087_v24 = vsel %vm990_vm0, %v942_v63, %v1039_v6  ;;  %15937 = vst [vmem:[#allocation65_spill] sm:$0xff] %v13624_v34  ;;  %v11560_v37 = vld [vmem:[#allocation11 + $0x814] ss:$24 sps:$4 sm:$0xff]   ;;  %15938 = vst [vmem:[#allocation66_spill] sm:$0xff] %v13632_v62  ;;  %v13645_v3 = vpop.f32.mrf.mxu0  ;;  %v862_v23 = vmul.f32 %v13628_v35, %v13624_v34  ;;  %v11566_v63 = vld [vmem:[#allocation11 + $0x7e4] ss:$24 sps:$4 sm:$0xff]   ;;  %v868_v46 = vmul.f32 %v13628_v35, %v13632_v62 }
 0x17f   :  { %3079 = vmatprep.subr.bf16.mxu1 %v11548_v10  ;;  %vm996_vm1 = vcmp.ge.f32.partialorder %v948_v16, 0.0  ;;  %v1045_v8 = vmul.f32 %v13127_v36, %v948_v16  ;;  %15939 = vst [vmem:[#allocation67_spill] sm:$0xff] %v13638_v45  ;;  %15940 = vst [vmem:[#allocation68_spill] sm:$0xff] %v13642_v44  ;;  %v13651_v10 = vrot.slane %v13066_v14, %v13587_v25  ;;  %v11564_v14 = vld [vmem:[#allocation11 + $0x7e0] ss:$24 sps:$4 sm:$0xff]  }
 0x180   :  { %3151 = vmatpush2.bf16.msra.mxu0 %v11543_v1  ;;  %v875_v13 = vmul.f32 %v13155_v49, %v13638_v45  ;;  %v881_v9 = vmul.f32 %v13155_v49, %v13642_v44  ;;  %v11561_v1 = vld [vmem:[#allocation11 + $0x218] ss:$24 sps:$4 sm:$0xff]   ;;  %v11569_v6 = vld [vmem:[#allocation11 + $0x1ec] ss:$24 sps:$4 sm:$0xff]  }
 0x181   :  { %3152 = vmatprep.subr.bf16.mxu0 %v11551_v2  ;;  %v1093_v61 = vsel %vm996_vm1, %v948_v16, %v1045_v8  ;;  %v941_v2 = vadd.f32 %v13651_v10, %v862_v23  ;;  %v947_v59 = vadd.f32 %v13651_v10, %v868_v46  ;;  %v13664_v16 = vadd.f32 %v13486_v39, %v13611_v52  ;;  %v11570_v39 = vld [vmem:[#allocation11 + $0x7b0] ss:$24 sps:$4 sm:$0xff]  }
 0x182   :  { %3080 = vmatpush2.bf16.msra.mxu1 %v11546_v56  ;;  %v13634_v18 = vpack.c.bf16 %v1093_v61, %v1087_v24  ;;  %v724_v56 = vpop.f32.mrf.mxu0  ;;  %v13672_v8 = vadd.f32 %v13593_v7, %v13151_v48  ;;  %v11567_v24 = vld [vmem:[#allocation11 + $0x1e8] ss:$24 sps:$4 sm:$0xff]   ;;  %v11575_v61 = vld [vmem:[#allocation11 + $0x1bc] ss:$24 sps:$4 sm:$0xff]  }
 0x183   :  { %3081 = vmatprep.subr.bf16.mxu1 %v11554_v40  ;;  %15941 = vst [vmem:[#allocation69_spill] sm:$0xff] %v13664_v16  ;;  %v13668_v40 = vadd.f32 %v13518_v29, %v13611_v52  ;;  %vm989_vm2 = vcmp.ge.f32.partialorder %v941_v2, 0.0  ;;  %v1038_v29 = vmul.f32 %v13127_v36, %v941_v2  ;;  %v11578_v7 = vld [vmem:[#allocation11 + $0x784] ss:$24 sps:$4 sm:$0xff]   ;;  %vm995_vm3 = vcmp.ge.f32.partialorder %v947_v59, 0.0 }
 0x184   :  { %3153 = vmatpush2.bf16.msra.mxu0 %v11549_v38  ;;  %2976 = vmatmul.mubr.bf16.gmra.mxu1 %v13620_v27  ;;  %15943 = vst [vmem:[#allocation71_spill] sm:$0xff] %v13672_v8  ;;  %v954_v38 = vadd.f32 %v13581_v50, %v875_v13  ;;  %v887_v23 = vmul.f32 %v13155_v49, %v13672_v8  ;;  %v11573_v13 = vld [vmem:[#allocation11 + $0x1b8] ss:$24 sps:$4 sm:$0xff]  }
 0x185   :  { %3154 = vmatprep.subr.bf16.mxu0 %v11557_v42  ;;  %3091 = vmatprep.mubr.bf16.mxu1 %v13634_v18  ;;  %15942 = vst [vmem:[#allocation70_spill] sm:$0xff] %v13668_v40  ;;  %v13677_v42 = vadd.f32 %v718_v12, %v13151_v48  ;;  %v880_v12 = vmul.f32 %v13628_v35, %v13668_v40 }
 0x186   :  { %3082 = vmatpush2.bf16.msra.mxu1 %v11552_v26  ;;  %v960_v26 = vadd.f32 %v13581_v50, %v881_v9  ;;  %vm1002_vm4 = vcmp.ge.f32.partialorder %v954_v38, 0.0  ;;  %v13696_v8 = vadd.f32 %v13566_v17, %v13611_v52 }
 0x187   :  { %3083 = vmatprep.subr.bf16.mxu1 %v11560_v37  ;;  %15944 = vst [vmem:[#allocation72_spill] sm:$0xff] %v13677_v42  ;;  %v13679_v37 = vpop.f32.mrf.mxu0 }
 0x188   :  { %3155 = vmatpush2.bf16.msra.mxu0 %v11555_v11  ;;  %v1044_v11 = vmul.f32 %v13127_v36, %v947_v59  ;;  %v1057_v46 = vmul.f32 %v13127_v36, %v960_v26  ;;  %vm1008_vm5 = vcmp.ge.f32.partialorder %v960_v26, 0.0  ;;  %15945 = vst [vmem:[#allocation73_spill] sm:$0xff] %v13696_v8 }
 0x189   :  { %3156 = vmatprep.subr.bf16.mxu0 %v11563_v0  ;;  %v1051_v0 = vmul.f32 %v13127_v36, %v954_v38  ;;  %v728_v9 = vpop.f32.mrf.mxu0 }
 0x18a   :  { %3084 = vmatpush2.bf16.msra.mxu1 %v11558_v28  ;;  %v874_v28 = vmul.f32 %v13628_v35, %v13664_v16  ;;  %v1092_v44 = vsel %vm995_vm3, %v947_v59, %v1044_v11  ;;  %v13713_v45 = vadd.f32 %v728_v9, %v13151_v48  ;;  %v11582_v59 = vld [vmem:[#allocation11 + $0x458] ss:$24 sps:$4 sm:$0xff]   ;;  %v11587_v11 = vld [vmem:[#allocation11 + $0x75c] ss:$24 sps:$4 sm:$0xff]   ;;  %v13733_v9 = vadd.f32 %v13645_v3, %v13611_v52 }
 0x18b   :  { %3085 = vmatprep.subr.bf16.mxu1 %v11566_v63  ;;  %v893_v63 = vmul.f32 %v13155_v49, %v13677_v42  ;;  %v13700_v42 = vadd.f32 %v13614_v15, %v13611_v52  ;;  %v1105_v15 = vsel %vm1008_vm5, %v960_v26, %v1057_v46  ;;  %v11585_v46 = vld [vmem:[#allocation11 + $0x758] ss:$24 sps:$4 sm:$0xff]  }
 0x18c   :  { %3157 = vmatpush2.bf16.msra.mxu0 %v11561_v1  ;;  %v1086_v1 = vsel %vm989_vm2, %v941_v2, %v1038_v29  ;;  %v953_v40 = vadd.f32 %v13651_v10, %v874_v28  ;;  %v959_v2 = vadd.f32 %v13651_v10, %v880_v12  ;;  %v966_v29 = vadd.f32 %v13581_v50, %v887_v23  ;;  %v11590_v12 = vld [vmem:[#allocation11 + $0x42c] ss:$24 sps:$4 sm:$0xff]  }
 0x18d   :  { %3158 = vmatprep.subr.bf16.mxu0 %v11569_v6  ;;  %v11581_v6 = vld [vmem:[#allocation11 + $0x18c] ss:$24 sps:$4 sm:$0xff]   ;;  %15946 = vst [vmem:[#allocation74_spill] sm:$0xff] %v13700_v42  ;;  %v972_v17 = vadd.f32 %v13581_v50, %v893_v63  ;;  %15948 = vst [vmem:[#allocation76_spill] sm:$0xff] %v13713_v45  ;;  %v13715_v28 = vpack.c.bf16 %v1092_v44, %v1086_v1 }
 0x18e   :  { %3086 = vmatpush2.bf16.msra.mxu1 %v11564_v14  ;;  %v11576_v14 = vld [vmem:[#allocation11 + $0x780] ss:$24 sps:$4 sm:$0xff]   ;;  %v1056_v26 = vmul.f32 %v13127_v36, %v959_v2  ;;  %vm1001_vm6 = vcmp.ge.f32.partialorder %v953_v40, 0.0  ;;  %v1063_v44 = vmul.f32 %v13127_v36, %v966_v29  ;;  %vm1007_vm7 = vcmp.ge.f32.partialorder %v959_v2, 0.0  ;;  %15949 = vst [vmem:[#allocation77_spill] sm:$0xff] %v13733_v9 }
 0x18f   :  { %3087 = vmatprep.subr.bf16.mxu1 %v11572_v19  ;;  %v11584_v19 = vld [vmem:[#allocation11 + $0x45c] ss:$24 sps:$4 sm:$0xff]   ;;  %v1069_v63 = vmul.f32 %v13127_v36, %v972_v17  ;;  %vm1014_vm8 = vcmp.ge.f32.partialorder %v966_v29, 0.0  ;;  %vm1020_vm9 = vcmp.ge.f32.partialorder %v972_v17, 0.0 }
 0x190   :  { %3159 = vmatpush2.bf16.msra.mxu0 %v11567_v24  ;;  %v13703_v24 = vadd.f32 %v724_v56, %v13151_v48  ;;  %v11579_v56 = vld [vmem:[#allocation11 + $0x188] ss:$24 sps:$4 sm:$0xff]   ;;  %v1050_v48 = vmul.f32 %v13127_v36, %v953_v40  ;;  %v1104_v3 = vsel %vm1007_vm7, %v959_v2, %v1056_v26  ;;  %v898_v2 = vmul.f32 %v13628_v35, %v13733_v9 }
 0x191   :  { %3160 = vmatprep.subr.bf16.mxu0 %v11575_v61  ;;  %v1099_v61 = vsel %vm1002_vm4, %v954_v38, %v1051_v0  ;;  %v905_v0 = vmul.f32 %v13155_v49, %v13713_v45  ;;  %v11872_v45 = vld [vmem:[#allocation13 + $0x454] ss:$24 sps:$4 sm:$0xff]  }
 0x192   :  { %15947 = vst [vmem:[#allocation75_spill] sm:$0xff] %v13703_v24  ;;  %3088 = vmatpush2.bf16.msra.mxu1 %v11570_v39  ;;  %v886_v39 = vmul.f32 %v13628_v35, %v13696_v8  ;;  %v899_v38 = vmul.f32 %v13155_v49, %v13703_v24  ;;  %v13725_v23 = vpack.c.bf16 %v1105_v15, %v1099_v61  ;;  %v11596_v15 = vld [vmem:[#allocation11 + $0x3fc] ss:$24 sps:$4 sm:$0xff]  }
 0x193   :  { %3089 = vmatprep.subr.bf16.mxu1 %v11578_v7  ;;  %v892_v7 = vmul.f32 %v13628_v35, %v13700_v42  ;;  %v1098_v61 = vsel %vm1001_vm6, %v953_v40, %v1050_v48  ;;  %v11594_v40 = vld [vmem:[#allocation11 + $0x3f8] ss:$24 sps:$4 sm:$0xff]  }
 0x194   :  { %3161 = vmatpush2.bf16.msra.mxu0 %v11573_v13  ;;  %v11588_v13 = vld [vmem:[#allocation11 + $0x428] ss:$24 sps:$4 sm:$0xff]   ;;  %v965_v1 = vadd.f32 %v13651_v10, %v886_v39  ;;  %v978_v49 = vadd.f32 %v13581_v50, %v899_v38  ;;  %v1111_v39 = vsel %vm1014_vm8, %v966_v29, %v1063_v44  ;;  %v11597_v29 = vld [vmem:[#allocation11 + $0x6f8] ss:$24 sps:$4 sm:$0xff]  }
 0x195   :  { %3162 = vmatprep.subr.bf16.mxu0 %v11581_v6  ;;  %v11593_v6 = vld [vmem:[#allocation11 + $0x72c] ss:$24 sps:$4 sm:$0xff]   ;;  %v11600_v44 = vld [vmem:[#allocation11 + $0x3c8] ss:$24 sps:$4 sm:$0xff]  }
 0x196   :  { %3090 = vmatpush2.bf16.msra.mxu1 %v11576_v14  ;;  %v971_v14 = vadd.f32 %v13651_v10, %v892_v7  ;;  %v11599_v7 = vld [vmem:[#allocation11 + $0x6fc] ss:$24 sps:$4 sm:$0xff]   ;;  %v1075_v48 = vmul.f32 %v13127_v36, %v978_v49  ;;  %vm1013_vm10 = vcmp.ge.f32.partialorder %v965_v1, 0.0  ;;  %vm1026_vm12 = vcmp.ge.f32.partialorder %v978_v49, 0.0 }
 0x197   :  { %3205 = vmatprep.subr.bf16.mxu1 %v11584_v19  ;;  %v11591_v19 = vld [vmem:[#allocation11 + $0x728] ss:$24 sps:$4 sm:$0xff]  }
 0x198   :  { %3163 = vmatpush2.bf16.msra.mxu0 %v11579_v56  ;;  %v13744_v56 = vadd.f32 %v13679_v37, %v13611_v52  ;;  %v13753_v52 = vpack.c.bf16 %v1104_v3, %v1098_v61  ;;  %v11602_v37 = vld [vmem:[#allocation11 + $0x3cc] ss:$24 sps:$4 sm:$0xff]   ;;  %vm1019_vm11 = vcmp.ge.f32.partialorder %v971_v14, 0.0  ;;  %v11608_v61 = vld [vmem:[#allocation11 + $0x39c] ss:$24 sps:$4 sm:$0xff]  }
 0x199   :  { %3092 = vmatmul.mubr.bf16.vlgmr.msra.gmra.mxu1 %v13715_v28  ;;  %3278 = vmatprep.subr.bf16.mxu0 %v11587_v11  ;;  %v984_v11 = vadd.f32 %v13581_v50, %v905_v0  ;;  %v1068_v50 = vmul.f32 %v13127_v36, %v971_v14  ;;  %v977_v0 = vadd.f32 %v13651_v10, %v898_v2 }
 0x19a   :  { %3206 = vmatpush1.bf16.msra.mxu1 %v11582_v59  ;;  %3101 = vmatprep.mubr.bf16.mxu1 %v13725_v23  ;;  %15950 = vst [vmem:[#allocation78_spill] sm:$0xff] %v13744_v56  ;;  %v1117_v59 = vsel %vm1020_vm9, %v972_v17, %v1069_v63  ;;  %v904_v17 = vmul.f32 %v13628_v35, %v13744_v56  ;;  %v11605_v63 = vld [vmem:[#allocation11 + $0x6cc] ss:$24 sps:$4 sm:$0xff]  }
 0x19b   :  { %3165 = vmatmul.mubr.bf16.vlgmr.msra.gmra.mxu0 %v13207_v51  ;;  %3207 = vmatprep.subr.bf16.mxu1 %v11590_v12  ;;  %v1062_v12 = vmul.f32 %v13127_v36, %v965_v1  ;;  %v13759_v38 = vpack.c.bf16 %v1117_v59, %v1111_v39  ;;  %v1081_v26 = vmul.f32 %v13127_v36, %v984_v11  ;;  %vm1032_vm13 = vcmp.ge.f32.partialorder %v984_v11, 0.0  ;;  %v11611_v39 = vld [vmem:[#allocation11 + $0x69c] ss:$24 sps:$4 sm:$0xff]  }
 0x19c   :  { %3174 = vmatprep.mubr.bf16.mxu0 %v13524_v32  ;;  %3279 = vmatpush1.bf16.msra.mxu0 %v11585_v46  ;;  %v983_v35 = vadd.f32 %v13651_v10, %v904_v17  ;;  %v11603_v46 = vld [vmem:[#allocation11 + $0x6c8] ss:$24 sps:$4 sm:$0xff]   ;;  %v1074_v10 = vmul.f32 %v13127_v36, %v977_v0  ;;  %vm1025_vm14 = vcmp.ge.f32.partialorder %v977_v0, 0.0  ;;  %v11618_v17 = vld [vmem:[#allocation11 + $0x338] ss:$24 sps:$4 sm:$0xff]  }
 0x19d   :  { %3280 = vmatprep.subr.bf16.mxu0 %v11593_v6  ;;  %v1116_v6 = vsel %vm1019_vm11, %v971_v14, %v1068_v50  ;;  %v1129_v3 = vsel %vm1032_vm13, %v984_v11, %v1081_v26  ;;  %v11614_v14 = vld [vmem:[#allocation11 + $0x36c] ss:$24 sps:$4 sm:$0xff]   ;;  %v11623_v50 = vld [vmem:[#allocation11 + $0x63c] ss:$24 sps:$4 sm:$0xff]  }
 0x19e   :  { %3208 = vmatpush1.bf16.msra.mxu1 %v11588_v13  ;;  %v1110_v13 = vsel %vm1013_vm10, %v965_v1, %v1062_v12  ;;  %v11609_v1 = vld [vmem:[#allocation11 + $0x698] ss:$24 sps:$4 sm:$0xff]   ;;  %vm1031_vm15 = vcmp.ge.f32.partialorder %v983_v35, 0.0  ;;  %v11617_v11 = vld [vmem:[#allocation11 + $0x66c] ss:$24 sps:$4 sm:$0xff]   ;;  %v1122_v2 = vsel %vm1025_vm14, %v977_v0, %v1074_v10 }
 0x19f   :  { %3209 = vmatprep.subr.bf16.mxu1 %v11596_v15  ;;  %v11606_v15 = vld [vmem:[#allocation11 + $0x398] ss:$24 sps:$4 sm:$0xff]   ;;  %v13769_v59 = vpack.c.bf16 %v1116_v6, %v1110_v13  ;;  %v11615_v12 = vld [vmem:[#allocation11 + $0x668] ss:$24 sps:$4 sm:$0xff]   ;;  %v11626_v26 = vld [vmem:[#allocation11 + $0x30c] ss:$24 sps:$4 sm:$0xff]  }
 0x1a0   :  { %3281 = vmatpush1.bf16.msra.mxu0 %v11591_v19  ;;  %v1123_v19 = vsel %vm1026_vm12, %v978_v49, %v1075_v48  ;;  %v11612_v49 = vld [vmem:[#allocation11 + $0x368] ss:$24 sps:$4 sm:$0xff]   ;;  %v11621_v48 = vld [vmem:[#allocation11 + $0x638] ss:$24 sps:$4 sm:$0xff]   ;;  %v11629_v0 = vld [vmem:[#allocation11 + $0x60c] ss:$24 sps:$4 sm:$0xff]  }
 0x1a1   :  { %3102 = vmatmul.mubr.bf16.gmra.mxu1 %v13753_v52  ;;  %3282 = vmatprep.subr.bf16.mxu0 %v11599_v7  ;;  %v13773_v7 = vpack.c.bf16 %v1129_v3, %v1123_v19  ;;  %v11635_v13 = vld [vmem:[#allocation11 + $0x8dc] ss:$24 sps:$4 sm:$0xff]   ;;  %v11638_v6 = vld [vmem:[#allocation11 + $0x5ac] ss:$24 sps:$4 sm:$0xff]   ;;  %v11636_v19 = vld [vmem:[#allocation11 + $0x5a8] ss:$24 sps:$4 sm:$0xff]  }
 0x1a2   :  { %3210 = vmatpush1.bf16.msra.mxu1 %v11594_v40  ;;  %3111 = vmatprep.mubr.bf16.mxu1 %v13759_v38  ;;  %v1080_v40 = vmul.f32 %v13127_v36, %v983_v35  ;;  %v11620_v36 = vld [vmem:[#allocation11 + $0x33c] ss:$24 sps:$4 sm:$0xff]   ;;  %v11641_v3 = vld [vmem:[#allocation11 + $0x8ac] ss:$24 sps:$4 sm:$0xff]   ;;  %v11642_v10 = vld [vmem:[#allocation11 + $0x578] ss:$24 sps:$4 sm:$0xff]  }
 0x1a3   :  { %3175 = vmatmul.mubr.bf16.gmra.mxu0 %v13548_v21  ;;  %3211 = vmatprep.subr.bf16.mxu1 %v11602_v37 }
 0x1a4   :  { %3184 = vmatprep.mubr.bf16.mxu0 %v13570_v58  ;;  %3283 = vmatpush1.bf16.msra.mxu0 %v11597_v29  ;;  %v1128_v37 = vsel %vm1031_vm15, %v983_v35, %v1080_v40  ;;  %v11627_v35 = vld [vmem:[#allocation11 + $0x608] ss:$24 sps:$4 sm:$0xff]   ;;  %v11647_v40 = vld [vmem:[#allocation11 + $0x87c] ss:$24 sps:$4 sm:$0xff]  }
 0x1a5   :  { %3284 = vmatprep.subr.bf16.mxu0 %v11605_v63  ;;  %v13779_v29 = vpack.c.bf16 %v1128_v37, %v1122_v2  ;;  %v11632_v63 = vld [vmem:[#allocation11 + $0x5dc] ss:$24 sps:$4 sm:$0xff]   ;;  %v11651_v37 = vld [vmem:[#allocation11 + $0x848] ss:$24 sps:$4 sm:$0xff]  }
 0x1a6   :  { %3212 = vmatpush1.bf16.msra.mxu1 %v11600_v44  ;;  %v11624_v44 = vld [vmem:[#allocation11 + $0x308] ss:$24 sps:$4 sm:$0xff]   ;;  %v11656_v2 = vld [vmem:[#allocation11 + $0x51c] ss:$24 sps:$4 sm:$0xff]  }
 0x1a7   :  { %3213 = vmatprep.subr.bf16.mxu1 %v11608_v61  ;;  %v11633_v61 = vld [vmem:[#allocation11 + $0x8d8] ss:$24 sps:$4 sm:$0xff]  }
 0x1a8   :  { %3285 = vmatpush1.bf16.msra.mxu0 %v11603_v46  ;;  %v11630_v46 = vld [vmem:[#allocation11 + $0x5d8] ss:$24 sps:$4 sm:$0xff]  }
 0x1a9   :  { %3112 = vmatmul.mubr.bf16.gmra.mxu1 %v13769_v59  ;;  %3286 = vmatprep.subr.bf16.mxu0 %v11611_v39  ;;  %v11639_v39 = vld [vmem:[#allocation11 + $0x8a8] ss:$24 sps:$4 sm:$0xff]  }
 0x1aa   :  { %3214 = vmatpush1.bf16.msra.mxu1 %v11606_v15  ;;  %3121 = vmatprep.mubr.bf16.mxu1 %v13773_v7  ;;  %v11644_v15 = vld [vmem:[#allocation11 + $0x57c] ss:$24 sps:$4 sm:$0xff]  }
 0x1ab   :  { %3185 = vmatmul.mubr.bf16.gmra.mxu0 %v13584_v22  ;;  %3215 = vmatprep.subr.bf16.mxu1 %v11614_v14  ;;  %v11645_v14 = vld [vmem:[#allocation11 + $0x878] ss:$24 sps:$4 sm:$0xff]  }
 0x1ac   :  { %3194 = vmatprep.mubr.bf16.mxu0 %v13604_v5  ;;  %3287 = vmatpush1.bf16.msra.mxu0 %v11609_v1  ;;  %v11650_v1 = vld [vmem:[#allocation11 + $0x54c] ss:$24 sps:$4 sm:$0xff]  }
 0x1ad   :  { %3288 = vmatprep.subr.bf16.mxu0 %v11617_v11  ;;  %v11653_v11 = vld [vmem:[#allocation11 + $0x84c] ss:$24 sps:$4 sm:$0xff]  }
 0x1ae   :  { %3216 = vmatpush1.bf16.msra.mxu1 %v11612_v49  ;;  %v11648_v49 = vld [vmem:[#allocation11 + $0x548] ss:$24 sps:$4 sm:$0xff]  }
 0x1af   :  { %3217 = vmatprep.subr.bf16.mxu1 %v11620_v36  ;;  %v11654_v36 = vld [vmem:[#allocation11 + $0x518] ss:$24 sps:$4 sm:$0xff]  }
 0x1b0   :  { %3289 = vmatpush1.bf16.msra.mxu0 %v11615_v12  ;;  %v11659_v12 = vld [vmem:[#allocation11 + $0x81c] ss:$24 sps:$4 sm:$0xff]  }
 0x1b1   :  { %3122 = vmatmul.mubr.bf16.gmra.mxu1 %v13779_v29  ;;  %3290 = vmatprep.subr.bf16.mxu0 %v11623_v50  ;;  %v11662_v50 = vld [vmem:[#allocation11 + $0x4ec] ss:$24 sps:$4 sm:$0xff]  }
 0x1b2   :  { %3218 = vmatpush1.bf16.msra.mxu1 %v11618_v17  ;;  %3237 = vmatprep.mubr.bf16.mxu1 %v13280_v57  ;;  %v11657_v17 = vld [vmem:[#allocation11 + $0x818] ss:$24 sps:$4 sm:$0xff]  }
 0x1b3   :  { %3195 = vmatmul.mubr.bf16.gmra.mxu0 %v13620_v27  ;;  %3219 = vmatprep.subr.bf16.mxu1 %v11626_v26  ;;  %v11665_v26 = vld [vmem:[#allocation11 + $0x7ec] ss:$24 sps:$4 sm:$0xff]  }
 0x1b4   :  { %3291 = vmatpush1.bf16.msra.mxu0 %v11621_v48  ;;  %3310 = vmatprep.mubr.bf16.mxu0 %v13634_v18  ;;  %v11660_v48 = vld [vmem:[#allocation11 + $0x4e8] ss:$24 sps:$4 sm:$0xff]  }
 0x1b5   :  { %3292 = vmatprep.subr.bf16.mxu0 %v11629_v0  ;;  %v11663_v0 = vld [vmem:[#allocation11 + $0x7e8] ss:$24 sps:$4 sm:$0xff]  }
 0x1b6   :  { %3220 = vmatpush1.bf16.msra.mxu1 %v11624_v44  ;;  %v11668_v44 = vld [vmem:[#allocation11 + $0x4bc] ss:$24 sps:$4 sm:$0xff]  }
 0x1b7   :  { %3221 = vmatprep.subr.bf16.mxu1 %v11632_v63  ;;  %v11671_v63 = vld [vmem:[#allocation11 + $0x7bc] ss:$24 sps:$4 sm:$0xff]  }
 0x1b8   :  { %3293 = vmatpush1.bf16.msra.mxu0 %v11627_v35  ;;  %v11666_v35 = vld [vmem:[#allocation11 + $0x4b8] ss:$24 sps:$4 sm:$0xff]  }
 0x1b9   :  { %3294 = vmatprep.subr.bf16.mxu0 %v11635_v13  ;;  %v11674_v13 = vld [vmem:[#allocation11 + $0x48c] ss:$24 sps:$4 sm:$0xff]  }
 0x1ba   :  { %3222 = vmatpush2.bf16.msra.mxu1 %v11630_v46  ;;  %v11669_v46 = vld [vmem:[#allocation11 + $0x7b8] ss:$24 sps:$4 sm:$0xff]  }
 0x1bb   :  { %3223 = vmatprep.subr.bf16.mxu1 %v11638_v6  ;;  %v11677_v6 = vld [vmem:[#allocation11 + $0x78c] ss:$24 sps:$4 sm:$0xff]  }
 0x1bc   :  { %3295 = vmatpush2.bf16.msra.mxu0 %v11633_v61  ;;  %v11672_v61 = vld [vmem:[#allocation11 + $0x488] ss:$24 sps:$4 sm:$0xff]  }
 0x1bd   :  { %3296 = vmatprep.subr.bf16.mxu0 %v11641_v3  ;;  %v11680_v3 = vld [vmem:[#allocation11 + $0x164] ss:$24 sps:$4 sm:$0xff]  }
 0x1be   :  { %3224 = vmatpush2.bf16.msra.mxu1 %v11636_v19  ;;  %v11675_v19 = vld [vmem:[#allocation11 + $0x788] ss:$24 sps:$4 sm:$0xff]  }
 0x1bf   :  { %3225 = vmatprep.subr.bf16.mxu1 %v11644_v15  ;;  %v11683_v15 = vld [vmem:[#allocation11 + $0x464] ss:$24 sps:$4 sm:$0xff]  }
 0x1c0   :  { %3297 = vmatpush2.bf16.msra.mxu0 %v11639_v39  ;;  %v11678_v39 = vld [vmem:[#allocation11 + $0x160] ss:$24 sps:$4 sm:$0xff]  }
 0x1c1   :  { %3298 = vmatprep.subr.bf16.mxu0 %v11647_v40  ;;  %v11686_v40 = vld [vmem:[#allocation11 + $0x134] ss:$24 sps:$4 sm:$0xff]  }
 0x1c2   :  { %3226 = vmatpush2.bf16.msra.mxu1 %v11642_v10  ;;  %v11681_v10 = vld [vmem:[#allocation11 + $0x460] ss:$24 sps:$4 sm:$0xff]  }
 0x1c3   :  { %3227 = vmatprep.subr.bf16.mxu1 %v11650_v1  ;;  %v11689_v1 = vld [vmem:[#allocation11 + $0x434] ss:$24 sps:$4 sm:$0xff]  }
 0x1c4   :  { %3299 = vmatpush2.bf16.msra.mxu0 %v11645_v14  ;;  %v11684_v14 = vld [vmem:[#allocation11 + $0x130] ss:$24 sps:$4 sm:$0xff]  }
 0x1c5   :  { %3300 = vmatprep.subr.bf16.mxu0 %v11653_v11  ;;  %v11687_v11 = vld [vmem:[#allocation11 + $0x430] ss:$24 sps:$4 sm:$0xff]  }
 0x1c6   :  { %3228 = vmatpush2.bf16.msra.mxu1 %v11648_v49  ;;  %v11692_v49 = vld [vmem:[#allocation11 + $0x104] ss:$24 sps:$4 sm:$0xff]  }
 0x1c7   :  { %3229 = vmatprep.subr.bf16.mxu1 %v11656_v2  ;;  %v11695_v2 = vld [vmem:[#allocation11 + $0x404] ss:$24 sps:$4 sm:$0xff]  }
 0x1c8   :  { %3301 = vmatpush2.bf16.msra.mxu0 %v11651_v37  ;;  %v11690_v37 = vld [vmem:[#allocation11 + $0x100] ss:$24 sps:$4 sm:$0xff]  }
 0x1c9   :  { %3302 = vmatprep.subr.bf16.mxu0 %v11659_v12  ;;  %v11693_v12 = vld [vmem:[#allocation11 + $0x400] ss:$24 sps:$4 sm:$0xff]  }
 0x1ca   :  { %3230 = vmatpush2.bf16.msra.mxu1 %v11654_v36  ;;  %v11698_v36 = vld [vmem:[#allocation11 + $0xd4] ss:$24 sps:$4 sm:$0xff]  }
 0x1cb   :  { %3231 = vmatprep.subr.bf16.mxu1 %v11662_v50  ;;  %v11696_v50 = vld [vmem:[#allocation11 + $0xd0] ss:$24 sps:$4 sm:$0xff]  }
 0x1cc   :  { %3303 = vmatpush2.bf16.msra.mxu0 %v11657_v17  ;;  %v11701_v17 = vld [vmem:[#allocation11 + $0x3d4] ss:$24 sps:$4 sm:$0xff]  }
 0x1cd   :  { %3304 = vmatprep.subr.bf16.mxu0 %v11665_v26  ;;  %v11699_v26 = vld [vmem:[#allocation11 + $0x3d0] ss:$24 sps:$4 sm:$0xff]  }
 0x1ce   :  { %3232 = vmatpush2.bf16.msra.mxu1 %v11660_v48  ;;  %v11704_v48 = vld [vmem:[#allocation11 + $0xa4] ss:$24 sps:$4 sm:$0xff]  }
 0x1cf   :  { %3233 = vmatprep.subr.bf16.mxu1 %v11668_v44  ;;  %v11707_v44 = vld [vmem:[#allocation11 + $0x3a4] ss:$24 sps:$4 sm:$0xff]  }
 0x1d0   :  { %3305 = vmatpush2.bf16.msra.mxu0 %v11663_v0  ;;  %v11702_v0 = vld [vmem:[#allocation11 + $0xa0] ss:$24 sps:$4 sm:$0xff]  }
 0x1d1   :  { %3306 = vmatprep.subr.bf16.mxu0 %v11671_v63  ;;  %v11710_v63 = vld [vmem:[#allocation11 + $0x74] ss:$24 sps:$4 sm:$0xff]  }
 0x1d2   :  { %3234 = vmatpush2.bf16.msra.mxu1 %v11666_v35  ;;  %v11705_v35 = vld [vmem:[#allocation11 + $0x3a0] ss:$24 sps:$4 sm:$0xff]  }
 0x1d3   :  { %3235 = vmatprep.subr.bf16.mxu1 %v11674_v13  ;;  %v15951_v13 = vld [vmem:[#allocation57_spill] sm:$0xff] }
 0x1d4   :  { %3307 = vmatpush2.bf16.msra.mxu0 %v11669_v46  ;;  %v11708_v46 = vld [vmem:[#allocation11 + $0x70] ss:$24 sps:$4 sm:$0xff]  }
 0x1d5   :  { %3308 = vmatprep.subr.bf16.mxu0 %v11677_v6  ;;  %v11713_v6 = vld [vmem:[#allocation11 + $0x374] ss:$24 sps:$4 sm:$0xff]  }
 0x1d6   :  { %3236 = vmatpush2.bf16.msra.mxu1 %v11672_v61  ;;  %v11711_v61 = vld [vmem:[#allocation11 + $0x370] ss:$24 sps:$4 sm:$0xff]  }
 0x1d7   :  { %3351 = vmatprep.subr.bf16.mxu1 %v11680_v3  ;;  %v11719_v3 = vld [vmem:[#allocation11 + $0x344] ss:$24 sps:$4 sm:$0xff]  }
 0x1d8   :  { %3309 = vmatpush2.bf16.msra.mxu0 %v11675_v19  ;;  %v11716_v19 = vld [vmem:[#allocation11 + $0x44] ss:$24 sps:$4 sm:$0xff]  }
 0x1d9   :  { %3238 = vmatmul.mubr.bf16.vlgmr.msra.gmra.mxu1 %v13209_v54  ;;  %3424 = vmatprep.subr.bf16.mxu0 %v11683_v15  ;;  %v11714_v15 = vld [vmem:[#allocation11 + $0x40] ss:$24 sps:$4 sm:$0xff]  }
 0x1da   :  { %3247 = vmatprep.mubr.bf16.mxu1 %v13302_v30  ;;  %3352 = vmatpush1.bf16.msra.mxu1 %v11678_v39  ;;  %v11717_v39 = vld [vmem:[#allocation11 + $0x340] ss:$24 sps:$4 sm:$0xff]  }
 0x1db   :  { %3311 = vmatmul.mubr.bf16.vlgmr.msra.gmra.mxu0 %v13715_v28  ;;  %3353 = vmatprep.subr.bf16.mxu1 %v11686_v40  ;;  %v11720_v40 = vld [vmem:[#allocation11 + $0x10] ss:$24 sps:$4 sm:$0xff]  }
 0x1dc   :  { %3320 = vmatprep.mubr.bf16.mxu0 %v13725_v23  ;;  %3425 = vmatpush1.bf16.msra.mxu0 %v11681_v10  ;;  %v11722_v10 = vld [vmem:[#allocation11 + $0x14] ss:$24 sps:$4 sm:$0xff]  }
 0x1dd   :  { %3426 = vmatprep.subr.bf16.mxu0 %v11689_v1  ;;  %v11725_v1 = vld [vmem:[#allocation11 + $0x314] ss:$24 sps:$4 sm:$0xff]  }
 0x1de   :  { %3354 = vmatpush1.bf16.msra.mxu1 %v11684_v14  ;;  %v11723_v14 = vld [vmem:[#allocation11 + $0x310] ss:$24 sps:$4 sm:$0xff]  }
 0x1df   :  { %3355 = vmatprep.subr.bf16.mxu1 %v11692_v49  ;;  %v11728_v49 = vld [vmem:[#allocation11 + $0x2e4] ss:$24 sps:$4 sm:$0xff]  }
 0x1e0   :  { %3427 = vmatpush1.bf16.msra.mxu0 %v11687_v11  ;;  %v11726_v11 = vld [vmem:[#allocation11 + $0x2e0] ss:$24 sps:$4 sm:$0xff]  }
 0x1e1   :  { %3248 = vmatmul.mubr.bf16.gmra.mxu1 %v13354_v60  ;;  %3428 = vmatprep.subr.bf16.mxu0 %v11695_v2  ;;  %v11731_v2 = vld [vmem:[#allocation11 + $0x5e4] ss:$24 sps:$4 sm:$0xff]  }
 0x1e2   :  { %3257 = vmatprep.mubr.bf16.mxu1 %v13432_v47  ;;  %3356 = vmatpush1.bf16.msra.mxu1 %v11690_v37  ;;  %v11729_v37 = vld [vmem:[#allocation11 + $0x5e0] ss:$24 sps:$4 sm:$0xff]  }
 0x1e3   :  { %3321 = vmatmul.mubr.bf16.gmra.mxu0 %v13753_v52  ;;  %3357 = vmatprep.subr.bf16.mxu1 %v11698_v36  ;;  %v11734_v36 = vld [vmem:[#allocation11 + $0x2b4] ss:$24 sps:$4 sm:$0xff]  }
 0x1e4   :  { %3330 = vmatprep.mubr.bf16.mxu0 %v13759_v38  ;;  %3429 = vmatpush1.bf16.msra.mxu0 %v11693_v12  ;;  %v11737_v12 = vld [vmem:[#allocation11 + $0x5b4] ss:$24 sps:$4 sm:$0xff]  }
 0x1e5   :  { %3430 = vmatprep.subr.bf16.mxu0 %v11701_v17  ;;  %v11740_v17 = vld [vmem:[#allocation11 + $0x284] ss:$24 sps:$4 sm:$0xff]  }
 0x1e6   :  { %3358 = vmatpush1.bf16.msra.mxu1 %v11696_v50  ;;  %v11735_v50 = vld [vmem:[#allocation11 + $0x5b0] ss:$24 sps:$4 sm:$0xff]  }
 0x1e7   :  { %3359 = vmatprep.subr.bf16.mxu1 %v11704_v48  ;;  %v11743_v48 = vld [vmem:[#allocation11 + $0x584] ss:$24 sps:$4 sm:$0xff]  }
 0x1e8   :  { %3431 = vmatpush1.bf16.msra.mxu0 %v11699_v26  ;;  %v11738_v26 = vld [vmem:[#allocation11 + $0x280] ss:$24 sps:$4 sm:$0xff]  }
 0x1e9   :  { %3258 = vmatmul.mubr.bf16.gmra.mxu1 %v15951_v13  ;;  %3432 = vmatprep.subr.bf16.mxu0 %v11707_v44  ;;  %v11741_v44 = vld [vmem:[#allocation11 + $0x580] ss:$24 sps:$4 sm:$0xff]  }
 0x1ea   :  { %3267 = vmatprep.mubr.bf16.mxu1 %v13506_v41  ;;  %3360 = vmatpush1.bf16.msra.mxu1 %v11702_v0  ;;  %v11749_v0 = vld [vmem:[#allocation11 + $0x554] ss:$24 sps:$4 sm:$0xff]  }
 0x1eb   :  { %3331 = vmatmul.mubr.bf16.gmra.mxu0 %v13769_v59  ;;  %3361 = vmatprep.subr.bf16.mxu1 %v11710_v63  ;;  %v11744_v63 = vld [vmem:[#allocation11 + $0x250] ss:$24 sps:$4 sm:$0xff]  }
 0x1ec   :  { %3340 = vmatprep.mubr.bf16.mxu0 %v13773_v7  ;;  %3433 = vmatpush1.bf16.msra.mxu0 %v11705_v35  ;;  %v11752_v35 = vld [vmem:[#allocation11 + $0x224] ss:$24 sps:$4 sm:$0xff]  }
 0x1ed   :  { %3434 = vmatprep.subr.bf16.mxu0 %v11713_v6  ;;  %v11750_v6 = vld [vmem:[#allocation11 + $0x220] ss:$24 sps:$4 sm:$0xff]  }
 0x1ee   :  { %3362 = vmatpush1.bf16.msra.mxu1 %v11708_v46  ;;  %v11747_v46 = vld [vmem:[#allocation11 + $0x550] ss:$24 sps:$4 sm:$0xff]  }
 0x1ef   :  { %3363 = vmatprep.subr.bf16.mxu1 %v11716_v19  ;;  %v11758_v19 = vld [vmem:[#allocation11 + $0x1f4] ss:$24 sps:$4 sm:$0xff]  }
 0x1f0   :  { %3435 = vmatpush1.bf16.msra.mxu0 %v11711_v61  ;;  %v11755_v61 = vld [vmem:[#allocation11 + $0x524] ss:$24 sps:$4 sm:$0xff]  }
 0x1f1   :  { %3268 = vmatmul.mubr.bf16.gmra.mxu1 %v13532_v33  ;;  %3436 = vmatprep.subr.bf16.mxu0 %v11719_v3  ;;  %v11753_v3 = vld [vmem:[#allocation11 + $0x520] ss:$24 sps:$4 sm:$0xff]  }
 0x1f2   :  { %3364 = vmatpush1.bf16.msra.mxu1 %v11714_v15  ;;  %3383 = vmatprep.mubr.bf16.mxu1 %v13244_v4  ;;  %v11732_v4 = vld [vmem:[#allocation11 + $0x2b0] ss:$24 sps:$4 sm:$0xff]   ;;  %v11761_v15 = vld [vmem:[#allocation11 + $0x4f4] ss:$24 sps:$4 sm:$0xff]  }
 0x1f3   :  { %3341 = vmatmul.mubr.bf16.gmra.mxu0 %v13779_v29  ;;  %3365 = vmatprep.subr.bf16.mxu1 %v11722_v10  ;;  %v11764_v10 = vld [vmem:[#allocation11 + $0x1c4] ss:$24 sps:$4 sm:$0xff]  }
 0x1f4   :  { %3437 = vmatpush1.bf16.msra.mxu0 %v11717_v39  ;;  %3456 = vmatprep.mubr.bf16.mxu0 %v13280_v57  ;;  %v11746_v57 = vld [vmem:[#allocation11 + $0x254] ss:$24 sps:$4 sm:$0xff]   ;;  %v11756_v39 = vld [vmem:[#allocation11 + $0x1f0] ss:$24 sps:$4 sm:$0xff]  }
 0x1f5   :  { %3438 = vmatprep.subr.bf16.mxu0 %v11725_v1  ;;  %v11767_v1 = vld [vmem:[#allocation11 + $0x4c4] ss:$24 sps:$4 sm:$0xff]  }
 0x1f6   :  { %3366 = vmatpush1.bf16.msra.mxu1 %v11720_v40  ;;  %v11759_v40 = vld [vmem:[#allocation11 + $0x4f0] ss:$24 sps:$4 sm:$0xff]  }
 0x1f7   :  { %3367 = vmatprep.subr.bf16.mxu1 %v11728_v49  ;;  %v11770_v49 = vld [vmem:[#allocation11 + $0x194] ss:$24 sps:$4 sm:$0xff]  }
 0x1f8   :  { %3439 = vmatpush1.bf16.msra.mxu0 %v11723_v14  ;;  %v11762_v14 = vld [vmem:[#allocation11 + $0x1c0] ss:$24 sps:$4 sm:$0xff]  }
 0x1f9   :  { %3440 = vmatprep.subr.bf16.mxu0 %v11731_v2  ;;  %v11773_v2 = vld [vmem:[#allocation11 + $0x494] ss:$24 sps:$4 sm:$0xff]  }
 0x1fa   :  { %3368 = vmatpush2.bf16.msra.mxu1 %v11726_v11  ;;  %v11765_v11 = vld [vmem:[#allocation11 + $0x4c0] ss:$24 sps:$4 sm:$0xff]  }
 0x1fb   :  { %3369 = vmatprep.subr.bf16.mxu1 %v11734_v36  ;;  %v11776_v36 = vld [vmem:[#allocation11 + $0x764] ss:$24 sps:$4 sm:$0xff]  }
 0x1fc   :  { %3441 = vmatpush2.bf16.msra.mxu0 %v11729_v37  ;;  %v11768_v37 = vld [vmem:[#allocation11 + $0x190] ss:$24 sps:$4 sm:$0xff]  }
 0x1fd   :  { %3442 = vmatprep.subr.bf16.mxu0 %v11737_v12  ;;  %v11771_v12 = vld [vmem:[#allocation11 + $0x490] ss:$24 sps:$4 sm:$0xff]  }
 0x1fe   :  { %3370 = vmatpush2.bf16.msra.mxu1 %v11732_v4  ;;  %v11788_v4 = vld [vmem:[#allocation13 + $0x154] ss:$24 sps:$4 sm:$0xff]  }
 0x1ff   :  { %3371 = vmatprep.subr.bf16.mxu1 %v11740_v17  ;;  %v11779_v17 = vld [vmem:[#allocation11 + $0x734] ss:$24 sps:$4 sm:$0xff]  }
 0x200   :  { %3443 = vmatpush2.bf16.msra.mxu0 %v11735_v50  ;;  %v11774_v50 = vld [vmem:[#allocation11 + $0x760] ss:$24 sps:$4 sm:$0xff]  }
 0x201   :  { %3444 = vmatprep.subr.bf16.mxu0 %v11743_v48  ;;  %v11786_v48 = vld [vmem:[#allocation13 + $0x150] ss:$24 sps:$4 sm:$0xff]  }
 0x202   :  { %3372 = vmatpush2.bf16.msra.mxu1 %v11738_v26  ;;  %v11777_v26 = vld [vmem:[#allocation11 + $0x730] ss:$24 sps:$4 sm:$0xff]  }
 0x203   :  { %3373 = vmatprep.subr.bf16.mxu1 %v11746_v57  ;;  %v11782_v57 = vld [vmem:[#allocation11 + $0x704] ss:$24 sps:$4 sm:$0xff]  }
 0x204   :  { %3445 = vmatpush2.bf16.msra.mxu0 %v11741_v44  ;;  %v11794_v44 = vld [vmem:[#allocation13 + $0x124] ss:$24 sps:$4 sm:$0xff]  }
 0x205   :  { %3446 = vmatprep.subr.bf16.mxu0 %v11749_v0  ;;  %v11792_v0 = vld [vmem:[#allocation13 + $0x120] ss:$24 sps:$4 sm:$0xff]  }
 0x206   :  { %3374 = vmatpush2.bf16.msra.mxu1 %v11744_v63  ;;  %v11780_v63 = vld [vmem:[#allocation11 + $0x700] ss:$24 sps:$4 sm:$0xff]  }
 0x207   :  { %3375 = vmatprep.subr.bf16.mxu1 %v11752_v35  ;;  %v11785_v35 = vld [vmem:[#allocation11 + $0x6d4] ss:$24 sps:$4 sm:$0xff]  }
 0x208   :  { %3447 = vmatpush2.bf16.msra.mxu0 %v11747_v46  ;;  %v11800_v46 = vld [vmem:[#allocation13 + $0xf4] ss:$24 sps:$4 sm:$0xff]  }
 0x209   :  { %3448 = vmatprep.subr.bf16.mxu0 %v11755_v61 }
 0x20a   :  { %3376 = vmatpush2.bf16.msra.mxu1 %v11750_v6  ;;  %v11798_v6 = vld [vmem:[#allocation13 + $0xf0] ss:$24 sps:$4 sm:$0xff]  }
 0x20b   :  { %3377 = vmatprep.subr.bf16.mxu1 %v11758_v19  ;;  %v11789_v19 = vld [vmem:[#allocation11 + $0x6a0] ss:$24 sps:$4 sm:$0xff]  }
 0x20c   :  { %3449 = vmatpush2.bf16.msra.mxu0 %v11753_v3 }
 0x20d   :  { %3450 = vmatprep.subr.bf16.mxu0 %v11761_v15  ;;  %v11797_v15 = vld [vmem:[#allocation11 + $0x674] ss:$24 sps:$4 sm:$0xff]  }
 0x20e   :  { %3378 = vmatpush2.bf16.msra.mxu1 %v11756_v39  ;;  %v11812_v39 = vld [vmem:[#allocation13 + $0x94] ss:$24 sps:$4 sm:$0xff]  }
 0x20f   :  { %3379 = vmatprep.subr.bf16.mxu1 %v11764_v10  ;;  %v11810_v10 = vld [vmem:[#allocation13 + $0x90] ss:$24 sps:$4 sm:$0xff]  }
 0x210   :  { %3451 = vmatpush2.bf16.msra.mxu0 %v11759_v40 }
 0x211   :  { %3452 = vmatprep.subr.bf16.mxu0 %v11767_v1 }
 0x212   :  { %3380 = vmatpush2.bf16.msra.mxu1 %v11762_v14  ;;  %v11816_v14 = vld [vmem:[#allocation13 + $0x60] ss:$24 sps:$4 sm:$0xff]  }
 0x213   :  { %3381 = vmatprep.subr.bf16.mxu1 %v11770_v49  ;;  %v11824_v49 = vld [vmem:[#allocation13 + $0x34] ss:$24 sps:$4 sm:$0xff]  }
 0x214   :  { %3453 = vmatpush2.bf16.msra.mxu0 %v11765_v11  ;;  %v11801_v11 = vld [vmem:[#allocation11 + $0x640] ss:$24 sps:$4 sm:$0xff]  }
 0x215   :  { %3454 = vmatprep.subr.bf16.mxu0 %v11773_v2 }
 0x216   :  { %3382 = vmatpush2.bf16.msra.mxu1 %v11768_v37 }
 0x217   :  { %3497 = vmatprep.subr.bf16.mxu1 %v11776_v36  ;;  %v11822_v36 = vld [vmem:[#allocation13 + $0x30] ss:$24 sps:$4 sm:$0xff]  }
 0x218   :  { %3455 = vmatpush2.bf16.msra.mxu0 %v11771_v12  ;;  %v11830_v12 = vld [vmem:[#allocation13 + $0x4] ss:$24 sps:$4 sm:$0xff]  }
 0x219   :  { %3384 = vmatmul.mubr.bf16.vlgmr.msra.gmra.mxu1 %v13207_v51  ;;  %5498 = vmatprep.subr.bf16.mxu0 %v11788_v4  ;;  %v11783_v51 = vld [vmem:[#allocation11 + $0x6d0] ss:$24 sps:$4 sm:$0xff]  }
 0x21a   :  { %3393 = vmatprep.mubr.bf16.mxu1 %v13524_v32  ;;  %3498 = vmatpush1.bf16.msra.mxu1 %v11774_v50  ;;  %v13805_v61 = vpop.f32.mrf.mxu0  ;;  %v11791_v32 = vld [vmem:[#allocation11 + $0x6a4] ss:$24 sps:$4 sm:$0xff]   ;;  %v11807_v4 = vld [vmem:[#allocation11 + $0x610] ss:$24 sps:$4 sm:$0xff]   ;;  %v11828_v50 = vld [vmem:[#allocation13] ss:$24 sps:$4 sm:$0xff]  }
 0x21b   :  { %3457 = vmatmul.mubr.bf16.vlgmr.msra.gmra.mxu0 %v13209_v54  ;;  %3499 = vmatprep.subr.bf16.mxu1 %v11779_v17  ;;  %v11806_v54 = vld [vmem:[#allocation13 + $0xc4] ss:$24 sps:$4 sm:$0xff]  }
 0x21c   :  { %3466 = vmatprep.mubr.bf16.mxu0 %v13302_v30  ;;  %5499 = vmatpush1.bf16.msra.mxu0 %v11786_v48  ;;  %v11804_v30 = vld [vmem:[#allocation13 + $0xc0] ss:$24 sps:$4 sm:$0xff]   ;;  %v13811_v3 = vpop.f32.mrf.mxu0  ;;  %v11836_v48 = vld [vmem:[#allocation13 + $0x2d4] ss:$24 sps:$4 sm:$0xff]  }
 0x21d   :  { %5500 = vmatprep.subr.bf16.mxu0 %v11794_v44  ;;  %v11821_v44 = vld [vmem:[#allocation11 + $0x8b4] ss:$24 sps:$4 sm:$0xff]  }
 0x21e   :  { %3500 = vmatpush1.bf16.msra.mxu1 %v11777_v26  ;;  %v13815_v40 = vpop.f32.mrf.mxu0 }
 0x21f   :  { %3501 = vmatprep.subr.bf16.mxu1 %v11782_v57  ;;  %v11813_v57 = vld [vmem:[#allocation11 + $0x8e0] ss:$24 sps:$4 sm:$0xff]  }
 0x220   :  { %5501 = vmatpush1.bf16.msra.mxu0 %v11792_v0  ;;  %v13823_v2 = vpop.f32.mrf.mxu0  ;;  %v11834_v0 = vld [vmem:[#allocation13 + $0x2d0] ss:$24 sps:$4 sm:$0xff]  }
 0x221   :  { %3394 = vmatmul.mubr.bf16.gmra.mxu1 %v13548_v21  ;;  %5502 = vmatprep.subr.bf16.mxu0 %v11800_v46  ;;  %v13813_v21 = vpop.f32.mrf.mxu1 }
 0x222   :  { %3403 = vmatprep.mubr.bf16.mxu1 %v13570_v58  ;;  %3502 = vmatpush1.bf16.msra.mxu1 %v11780_v63  ;;  %v11795_v58 = vld [vmem:[#allocation11 + $0x670] ss:$24 sps:$4 sm:$0xff]  }
 0x223   :  { %3467 = vmatmul.mubr.bf16.gmra.mxu0 %v13354_v60  ;;  %3503 = vmatprep.subr.bf16.mxu1 %v11785_v35  ;;  %v11803_v60 = vld [vmem:[#allocation11 + $0x644] ss:$24 sps:$4 sm:$0xff]   ;;  %v13818_v1 = vpop.f32.mrf.mxu1 }
 0x224   :  { %3476 = vmatprep.mubr.bf16.mxu0 %v13432_v47  ;;  %5503 = vmatpush1.bf16.msra.mxu0 %v11798_v6  ;;  %v11818_v47 = vld [vmem:[#allocation13 + $0x64] ss:$24 sps:$4 sm:$0xff]  }
 0x225   :  { %5504 = vmatprep.subr.bf16.mxu0 %v11806_v54  ;;  %v13825_v37 = vpop.f32.mrf.mxu1  ;;  %v11827_v6 = vld [vmem:[#allocation11 + $0x884] ss:$24 sps:$4 sm:$0xff]  }
 0x226   :  { %3504 = vmatpush1.bf16.msra.mxu1 %v11783_v51 }
 0x227   :  { %3505 = vmatprep.subr.bf16.mxu1 %v11791_v32  ;;  %v11840_v32 = vld [vmem:[#allocation13 + $0x2a0] ss:$24 sps:$4 sm:$0xff]  }
 0x228   :  { %5505 = vmatpush1.bf16.msra.mxu0 %v11804_v30  ;;  %v11825_v30 = vld [vmem:[#allocation11 + $0x880] ss:$24 sps:$4 sm:$0xff]  }
 0x229   :  { %3404 = vmatmul.mubr.bf16.gmra.mxu1 %v13584_v22  ;;  %5506 = vmatprep.subr.bf16.mxu0 %v11812_v39  ;;  %v11809_v22 = vld [vmem:[#allocation11 + $0x614] ss:$24 sps:$4 sm:$0xff]  }
 0x22a   :  { %3413 = vmatprep.mubr.bf16.mxu1 %v13604_v5  ;;  %3506 = vmatpush1.bf16.msra.mxu1 %v11789_v19  ;;  %v13827_v5 = vpop.f32.mrf.mxu0  ;;  %v11848_v19 = vld [vmem:[#allocation13 + $0x274] ss:$24 sps:$4 sm:$0xff]  }
 0x22b   :  { %3477 = vmatmul.mubr.bf16.gmra.mxu0 %v15951_v13  ;;  %3507 = vmatprep.subr.bf16.mxu1 %v11797_v15  ;;  %v11815_v13 = vld [vmem:[#allocation11 + $0x8e4] ss:$24 sps:$4 sm:$0xff]  }
 0x22c   :  { %3486 = vmatprep.mubr.bf16.mxu0 %v13506_v41  ;;  %5507 = vmatpush1.bf16.msra.mxu0 %v11810_v10  ;;  %v13830_v41 = vpop.f32.mrf.mxu1  ;;  %v13834_v17 = vpop.f32.mrf.mxu0  ;;  %v11833_v10 = vld [vmem:[#allocation11 + $0x854] ss:$24 sps:$4 sm:$0xff]  }
 0x22d   :  { %5508 = vmatprep.subr.bf16.mxu0 %v11818_v47  ;;  %v11831_v47 = vld [vmem:[#allocation11 + $0x850] ss:$24 sps:$4 sm:$0xff]  }
 0x22e   :  { %3508 = vmatpush1.bf16.msra.mxu1 %v11795_v58  ;;  %v13840_v63 = vpop.f32.mrf.mxu0  ;;  %v11846_v58 = vld [vmem:[#allocation13 + $0x270] ss:$24 sps:$4 sm:$0xff]  }
 0x22f   :  { %3509 = vmatprep.subr.bf16.mxu1 %v11803_v60  ;;  %v11854_v60 = vld [vmem:[#allocation13 + $0x244] ss:$24 sps:$4 sm:$0xff]  }
 0x230   :  { %5509 = vmatpush1.bf16.msra.mxu0 %v11816_v14  ;;  %v13846_v51 = vpop.f32.mrf.mxu0 }
 0x231   :  { %3414 = vmatmul.mubr.bf16.gmra.mxu1 %v13620_v27  ;;  %5510 = vmatprep.subr.bf16.mxu0 %v11824_v49 }
 0x232   :  { %3510 = vmatpush1.bf16.msra.mxu1 %v11801_v11  ;;  %3529 = vmatprep.mubr.bf16.mxu1 %v13634_v18  ;;  %v11842_v18 = vld [vmem:[#allocation13 + $0x2a4] ss:$24 sps:$4 sm:$0xff]   ;;  %v13852_v39 = vpop.f32.mrf.mxu0 }
 0x233   :  { %3487 = vmatmul.mubr.bf16.gmra.mxu0 %v13532_v33  ;;  %3511 = vmatprep.subr.bf16.mxu1 %v11809_v22  ;;  %v11819_v33 = vld [vmem:[#allocation11 + $0x8b0] ss:$24 sps:$4 sm:$0xff]   ;;  %v11839_v11 = vld [vmem:[#allocation11 + $0x824] ss:$24 sps:$4 sm:$0xff]   ;;  %v11852_v22 = vld [vmem:[#allocation13 + $0x240] ss:$24 sps:$4 sm:$0xff]  }
 0x234   :  { %v13836_v26 = vpop.f32.mrf.mxu1  ;;  %5511 = vmatpush1.bf16.msra.mxu0 %v11822_v36  ;;  %v13856_v49 = vpop.f32.mrf.mxu0  ;;  %v11860_v36 = vld [vmem:[#allocation13 + $0x214] ss:$24 sps:$4 sm:$0xff]  }
 0x235   :  { %5512 = vmatprep.subr.bf16.mxu0 %v11830_v12  ;;  %v11837_v12 = vld [vmem:[#allocation11 + $0x820] ss:$24 sps:$4 sm:$0xff]  }
 0x236   :  { %v13838_v27 = vpop.f32.mrf.mxu1  ;;  %3512 = vmatpush1.bf16.msra.mxu1 %v11807_v4 }
 0x237   :  { %3513 = vmatprep.subr.bf16.mxu1 %v11815_v13  ;;  %v13860_v13 = vpop.f32.mrf.mxu0 }
 0x238   :  { %v13842_v35 = vpop.f32.mrf.mxu1  ;;  %5513 = vmatpush1.bf16.msra.mxu0 %v11828_v50  ;;  %v11845_v50 = vld [vmem:[#allocation11 + $0x7f4] ss:$24 sps:$4 sm:$0xff]  }
 0x239   :  { %5514 = vmatprep.subr.bf16.mxu0 %v11836_v48  ;;  %v11858_v48 = vld [vmem:[#allocation13 + $0x210] ss:$24 sps:$4 sm:$0xff]  }
 0x23a   :  { %v13844_v46 = vpop.f32.mrf.mxu1  ;;  %3514 = vmatpush2.bf16.msra.mxu1 %v11813_v57  ;;  %v11863_v57 = vld [vmem:[#allocation13 + $0x1e4] ss:$24 sps:$4 sm:$0xff]  }
 0x23b   :  { %3515 = vmatprep.subr.bf16.mxu1 %v11821_v44  ;;  %v11843_v44 = vld [vmem:[#allocation11 + $0x7f0] ss:$24 sps:$4 sm:$0xff]  }
 0x23c   :  { %v13848_v54 = vpop.f32.mrf.mxu1  ;;  %5515 = vmatpush2.bf16.msra.mxu0 %v11834_v0 }
 0x23d   :  { %5516 = vmatprep.subr.bf16.mxu0 %v11842_v18  ;;  %v13864_v18 = vpop.f32.mrf.mxu0 }
 0x23e   :  { %3516 = vmatpush2.bf16.msra.mxu1 %v11819_v33  ;;  %v13850_v15 = vpop.f32.mrf.mxu1  ;;  %v11851_v33 = vld [vmem:[#allocation11 + $0x7c4] ss:$24 sps:$4 sm:$0xff]  }
 0x23f   :  { %3517 = vmatprep.subr.bf16.mxu1 %v11827_v6  ;;  %v153_v6 = vld [vmem:[#allocation8 + $0x3] ss:$8 sm:$0xf] }
 0x240   :  { %5517 = vmatpush2.bf16.msra.mxu0 %v11840_v32  ;;  %v13854_v14 = vpop.f32.mrf.mxu1  ;;  %v11861_v32 = vld [vmem:[#allocation13 + $0x1e0] ss:$24 sps:$4 sm:$0xff]  }
 0x241   :  { %5518 = vmatprep.subr.bf16.mxu0 %v11848_v19  ;;  %v11866_v19 = vld [vmem:[#allocation13 + $0x1b4] ss:$24 sps:$4 sm:$0xff]  }
 0x242   :  { %3518 = vmatpush2.bf16.msra.mxu1 %v11825_v30  ;;  %v13858_v4 = vpop.f32.mrf.mxu1  ;;  %v154_v30 = vld [vmem:[#allocation8 + $0x3] ss:$8 sm:$0x30] }
 0x243   :  { %3519 = vmatprep.subr.bf16.mxu1 %v11833_v10  ;;  %v11849_v10 = vld [vmem:[#allocation11 + $0x7c0] ss:$24 sps:$4 sm:$0xff]  }
 0x244   :  { %5519 = vmatpush2.bf16.msra.mxu0 %v11846_v58  ;;  %v13862_v0 = vpop.f32.mrf.mxu1 }
 0x245   :  { %5520 = vmatprep.subr.bf16.mxu0 %v11854_v60  ;;  %v13868_v60 = vpop.f32.mrf.mxu0 }
 0x246   :  { %3520 = vmatpush2.bf16.msra.mxu1 %v11831_v47  ;;  %v13866_v58 = vpop.f32.mrf.mxu1  ;;  %v11857_v47 = vld [vmem:[#allocation11 + $0x794] ss:$24 sps:$4 sm:$0xff]  }
 0x247   :  { %3521 = vmatprep.subr.bf16.mxu1 %v11839_v11  ;;  %v13870_v11 = vor.u32 %v154_v30, %v153_v6  ;;  %v11870_v30 = vld [vmem:[#allocation13 + $0x450] ss:$24 sps:$4 sm:$0xff]  }
 0x248   :  { %5521 = vmatpush2.bf16.msra.mxu0 %v11852_v22  ;;  %v11864_v22 = vld [vmem:[#allocation13 + $0x1b0] ss:$24 sps:$4 sm:$0xff]  }
 0x249   :  { %5522 = vmatprep.subr.bf16.mxu0 %v11860_v36  ;;  %v11869_v36 = vld [vmem:[#allocation13 + $0x184] ss:$24 sps:$4 sm:$0xff]  }
 0x24a   :  { %3522 = vmatpush2.bf16.msra.mxu1 %v11837_v12  ;;  %v11855_v12 = vld [vmem:[#allocation11 + $0x790] ss:$24 sps:$4 sm:$0xff]  }
 0x24b   :  { %3523 = vmatprep.subr.bf16.mxu1 %v11845_v50  ;;  %v15952_v50 = vld [vmem:[#allocation26_spill] sm:$0xff] }
 0x24c   :  { %5523 = vmatpush2.bf16.msra.mxu0 %v11858_v48  ;;  %v13874_v48 = vrot.slane %v13870_v11, %v15952_v50  ;;  %v12062_v50 = vld [vmem:[#allocation13 + $0x458] ss:$24 sps:$4 sm:$0xff]  }
 0x24d   :  { %5524 = vmatprep.subr.bf16.mxu0 %v11863_v57  ;;  %v13876_v57 = vpop.f32.mrf.mxu1 }
 0x24e   :  { %3524 = vmatpush2.bf16.msra.mxu1 %v11843_v44  ;;  %v13878_v44 = vpop.f32.mrf.mxu0 }
 0x24f   :  { %3525 = vmatprep.subr.bf16.mxu1 %v11851_v33  ;;  %v15953_v33 = vld [vmem:[#allocation24_spill] sm:$0xff] }
 0x250   :  { %5525 = vmatpush2.bf16.msra.mxu0 %v11861_v32  ;;  %v13882_v6 = vrot.slane %v13870_v11, %v15953_v33  ;;  %v11867_v32 = vld [vmem:[#allocation13 + $0x180] ss:$24 sps:$4 sm:$0xff]   ;;  %v13888_v56 = vpop.f32.mrf.mxu0 }
 0x251   :  { %5526 = vmatprep.subr.bf16.mxu0 %v11866_v19  ;;  %v2950_v19 = vadd.f32 %v13818_v1, %v13874_v48  ;;  %v2954_v1 = vadd.f32 %v13830_v41, %v13874_v48 }
 0x252   :  { %3526 = vmatpush2.bf16.msra.mxu1 %v11849_v10  ;;  %v13886_v10 = vpop.f32.mrf.mxu1  ;;  %v2948_v24 = vadd.f32 %v13813_v21, %v13882_v6  ;;  %v13899_v9 = vpop.f32.mrf.mxu0  ;;  %v11878_v21 = vld [vmem:[#allocation13 + $0x3f4] ss:$24 sps:$4 sm:$0xff]  }
 0x253   :  { %3527 = vmatprep.subr.bf16.mxu1 %v11857_v47  ;;  %v11875_v47 = vld [vmem:[#allocation13 + $0x424] ss:$24 sps:$4 sm:$0xff]   ;;  %v3027_v41 = vadd.f32 %v13823_v2, %v2954_v1  ;;  %v2964_v2 = vadd.f32 %v13844_v46, %v13874_v48 }
 0x254   :  { %5527 = vmatpush2.bf16.msra.mxu0 %v11864_v22  ;;  %v2952_v22 = vadd.f32 %v13825_v37, %v13882_v6 }
 0x255   :  { %5528 = vmatprep.subr.bf16.mxu0 %v11869_v36 }
 0x256   :  { %3528 = vmatpush2.bf16.msra.mxu1 %v11855_v12  ;;  %v11873_v12 = vld [vmem:[#allocation13 + $0x420] ss:$24 sps:$4 sm:$0xff]   ;;  %v3025_v37 = vadd.f32 %v13815_v40, %v2952_v22 }
 0x257   :  { %5571 = vmatprep.subr.bf16.mxu1 %v11872_v45  ;;  %v3023_v45 = vadd.f32 %v13811_v3, %v2950_v19 }
 0x258   :  { %5529 = vmatpush2.bf16.msra.mxu0 %v11867_v32  ;;  %v3021_v32 = vadd.f32 %v13805_v61, %v2948_v24  ;;  %v2958_v24 = vadd.f32 %v13836_v26, %v13882_v6  ;;  %v2960_v61 = vadd.f32 %v13838_v27, %v13874_v48 }
 0x259   :  { %v3093_v36 = vpop.f32.mrf.mxu1  ;;  %3530 = vmatmul.mubr.bf16.vlgmr.msra.gmra.mxu1 %v13715_v28 }
 0x25a   :  { %3539 = vmatprep.mubr.bf16.mxu1 %v13725_v23  ;;  %5572 = vmatpush1.bf16.msra.mxu1 %v11870_v30  ;;  %v3094_v23 = vadd.f32 %v3093_v36, %v3021_v32  ;;  %v11876_v30 = vld [vmem:[#allocation13 + $0x3f0] ss:$24 sps:$4 sm:$0xff]   ;;  %v3031_v32 = vadd.f32 %v13827_v5, %v2958_v24  ;;  %v2968_v24 = vadd.f32 %v13848_v54, %v13882_v6 }
 0x25b   :  { %v3095_v42 = vpop.f32.mrf.mxu1  ;;  %5573 = vmatprep.subr.bf16.mxu1 %v11875_v47  ;;  %v13903_v8 = vpop.f32.mrf.mxu0  ;;  %v11881_v47 = vld [vmem:[#allocation13 + $0x3c4] ss:$24 sps:$4 sm:$0xff]  }
 0x25c   :  { %v3096_v28 = vadd.f32 %v3095_v42, %v3023_v45  ;;  %v2962_v42 = vadd.f32 %v13842_v35, %v13882_v6  ;;  %v3619_v26 = vmul.f32 %v13906_v53, %v3094_v23  ;;  %v11879_v35 = vld [vmem:[#allocation13 + $0x3c0] ss:$24 sps:$4 sm:$0xff]   ;;  %vm3570_vm3 = vcmp.ge.f32.partialorder %v3094_v23, 0.0 }
 0x25d   :  { %v3097_v16 = vpop.f32.mrf.mxu1  ;;  %v13917_v36 = vpop.f32.mrf.mxu0  ;;  %v3033_v45 = vadd.f32 %v13834_v17, %v2960_v61  ;;  %v11882_v17 = vld [vmem:[#allocation13 + $0x390] ss:$24 sps:$4 sm:$0xff]  }
 0x25e   :  { %5574 = vmatpush1.bf16.msra.mxu1 %v11873_v12  ;;  %v3098_v3 = vadd.f32 %v3097_v16, %v3025_v37  ;;  %v3620_v22 = vmul.f32 %v13906_v53, %v3096_v28  ;;  %vm3571_vm1 = vcmp.ge.f32.partialorder %v3096_v28, 0.0  ;;  %v11884_v12 = vld [vmem:[#allocation13 + $0x394] ss:$24 sps:$4 sm:$0xff]   ;;  %v3037_v37 = vadd.f32 %v13846_v51, %v2964_v2  ;;  %v11887_v51 = vld [vmem:[#allocation13 + $0x364] ss:$24 sps:$4 sm:$0xff]  }
 0x25f   :  { %v3099_v19 = vpop.f32.mrf.mxu1  ;;  %5575 = vmatprep.subr.bf16.mxu1 %v11878_v21  ;;  %v3035_v21 = vadd.f32 %v13840_v63, %v2962_v42  ;;  %v3667_v62 = vsel %vm3570_vm3, %v3094_v23, %v3619_v26  ;;  %v2972_v23 = vadd.f32 %v13854_v14, %v13882_v6  ;;  %v11968_v42 = vld [vmem:[#allocation13 + $0x754] ss:$24 sps:$4 sm:$0xff]  }
 0x260   :  { %v3100_v40 = vadd.f32 %v3099_v19, %v3027_v41  ;;  %vm3576_vm0 = vcmp.ge.f32.partialorder %v3098_v3, 0.0  ;;  %v3625_v16 = vmul.f32 %v13906_v53, %v3098_v3  ;;  %v13929_v41 = vpop.f32.mrf.mxu0  ;;  %v11890_v26 = vld [vmem:[#allocation13 + $0x334] ss:$24 sps:$4 sm:$0xff]   ;;  %5644 = vmatprep.subr.bf16.mxu0 %v11968_v42 }
 0x261   :  { %v3103_v1 = vpop.f32.mrf.mxu1  ;;  %3540 = vmatmul.mubr.bf16.gmra.mxu1 %v13753_v52 }
 0x262   :  { %vm3577_vm2 = vcmp.ge.f32.partialorder %v3100_v40, 0.0  ;;  %v3626_v27 = vmul.f32 %v13906_v53, %v3100_v40  ;;  %3549 = vmatprep.mubr.bf16.mxu1 %v13759_v38  ;;  %5576 = vmatpush1.bf16.msra.mxu1 %v11876_v30  ;;  %v3673_v52 = vsel %vm3576_vm0, %v3098_v3, %v3625_v16  ;;  %v3668_v38 = vsel %vm3571_vm1, %v3096_v28, %v3620_v22 }
 0x263   :  { %v3105_v46 = vpop.f32.mrf.mxu1  ;;  %5577 = vmatprep.subr.bf16.mxu1 %v11881_v47  ;;  %v13935_v63 = vpack.c.bf16 %v3673_v52, %v3667_v62  ;;  %v3104_v3 = vadd.f32 %v3103_v1, %v3031_v32  ;;  %v2970_v28 = vadd.f32 %v13850_v15, %v13874_v48  ;;  %v2974_v62 = vadd.f32 %v13858_v4, %v13874_v48  ;;  %v11966_v15 = vld [vmem:[#allocation13 + $0x750] ss:$24 sps:$4 sm:$0xff]   ;;  %v11885_v4 = vld [vmem:[#allocation13 + $0x360] ss:$24 sps:$4 sm:$0xff]  }
 0x264   :  { %v3674_v30 = vsel %vm3577_vm2, %v3100_v40, %v3626_v27  ;;  %v3106_v47 = vadd.f32 %v3105_v46, %v3033_v45  ;;  %v13946_v40 = vpop.f32.mrf.mxu0  ;;  %v11974_v46 = vld [vmem:[#allocation13 + $0x724] ss:$24 sps:$4 sm:$0xff]  }
 0x265   :  { %v3107_v19 = vpop.f32.mrf.mxu1  ;;  %v13933_v34 = vpack.c.bf16 %v3674_v30, %v3668_v38  ;;  %v3631_v16 = vmul.f32 %v13906_v53, %v3104_v3  ;;  %v3043_v27 = vadd.f32 %v13856_v49, %v2970_v28  ;;  %vm3582_vm7 = vcmp.ge.f32.partialorder %v3104_v3, 0.0 }
 0x266   :  { %v3108_v20 = vadd.f32 %v3107_v19, %v3035_v21  ;;  %5578 = vmatpush1.bf16.msra.mxu1 %v11879_v35  ;;  %v3632_v22 = vmul.f32 %v13906_v53, %v3106_v47  ;;  %vm3583_vm6 = vcmp.ge.f32.partialorder %v3106_v47, 0.0  ;;  %v3045_v35 = vadd.f32 %v13860_v13, %v2972_v23  ;;  %v13961_v45 = vpop.f32.mrf.mxu0  ;;  %v11888_v19 = vld [vmem:[#allocation13 + $0x330] ss:$24 sps:$4 sm:$0xff]  }
 0x267   :  { %v3109_v5 = vpop.f32.mrf.mxu1  ;;  %5579 = vmatprep.subr.bf16.mxu1 %v11884_v12  ;;  %5530 = vmatprep.mubr.bf16.mxu0 %v13933_v34  ;;  %v2980_v12 = vadd.f32 %v13866_v58, %v13874_v48  ;;  %v3679_v58 = vsel %vm3582_vm7, %v3104_v3, %v3631_v16  ;;  %v2984_v23 = vadd.f32 %v13886_v10, %v13874_v48  ;;  %v11891_v48 = vld [vmem:[#allocation13 + $0x300] ss:$24 sps:$4 sm:$0xff]  }
 0x268   :  { %v3110_v61 = vadd.f32 %v3109_v5, %v3037_v37  ;;  %v3637_v2 = vmul.f32 %v13906_v53, %v3108_v20  ;;  %5531 = vmatmul.mubr.bf16.vlgmr.msra.gmra.mxu0 %v13935_v63  ;;  %vm3588_vm4 = vcmp.ge.f32.partialorder %v3108_v20, 0.0  ;;  %v3680_v13 = vsel %vm3583_vm6, %v3106_v47, %v3632_v22  ;;  %v11980_v47 = vld [vmem:[#allocation13 + $0x6f4] ss:$24 sps:$4 sm:$0xff]  }
 0x269   :  { %v3113_v54 = vpop.f32.mrf.mxu1  ;;  %3550 = vmatmul.mubr.bf16.gmra.mxu1 %v13769_v59  ;;  %v3041_v59 = vadd.f32 %v13852_v39, %v2968_v24  ;;  %5645 = vmatpush1.bf16.msra.mxu0 %v11966_v15  ;;  %v11972_v39 = vld [vmem:[#allocation13 + $0x720] ss:$24 sps:$4 sm:$0xff]   ;;  %v2978_v5 = vadd.f32 %v13862_v0, %v13882_v6  ;;  %v3053_v28 = vadd.f32 %v13878_v44, %v2980_v12  ;;  %v11899_v12 = vld [vmem:[#allocation13 + $0x5a4] ss:$24 sps:$4 sm:$0xff]  }
 0x26a   :  { %vm3589_vm5 = vcmp.ge.f32.partialorder %v3110_v61, 0.0  ;;  %v3638_v14 = vmul.f32 %v13906_v53, %v3110_v61  ;;  %3559 = vmatprep.mubr.bf16.mxu1 %v13773_v7  ;;  %5580 = vmatpush1.bf16.msra.mxu1 %v11882_v17  ;;  %v3047_v7 = vadd.f32 %v13864_v18, %v2974_v62  ;;  %v3685_v32 = vsel %vm3588_vm4, %v3108_v20, %v3637_v2  ;;  %v11893_v17 = vld [vmem:[#allocation13 + $0x304] ss:$24 sps:$4 sm:$0xff]   ;;  %v11896_v62 = vld [vmem:[#allocation13 + $0x5d4] ss:$24 sps:$4 sm:$0xff]  }
 0x26b   :  { %v3115_v1 = vpop.f32.mrf.mxu1  ;;  %5581 = vmatprep.subr.bf16.mxu1 %v11887_v51  ;;  %5646 = vmatprep.subr.bf16.mxu0 %v11974_v46  ;;  %v3114_v38 = vadd.f32 %v3113_v54, %v3041_v59  ;;  %v2982_v20 = vadd.f32 %v13876_v57, %v13882_v6  ;;  %v13973_v24 = vpack.c.bf16 %v3685_v32, %v3679_v58  ;;  %v11978_v57 = vld [vmem:[#allocation13 + $0x6f0] ss:$24 sps:$4 sm:$0xff]   ;;  %v11986_v54 = vld [vmem:[#allocation13 + $0x6c4] ss:$24 sps:$4 sm:$0xff]  }
 0x26c   :  { %v3686_v52 = vsel %vm3589_vm5, %v3110_v61, %v3638_v14  ;;  %v3116_v37 = vadd.f32 %v3115_v1, %v3043_v27  ;;  %v13978_v61 = vpop.f32.mrf.mxu0  ;;  %v3051_v15 = vadd.f32 %v13868_v60, %v2978_v5  ;;  %v11984_v1 = vld [vmem:[#allocation13 + $0x6c0] ss:$24 sps:$4 sm:$0xff]   ;;  %v11998_v5 = vld [vmem:[#allocation13 + $0x664] ss:$24 sps:$4 sm:$0xff]  }
 0x26d   :  { %v3117_v21 = vpop.f32.mrf.mxu1  ;;  %v13966_v30 = vpack.c.bf16 %v3686_v52, %v3680_v13  ;;  %5647 = vmatpush1.bf16.msra.mxu0 %v11972_v39  ;;  %v3643_v44 = vmul.f32 %v13906_v53, %v3114_v38  ;;  %vm3594_vm11 = vcmp.ge.f32.partialorder %v3114_v38, 0.0 }
 0x26e   :  { %v3118_v49 = vadd.f32 %v3117_v21, %v3045_v35  ;;  %5582 = vmatpush1.bf16.msra.mxu1 %v11885_v4  ;;  %v3644_v6 = vmul.f32 %v13906_v53, %v3116_v37  ;;  %vm3595_vm10 = vcmp.ge.f32.partialorder %v3116_v37, 0.0  ;;  %5648 = vmatprep.subr.bf16.mxu0 %v11980_v47  ;;  %v13989_v22 = vpop.f32.mrf.mxu0 }
 0x26f   :  { %v3119_v18 = vpop.f32.mrf.mxu1  ;;  %5583 = vmatprep.subr.bf16.mxu1 %v11890_v26  ;;  %5540 = vmatprep.mubr.bf16.mxu0 %v13966_v30  ;;  %v3057_v26 = vadd.f32 %v13899_v9, %v2984_v23  ;;  %v3691_v60 = vsel %vm3594_vm11, %v3114_v38, %v3643_v44  ;;  %v11992_v9 = vld [vmem:[#allocation13 + $0x694] ss:$24 sps:$4 sm:$0xff]   ;;  %v11900_v23 = vld [vmem:[#allocation13 + $0x570] ss:$24 sps:$4 sm:$0xff]   ;;  %v11903_v44 = vld [vmem:[#allocation13 + $0x540] ss:$24 sps:$4 sm:$0xff]  }
 0x270   :  { %v3120_v51 = vadd.f32 %v3119_v18, %v3047_v7  ;;  %v3649_v3 = vmul.f32 %v13906_v53, %v3118_v49  ;;  %vm3600_vm8 = vcmp.ge.f32.partialorder %v3118_v49, 0.0  ;;  %5541 = vmatmul.mubr.bf16.gmra.mxu0 %v13973_v24  ;;  %v3692_v27 = vsel %vm3595_vm10, %v3116_v37, %v3644_v6  ;;  %v14001_v39 = vpop.f32.mrf.mxu0  ;;  %v11902_v18 = vld [vmem:[#allocation13 + $0x574] ss:$24 sps:$4 sm:$0xff]  }
 0x271   :  { %v3123_v0 = vpop.f32.mrf.mxu1  ;;  %3560 = vmatmul.mubr.bf16.gmra.mxu1 %v13779_v29  ;;  %v3055_v29 = vadd.f32 %v13888_v56, %v2982_v20  ;;  %5649 = vmatpush1.bf16.msra.mxu0 %v11978_v57  ;;  %v11894_v56 = vld [vmem:[#allocation13 + $0x5d0] ss:$24 sps:$4 sm:$0xff]   ;;  %v12004_v6 = vld [vmem:[#allocation13 + $0x634] ss:$24 sps:$4 sm:$0xff]  }
 0x272   :  { %vm3601_vm9 = vcmp.ge.f32.partialorder %v3120_v51, 0.0  ;;  %v3650_v42 = vmul.f32 %v13906_v53, %v3120_v51  ;;  %5584 = vmatpush1.bf16.msra.mxu1 %v11888_v19  ;;  %v3697_v16 = vsel %vm3600_vm8, %v3118_v49, %v3649_v3  ;;  %5650 = vmatprep.subr.bf16.mxu0 %v11986_v54  ;;  %v3124_v35 = vadd.f32 %v3123_v0, %v3051_v15  ;;  %v11990_v49 = vld [vmem:[#allocation13 + $0x690] ss:$24 sps:$4 sm:$0xff]   ;;  %v11897_v19 = vld [vmem:[#allocation13 + $0x5a0] ss:$24 sps:$4 sm:$0xff]   ;;  %v14008_v20 = vpop.f32.mrf.mxu0 }
 0x273   :  { %v3125_v10 = vpop.f32.mrf.mxu1  ;;  %5585 = vmatprep.subr.bf16.mxu1 %v11893_v17  ;;  %v13999_v32 = vpack.c.bf16 %v3697_v16, %v3691_v60  ;;  %v11905_v0 = vld [vmem:[#allocation13 + $0x544] ss:$24 sps:$4 sm:$0xff]   ;;  %v11906_v54 = vld [vmem:[#allocation13 + $0x510] ss:$24 sps:$4 sm:$0xff]   ;;  %v12028_v60 = vld [vmem:[#allocation13 + $0x874] ss:$24 sps:$4 sm:$0xff]  }
 0x274   :  { %v3126_v2 = vadd.f32 %v3125_v10, %v3053_v28  ;;  %v3698_v4 = vsel %vm3601_vm9, %v3120_v51, %v3650_v42  ;;  %v3655_v38 = vmul.f32 %v13906_v53, %v3124_v35  ;;  %vm3606_vm15 = vcmp.ge.f32.partialorder %v3124_v35, 0.0  ;;  %v11996_v28 = vld [vmem:[#allocation13 + $0x660] ss:$24 sps:$4 sm:$0xff]   ;;  %v14016_v42 = vpop.f32.mrf.mxu0  ;;  %v11908_v10 = vld [vmem:[#allocation13 + $0x514] ss:$24 sps:$4 sm:$0xff]  }
 0x275   :  { %v3127_v14 = vpop.f32.mrf.mxu1  ;;  %v13995_v7 = vpack.c.bf16 %v3698_v4, %v3692_v27  ;;  %5651 = vmatpush1.bf16.msra.mxu0 %v11984_v1  ;;  %v11911_v15 = vld [vmem:[#allocation13 + $0x4e4] ss:$24 sps:$4 sm:$0xff]   ;;  %v12014_v16 = vld [vmem:[#allocation13 + $0x8d0] ss:$24 sps:$4 sm:$0xff]   ;;  %v11909_v1 = vld [vmem:[#allocation13 + $0x4e0] ss:$24 sps:$4 sm:$0xff]  }
 0x276   :  { %v3128_v59 = vadd.f32 %v3127_v14, %v3055_v29  ;;  %5586 = vmatpush1.bf16.msra.mxu1 %v11891_v48  ;;  %v3656_v21 = vmul.f32 %v13906_v53, %v3126_v2  ;;  %vm3607_vm12 = vcmp.ge.f32.partialorder %v3126_v2, 0.0  ;;  %5652 = vmatprep.subr.bf16.mxu0 %v11992_v9  ;;  %v3703_v3 = vsel %vm3606_vm15, %v3124_v35, %v3655_v38  ;;  %v12002_v48 = vld [vmem:[#allocation13 + $0x630] ss:$24 sps:$4 sm:$0xff]   ;;  %v14019_v29 = vpop.f32.mrf.mxu0  ;;  %v12016_v14 = vld [vmem:[#allocation13 + $0x8d4] ss:$24 sps:$4 sm:$0xff]  }
 0x277   :  { %v3129_v46 = vpop.f32.mrf.mxu1  ;;  %5587 = vmatprep.subr.bf16.mxu1 %v11896_v62  ;;  %5550 = vmatprep.mubr.bf16.mxu0 %v13995_v7  ;;  %v12010_v62 = vld [vmem:[#allocation13 + $0x604] ss:$24 sps:$4 sm:$0xff]   ;;  %v11912_v35 = vld [vmem:[#allocation13 + $0x4b0] ss:$24 sps:$4 sm:$0xff]  }
 0x278   :  { %v3130_v52 = vadd.f32 %v3129_v46, %v3057_v26  ;;  %v3661_v37 = vmul.f32 %v13906_v53, %v3128_v59  ;;  %vm3612_vm13 = vcmp.ge.f32.partialorder %v3128_v59, 0.0  ;;  %5551 = vmatmul.mubr.bf16.gmra.mxu0 %v13999_v32  ;;  %v3704_v58 = vsel %vm3607_vm12, %v3126_v2, %v3656_v21  ;;  %v12008_v2 = vld [vmem:[#allocation13 + $0x600] ss:$24 sps:$4 sm:$0xff]   ;;  %v14021_v4 = vpop.f32.mrf.mxu0  ;;  %v11914_v26 = vld [vmem:[#allocation13 + $0x4b4] ss:$24 sps:$4 sm:$0xff]  }
 0x279   :  { %5653 = vmatpush1.bf16.msra.mxu0 %v11990_v49  ;;  %v11917_v46 = vld [vmem:[#allocation13 + $0x484] ss:$24 sps:$4 sm:$0xff]   ;;  %v12026_v21 = vld [vmem:[#allocation13 + $0x870] ss:$24 sps:$4 sm:$0xff]  }
 0x27a   :  { %vm3613_vm14 = vcmp.ge.f32.partialorder %v3130_v52, 0.0  ;;  %v3662_v13 = vmul.f32 %v13906_v53, %v3130_v52  ;;  %5588 = vmatpush2.bf16.msra.mxu1 %v11894_v56  ;;  %v3709_v47 = vsel %vm3612_vm13, %v3128_v59, %v3661_v37  ;;  %5654 = vmatprep.subr.bf16.mxu0 %v11998_v5  ;;  %v12022_v59 = vld [vmem:[#allocation13 + $0x8a4] ss:$24 sps:$4 sm:$0xff]   ;;  %v14023_v27 = vpop.f32.mrf.mxu0  ;;  %v12020_v56 = vld [vmem:[#allocation13 + $0x8a0] ss:$24 sps:$4 sm:$0xff]  }
 0x27b   :  { %5589 = vmatprep.subr.bf16.mxu1 %v11899_v12  ;;  %v14014_v57 = vpack.c.bf16 %v3709_v47, %v3703_v3  ;;  %v11920_v9 = vld [vmem:[#allocation13 + $0x15c] ss:$24 sps:$4 sm:$0xff]  }
 0x27c   :  { %v3710_v17 = vsel %vm3613_vm14, %v3130_v52, %v3662_v13  ;;  %v14025_v12 = vpop.f32.mrf.mxu0  ;;  %v11915_v52 = vld [vmem:[#allocation13 + $0x480] ss:$24 sps:$4 sm:$0xff]   ;;  %v12034_v37 = vld [vmem:[#allocation13 + $0x844] ss:$24 sps:$4 sm:$0xff]  }
 0x27d   :  { %v14010_v51 = vpack.c.bf16 %v3710_v17, %v3704_v58  ;;  %5655 = vmatpush1.bf16.msra.mxu0 %v11996_v28  ;;  %v12032_v13 = vld [vmem:[#allocation13 + $0x840] ss:$24 sps:$4 sm:$0xff]   ;;  %v12040_v17 = vld [vmem:[#allocation13 + $0x814] ss:$24 sps:$4 sm:$0xff]   ;;  %v12038_v28 = vld [vmem:[#allocation13 + $0x810] ss:$24 sps:$4 sm:$0xff]  }
 0x27e   :  { %5590 = vmatpush2.bf16.msra.mxu1 %v11897_v19  ;;  %5656 = vmatprep.subr.bf16.mxu0 %v12004_v6  ;;  %v14027_v49 = vpop.f32.mrf.mxu0  ;;  %v15954_v19 = vld [vmem:[#allocation25_spill] sm:$0xff] }
 0x27f   :  { %5560 = vmatprep.mubr.bf16.mxu0 %v14010_v51  ;;  %5591 = vmatprep.subr.bf16.mxu1 %v11902_v18  ;;  %v14031_v38 = vrot.slane %v13870_v11, %v15954_v19  ;;  %v15955_v18 = vld [vmem:[#allocation27_spill] sm:$0xff] }
 0x280   :  { %5561 = vmatmul.mubr.bf16.gmra.mxu0 %v14014_v57  ;;  %v14035_v58 = vrot.slane %v13870_v11, %v15955_v18  ;;  %v14037_v5 = vpop.f32.mrf.mxu0  ;;  %v12047_v18 = vld [vmem:[#allocation13 + $0x7e8] ss:$24 sps:$4 sm:$0xff]  }
 0x281   :  { %5657 = vmatpush1.bf16.msra.mxu0 %v12002_v48  ;;  %v3171_v48 = vadd.f32 %v13929_v41, %v14031_v38 }
 0x282   :  { %5592 = vmatpush2.bf16.msra.mxu1 %v11900_v23  ;;  %5658 = vmatprep.subr.bf16.mxu0 %v12010_v62  ;;  %v3167_v23 = vadd.f32 %v13903_v8, %v14031_v38  ;;  %v3169_v3 = vadd.f32 %v13917_v36, %v14035_v58  ;;  %v12046_v62 = vld [vmem:[#allocation13 + $0x7e4] ss:$24 sps:$4 sm:$0xff]   ;;  %v3173_v8 = vadd.f32 %v13946_v40, %v14035_v58 }
 0x283   :  { %5593 = vmatprep.subr.bf16.mxu1 %v11905_v0  ;;  %v3181_v40 = vadd.f32 %v13989_v22, %v14031_v38 }
 0x285   :  { %5659 = vmatpush1.bf16.msra.mxu0 %v12008_v2 }
 0x286   :  { %5594 = vmatpush2.bf16.msra.mxu1 %v11903_v44  ;;  %5660 = vmatprep.subr.bf16.mxu0 %v12016_v14 }
 0x287   :  { %5595 = vmatprep.subr.bf16.mxu1 %v11908_v10 }
 0x289   :  { %5661 = vmatpush2.bf16.msra.mxu0 %v12014_v16 }
 0x28a   :  { %5596 = vmatpush2.bf16.msra.mxu1 %v11906_v54  ;;  %5662 = vmatprep.subr.bf16.mxu0 %v12022_v59 }
 0x28b   :  { %5597 = vmatprep.subr.bf16.mxu1 %v11911_v15  ;;  %v12044_v15 = vld [vmem:[#allocation13 + $0x7e0] ss:$24 sps:$4 sm:$0xff]  }
 0x28d   :  { %5663 = vmatpush2.bf16.msra.mxu0 %v12020_v56  ;;  %v12052_v56 = vld [vmem:[#allocation13 + $0x7b4] ss:$24 sps:$4 sm:$0xff]  }
 0x28e   :  { %5598 = vmatpush2.bf16.msra.mxu1 %v11909_v1  ;;  %5664 = vmatprep.subr.bf16.mxu0 %v12028_v60  ;;  %v12050_v60 = vld [vmem:[#allocation13 + $0x7b0] ss:$24 sps:$4 sm:$0xff]  }
 0x28f   :  { %5599 = vmatprep.subr.bf16.mxu1 %v11914_v26 }
 0x291   :  { %5665 = vmatpush2.bf16.msra.mxu0 %v12026_v21  ;;  %v3179_v21 = vadd.f32 %v13978_v61, %v14035_v58  ;;  %v12058_v61 = vld [vmem:[#allocation13 + $0x784] ss:$24 sps:$4 sm:$0xff]  }
 0x292   :  { %5600 = vmatpush2.bf16.msra.mxu1 %v11912_v35  ;;  %5666 = vmatprep.subr.bf16.mxu0 %v12034_v37 }
 0x293   :  { %5601 = vmatprep.subr.bf16.mxu1 %v11917_v46 }
 0x295   :  { %5667 = vmatpush2.bf16.msra.mxu0 %v12032_v13 }
 0x296   :  { %5602 = vmatpush2.bf16.msra.mxu1 %v11915_v52  ;;  %5668 = vmatprep.subr.bf16.mxu0 %v12040_v17  ;;  %v3177_v52 = vadd.f32 %v13961_v45, %v14031_v38 }
 0x297   :  { %5717 = vmatprep.subr.bf16.mxu1 %v11920_v9 }
 0x299   :  { %v3239_v47 = vpop.f32.mrf.mxu1  ;;  %5669 = vmatpush2.bf16.msra.mxu0 %v12038_v28 }
 0x29a   :  { %v3240_v44 = vadd.f32 %v3239_v47, %v3167_v23  ;;  %5670 = vmatprep.subr.bf16.mxu0 %v12046_v62 }
 0x29b   :  { %v3312_v0 = vpop.f32.mrf.mxu0  ;;  %v3241_v6 = vpop.f32.mrf.mxu1 }
 0x29c   :  { %v3242_v10 = vadd.f32 %v3241_v6, %v3169_v3  ;;  %v3313_v1 = vadd.f32 %v3312_v0, %v3240_v44  ;;  %v12056_v6 = vld [vmem:[#allocation13 + $0x780] ss:$24 sps:$4 sm:$0xff]  }
 0x29d   :  { %v3314_v2 = vpop.f32.mrf.mxu0  ;;  %v3243_v54 = vpop.f32.mrf.mxu1  ;;  %5671 = vmatpush2.bf16.msra.mxu0 %v12044_v15 }
 0x29e   :  { %v3244_v14 = vadd.f32 %v3243_v54, %v3171_v48  ;;  %v3315_v26 = vadd.f32 %v3314_v2, %v3242_v10  ;;  %5672 = vmatprep.subr.bf16.mxu0 %v12052_v56  ;;  %v3621_v47 = vmul.f32 %v13906_v53, %v3313_v1  ;;  %v3183_v48 = vadd.f32 %v14001_v39, %v14035_v58  ;;  %v11918_v39 = vld [vmem:[#allocation13 + $0x158] ss:$24 sps:$4 sm:$0xff]  }
 0x29f   :  { %v3316_v16 = vpop.f32.mrf.mxu0  ;;  %v3245_v36 = vpop.f32.mrf.mxu1  ;;  %vm3572_vm3 = vcmp.ge.f32.partialorder %v3313_v1, 0.0 }
 0x2a0   :  { %v3317_v59 = vadd.f32 %v3316_v16, %v3244_v14  ;;  %v3246_v41 = vadd.f32 %v3245_v36, %v3173_v8  ;;  %v3622_v28 = vmul.f32 %v13906_v53, %v3315_v26  ;;  %vm3573_vm1 = vcmp.ge.f32.partialorder %v3315_v26, 0.0  ;;  %v12064_v36 = vld [vmem:[#allocation13 + $0x45c] ss:$24 sps:$4 sm:$0xff]  }
 0x2a1   :  { %v3318_v35 = vpop.f32.mrf.mxu0  ;;  %v3249_v46 = vpop.f32.mrf.mxu1  ;;  %5673 = vmatpush2.bf16.msra.mxu0 %v12050_v60  ;;  %v3669_v56 = vsel %vm3572_vm3, %v3313_v1, %v3621_v47  ;;  %v3191_v1 = vadd.f32 %v14019_v29, %v14031_v38 }
 0x2a2   :  { %v3627_v9 = vmul.f32 %v13906_v53, %v3317_v59  ;;  %v3319_v37 = vadd.f32 %v3318_v35, %v3246_v41  ;;  %vm3578_vm0 = vcmp.ge.f32.partialorder %v3317_v59, 0.0  ;;  %v3250_v3 = vadd.f32 %v3249_v46, %v3177_v52  ;;  %5674 = vmatprep.subr.bf16.mxu0 %v12058_v61  ;;  %v11921_v61 = vld [vmem:[#allocation13 + $0x128] ss:$24 sps:$4 sm:$0xff]  }
 0x2a3   :  { %v3322_v13 = vpop.f32.mrf.mxu0  ;;  %v3251_v17 = vpop.f32.mrf.mxu1  ;;  %v3670_v16 = vsel %vm3573_vm1, %v3315_v26, %v3622_v28  ;;  %v3187_v26 = vadd.f32 %v14008_v20, %v14031_v38 }
 0x2a4   :  { %v3252_v23 = vadd.f32 %v3251_v17, %v3179_v21  ;;  %vm3579_vm2 = vcmp.ge.f32.partialorder %v3319_v37, 0.0  ;;  %v3628_v45 = vmul.f32 %v13906_v53, %v3319_v37  ;;  %v3675_v10 = vsel %vm3578_vm0, %v3317_v59, %v3627_v9 }
 0x2a5   :  { %v3324_v0 = vpop.f32.mrf.mxu0  ;;  %v3253_v22 = vpop.f32.mrf.mxu1  ;;  %5675 = vmatpush2.bf16.msra.mxu0 %v12056_v6  ;;  %v3323_v41 = vadd.f32 %v3322_v13, %v3250_v3  ;;  %v3189_v59 = vadd.f32 %v14016_v42, %v14035_v58  ;;  %v14064_v21 = vpack.c.bf16 %v3675_v10, %v3669_v56  ;;  %v11924_v56 = vld [vmem:[#allocation13 + $0xf8] ss:$24 sps:$4 sm:$0xff]  }
 0x2a6   :  { %v3254_v44 = vadd.f32 %v3253_v22, %v3181_v40  ;;  %v3325_v62 = vadd.f32 %v3324_v0, %v3252_v23  ;;  %v3676_v15 = vsel %vm3579_vm2, %v3319_v37, %v3628_v45  ;;  %v11923_v40 = vld [vmem:[#allocation13 + $0x12c] ss:$24 sps:$4 sm:$0xff]   ;;  %5790 = vmatprep.subr.bf16.mxu0 %v12064_v36  ;;  %v3193_v45 = vadd.f32 %v14021_v4, %v14035_v58  ;;  %v11926_v0 = vld [vmem:[#allocation13 + $0xfc] ss:$24 sps:$4 sm:$0xff]  }
 0x2a7   :  { %v3326_v2 = vpop.f32.mrf.mxu0  ;;  %v3255_v54 = vpop.f32.mrf.mxu1  ;;  %v14060_v60 = vpack.c.bf16 %v3676_v15, %v3670_v16  ;;  %v3633_v20 = vmul.f32 %v13906_v53, %v3323_v41  ;;  %vm3584_vm7 = vcmp.ge.f32.partialorder %v3323_v41, 0.0 }
 0x2a8   :  { %v3327_v14 = vadd.f32 %v3326_v2, %v3254_v44  ;;  %v3256_v8 = vadd.f32 %v3255_v54, %v3183_v48  ;;  %v3634_v9 = vmul.f32 %v13906_v53, %v3325_v62  ;;  %vm3585_vm6 = vcmp.ge.f32.partialorder %v3325_v62, 0.0 }
 0x2a9   :  { %v3328_v35 = vpop.f32.mrf.mxu0  ;;  %v3259_v46 = vpop.f32.mrf.mxu1  ;;  %5603 = vmatprep.mubr.bf16.mxu1 %v14060_v60 }
 0x2aa   :  { %v3329_v52 = vadd.f32 %v3328_v35, %v3256_v8  ;;  %v3639_v37 = vmul.f32 %v13906_v53, %v3327_v14  ;;  %vm3590_vm4 = vcmp.ge.f32.partialorder %v3327_v14, 0.0  ;;  %5604 = vmatmul.mubr.bf16.vlgmr.msra.gmra.mxu1 %v14064_v21  ;;  %v3260_v28 = vadd.f32 %v3259_v46, %v3187_v26 }
 0x2ab   :  { %v3332_v13 = vpop.f32.mrf.mxu0  ;;  %v3261_v17 = vpop.f32.mrf.mxu1  ;;  %5718 = vmatpush1.bf16.msra.mxu1 %v11918_v39  ;;  %v3682_v15 = vsel %vm3585_vm6, %v3325_v62, %v3634_v9  ;;  %v3681_v35 = vsel %vm3584_vm7, %v3323_v41, %v3633_v20  ;;  %v3199_v46 = vadd.f32 %v14025_v12, %v14035_v58  ;;  %v3197_v62 = vadd.f32 %v14023_v27, %v14031_v38  ;;  %v11932_v20 = vld [vmem:[#allocation13 + $0x9c] ss:$24 sps:$4 sm:$0xff]  }
 0x2ac   :  { %vm3591_vm5 = vcmp.ge.f32.partialorder %v3329_v52, 0.0  ;;  %v3640_v42 = vmul.f32 %v13906_v53, %v3329_v52  ;;  %v3262_v47 = vadd.f32 %v3261_v17, %v3189_v59  ;;  %5719 = vmatprep.subr.bf16.mxu1 %v11923_v40  ;;  %v3687_v10 = vsel %vm3590_vm4, %v3327_v14, %v3639_v37  ;;  %v11929_v14 = vld [vmem:[#allocation13 + $0xcc] ss:$24 sps:$4 sm:$0xff]  }
 0x2ad   :  { %v3334_v29 = vpop.f32.mrf.mxu0  ;;  %v3263_v23 = vpop.f32.mrf.mxu1  ;;  %v3333_v8 = vadd.f32 %v3332_v13, %v3260_v28  ;;  %v14086_v59 = vpack.c.bf16 %v3687_v10, %v3681_v35  ;;  %v11927_v13 = vld [vmem:[#allocation13 + $0xc8] ss:$24 sps:$4 sm:$0xff]   ;;  %v3203_v17 = vadd.f32 %v14037_v5, %v14035_v58  ;;  %v11930_v58 = vld [vmem:[#allocation13 + $0x98] ss:$24 sps:$4 sm:$0xff]  }
 0x2ae   :  { %v3264_v3 = vadd.f32 %v3263_v23, %v3191_v1  ;;  %v3335_v22 = vadd.f32 %v3334_v29, %v3262_v47  ;;  %v3688_v44 = vsel %vm3591_vm5, %v3329_v52, %v3640_v42  ;;  %v3201_v52 = vadd.f32 %v14027_v49, %v14031_v38 }
 0x2af   :  { %v3336_v6 = vpop.f32.mrf.mxu0  ;;  %v3265_v48 = vpop.f32.mrf.mxu1  ;;  %5720 = vmatpush1.bf16.msra.mxu1 %v11921_v61  ;;  %v14081_v4 = vpack.c.bf16 %v3688_v44, %v3682_v15  ;;  %v3645_v27 = vmul.f32 %v13906_v53, %v3333_v8  ;;  %vm3596_vm11 = vcmp.ge.f32.partialorder %v3333_v8, 0.0 }
 0x2b0   :  { %v3337_v2 = vadd.f32 %v3336_v6, %v3264_v3  ;;  %v3266_v54 = vadd.f32 %v3265_v48, %v3193_v45  ;;  %5721 = vmatprep.subr.bf16.mxu1 %v11926_v0  ;;  %v3646_v40 = vmul.f32 %v13906_v53, %v3335_v22  ;;  %vm3597_vm10 = vcmp.ge.f32.partialorder %v3335_v22, 0.0 }
 0x2b1   :  { %v3338_v16 = vpop.f32.mrf.mxu0  ;;  %v3269_v36 = vpop.f32.mrf.mxu1  ;;  %5613 = vmatprep.mubr.bf16.mxu1 %v14081_v4  ;;  %v3693_v5 = vsel %vm3596_vm11, %v3333_v8, %v3645_v27  ;;  %v11945_v27 = vld [vmem:[#allocation13 + $0x2a8] ss:$24 sps:$4 sm:$0xff]  }
 0x2b2   :  { %v3339_v39 = vadd.f32 %v3338_v16, %v3266_v54  ;;  %v3651_v26 = vmul.f32 %v13906_v53, %v3337_v2  ;;  %vm3602_vm8 = vcmp.ge.f32.partialorder %v3337_v2, 0.0  ;;  %5614 = vmatmul.mubr.bf16.gmra.mxu1 %v14086_v59  ;;  %v3270_v37 = vadd.f32 %v3269_v36, %v3197_v62  ;;  %v11935_v16 = vld [vmem:[#allocation13 + $0x6c] ss:$24 sps:$4 sm:$0xff]   ;;  %v11933_v36 = vld [vmem:[#allocation13 + $0x68] ss:$24 sps:$4 sm:$0xff]  }
 0x2b3   :  { %v3342_v1 = vpop.f32.mrf.mxu0  ;;  %v3271_v41 = vpop.f32.mrf.mxu1  ;;  %5722 = vmatpush1.bf16.msra.mxu1 %v11924_v56  ;;  %v3694_v0 = vsel %vm3597_vm10, %v3335_v22, %v3646_v40  ;;  %v11936_v62 = vld [vmem:[#allocation13 + $0x38] ss:$24 sps:$4 sm:$0xff]  }
 0x2b4   :  { %vm3603_vm9 = vcmp.ge.f32.partialorder %v3339_v39, 0.0  ;;  %v3652_v12 = vmul.f32 %v13906_v53, %v3339_v39  ;;  %v3272_v9 = vadd.f32 %v3271_v41, %v3199_v46  ;;  %5723 = vmatprep.subr.bf16.mxu1 %v11929_v14  ;;  %v3699_v61 = vsel %vm3602_vm8, %v3337_v2, %v3651_v26  ;;  %v11938_v46 = vld [vmem:[#allocation13 + $0x3c] ss:$24 sps:$4 sm:$0xff]   ;;  %v11941_v26 = vld [vmem:[#allocation13 + $0xc] ss:$24 sps:$4 sm:$0xff]  }
 0x2b5   :  { %v3344_v49 = vpop.f32.mrf.mxu0  ;;  %v3273_v38 = vpop.f32.mrf.mxu1  ;;  %v3343_v6 = vadd.f32 %v3342_v1, %v3270_v37  ;;  %v14107_v15 = vpack.c.bf16 %v3699_v61, %v3693_v5  ;;  %v11939_v1 = vld [vmem:[#allocation13 + $0x8] ss:$24 sps:$4 sm:$0xff]   ;;  %v11944_v41 = vld [vmem:[#allocation13 + $0x2dc] ss:$24 sps:$4 sm:$0xff]   ;;  %v11960_v61 = vld [vmem:[#allocation13 + $0x1b8] ss:$24 sps:$4 sm:$0xff]  }
 0x2b6   :  { %v3345_v42 = vadd.f32 %v3344_v49, %v3272_v9  ;;  %v3274_v47 = vadd.f32 %v3273_v38, %v3201_v52  ;;  %v3700_v23 = vsel %vm3603_vm9, %v3339_v39, %v3652_v12  ;;  %v11942_v12 = vld [vmem:[#allocation13 + $0x2d8] ss:$24 sps:$4 sm:$0xff]   ;;  %v11947_v9 = vld [vmem:[#allocation13 + $0x2ac] ss:$24 sps:$4 sm:$0xff]   ;;  %v11950_v37 = vld [vmem:[#allocation13 + $0x27c] ss:$24 sps:$4 sm:$0xff]  }
 0x2b7   :  { %v3346_v28 = vpop.f32.mrf.mxu0  ;;  %v3275_v29 = vpop.f32.mrf.mxu1  ;;  %5724 = vmatpush1.bf16.msra.mxu1 %v11927_v13  ;;  %v14103_v44 = vpack.c.bf16 %v3700_v23, %v3694_v0  ;;  %v3657_v8 = vmul.f32 %v13906_v53, %v3343_v6  ;;  %vm3608_vm15 = vcmp.ge.f32.partialorder %v3343_v6, 0.0  ;;  %v11948_v49 = vld [vmem:[#allocation13 + $0x278] ss:$24 sps:$4 sm:$0xff]   ;;  %v11953_v38 = vld [vmem:[#allocation13 + $0x24c] ss:$24 sps:$4 sm:$0xff]  }
 0x2b8   :  { %v3347_v45 = vadd.f32 %v3346_v28, %v3274_v47  ;;  %v3276_v3 = vadd.f32 %v3275_v29, %v3203_v17  ;;  %v3658_v10 = vmul.f32 %v13906_v53, %v3345_v42  ;;  %5725 = vmatprep.subr.bf16.mxu1 %v11932_v20  ;;  %vm3609_vm12 = vcmp.ge.f32.partialorder %v3345_v42, 0.0  ;;  %v11951_v13 = vld [vmem:[#allocation13 + $0x248] ss:$24 sps:$4 sm:$0xff]   ;;  %v11956_v17 = vld [vmem:[#allocation13 + $0x21c] ss:$24 sps:$4 sm:$0xff]  }
 0x2b9   :  { %v3348_v48 = vpop.f32.mrf.mxu0  ;;  %5623 = vmatprep.mubr.bf16.mxu1 %v14103_v44  ;;  %v3705_v52 = vsel %vm3608_vm15, %v3343_v6, %v3657_v8  ;;  %v11959_v47 = vld [vmem:[#allocation13 + $0x1ec] ss:$24 sps:$4 sm:$0xff]   ;;  %v11957_v28 = vld [vmem:[#allocation13 + $0x1e8] ss:$24 sps:$4 sm:$0xff]   ;;  %v11962_v29 = vld [vmem:[#allocation13 + $0x1bc] ss:$24 sps:$4 sm:$0xff]  }
 0x2ba   :  { %v3349_v54 = vadd.f32 %v3348_v48, %v3276_v3  ;;  %v3663_v2 = vmul.f32 %v13906_v53, %v3347_v45  ;;  %vm3614_vm13 = vcmp.ge.f32.partialorder %v3347_v45, 0.0  ;;  %5624 = vmatmul.mubr.bf16.gmra.mxu1 %v14107_v15  ;;  %v3706_v56 = vsel %vm3609_vm12, %v3345_v42, %v3658_v10  ;;  %v11954_v42 = vld [vmem:[#allocation13 + $0x218] ss:$24 sps:$4 sm:$0xff]   ;;  %v11963_v0 = vld [vmem:[#allocation13 + $0x188] ss:$24 sps:$4 sm:$0xff]  }
 0x2bb   :  { %5726 = vmatpush1.bf16.msra.mxu1 %v11930_v58  ;;  %v11971_v6 = vld [vmem:[#allocation13 + $0x75c] ss:$24 sps:$4 sm:$0xff]   ;;  %v11969_v58 = vld [vmem:[#allocation13 + $0x758] ss:$24 sps:$4 sm:$0xff]   ;;  %v11977_v5 = vld [vmem:[#allocation13 + $0x72c] ss:$24 sps:$4 sm:$0xff]  }
 0x2bc   :  { %vm3615_vm14 = vcmp.ge.f32.partialorder %v3349_v54, 0.0  ;;  %v3664_v22 = vmul.f32 %v13906_v53, %v3349_v54  ;;  %5727 = vmatprep.subr.bf16.mxu1 %v11935_v16  ;;  %v3711_v14 = vsel %vm3614_vm13, %v3347_v45, %v3663_v2  ;;  %v11965_v45 = vld [vmem:[#allocation13 + $0x18c] ss:$24 sps:$4 sm:$0xff]   ;;  %v11983_v16 = vld [vmem:[#allocation13 + $0x6fc] ss:$24 sps:$4 sm:$0xff]  }
 0x2bd   :  { %v14117_v40 = vpack.c.bf16 %v3711_v14, %v3705_v52  ;;  %v11989_v8 = vld [vmem:[#allocation13 + $0x6cc] ss:$24 sps:$4 sm:$0xff]  }
 0x2be   :  { %v3712_v35 = vsel %vm3615_vm14, %v3349_v54, %v3664_v22  ;;  %v11975_v54 = vld [vmem:[#allocation13 + $0x728] ss:$24 sps:$4 sm:$0xff]   ;;  %v11981_v22 = vld [vmem:[#allocation13 + $0x6f8] ss:$24 sps:$4 sm:$0xff]   ;;  %v12001_v52 = vld [vmem:[#allocation13 + $0x66c] ss:$24 sps:$4 sm:$0xff]  }
 0x2bf   :  { %v14114_v39 = vpack.c.bf16 %v3712_v35, %v3706_v56  ;;  %5728 = vmatpush1.bf16.msra.mxu1 %v11933_v36  ;;  %v11987_v56 = vld [vmem:[#allocation13 + $0x6c8] ss:$24 sps:$4 sm:$0xff]   ;;  %v11995_v35 = vld [vmem:[#allocation13 + $0x69c] ss:$24 sps:$4 sm:$0xff]  }
 0x2c0   :  { %5729 = vmatprep.subr.bf16.mxu1 %v11938_v46 }
 0x2c1   :  { %5633 = vmatprep.mubr.bf16.mxu1 %v14114_v39 }
 0x2c2   :  { %5634 = vmatmul.mubr.bf16.gmra.mxu1 %v14117_v40 }
 0x2c3   :  { %5730 = vmatpush1.bf16.msra.mxu1 %v11936_v62  ;;  %5749 = vmatprep.mubr.bf16.mxu1 %v13933_v34  ;;  %v11993_v62 = vld [vmem:[#allocation13 + $0x698] ss:$24 sps:$4 sm:$0xff]  }
 0x2c4   :  { %5731 = vmatprep.subr.bf16.mxu1 %v11941_v26 }
 0x2c7   :  { %5732 = vmatpush1.bf16.msra.mxu1 %v11939_v1 }
 0x2c8   :  { %5733 = vmatprep.subr.bf16.mxu1 %v11944_v41  ;;  %v11999_v41 = vld [vmem:[#allocation13 + $0x668] ss:$24 sps:$4 sm:$0xff]  }
 0x2cb   :  { %5734 = vmatpush2.bf16.msra.mxu1 %v11942_v12  ;;  %v12007_v12 = vld [vmem:[#allocation13 + $0x63c] ss:$24 sps:$4 sm:$0xff]  }
 0x2cc   :  { %5735 = vmatprep.subr.bf16.mxu1 %v11947_v9 }
 0x2cf   :  { %5736 = vmatpush2.bf16.msra.mxu1 %v11945_v27 }
 0x2d0   :  { %5737 = vmatprep.subr.bf16.mxu1 %v11950_v37  ;;  %v12005_v37 = vld [vmem:[#allocation13 + $0x638] ss:$24 sps:$4 sm:$0xff]  }
 0x2d3   :  { %5738 = vmatpush2.bf16.msra.mxu1 %v11948_v49  ;;  %v12013_v49 = vld [vmem:[#allocation13 + $0x60c] ss:$24 sps:$4 sm:$0xff]  }
 0x2d4   :  { %5739 = vmatprep.subr.bf16.mxu1 %v11953_v38 }
 0x2d7   :  { %5740 = vmatpush2.bf16.msra.mxu1 %v11951_v13 }
 0x2d8   :  { %5741 = vmatprep.subr.bf16.mxu1 %v11956_v17  ;;  %v12011_v17 = vld [vmem:[#allocation13 + $0x608] ss:$24 sps:$4 sm:$0xff]  }
 0x2d9   :  { %v14121_v20 = vpop.f32.mrf.mxu1 }
 0x2db   :  { %5742 = vmatpush2.bf16.msra.mxu1 %v11954_v42  ;;  %v14123_v23 = vpop.f32.mrf.mxu1  ;;  %v14141_v14 = vpop.f32.mrf.mxu0  ;;  %v12019_v42 = vld [vmem:[#allocation13 + $0x8dc] ss:$24 sps:$4 sm:$0xff]  }
 0x2dc   :  { %5743 = vmatprep.subr.bf16.mxu1 %v11959_v47 }
 0x2dd   :  { %v14125_v3 = vpop.f32.mrf.mxu1  ;;  %v3460_v1 = vpop.f32.mrf.mxu0 }
 0x2df   :  { %5744 = vmatpush2.bf16.msra.mxu1 %v11957_v28  ;;  %v14127_v48 = vpop.f32.mrf.mxu1  ;;  %v3462_v27 = vpop.f32.mrf.mxu0 }
 0x2e0   :  { %5745 = vmatprep.subr.bf16.mxu1 %v11962_v29  ;;  %v12017_v29 = vld [vmem:[#allocation13 + $0x8d8] ss:$24 sps:$4 sm:$0xff]  }
 0x2e1   :  { %v14129_v10 = vpop.f32.mrf.mxu1  ;;  %v3464_v13 = vpop.f32.mrf.mxu0 }
 0x2e3   :  { %5746 = vmatpush2.bf16.msra.mxu1 %v11960_v61  ;;  %v14133_v2 = vpop.f32.mrf.mxu1  ;;  %v14154_v28 = vpop.f32.mrf.mxu0  ;;  %v12025_v61 = vld [vmem:[#allocation13 + $0x8ac] ss:$24 sps:$4 sm:$0xff]  }
 0x2e4   :  { %5747 = vmatprep.subr.bf16.mxu1 %v11965_v45 }
 0x2e5   :  { %v14135_v36 = vpop.f32.mrf.mxu1 }
 0x2e7   :  { %5748 = vmatpush2.bf16.msra.mxu1 %v11963_v0  ;;  %v14139_v46 = vpop.f32.mrf.mxu1  ;;  %v3470_v0 = vpop.f32.mrf.mxu0 }
 0x2e8   :  { %5863 = vmatprep.subr.bf16.mxu1 %v11971_v6  ;;  %v12023_v6 = vld [vmem:[#allocation13 + $0x8a8] ss:$24 sps:$4 sm:$0xff]  }
 0x2e9   :  { %v14143_v26 = vpop.f32.mrf.mxu1 }
 0x2ea   :  { %5750 = vmatmul.mubr.bf16.vlgmr.msra.gmra.mxu1 %v13935_v63 }
 0x2eb   :  { %5759 = vmatprep.mubr.bf16.mxu1 %v13966_v30  ;;  %5864 = vmatpush1.bf16.msra.mxu1 %v11969_v58  ;;  %v14147_v9 = vpop.f32.mrf.mxu1  ;;  %v12031_v58 = vld [vmem:[#allocation13 + $0x87c] ss:$24 sps:$4 sm:$0xff]  }
 0x2ec   :  { %5865 = vmatprep.subr.bf16.mxu1 %v11977_v5 }
 0x2ed   :  { %v14149_v38 = vpop.f32.mrf.mxu1 }
 0x2ef   :  { %5866 = vmatpush1.bf16.msra.mxu1 %v11975_v54  ;;  %v14152_v47 = vpop.f32.mrf.mxu1  ;;  %v3472_v54 = vpop.f32.mrf.mxu0 }
 0x2f0   :  { %5867 = vmatprep.subr.bf16.mxu1 %v11983_v16  ;;  %v12029_v16 = vld [vmem:[#allocation13 + $0x878] ss:$24 sps:$4 sm:$0xff]  }
 0x2f1   :  { %v14156_v45 = vpop.f32.mrf.mxu1 }
 0x2f2   :  { %5760 = vmatmul.mubr.bf16.gmra.mxu1 %v13973_v24 }
 0x2f3   :  { %5769 = vmatprep.mubr.bf16.mxu1 %v13995_v7  ;;  %5868 = vmatpush1.bf16.msra.mxu1 %v11981_v22  ;;  %v14158_v5 = vpop.f32.mrf.mxu1  ;;  %v14162_v22 = vrot.slane %v13870_v11, %v13115_v31 }
 0x2f4   :  { %5869 = vmatprep.subr.bf16.mxu1 %v11989_v8  ;;  %v12037_v8 = vld [vmem:[#allocation13 + $0x84c] ss:$24 sps:$4 sm:$0xff]  }
 0x2f5   :  { %v3398_v31 = vadd.f32 %v14133_v2, %v14162_v22 }
 0x2f7   :  { %5870 = vmatpush1.bf16.msra.mxu1 %v11987_v56  ;;  %v14166_v56 = vrot.slane %v13870_v11, %v13587_v25 }
 0x2f8   :  { %5871 = vmatprep.subr.bf16.mxu1 %v11995_v35  ;;  %v14168_v35 = vpop.f32.mrf.mxu1 }
 0x2f9   :  { %v3390_v11 = vadd.f32 %v14125_v3, %v14166_v56 }
 0x2fa   :  { %5770 = vmatmul.mubr.bf16.gmra.mxu1 %v13999_v32 }
 0x2fb   :  { %5779 = vmatprep.mubr.bf16.mxu1 %v14010_v51  ;;  %5872 = vmatpush1.bf16.msra.mxu1 %v11993_v62  ;;  %v14170_v62 = vpop.f32.mrf.mxu0 }
 0x2fc   :  { %5873 = vmatprep.subr.bf16.mxu1 %v12001_v52  ;;  %v12035_v52 = vld [vmem:[#allocation13 + $0x848] ss:$24 sps:$4 sm:$0xff]  }
 0x2ff   :  { %5874 = vmatpush1.bf16.msra.mxu1 %v11999_v41  ;;  %v3388_v41 = vadd.f32 %v14123_v23, %v14162_v22  ;;  %v12049_v23 = vld [vmem:[#allocation13 + $0x7ec] ss:$24 sps:$4 sm:$0xff]  }
 0x300   :  { %5875 = vmatprep.subr.bf16.mxu1 %v12007_v12  ;;  %v12043_v12 = vld [vmem:[#allocation13 + $0x81c] ss:$24 sps:$4 sm:$0xff]  }
 0x302   :  { %5780 = vmatmul.mubr.bf16.gmra.mxu1 %v14014_v57 }
 0x303   :  { %5876 = vmatpush1.bf16.msra.mxu1 %v12005_v37  ;;  %v3386_v37 = vadd.f32 %v14121_v20, %v14166_v56  ;;  %v3463_v20 = vadd.f32 %v3462_v27, %v3390_v11  ;;  %v3471_v11 = vadd.f32 %v3470_v0, %v3398_v31 }
 0x304   :  { %5877 = vmatprep.subr.bf16.mxu1 %v12013_v49  ;;  %v14176_v49 = vpop.f32.mrf.mxu1 }
 0x307   :  { %5878 = vmatpush1.bf16.msra.mxu1 %v12011_v17  ;;  %v14180_v17 = vpop.f32.mrf.mxu0 }
 0x308   :  { %5879 = vmatprep.subr.bf16.mxu1 %v12019_v42 }
 0x309   :  { %v3480_v3 = vpop.f32.mrf.mxu0 }
 0x30b   :  { %5880 = vmatpush2.bf16.msra.mxu1 %v12017_v29  ;;  %v12041_v29 = vld [vmem:[#allocation13 + $0x818] ss:$24 sps:$4 sm:$0xff]  }
 0x30c   :  { %5881 = vmatprep.subr.bf16.mxu1 %v12025_v61  ;;  %v3461_v61 = vadd.f32 %v3460_v1, %v3388_v41  ;;  %v12055_v41 = vld [vmem:[#allocation13 + $0x7bc] ss:$24 sps:$4 sm:$0xff]  }
 0x30f   :  { %5882 = vmatpush2.bf16.msra.mxu1 %v12023_v6  ;;  %v3392_v6 = vadd.f32 %v14127_v48, %v14162_v22  ;;  %v3396_v48 = vadd.f32 %v14129_v10, %v14166_v56  ;;  %v3402_v10 = vadd.f32 %v14139_v46, %v14162_v22 }
 0x310   :  { %5883 = vmatprep.subr.bf16.mxu1 %v12031_v58  ;;  %v3459_v58 = vadd.f32 %v14141_v14, %v3386_v37  ;;  %v3400_v14 = vadd.f32 %v14135_v36, %v14166_v56 }
 0x311   :  { %v3465_v19 = vadd.f32 %v3464_v13, %v3392_v6  ;;  %v12061_v6 = vld [vmem:[#allocation13 + $0x78c] ss:$24 sps:$4 sm:$0xff]  }
 0x312   :  { %v3473_v0 = vadd.f32 %v3472_v54, %v3400_v14 }
 0x313   :  { %5884 = vmatpush2.bf16.msra.mxu1 %v12029_v16 }
 0x314   :  { %5885 = vmatprep.subr.bf16.mxu1 %v12037_v8 }
 0x317   :  { %5886 = vmatpush2.bf16.msra.mxu1 %v12035_v52 }
 0x318   :  { %5887 = vmatprep.subr.bf16.mxu1 %v12043_v12 }
 0x319   :  { %v3531_v42 = vpop.f32.mrf.mxu1 }
 0x31a   :  { %v3532_v25 = vadd.f32 %v3531_v42, %v3459_v58  ;;  %v3482_v42 = vpop.f32.mrf.mxu0 }
 0x31b   :  { %v3533_v16 = vpop.f32.mrf.mxu1  ;;  %5888 = vmatpush2.bf16.msra.mxu1 %v12041_v29 }
 0x31c   :  { %v3534_v8 = vadd.f32 %v3533_v16, %v3461_v61  ;;  %5889 = vmatprep.subr.bf16.mxu1 %v12049_v23  ;;  %v3623_v13 = vmul.f32 %v13906_v53, %v3532_v25  ;;  %v12053_v61 = vld [vmem:[#allocation13 + $0x7b8] ss:$24 sps:$4 sm:$0xff]   ;;  %vm3574_vm2 = vcmp.ge.f32.partialorder %v3532_v25, 0.0  ;;  %v3469_v23 = vadd.f32 %v14154_v28, %v3396_v48  ;;  %v12070_v48 = vld [vmem:[#allocation13 + $0x42c] ss:$24 sps:$4 sm:$0xff]  }
 0x31d   :  { %v3535_v52 = vpop.f32.mrf.mxu1  ;;  %v3475_v28 = vadd.f32 %v14170_v62, %v3402_v10  ;;  %v12076_v10 = vld [vmem:[#allocation13 + $0x3fc] ss:$24 sps:$4 sm:$0xff]  }
 0x31e   :  { %v3536_v1 = vadd.f32 %v3535_v52, %v3463_v20  ;;  %v3624_v12 = vmul.f32 %v13906_v53, %v3534_v8  ;;  %vm3575_vm1 = vcmp.ge.f32.partialorder %v3534_v8, 0.0  ;;  %v3408_v20 = vadd.f32 %v14147_v9, %v14162_v22  ;;  %v3484_v52 = vpop.f32.mrf.mxu0 }
 0x31f   :  { %v3537_v27 = vpop.f32.mrf.mxu1  ;;  %5890 = vmatpush2.bf16.msra.mxu1 %v12047_v18  ;;  %v3671_v46 = vsel %vm3574_vm2, %v3532_v25, %v3623_v13  ;;  %v3406_v9 = vadd.f32 %v14143_v26, %v14166_v56  ;;  %v3410_v25 = vadd.f32 %v14149_v38, %v14166_v56  ;;  %v12068_v13 = vld [vmem:[#allocation13 + $0x428] ss:$24 sps:$4 sm:$0xff]  }
 0x320   :  { %vm3580_vm0 = vcmp.ge.f32.partialorder %v3536_v1, 0.0  ;;  %v3629_v2 = vmul.f32 %v13906_v53, %v3536_v1  ;;  %v3538_v37 = vadd.f32 %v3537_v27, %v3465_v19  ;;  %5891 = vmatprep.subr.bf16.mxu1 %v12055_v41  ;;  %v3672_v16 = vsel %vm3575_vm1, %v3534_v8, %v3624_v12  ;;  %v12067_v8 = vld [vmem:[#allocation13 + $0x464] ss:$24 sps:$4 sm:$0xff]  }
 0x321   :  { %v3541_v29 = vpop.f32.mrf.mxu1 }
 0x322   :  { %vm3581_vm3 = vcmp.ge.f32.partialorder %v3538_v37, 0.0  ;;  %v3630_v36 = vmul.f32 %v13906_v53, %v3538_v37  ;;  %v3677_v31 = vsel %vm3580_vm0, %v3536_v1, %v3629_v2  ;;  %v3542_v27 = vadd.f32 %v3541_v29, %v3469_v23 }
 0x323   :  { %v3543_v19 = vpop.f32.mrf.mxu1  ;;  %5892 = vmatpush2.bf16.msra.mxu1 %v12053_v61  ;;  %v14204_v1 = vpack.c.bf16 %v3677_v31, %v3671_v46  ;;  %v3481_v2 = vadd.f32 %v3480_v3, %v3408_v20  ;;  %v3412_v29 = vadd.f32 %v14152_v47, %v14162_v22  ;;  %v12073_v3 = vld [vmem:[#allocation13 + $0x434] ss:$24 sps:$4 sm:$0xff]   ;;  %v3418_v23 = vadd.f32 %v14158_v5, %v14162_v22  ;;  %v12074_v46 = vld [vmem:[#allocation13 + $0x3f8] ss:$24 sps:$4 sm:$0xff]  }
 0x324   :  { %v3544_v58 = vadd.f32 %v3543_v19, %v3471_v11  ;;  %v3678_v18 = vsel %vm3581_vm3, %v3538_v37, %v3630_v36  ;;  %5893 = vmatprep.subr.bf16.mxu1 %v12061_v6  ;;  %v14215_v37 = vpop.f32.mrf.mxu0  ;;  %v3635_v26 = vmul.f32 %v13906_v53, %v3542_v27  ;;  %v12065_v11 = vld [vmem:[#allocation13 + $0x460] ss:$24 sps:$4 sm:$0xff]   ;;  %vm3586_vm6 = vcmp.ge.f32.partialorder %v3542_v27, 0.0 }
 0x325   :  { %v3545_v43 = vpop.f32.mrf.mxu1  ;;  %v14201_v41 = vpack.c.bf16 %v3678_v18, %v3672_v16  ;;  %v3479_v36 = vadd.f32 %v14180_v17, %v3406_v9  ;;  %v3483_v6 = vadd.f32 %v3482_v42, %v3410_v25  ;;  %v12071_v42 = vld [vmem:[#allocation13 + $0x430] ss:$24 sps:$4 sm:$0xff]  }
 0x326   :  { %v3546_v54 = vadd.f32 %v3545_v43, %v3473_v0  ;;  %v3636_v12 = vmul.f32 %v13906_v53, %v3544_v58  ;;  %vm3587_vm5 = vcmp.ge.f32.partialorder %v3544_v58, 0.0  ;;  %v3490_v0 = vpop.f32.mrf.mxu0  ;;  %v3683_v16 = vsel %vm3586_vm6, %v3542_v27, %v3635_v26 }
 0x327   :  { %v3547_v14 = vpop.f32.mrf.mxu1  ;;  %5676 = vmatprep.mubr.bf16.mxu0 %v14201_v41  ;;  %5895 = vmatprep.mubr.bf16.mxu1 %v14201_v41  ;;  %v3420_v27 = vadd.f32 %v14168_v35, %v14166_v56  ;;  %v12077_v35 = vld [vmem:[#allocation13 + $0x400] ss:$24 sps:$4 sm:$0xff]  }
 0x328   :  { %vm3592_vm4 = vcmp.ge.f32.partialorder %v3546_v54, 0.0  ;;  %v3641_v62 = vmul.f32 %v13906_v53, %v3546_v54  ;;  %v3548_v43 = vadd.f32 %v3547_v14, %v3475_v28  ;;  %5677 = vmatmul.mubr.bf16.vlgmr.msra.gmra.mxu0 %v14204_v1  ;;  %5894 = vmatpush2.bf16.msra.mxu1 %v12059_v55  ;;  %v3684_v31 = vsel %vm3587_vm5, %v3544_v58, %v3636_v12  ;;  %v12082_v58 = vld [vmem:[#allocation13 + $0x3cc] ss:$24 sps:$4 sm:$0xff]  }
 0x329   :  { %5791 = vmatpush1.bf16.msra.mxu0 %v12062_v50  ;;  %v3551_v38 = vpop.f32.mrf.mxu1  ;;  %6009 = vmatprep.subr.bf16.mxu1 %v12067_v8  ;;  %v3485_v28 = vadd.f32 %v3484_v52, %v3412_v29  ;;  %v12079_v8 = vld [vmem:[#allocation13 + $0x404] ss:$24 sps:$4 sm:$0xff]   ;;  %v3491_v12 = vadd.f32 %v3490_v0, %v3418_v23  ;;  %v12083_v23 = vld [vmem:[#allocation13 + $0x3d0] ss:$24 sps:$4 sm:$0xff]  }
 0x32a   :  { %vm3593_vm7 = vcmp.ge.f32.partialorder %v3548_v43, 0.0  ;;  %v3642_v61 = vmul.f32 %v13906_v53, %v3548_v43  ;;  %5792 = vmatprep.subr.bf16.mxu0 %v12070_v48  ;;  %v3689_v55 = vsel %vm3592_vm4, %v3546_v54, %v3641_v62  ;;  %v3552_v18 = vadd.f32 %v3551_v38, %v3479_v36  ;;  %v3492_v62 = vpop.f32.mrf.mxu0  ;;  %v12085_v38 = vld [vmem:[#allocation13 + $0x3d4] ss:$24 sps:$4 sm:$0xff]  }
 0x32b   :  { %v3553_v50 = vpop.f32.mrf.mxu1  ;;  %5896 = vmatmul.mubr.bf16.vlgmr.msra.gmra.mxu1 %v14204_v1  ;;  %v14230_v54 = vpack.c.bf16 %v3689_v55, %v3683_v16  ;;  %v3416_v48 = vadd.f32 %v14156_v45, %v14166_v56 }
 0x32c   :  { %v3554_v47 = vadd.f32 %v3553_v50, %v3481_v2  ;;  %v3690_v19 = vsel %vm3593_vm7, %v3548_v43, %v3642_v61  ;;  %6010 = vmatpush1.bf16.msra.mxu1 %v12065_v11  ;;  %v3647_v45 = vmul.f32 %v13906_v53, %v3552_v18  ;;  %v12080_v43 = vld [vmem:[#allocation13 + $0x3c8] ss:$24 sps:$4 sm:$0xff]   ;;  %v3422_v2 = vadd.f32 %v14176_v49, %v14162_v22  ;;  %v12088_v11 = vld [vmem:[#allocation13 + $0x39c] ss:$24 sps:$4 sm:$0xff]   ;;  %v3494_v49 = vpop.f32.mrf.mxu0 }
 0x32d   :  { %5793 = vmatpush1.bf16.msra.mxu0 %v12068_v13  ;;  %v3555_v17 = vpop.f32.mrf.mxu1  ;;  %v14228_v20 = vpack.c.bf16 %v3690_v19, %v3684_v31  ;;  %6011 = vmatprep.subr.bf16.mxu1 %v12073_v3  ;;  %vm3598_vm10 = vcmp.ge.f32.partialorder %v3552_v18, 0.0  ;;  %v3489_v13 = vadd.f32 %v14215_v37, %v3416_v48  ;;  %v3493_v3 = vadd.f32 %v3492_v62, %v3420_v27  ;;  %v12086_v37 = vld [vmem:[#allocation13 + $0x398] ss:$24 sps:$4 sm:$0xff]   ;;  %v12097_v27 = vld [vmem:[#allocation13 + $0x374] ss:$24 sps:$4 sm:$0xff]  }
 0x32e   :  { %v3556_v5 = vadd.f32 %v3555_v17, %v3483_v6  ;;  %5794 = vmatprep.subr.bf16.mxu0 %v12076_v10  ;;  %v3648_v52 = vmul.f32 %v13906_v53, %v3554_v47  ;;  %vm3599_vm9 = vcmp.ge.f32.partialorder %v3554_v47, 0.0  ;;  %v3695_v6 = vsel %vm3598_vm10, %v3552_v18, %v3647_v45  ;;  %v12091_v17 = vld [vmem:[#allocation13 + $0x3a4] ss:$24 sps:$4 sm:$0xff]   ;;  %v12095_v62 = vld [vmem:[#allocation13 + $0x370] ss:$24 sps:$4 sm:$0xff]  }
 0x32f   :  { %v3557_v9 = vpop.f32.mrf.mxu1  ;;  %5686 = vmatprep.mubr.bf16.mxu0 %v14228_v20  ;;  %5905 = vmatprep.mubr.bf16.mxu1 %v14228_v20  ;;  %v3495_v19 = vadd.f32 %v3494_v49, %v3422_v2  ;;  %v12101_v2 = vld [vmem:[#allocation13 + $0x340] ss:$24 sps:$4 sm:$0xff]   ;;  %v12124_v49 = vld [vmem:[#allocation13 + $0x57c] ss:$24 sps:$4 sm:$0xff]  }
 0x330   :  { %vm3604_vm8 = vcmp.ge.f32.partialorder %v3556_v5, 0.0  ;;  %v3653_v25 = vmul.f32 %v13906_v53, %v3556_v5  ;;  %v3558_v14 = vadd.f32 %v3557_v9, %v3485_v28  ;;  %5687 = vmatmul.mubr.bf16.gmra.mxu0 %v14230_v54  ;;  %6012 = vmatpush1.bf16.msra.mxu1 %v12071_v42  ;;  %v3696_v36 = vsel %vm3599_vm9, %v3554_v47, %v3648_v52  ;;  %v12094_v47 = vld [vmem:[#allocation13 + $0x36c] ss:$24 sps:$4 sm:$0xff]   ;;  %v12100_v9 = vld [vmem:[#allocation13 + $0x33c] ss:$24 sps:$4 sm:$0xff]  }
 0x331   :  { %5795 = vmatpush1.bf16.msra.mxu0 %v12074_v46  ;;  %v3561_v56 = vpop.f32.mrf.mxu1  ;;  %6013 = vmatprep.subr.bf16.mxu1 %v12079_v8  ;;  %v12089_v8 = vld [vmem:[#allocation13 + $0x3a0] ss:$24 sps:$4 sm:$0xff]  }
 0x332   :  { %vm3605_vm11 = vcmp.ge.f32.partialorder %v3558_v14, 0.0  ;;  %v3654_v26 = vmul.f32 %v13906_v53, %v3558_v14  ;;  %5796 = vmatprep.subr.bf16.mxu0 %v12082_v58  ;;  %v3701_v29 = vsel %vm3604_vm8, %v3556_v5, %v3653_v25  ;;  %v3562_v55 = vadd.f32 %v3561_v56, %v3489_v13  ;;  %v12092_v58 = vld [vmem:[#allocation13 + $0x368] ss:$24 sps:$4 sm:$0xff]   ;;  %v12098_v56 = vld [vmem:[#allocation13 + $0x338] ss:$24 sps:$4 sm:$0xff]  }
 0x333   :  { %v3563_v61 = vpop.f32.mrf.mxu1  ;;  %5906 = vmatmul.mubr.bf16.gmra.mxu1 %v14230_v54  ;;  %v14252_v0 = vpack.c.bf16 %v3701_v29, %v3695_v6  ;;  %v12107_v13 = vld [vmem:[#allocation13 + $0x310] ss:$24 sps:$4 sm:$0xff]  }
 0x334   :  { %v3564_v10 = vadd.f32 %v3563_v61, %v3491_v12  ;;  %v3702_v22 = vsel %vm3605_vm11, %v3558_v14, %v3654_v26  ;;  %6014 = vmatpush1.bf16.msra.mxu1 %v12077_v35  ;;  %v3659_v5 = vmul.f32 %v13906_v53, %v3562_v55  ;;  %vm3610_vm14 = vcmp.ge.f32.partialorder %v3562_v55, 0.0  ;;  %v12104_v26 = vld [vmem:[#allocation13 + $0x308] ss:$24 sps:$4 sm:$0xff]   ;;  %v12110_v29 = vld [vmem:[#allocation13 + $0x5d8] ss:$24 sps:$4 sm:$0xff]  }
 0x335   :  { %5797 = vmatpush1.bf16.msra.mxu0 %v12080_v43  ;;  %v3565_v50 = vpop.f32.mrf.mxu1  ;;  %v14250_v31 = vpack.c.bf16 %v3702_v22, %v3696_v36  ;;  %6015 = vmatprep.subr.bf16.mxu1 %v12085_v38  ;;  %v12106_v43 = vld [vmem:[#allocation13 + $0x30c] ss:$24 sps:$4 sm:$0xff]   ;;  %v12116_v36 = vld [vmem:[#allocation13 + $0x5a8] ss:$24 sps:$4 sm:$0xff]  }
 0x336   :  { %v3566_v16 = vadd.f32 %v3565_v50, %v3493_v3  ;;  %5798 = vmatprep.subr.bf16.mxu0 %v12088_v11  ;;  %v3660_v18 = vmul.f32 %v13906_v53, %v3564_v10  ;;  %vm3611_vm13 = vcmp.ge.f32.partialorder %v3564_v10, 0.0  ;;  %v3707_v12 = vsel %vm3610_vm14, %v3562_v55, %v3659_v5  ;;  %v12109_v38 = vld [vmem:[#allocation13 + $0x314] ss:$24 sps:$4 sm:$0xff]   ;;  %v12115_v61 = vld [vmem:[#allocation13 + $0x5e4] ss:$24 sps:$4 sm:$0xff]  }
 0x337   :  { %v3567_v42 = vpop.f32.mrf.mxu1  ;;  %5696 = vmatprep.mubr.bf16.mxu0 %v14250_v31  ;;  %5915 = vmatprep.mubr.bf16.mxu1 %v14250_v31  ;;  %v12112_v11 = vld [vmem:[#allocation13 + $0x5dc] ss:$24 sps:$4 sm:$0xff]   ;;  %v12118_v3 = vld [vmem:[#allocation13 + $0x5ac] ss:$24 sps:$4 sm:$0xff]   ;;  %v12119_v6 = vld [vmem:[#allocation13 + $0x5b0] ss:$24 sps:$4 sm:$0xff]  }
 0x338   :  { %vm3616_vm12 = vcmp.ge.f32.partialorder %v3566_v16, 0.0  ;;  %v3665_v46 = vmul.f32 %v13906_v53, %v3566_v16  ;;  %v3568_v28 = vadd.f32 %v3567_v42, %v3495_v19  ;;  %5697 = vmatmul.mubr.bf16.gmra.mxu0 %v14252_v0  ;;  %6016 = vmatpush1.bf16.msra.mxu1 %v12083_v23  ;;  %v3708_v25 = vsel %vm3611_vm13, %v3564_v10, %v3660_v18  ;;  %v12113_v10 = vld [vmem:[#allocation13 + $0x5e0] ss:$24 sps:$4 sm:$0xff]   ;;  %v12121_v22 = vld [vmem:[#allocation13 + $0x5b4] ss:$24 sps:$4 sm:$0xff]  }
 0x339   :  { %5799 = vmatpush1.bf16.msra.mxu0 %v12086_v37  ;;  %6017 = vmatprep.subr.bf16.mxu1 %v12091_v17  ;;  %v12127_v55 = vld [vmem:[#allocation13 + $0x584] ss:$24 sps:$4 sm:$0xff]   ;;  %v12125_v23 = vld [vmem:[#allocation13 + $0x580] ss:$24 sps:$4 sm:$0xff]   ;;  %v12133_v19 = vld [vmem:[#allocation13 + $0x554] ss:$24 sps:$4 sm:$0xff]  }
 0x33a   :  { %vm3617_vm15 = vcmp.ge.f32.partialorder %v3568_v28, 0.0  ;;  %v3666_v48 = vmul.f32 %v13906_v53, %v3568_v28  ;;  %5800 = vmatprep.subr.bf16.mxu0 %v12094_v47  ;;  %v3713_v52 = vsel %vm3616_vm12, %v3566_v16, %v3665_v46  ;;  %v12103_v53 = vld [vmem:[#allocation13 + $0x344] ss:$24 sps:$4 sm:$0xff]   ;;  %v12128_v37 = vld [vmem:[#allocation13 + $0x548] ss:$24 sps:$4 sm:$0xff]  }
 0x33b   :  { %5916 = vmatmul.mubr.bf16.gmra.mxu1 %v14252_v0  ;;  %v14265_v35 = vpack.c.bf16 %v3713_v52, %v3707_v12  ;;  %v12130_v50 = vld [vmem:[#allocation13 + $0x54c] ss:$24 sps:$4 sm:$0xff]   ;;  %v12136_v16 = vld [vmem:[#allocation13 + $0x51c] ss:$24 sps:$4 sm:$0xff]   ;;  %v12131_v17 = vld [vmem:[#allocation13 + $0x550] ss:$24 sps:$4 sm:$0xff]  }
 0x33c   :  { %v3714_v14 = vsel %vm3617_vm15, %v3568_v28, %v3666_v48  ;;  %6018 = vmatpush1.bf16.msra.mxu1 %v12089_v8  ;;  %v12134_v47 = vld [vmem:[#allocation13 + $0x518] ss:$24 sps:$4 sm:$0xff]   ;;  %v12139_v42 = vld [vmem:[#allocation13 + $0x524] ss:$24 sps:$4 sm:$0xff]   ;;  %v12140_v28 = vld [vmem:[#allocation13 + $0x4e8] ss:$24 sps:$4 sm:$0xff]  }
 0x33d   :  { %5801 = vmatpush1.bf16.msra.mxu0 %v12092_v58  ;;  %v14263_v45 = vpack.c.bf16 %v3714_v14, %v3708_v25  ;;  %6019 = vmatprep.subr.bf16.mxu1 %v12097_v27  ;;  %v12142_v18 = vld [vmem:[#allocation13 + $0x4ec] ss:$24 sps:$4 sm:$0xff]   ;;  %v12137_v46 = vld [vmem:[#allocation13 + $0x520] ss:$24 sps:$4 sm:$0xff]   ;;  %v12148_v8 = vld [vmem:[#allocation13 + $0x4bc] ss:$24 sps:$4 sm:$0xff]  }
 0x33e   :  { %5802 = vmatprep.subr.bf16.mxu0 %v12100_v9  ;;  %v12145_v5 = vld [vmem:[#allocation13 + $0x4f4] ss:$24 sps:$4 sm:$0xff]   ;;  %v12143_v58 = vld [vmem:[#allocation13 + $0x4f0] ss:$24 sps:$4 sm:$0xff]   ;;  %v12151_v27 = vld [vmem:[#allocation13 + $0x4c4] ss:$24 sps:$4 sm:$0xff]  }
 0x33f   :  { %5706 = vmatprep.mubr.bf16.mxu0 %v14263_v45  ;;  %5925 = vmatprep.mubr.bf16.mxu1 %v14263_v45  ;;  %v12146_v48 = vld [vmem:[#allocation13 + $0x4b8] ss:$24 sps:$4 sm:$0xff]   ;;  %v12154_v9 = vld [vmem:[#allocation13 + $0x48c] ss:$24 sps:$4 sm:$0xff]   ;;  %v12152_v25 = vld [vmem:[#allocation13 + $0x488] ss:$24 sps:$4 sm:$0xff]  }
 0x340   :  { %5707 = vmatmul.mubr.bf16.gmra.mxu0 %v14265_v35  ;;  %6020 = vmatpush1.bf16.msra.mxu1 %v12095_v62  ;;  %v12149_v52 = vld [vmem:[#allocation13 + $0x4c0] ss:$24 sps:$4 sm:$0xff]   ;;  %v12157_v14 = vld [vmem:[#allocation13 + $0x494] ss:$24 sps:$4 sm:$0xff]   ;;  %v12160_v12 = vld [vmem:[#allocation13 + $0x164] ss:$24 sps:$4 sm:$0xff]  }
 0x341   :  { %5803 = vmatpush1.bf16.msra.mxu0 %v12098_v56  ;;  %5822 = vmatprep.mubr.bf16.mxu0 %v14060_v60  ;;  %v12155_v62 = vld [vmem:[#allocation13 + $0x490] ss:$24 sps:$4 sm:$0xff]   ;;  %v12158_v56 = vld [vmem:[#allocation13 + $0x160] ss:$24 sps:$4 sm:$0xff]  }
 0x342   :  { %6021 = vmatprep.subr.bf16.mxu1 %v12103_v53  ;;  %5804 = vmatprep.subr.bf16.mxu0 %v12106_v43  ;;  %v12163_v53 = vld [vmem:[#allocation13 + $0x134] ss:$24 sps:$4 sm:$0xff]  }
 0x343   :  { %5926 = vmatmul.mubr.bf16.gmra.mxu1 %v14265_v35  ;;  %v12229_v43 = vld [vmem:[#allocation14 + $0x154] ss:$24 sps:$4 sm:$0xff]  }
 0x344   :  { %6022 = vmatpush1.bf16.msra.mxu1 %v12101_v2  ;;  %6041 = vmatprep.mubr.bf16.mxu1 %v14060_v60  ;;  %v12122_v60 = vld [vmem:[#allocation13 + $0x578] ss:$24 sps:$4 sm:$0xff]  }
 0x345   :  { %5805 = vmatpush1.bf16.msra.mxu0 %v12104_v26  ;;  %6023 = vmatprep.subr.bf16.mxu1 %v12109_v38  ;;  %v12227_v2 = vld [vmem:[#allocation14 + $0x150] ss:$24 sps:$4 sm:$0xff]   ;;  %v12235_v38 = vld [vmem:[#allocation14 + $0x124] ss:$24 sps:$4 sm:$0xff]  }
 0x346   :  { %5806 = vmatprep.subr.bf16.mxu0 %v12112_v11  ;;  %v12161_v26 = vld [vmem:[#allocation13 + $0x130] ss:$24 sps:$4 sm:$0xff]   ;;  %v12166_v11 = vld [vmem:[#allocation13 + $0x104] ss:$24 sps:$4 sm:$0xff]  }
 0x348   :  { %6024 = vmatpush1.bf16.msra.mxu1 %v12107_v13  ;;  %v12233_v13 = vld [vmem:[#allocation14 + $0x120] ss:$24 sps:$4 sm:$0xff]  }
 0x349   :  { %5807 = vmatpush2.bf16.msra.mxu0 %v12110_v29  ;;  %6025 = vmatprep.subr.bf16.mxu1 %v12115_v61  ;;  %v12164_v29 = vld [vmem:[#allocation13 + $0x100] ss:$24 sps:$4 sm:$0xff]   ;;  %v12169_v61 = vld [vmem:[#allocation13 + $0xd4] ss:$24 sps:$4 sm:$0xff]  }
 0x34a   :  { %5808 = vmatprep.subr.bf16.mxu0 %v12118_v3  ;;  %v12241_v3 = vld [vmem:[#allocation14 + $0xf4] ss:$24 sps:$4 sm:$0xff]  }
 0x34c   :  { %6026 = vmatpush2.bf16.msra.mxu1 %v12113_v10  ;;  %v12239_v10 = vld [vmem:[#allocation14 + $0xf0] ss:$24 sps:$4 sm:$0xff]  }
 0x34d   :  { %5809 = vmatpush2.bf16.msra.mxu0 %v12116_v36  ;;  %6027 = vmatprep.subr.bf16.mxu1 %v12121_v22  ;;  %v12167_v36 = vld [vmem:[#allocation13 + $0xd0] ss:$24 sps:$4 sm:$0xff]   ;;  %v12247_v22 = vld [vmem:[#allocation14 + $0xc4] ss:$24 sps:$4 sm:$0xff]  }
 0x34e   :  { %5810 = vmatprep.subr.bf16.mxu0 %v12124_v49  ;;  %v12170_v49 = vld [vmem:[#allocation13 + $0xa0] ss:$24 sps:$4 sm:$0xff]  }
 0x350   :  { %6028 = vmatpush2.bf16.msra.mxu1 %v12119_v6  ;;  %v12175_v6 = vld [vmem:[#allocation13 + $0x74] ss:$24 sps:$4 sm:$0xff]  }
 0x351   :  { %5811 = vmatpush2.bf16.msra.mxu0 %v12122_v60  ;;  %6029 = vmatprep.subr.bf16.mxu1 %v12127_v55  ;;  %v12253_v60 = vld [vmem:[#allocation14 + $0x94] ss:$24 sps:$4 sm:$0xff]   ;;  %v12251_v55 = vld [vmem:[#allocation14 + $0x90] ss:$24 sps:$4 sm:$0xff]  }
 0x352   :  { %5812 = vmatprep.subr.bf16.mxu0 %v12130_v50  ;;  %v12173_v50 = vld [vmem:[#allocation13 + $0x70] ss:$24 sps:$4 sm:$0xff]  }
 0x354   :  { %6030 = vmatpush2.bf16.msra.mxu1 %v12125_v23  ;;  %v12259_v23 = vld [vmem:[#allocation14 + $0x64] ss:$24 sps:$4 sm:$0xff]  }
 0x355   :  { %5813 = vmatpush2.bf16.msra.mxu0 %v12128_v37  ;;  %6031 = vmatprep.subr.bf16.mxu1 %v12133_v19  ;;  %v12176_v37 = vld [vmem:[#allocation13 + $0x40] ss:$24 sps:$4 sm:$0xff]   ;;  %v12181_v19 = vld [vmem:[#allocation13 + $0x14] ss:$24 sps:$4 sm:$0xff]  }
 0x356   :  { %5814 = vmatprep.subr.bf16.mxu0 %v12136_v16  ;;  %v12265_v16 = vld [vmem:[#allocation14 + $0x34] ss:$24 sps:$4 sm:$0xff]  }
 0x358   :  { %6032 = vmatpush2.bf16.msra.mxu1 %v12131_v17  ;;  %v12263_v17 = vld [vmem:[#allocation14 + $0x30] ss:$24 sps:$4 sm:$0xff]  }
 0x359   :  { %5815 = vmatpush2.bf16.msra.mxu0 %v12134_v47  ;;  %6033 = vmatprep.subr.bf16.mxu1 %v12139_v42  ;;  %v12179_v47 = vld [vmem:[#allocation13 + $0x10] ss:$24 sps:$4 sm:$0xff]   ;;  %v12271_v42 = vld [vmem:[#allocation14 + $0x4] ss:$24 sps:$4 sm:$0xff]  }
 0x35a   :  { %5816 = vmatprep.subr.bf16.mxu0 %v12142_v18  ;;  %v12182_v18 = vld [vmem:[#allocation13 + $0x2e0] ss:$24 sps:$4 sm:$0xff]  }
 0x35c   :  { %6034 = vmatpush2.bf16.msra.mxu1 %v12137_v46  ;;  %v12277_v46 = vld [vmem:[#allocation14 + $0x2d4] ss:$24 sps:$4 sm:$0xff]  }
 0x35d   :  { %5817 = vmatpush2.bf16.msra.mxu0 %v12140_v28  ;;  %6035 = vmatprep.subr.bf16.mxu1 %v12145_v5  ;;  %v12187_v28 = vld [vmem:[#allocation13 + $0x2b4] ss:$24 sps:$4 sm:$0xff]   ;;  %v12275_v5 = vld [vmem:[#allocation14 + $0x2d0] ss:$24 sps:$4 sm:$0xff]  }
 0x35e   :  { %5818 = vmatprep.subr.bf16.mxu0 %v12148_v8  ;;  %v12185_v8 = vld [vmem:[#allocation13 + $0x2b0] ss:$24 sps:$4 sm:$0xff]  }
 0x360   :  { %6036 = vmatpush2.bf16.msra.mxu1 %v12143_v58  ;;  %v12190_v58 = vld [vmem:[#allocation13 + $0x284] ss:$24 sps:$4 sm:$0xff]  }
 0x361   :  { %5819 = vmatpush2.bf16.msra.mxu0 %v12146_v48  ;;  %6037 = vmatprep.subr.bf16.mxu1 %v12151_v27  ;;  %v12281_v48 = vld [vmem:[#allocation14 + $0x2a0] ss:$24 sps:$4 sm:$0xff]   ;;  %v12286_v27 = vld [vmem:[#allocation14 + $0x274] ss:$24 sps:$4 sm:$0xff]  }
 0x362   :  { %5820 = vmatprep.subr.bf16.mxu0 %v12154_v9  ;;  %v12193_v9 = vld [vmem:[#allocation13 + $0x254] ss:$24 sps:$4 sm:$0xff]  }
 0x364   :  { %6038 = vmatpush2.bf16.msra.mxu1 %v12149_v52 }
 0x365   :  { %5821 = vmatpush2.bf16.msra.mxu0 %v12152_v25  ;;  %6039 = vmatprep.subr.bf16.mxu1 %v12157_v14  ;;  %v12284_v25 = vld [vmem:[#allocation14 + $0x270] ss:$24 sps:$4 sm:$0xff]  }
 0x366   :  { %5936 = vmatprep.subr.bf16.mxu0 %v12160_v12  ;;  %v12191_v14 = vld [vmem:[#allocation13 + $0x250] ss:$24 sps:$4 sm:$0xff]   ;;  %v12289_v12 = vld [vmem:[#allocation14 + $0x244] ss:$24 sps:$4 sm:$0xff]  }
 0x368   :  { %6040 = vmatpush2.bf16.msra.mxu1 %v12155_v62  ;;  %5823 = vmatmul.mubr.bf16.vlgmr.msra.gmra.mxu0 %v14064_v21  ;;  %v12196_v62 = vld [vmem:[#allocation13 + $0x224] ss:$24 sps:$4 sm:$0xff]  }
 0x369   :  { %5832 = vmatprep.mubr.bf16.mxu0 %v14081_v4  ;;  %5937 = vmatpush1.bf16.msra.mxu0 %v12158_v56 }
 0x36a   :  { %5938 = vmatprep.subr.bf16.mxu0 %v12163_v53  ;;  %8433 = vmatprep.subr.bf16.mxu1 %v12229_v43  ;;  %v14288_v52 = vpop.f32.mrf.mxu1  ;;  %v12287_v53 = vld [vmem:[#allocation14 + $0x240] ss:$24 sps:$4 sm:$0xff]  }
 0x36b   :  { %6042 = vmatmul.mubr.bf16.vlgmr.msra.gmra.mxu1 %v14064_v21  ;;  %v12172_v21 = vld [vmem:[#allocation13 + $0xa4] ss:$24 sps:$4 sm:$0xff]   ;;  %v12194_v43 = vld [vmem:[#allocation13 + $0x220] ss:$24 sps:$4 sm:$0xff]  }
 0x36c   :  { %6051 = vmatprep.mubr.bf16.mxu1 %v14081_v4  ;;  %8434 = vmatpush1.bf16.msra.mxu1 %v12227_v2  ;;  %v12245_v4 = vld [vmem:[#allocation14 + $0xc0] ss:$24 sps:$4 sm:$0xff]   ;;  %v14290_v56 = vpop.f32.mrf.mxu1  ;;  %v12292_v2 = vld [vmem:[#allocation14 + $0x214] ss:$24 sps:$4 sm:$0xff]  }
 0x36d   :  { %5939 = vmatpush1.bf16.msra.mxu0 %v12161_v26  ;;  %8435 = vmatprep.subr.bf16.mxu1 %v12235_v38  ;;  %v12199_v26 = vld [vmem:[#allocation13 + $0x1f4] ss:$24 sps:$4 sm:$0xff]  }
 0x36e   :  { %5940 = vmatprep.subr.bf16.mxu0 %v12166_v11  ;;  %v14292_v38 = vpop.f32.mrf.mxu1  ;;  %v12290_v11 = vld [vmem:[#allocation14 + $0x210] ss:$24 sps:$4 sm:$0xff]  }
 0x370   :  { %5833 = vmatmul.mubr.bf16.gmra.mxu0 %v14086_v59  ;;  %8436 = vmatpush1.bf16.msra.mxu1 %v12233_v13  ;;  %v12197_v13 = vld [vmem:[#allocation13 + $0x1f0] ss:$24 sps:$4 sm:$0xff]  }
 0x371   :  { %5842 = vmatprep.mubr.bf16.mxu0 %v14103_v44  ;;  %5941 = vmatpush1.bf16.msra.mxu0 %v12164_v29  ;;  %v12295_v29 = vld [vmem:[#allocation14 + $0x1e4] ss:$24 sps:$4 sm:$0xff]  }
 0x372   :  { %5942 = vmatprep.subr.bf16.mxu0 %v12169_v61  ;;  %8437 = vmatprep.subr.bf16.mxu1 %v12241_v3  ;;  %v12202_v61 = vld [vmem:[#allocation13 + $0x1c4] ss:$24 sps:$4 sm:$0xff]   ;;  %v14294_v3 = vpop.f32.mrf.mxu1 }
 0x373   :  { %6052 = vmatmul.mubr.bf16.gmra.mxu1 %v14086_v59  ;;  %v12178_v59 = vld [vmem:[#allocation13 + $0x44] ss:$24 sps:$4 sm:$0xff]  }
 0x374   :  { %6061 = vmatprep.mubr.bf16.mxu1 %v14103_v44  ;;  %8438 = vmatpush1.bf16.msra.mxu1 %v12239_v10  ;;  %v12257_v44 = vld [vmem:[#allocation14 + $0x60] ss:$24 sps:$4 sm:$0xff]  }
 0x375   :  { %5943 = vmatpush1.bf16.msra.mxu0 %v12167_v36  ;;  %8439 = vmatprep.subr.bf16.mxu1 %v12247_v22  ;;  %v12293_v10 = vld [vmem:[#allocation14 + $0x1e0] ss:$24 sps:$4 sm:$0xff]   ;;  %v12298_v22 = vld [vmem:[#allocation14 + $0x1b4] ss:$24 sps:$4 sm:$0xff]  }
 0x376   :  { %5944 = vmatprep.subr.bf16.mxu0 %v12172_v21  ;;  %v12200_v36 = vld [vmem:[#allocation13 + $0x1c0] ss:$24 sps:$4 sm:$0xff]   ;;  %v12205_v21 = vld [vmem:[#allocation13 + $0x194] ss:$24 sps:$4 sm:$0xff]  }
 0x378   :  { %5843 = vmatmul.mubr.bf16.gmra.mxu0 %v14107_v15  ;;  %8440 = vmatpush1.bf16.msra.mxu1 %v12245_v4  ;;  %v14296_v4 = vpop.f32.mrf.mxu1 }
 0x379   :  { %5852 = vmatprep.mubr.bf16.mxu0 %v14114_v39  ;;  %5945 = vmatpush1.bf16.msra.mxu0 %v12170_v49  ;;  %v12296_v49 = vld [vmem:[#allocation14 + $0x1b0] ss:$24 sps:$4 sm:$0xff]  }
 0x37a   :  { %5946 = vmatprep.subr.bf16.mxu0 %v12175_v6  ;;  %8441 = vmatprep.subr.bf16.mxu1 %v12253_v60  ;;  %v12203_v6 = vld [vmem:[#allocation13 + $0x190] ss:$24 sps:$4 sm:$0xff]   ;;  %v12301_v60 = vld [vmem:[#allocation14 + $0x184] ss:$24 sps:$4 sm:$0xff]  }
 0x37b   :  { %6062 = vmatmul.mubr.bf16.gmra.mxu1 %v14107_v15  ;;  %v12184_v15 = vld [vmem:[#allocation13 + $0x2e4] ss:$24 sps:$4 sm:$0xff]  }
 0x37c   :  { %6071 = vmatprep.mubr.bf16.mxu1 %v14114_v39  ;;  %8442 = vmatpush1.bf16.msra.mxu1 %v12251_v55  ;;  %v12269_v39 = vld [vmem:[#allocation14] ss:$24 sps:$4 sm:$0xff]   ;;  %v12208_v55 = vld [vmem:[#allocation13 + $0x764] ss:$24 sps:$4 sm:$0xff]  }
 0x37d   :  { %5947 = vmatpush1.bf16.msra.mxu0 %v12173_v50  ;;  %8443 = vmatprep.subr.bf16.mxu1 %v12259_v23  ;;  %v14298_v50 = vpop.f32.mrf.mxu1  ;;  %v12299_v23 = vld [vmem:[#allocation14 + $0x180] ss:$24 sps:$4 sm:$0xff]  }
 0x37e   :  { %5948 = vmatprep.subr.bf16.mxu0 %v12178_v59  ;;  %v12206_v59 = vld [vmem:[#allocation13 + $0x760] ss:$24 sps:$4 sm:$0xff]  }
 0x380   :  { %5853 = vmatmul.mubr.bf16.gmra.mxu0 %v14117_v40  ;;  %8444 = vmatpush1.bf16.msra.mxu1 %v12257_v44  ;;  %v12211_v44 = vld [vmem:[#allocation13 + $0x734] ss:$24 sps:$4 sm:$0xff]  }
 0x381   :  { %5949 = vmatpush1.bf16.msra.mxu0 %v12176_v37  ;;  %5968 = vmatprep.mubr.bf16.mxu0 %v13933_v34  ;;  %v12283_v34 = vld [vmem:[#allocation14 + $0x2a4] ss:$24 sps:$4 sm:$0xff]   ;;  %v14300_v37 = vpop.f32.mrf.mxu1 }
 0x382   :  { %5950 = vmatprep.subr.bf16.mxu0 %v12181_v19  ;;  %8445 = vmatprep.subr.bf16.mxu1 %v12265_v16  ;;  %v14303_v19 = vpop.f32.mrf.mxu0  ;;  %v12209_v16 = vld [vmem:[#allocation13 + $0x730] ss:$24 sps:$4 sm:$0xff]  }
 0x383   :  { %6072 = vmatmul.mubr.bf16.gmra.mxu1 %v14117_v40  ;;  %v12188_v40 = vld [vmem:[#allocation13 + $0x280] ss:$24 sps:$4 sm:$0xff]  }
 0x384   :  { %8446 = vmatpush1.bf16.msra.mxu1 %v12263_v17  ;;  %v12214_v17 = vld [vmem:[#allocation13 + $0x704] ss:$24 sps:$4 sm:$0xff]  }
 0x385   :  { %5951 = vmatpush1.bf16.msra.mxu0 %v12179_v47  ;;  %8447 = vmatprep.subr.bf16.mxu1 %v12271_v42  ;;  %v14306_v47 = vpop.f32.mrf.mxu1  ;;  %v14308_v42 = vpop.f32.mrf.mxu0 }
 0x386   :  { %5952 = vmatprep.subr.bf16.mxu0 %v12184_v15  ;;  %v12212_v15 = vld [vmem:[#allocation13 + $0x700] ss:$24 sps:$4 sm:$0xff]  }
 0x388   :  { %8448 = vmatpush1.bf16.msra.mxu1 %v12269_v39  ;;  %v12217_v39 = vld [vmem:[#allocation13 + $0x6d4] ss:$24 sps:$4 sm:$0xff]  }
 0x389   :  { %5953 = vmatpush2.bf16.msra.mxu0 %v12182_v18  ;;  %8449 = vmatprep.subr.bf16.mxu1 %v12277_v46  ;;  %v14310_v18 = vpop.f32.mrf.mxu1  ;;  %v12220_v46 = vld [vmem:[#allocation13 + $0x6a4] ss:$24 sps:$4 sm:$0xff]  }
 0x38a   :  { %5954 = vmatprep.subr.bf16.mxu0 %v12187_v28 }
 0x38b   :  { %v14316_v28 = vpop.f32.mrf.mxu1 }
 0x38c   :  { %8450 = vmatpush2.bf16.msra.mxu1 %v12275_v5 }
 0x38d   :  { %5955 = vmatpush2.bf16.msra.mxu0 %v12185_v8  ;;  %8451 = vmatprep.subr.bf16.mxu1 %v12283_v34  ;;  %v12218_v8 = vld [vmem:[#allocation13 + $0x6a0] ss:$24 sps:$4 sm:$0xff]   ;;  %v12223_v34 = vld [vmem:[#allocation13 + $0x674] ss:$24 sps:$4 sm:$0xff]  }
 0x38e   :  { %5956 = vmatprep.subr.bf16.mxu0 %v12190_v58  ;;  %v14320_v58 = vpop.f32.mrf.mxu1 }
 0x390   :  { %8452 = vmatpush2.bf16.msra.mxu1 %v12281_v48  ;;  %v12226_v48 = vld [vmem:[#allocation13 + $0x644] ss:$24 sps:$4 sm:$0xff]  }
 0x391   :  { %5957 = vmatpush2.bf16.msra.mxu0 %v12188_v40  ;;  %8453 = vmatprep.subr.bf16.mxu1 %v12286_v27  ;;  %v14326_v40 = vpop.f32.mrf.mxu1 }
 0x392   :  { %5958 = vmatprep.subr.bf16.mxu0 %v12193_v9  ;;  %v12224_v9 = vld [vmem:[#allocation13 + $0x640] ss:$24 sps:$4 sm:$0xff]  }
 0x394   :  { %8454 = vmatpush2.bf16.msra.mxu1 %v12284_v25  ;;  %v12232_v25 = vld [vmem:[#allocation13 + $0x614] ss:$24 sps:$4 sm:$0xff]  }
 0x395   :  { %5959 = vmatpush2.bf16.msra.mxu0 %v12191_v14  ;;  %8455 = vmatprep.subr.bf16.mxu1 %v12289_v12  ;;  %v14330_v14 = vpop.f32.mrf.mxu1  ;;  %v12238_v12 = vld [vmem:[#allocation13 + $0x8e4] ss:$24 sps:$4 sm:$0xff]  }
 0x396   :  { %5960 = vmatprep.subr.bf16.mxu0 %v12196_v62 }
 0x397   :  { %v14336_v62 = vpop.f32.mrf.mxu1 }
 0x398   :  { %8456 = vmatpush2.bf16.msra.mxu1 %v12287_v53 }
 0x399   :  { %5961 = vmatpush2.bf16.msra.mxu0 %v12194_v43  ;;  %8457 = vmatprep.subr.bf16.mxu1 %v12292_v2  ;;  %v12236_v43 = vld [vmem:[#allocation13 + $0x8e0] ss:$24 sps:$4 sm:$0xff]   ;;  %v12244_v2 = vld [vmem:[#allocation13 + $0x8b4] ss:$24 sps:$4 sm:$0xff]  }
 0x39a   :  { %5962 = vmatprep.subr.bf16.mxu0 %v12199_v26  ;;  %v14340_v26 = vpop.f32.mrf.mxu1 }
 0x39c   :  { %8458 = vmatpush2.bf16.msra.mxu1 %v12290_v11 }
 0x39d   :  { %5963 = vmatpush2.bf16.msra.mxu0 %v12197_v13  ;;  %8459 = vmatprep.subr.bf16.mxu1 %v12295_v29  ;;  %v12250_v13 = vld [vmem:[#allocation13 + $0x884] ss:$24 sps:$4 sm:$0xff]  }
 0x39e   :  { %5964 = vmatprep.subr.bf16.mxu0 %v12202_v61  ;;  %v12248_v61 = vld [vmem:[#allocation13 + $0x880] ss:$24 sps:$4 sm:$0xff]  }
 0x3a0   :  { %8460 = vmatpush2.bf16.msra.mxu1 %v12293_v10 }
 0x3a1   :  { %5965 = vmatpush2.bf16.msra.mxu0 %v12200_v36  ;;  %8461 = vmatprep.subr.bf16.mxu1 %v12298_v22  ;;  %v12256_v36 = vld [vmem:[#allocation13 + $0x854] ss:$24 sps:$4 sm:$0xff]  }
 0x3a2   :  { %5966 = vmatprep.subr.bf16.mxu0 %v12205_v21  ;;  %v12254_v21 = vld [vmem:[#allocation13 + $0x850] ss:$24 sps:$4 sm:$0xff]  }
 0x3a4   :  { %8462 = vmatpush2.bf16.msra.mxu1 %v12296_v49 }
 0x3a5   :  { %5967 = vmatpush2.bf16.msra.mxu0 %v12203_v6  ;;  %8463 = vmatprep.subr.bf16.mxu1 %v12301_v60  ;;  %v12262_v6 = vld [vmem:[#allocation13 + $0x824] ss:$24 sps:$4 sm:$0xff]  }
 0x3a6   :  { %6082 = vmatprep.subr.bf16.mxu0 %v12208_v55  ;;  %v12260_v55 = vld [vmem:[#allocation13 + $0x820] ss:$24 sps:$4 sm:$0xff]  }
 0x3a8   :  { %5969 = vmatmul.mubr.bf16.vlgmr.msra.gmra.mxu0 %v13935_v63  ;;  %8464 = vmatpush2.bf16.msra.mxu1 %v12299_v23  ;;  %v14313_v63 = vpop.f32.mrf.mxu0 }
 0x3a9   :  { %5978 = vmatprep.mubr.bf16.mxu0 %v13966_v30  ;;  %6083 = vmatpush1.bf16.msra.mxu0 %v12206_v59  ;;  %v12215_v30 = vld [vmem:[#allocation13 + $0x6d0] ss:$24 sps:$4 sm:$0xff]   ;;  %v12268_v59 = vld [vmem:[#allocation13 + $0x7f4] ss:$24 sps:$4 sm:$0xff]  }
 0x3aa   :  { %6084 = vmatprep.subr.bf16.mxu0 %v12211_v44  ;;  %v14318_v5 = vpop.f32.mrf.mxu0  ;;  %v157_v44 = vld [vmem:[#allocation8 + $0x4] ss:$8 sm:$0xf] }
 0x3ad   :  { %6085 = vmatpush1.bf16.msra.mxu0 %v12209_v16  ;;  %v158_v16 = vld [vmem:[#allocation8 + $0x4] ss:$8 sm:$0x30] }
 0x3ae   :  { %6086 = vmatprep.subr.bf16.mxu0 %v12214_v17 }
 0x3b0   :  { %5979 = vmatmul.mubr.bf16.gmra.mxu0 %v13973_v24  ;;  %v14323_v24 = vpop.f32.mrf.mxu0 }
 0x3b1   :  { %5988 = vmatprep.mubr.bf16.mxu0 %v13995_v7  ;;  %6087 = vmatpush1.bf16.msra.mxu0 %v12212_v15  ;;  %v12221_v7 = vld [vmem:[#allocation13 + $0x670] ss:$24 sps:$4 sm:$0xff]  }
 0x3b2   :  { %6088 = vmatprep.subr.bf16.mxu0 %v12217_v39  ;;  %v14328_v27 = vpop.f32.mrf.mxu0  ;;  %v12266_v15 = vld [vmem:[#allocation13 + $0x7f0] ss:$24 sps:$4 sm:$0xff]  }
 0x3b5   :  { %6089 = vmatpush1.bf16.msra.mxu0 %v12215_v30  ;;  %v12274_v30 = vld [vmem:[#allocation13 + $0x7c4] ss:$24 sps:$4 sm:$0xff]  }
 0x3b6   :  { %6090 = vmatprep.subr.bf16.mxu0 %v12220_v46  ;;  %v14356_v46 = vor.u32 %v158_v16, %v157_v44  ;;  %v12302_v44 = vld [vmem:[#allocation14 + $0x450] ss:$24 sps:$4 sm:$0xff]  }
 0x3b8   :  { %5989 = vmatmul.mubr.bf16.gmra.mxu0 %v13999_v32  ;;  %v14333_v32 = vpop.f32.mrf.mxu0 }
 0x3b9   :  { %5998 = vmatprep.mubr.bf16.mxu0 %v14010_v51  ;;  %6091 = vmatpush1.bf16.msra.mxu0 %v12218_v8  ;;  %v12230_v51 = vld [vmem:[#allocation13 + $0x610] ss:$24 sps:$4 sm:$0xff]  }
 0x3ba   :  { %6092 = vmatprep.subr.bf16.mxu0 %v12223_v34  ;;  %v14338_v53 = vpop.f32.mrf.mxu0  ;;  %v12272_v34 = vld [vmem:[#allocation13 + $0x7c0] ss:$24 sps:$4 sm:$0xff]  }
 0x3bc   :  { %v14342_v11 = vpop.f32.mrf.mxu0 }
 0x3bd   :  { %6093 = vmatpush1.bf16.msra.mxu0 %v12221_v7 }
 0x3be   :  { %6094 = vmatprep.subr.bf16.mxu0 %v12226_v48  ;;  %v14346_v29 = vpop.f32.mrf.mxu0  ;;  %v12280_v48 = vld [vmem:[#allocation13 + $0x794] ss:$24 sps:$4 sm:$0xff]  }
 0x3c0   :  { %5999 = vmatmul.mubr.bf16.gmra.mxu0 %v14014_v57  ;;  %v12242_v57 = vld [vmem:[#allocation13 + $0x8b0] ss:$24 sps:$4 sm:$0xff]   ;;  %v5556_v22 = vpop.f32.mrf.mxu0 }
 0x3c1   :  { %6095 = vmatpush1.bf16.msra.mxu0 %v12224_v9  ;;  %6114 = vmatprep.mubr.bf16.mxu0 %v14201_v41  ;;  %v14344_v41 = vpop.f32.mrf.mxu1  ;;  %v4031_v9 = vrot.slane %v14356_v46, %v15953_v33 }
 0x3c2   :  { %6096 = vmatprep.subr.bf16.mxu0 %v12232_v25  ;;  %v5558_v60 = vpop.f32.mrf.mxu0  ;;  %v15958_v25 = vld [vmem:[#allocation26_spill] sm:$0xff] }
 0x3c3   :  { %v14348_v10 = vpop.f32.mrf.mxu1  ;;  %v5537_v16 = vadd.f32 %v14313_v63, %v4031_v9 }
 0x3c4   :  { %v5562_v17 = vpop.f32.mrf.mxu0 }
 0x3c5   :  { %6097 = vmatpush1.bf16.msra.mxu0 %v12230_v51  ;;  %v14350_v49 = vpop.f32.mrf.mxu1  ;;  %v4035_v51 = vrot.slane %v14356_v46, %v15958_v25 }
 0x3c6   :  { %6098 = vmatprep.subr.bf16.mxu0 %v12238_v12  ;;  %v5564_v8 = vpop.f32.mrf.mxu0 }
 0x3c7   :  { %v14352_v23 = vpop.f32.mrf.mxu1  ;;  %v5549_v63 = vadd.f32 %v14338_v53, %v4035_v51  ;;  %v5610_v53 = vadd.f32 %v14292_v38, %v5537_v16 }
 0x3c8   :  { %v5566_v12 = vpop.f32.mrf.mxu0 }
 0x3c9   :  { %6099 = vmatpush2.bf16.msra.mxu0 %v12236_v43  ;;  %v14354_v39 = vpop.f32.mrf.mxu1  ;;  %v12278_v43 = vld [vmem:[#allocation13 + $0x790] ss:$24 sps:$4 sm:$0xff]  }
 0x3ca   :  { %6100 = vmatprep.subr.bf16.mxu0 %v12244_v2  ;;  %15956 = vst [vmem:[#allocation57_spill] sm:$0xff] %v14354_v39 }
 0x3cb   :  { %v14358_v7 = vpop.f32.mrf.mxu1 }
 0x3cc   :  { %15957 = vst [vmem:[#allocation24_spill] sm:$0xff] %v14358_v7  ;;  %v5545_v7 = vadd.f32 %v14328_v27, %v4035_v51 }
 0x3cd   :  { %6101 = vmatpush2.bf16.msra.mxu0 %v12242_v57  ;;  %v14364_v2 = vpop.f32.mrf.mxu1  ;;  %v12304_v57 = vld [vmem:[#allocation14 + $0x454] ss:$24 sps:$4 sm:$0xff]  }
 0x3ce   :  { %6102 = vmatprep.subr.bf16.mxu0 %v12250_v13  ;;  %15959 = vst [vmem:[#allocation26_spill] sm:$0xff] %v14364_v2  ;;  %v161_v13 = vld [vmem:[#allocation8 + $0x5] ss:$8 sm:$0xf] }
 0x3cf   :  { %v12307_v2 = vld [vmem:[#allocation14 + $0x424] ss:$24 sps:$4 sm:$0xff]  }
 0x3d1   :  { %6103 = vmatpush2.bf16.msra.mxu0 %v12248_v61  ;;  %v162_v61 = vld [vmem:[#allocation8 + $0x5] ss:$8 sm:$0x30] }
 0x3d2   :  { %6104 = vmatprep.subr.bf16.mxu0 %v12256_v36  ;;  %v5533_v36 = vadd.f32 %v14303_v19, %v4031_v9  ;;  %v5543_v19 = vadd.f32 %v14323_v24, %v4031_v9  ;;  %v5559_v24 = vadd.f32 %v5558_v60, %v4035_v51  ;;  %v5563_v60 = vadd.f32 %v5562_v17, %v4031_v9 }
 0x3d4   :  { %v5616_v17 = vadd.f32 %v14296_v4, %v5543_v19  ;;  %v12313_v4 = vld [vmem:[#allocation14 + $0x3c4] ss:$24 sps:$4 sm:$0xff]   ;;  %v5622_v19 = vadd.f32 %v14306_v47, %v5549_v63  ;;  %v14440_v47 = vstv %s14385_s17  ;;  %v14444_v63 = vadd.f32 %v14326_v40, %v5559_v24 }
 0x3d5   :  { %6105 = vmatpush2.bf16.msra.mxu0 %v12254_v21  ;;  %v165_v21 = vld [vmem:[#allocation8 + $0x6] ss:$8 sm:$0xf] }
 0x3d6   :  { %6106 = vmatprep.subr.bf16.mxu0 %v12262_v6  ;;  %v166_v6 = vld [vmem:[#allocation8 + $0x6] ss:$8 sm:$0x30] }
 0x3d9   :  { %6107 = vmatpush2.bf16.msra.mxu0 %v12260_v55  ;;  %v5535_v55 = vadd.f32 %v14308_v42, %v4035_v51  ;;  %v5547_v42 = vadd.f32 %v14333_v32, %v4031_v9  ;;  %v12305_v32 = vld [vmem:[#allocation14 + $0x420] ss:$24 sps:$4 sm:$0xff]  }
 0x3da   :  { %6108 = vmatprep.subr.bf16.mxu0 %v12268_v59  ;;  %v5568_v59 = vpop.f32.mrf.mxu0 }
 0x3dd   :  { %6109 = vmatpush2.bf16.msra.mxu0 %v12266_v15  ;;  %v5539_v15 = vadd.f32 %v14318_v5, %v4035_v51  ;;  %v5553_v5 = vadd.f32 %v14342_v11, %v4031_v9  ;;  %v15960_v11 = vld [vmem:[#allocation28_spill] sm:$0xff] }
 0x3de   :  { %6110 = vmatprep.subr.bf16.mxu0 %v12274_v30  ;;  %v5606_v30 = vadd.f32 %v14288_v52, %v5533_v36  ;;  %v5608_v52 = vadd.f32 %v14290_v56, %v5535_v55 }
 0x3e1   :  { %6111 = vmatpush2.bf16.msra.mxu0 %v12272_v34  ;;  %v14371_v34 = vpop.f32.mrf.mxu1 }
 0x3e2   :  { %6112 = vmatprep.subr.bf16.mxu0 %v12280_v48  ;;  %v14373_v48 = vor.u32 %v162_v61, %v161_v13  ;;  %v5557_v61 = vadd.f32 %v5556_v22, %v4031_v9  ;;  %v12310_v22 = vld [vmem:[#allocation14 + $0x3f4] ss:$24 sps:$4 sm:$0xff]  }
 0x3e3   :  { %v14389_v36 = vpop.f32.mrf.mxu1 }
 0x3e4   :  { %v14402_v38 = vrot.slane %v14373_v48, %v15958_v25 }
 0x3e5   :  { %6113 = vmatpush2.bf16.msra.mxu0 %v12278_v43  ;;  %v14378_v43 = vor.u32 %v166_v6, %v165_v21  ;;  %v5612_v6 = vadd.f32 %v14294_v3, %v5539_v15 }
 0x3e6   :  { %8506 = vmatprep.subr.bf16.mxu0 %v12304_v57  ;;  %v5555_v57 = vadd.f32 %v14346_v29, %v4035_v51 }
 0x3e8   :  { %v5678_v39 = vpop.f32.mrf.mxu0  ;;  %6115 = vmatmul.mubr.bf16.vlgmr.msra.gmra.mxu0 %v14204_v1  ;;  %v14394_v1 = vrot.slane %v14373_v48, %v15953_v33 }
 0x3e9   :  { %v5679_v13 = vadd.f32 %v5678_v39, %v5606_v30  ;;  %6124 = vmatprep.mubr.bf16.mxu0 %v14228_v20  ;;  %8507 = vmatpush1.bf16.msra.mxu0 %v12302_v44  ;;  %v5565_v39 = vadd.f32 %v5564_v8, %v4035_v51  ;;  %v14398_v20 = vrot.slane %v14378_v43, %v15953_v33  ;;  %v15962_v44 = vld [vmem:[#allocation31_spill] sm:$0xff] }
 0x3ea   :  { %v5680_v27 = vpop.f32.mrf.mxu0  ;;  %8508 = vmatprep.subr.bf16.mxu0 %v12307_v2  ;;  %v5567_v2 = vadd.f32 %v5566_v12, %v4031_v9  ;;  %v14413_v8 = vrot.slane %v14378_v43, %v15958_v25  ;;  %v5618_v12 = vadd.f32 %v14298_v50, %v5545_v7  ;;  %v5628_v50 = vadd.f32 %v14316_v28, %v5555_v57  ;;  %v12316_v57 = vld [vmem:[#allocation14 + $0x394] ss:$24 sps:$4 sm:$0xff]  }
 0x3eb   :  { %v6155_v56 = vadd.f32 %v5679_v13, %v15960_v11  ;;  %v5681_v29 = vadd.f32 %v5680_v27, %v5608_v52  ;;  %v14408_v52 = vadd.f32 %v5568_v59, %v4035_v51  ;;  %v12308_v27 = vld [vmem:[#allocation14 + $0x3f0] ss:$24 sps:$4 sm:$0xff]   ;;  %v14415_v11 = vpop.f32.mrf.mxu1  ;;  %v5620_v59 = vadd.f32 %v14300_v37, %v5547_v42  ;;  %v12311_v42 = vld [vmem:[#allocation14 + $0x3c0] ss:$24 sps:$4 sm:$0xff]  }
 0x3ec   :  { %v5682_v21 = vpop.f32.mrf.mxu0  ;;  %v14437_v37 = vadd.f32 %v14320_v58, %v5557_v61 }
 0x3ed   :  { %v14405_v55 = vmul.f32 0.5, %v6155_v56  ;;  %v6156_v16 = vadd.f32 %v5681_v29, %v15962_v44  ;;  %v5683_v30 = vadd.f32 %v5682_v21, %v5610_v53  ;;  %8509 = vmatpush1.bf16.msra.mxu0 %v12305_v32  ;;  %v15964_v53 = vld [vmem:[#allocation33_spill] sm:$0xff]  ;;  %v5626_v32 = vadd.f32 %v14310_v18, %v5553_v5  ;;  %v14452_v28 = vpop.f32.mrf.mxu1 }
 0x3ee   :  { %v5684_v13 = vpop.f32.mrf.mxu0  ;;  %8510 = vmatprep.subr.bf16.mxu0 %v12310_v22  ;;  %v14447_v5 = vadd.f32 %v14330_v14, %v5563_v60  ;;  %v14461_v14 = vadd.f32 %v14340_v26, %v5567_v2 }
 0x3ef   :  { %15961 = vst [vmem:[#allocation28_spill] sm:$0xff] %v14405_v55  ;;  %v6378_v3 = vmul.f32 %v14394_v1, %v14405_v55  ;;  %v14419_v15 = vmul.f32 0.5, %v6156_v16  ;;  %v6161_v9 = vadd.f32 %v5683_v30, %v15964_v53  ;;  %v5685_v51 = vadd.f32 %v5684_v13, %v5612_v6  ;;  %v15966_v6 = vld [vmem:[#allocation35_spill] sm:$0xff]  ;;  %v15968_v16 = vld [vmem:[#allocation44_spill] sm:$0xff]  ;;  %v14472_v26 = vpop.f32.mrf.mxu1 }
 0x3f0   :  { %v5688_v56 = vpop.f32.mrf.mxu0  ;;  %6125 = vmatmul.mubr.bf16.gmra.mxu0 %v14230_v54  ;;  %v14450_v54 = vadd.f32 %v14336_v62, %v5565_v39 }
 0x3f1   :  { %15963 = vst [vmem:[#allocation31_spill] sm:$0xff] %v14419_v15  ;;  %v14427_v29 = vadd.f32 %v14398_v20, %v6378_v3  ;;  %v6379_v21 = vmul.f32 %v14402_v38, %v14419_v15  ;;  %v14431_v44 = vmul.f32 0.5, %v6161_v9  ;;  %v6162_v22 = vadd.f32 %v5685_v51, %v15966_v6  ;;  %6134 = vmatprep.mubr.bf16.mxu0 %v14250_v31  ;;  %v12314_v9 = vld [vmem:[#allocation14 + $0x390] ss:$24 sps:$4 sm:$0xff]  }
 0x3f2   :  { %v5689_v18 = vadd.f32 %v5688_v56, %v5616_v17  ;;  %v5690_v7 = vpop.f32.mrf.mxu0  ;;  %8511 = vmatpush1.bf16.msra.mxu0 %v12308_v27  ;;  %v15970_v27 = vld [vmem:[#allocation47_spill] sm:$0xff]  ;;  %v15971_v51 = vld [vmem:[#allocation50_spill] sm:$0xff] }
 0x3f3   :  { %15965 = vst [vmem:[#allocation33_spill] sm:$0xff] %v14431_v44  ;;  %v6384_v58 = vmul.f32 %v14394_v1, %v14431_v44  ;;  %8512 = vmatprep.subr.bf16.mxu0 %v12313_v4  ;;  %v6458_v31 = vadd.f32 %v14413_v8, %v6379_v21  ;;  %v14457_v61 = vmul.f32 0.5, %v6162_v22  ;;  %v5691_v24 = vadd.f32 %v5690_v7, %v5618_v12 }
 0x3f4   :  { %v6167_v40 = vadd.f32 %v5689_v18, %v15968_v16  ;;  %v5692_v30 = vpop.f32.mrf.mxu0  ;;  %vm6505_vm0 = vcmp.ge.f32.partialorder %v14427_v29, 0.0  ;;  %v6554_v39 = vmul.f32 %v14440_v47, %v14427_v29 }
 0x3f5   :  { %15967 = vst [vmem:[#allocation35_spill] sm:$0xff] %v14457_v61  ;;  %v6463_v62 = vadd.f32 %v14398_v20, %v6384_v58  ;;  %v5693_v60 = vadd.f32 %v5692_v30, %v5620_v59  ;;  %v6385_v17 = vmul.f32 %v14402_v38, %v14457_v61  ;;  %v6168_v3 = vadd.f32 %v5691_v24, %v15970_v27  ;;  %v12319_v59 = vld [vmem:[#allocation14 + $0x364] ss:$24 sps:$4 sm:$0xff]   ;;  %v12317_v30 = vld [vmem:[#allocation14 + $0x360] ss:$24 sps:$4 sm:$0xff]  }
 0x3f6   :  { %v14469_v13 = vmul.f32 0.5, %v6167_v40  ;;  %v5694_v53 = vpop.f32.mrf.mxu0  ;;  %8513 = vmatpush1.bf16.msra.mxu0 %v12311_v42  ;;  %v6555_v18 = vmul.f32 %v14440_v47, %v6458_v31  ;;  %v15974_v42 = vld [vmem:[#allocation52_spill] sm:$0xff]  ;;  %vm6506_vm2 = vcmp.ge.f32.partialorder %v6458_v31, 0.0 }
 0x3f7   :  { %vm6511_vm1 = vcmp.ge.f32.partialorder %v6463_v62, 0.0  ;;  %v6560_v2 = vmul.f32 %v14440_v47, %v6463_v62  ;;  %v6173_v4 = vadd.f32 %v5693_v60, %v15971_v51  ;;  %v5695_v12 = vadd.f32 %v5694_v53, %v5622_v19  ;;  %8514 = vmatprep.subr.bf16.mxu0 %v12316_v57  ;;  %v14493_v60 = vpop.f32.mrf.mxu1 }
 0x3f8   :  { %15969 = vst [vmem:[#allocation44_spill] sm:$0xff] %v14469_v13  ;;  %v6464_v56 = vadd.f32 %v14413_v8, %v6385_v17  ;;  %v6390_v21 = vmul.f32 %v14394_v1, %v14469_v13  ;;  %v14479_v6 = vmul.f32 0.5, %v6168_v3  ;;  %v5698_v22 = vpop.f32.mrf.mxu0  ;;  %6135 = vmatmul.mubr.bf16.gmra.mxu0 %v14252_v0  ;;  %v12322_v3 = vld [vmem:[#allocation14 + $0x334] ss:$24 sps:$4 sm:$0xff]   ;;  %v6603_v51 = vsel %vm6506_vm2, %v6458_v31, %v6555_v18  ;;  %v12320_v18 = vld [vmem:[#allocation14 + $0x330] ss:$24 sps:$4 sm:$0xff]  }
 0x3f9   :  { %v14482_v7 = vmul.f32 0.5, %v6173_v4  ;;  %v6174_v58 = vadd.f32 %v5695_v12, %v15974_v42  ;;  %v5699_v16 = vadd.f32 %v5698_v22, %v5626_v32  ;;  %v6608_v19 = vsel %vm6511_vm1, %v6463_v62, %v6560_v2  ;;  %6144 = vmatprep.mubr.bf16.mxu0 %v14263_v45  ;;  %v15976_v62 = vld [vmem:[#allocation53_spill] sm:$0xff] }
 0x3fa   :  { %15972 = vst [vmem:[#allocation47_spill] sm:$0xff] %v14479_v6  ;;  %v14488_v57 = vadd.f32 %v14398_v20, %v6390_v21  ;;  %v6391_v40 = vmul.f32 %v14402_v38, %v14479_v6  ;;  %v5700_v24 = vpop.f32.mrf.mxu0  ;;  %vm6512_vm3 = vcmp.ge.f32.partialorder %v6464_v56, 0.0  ;;  %8515 = vmatpush1.bf16.msra.mxu0 %v12314_v9  ;;  %v6602_v45 = vsel %vm6505_vm0, %v14427_v29, %v6554_v39 }
 0x3fb   :  { %15973 = vst [vmem:[#allocation50_spill] sm:$0xff] %v14482_v7  ;;  %v6396_v0 = vmul.f32 %v14394_v1, %v14482_v7  ;;  %v14497_v32 = vmul.f32 0.5, %v6174_v58  ;;  %v6179_v17 = vadd.f32 %v5699_v16, %v15976_v62  ;;  %v5701_v27 = vadd.f32 %v5700_v24, %v5628_v50  ;;  %8516 = vmatprep.subr.bf16.mxu0 %v12319_v59  ;;  %v15977_v59 = vld [vmem:[#allocation54_spill] sm:$0xff]  ;;  %v14520_v58 = vpop.f32.mrf.mxu1  ;;  %v15980_v24 = vld [vmem:[#allocation55_spill] sm:$0xff] }
 0x3fc   :  { %v6470_v53 = vadd.f32 %v14413_v8, %v6391_v40  ;;  %v5702_v9 = vpop.f32.mrf.mxu0  ;;  %v6561_v2 = vmul.f32 %v14440_v47, %v6464_v56  ;;  %v14506_v4 = vpack.c.bf16 %v6608_v19, %v6602_v45  ;;  %v14514_v22 = vmul.f32 %v14440_v47, %v14488_v57  ;;  %v12449_v7 = vld [vmem:[#allocation14 + $0x8d8] ss:$24 sps:$4 sm:$0xff]  }
 0x3fd   :  { %15975 = vst [vmem:[#allocation52_spill] sm:$0xff] %v14497_v32  ;;  %v6475_v12 = vadd.f32 %v14398_v20, %v6396_v0  ;;  %v6397_v50 = vmul.f32 %v14402_v38, %v14497_v32  ;;  %v6180_v21 = vadd.f32 %v5701_v27, %v15977_v59  ;;  %v14516_v29 = vmul.f32 0.5, %v6179_v17  ;;  %v12323_v59 = vld [vmem:[#allocation14 + $0x300] ss:$24 sps:$4 sm:$0xff]  }
 0x3fe   :  { %v5703_v39 = vadd.f32 %v5702_v9, %v14437_v37  ;;  %v5704_v42 = vpop.f32.mrf.mxu0  ;;  %v6609_v31 = vsel %vm6512_vm3, %v6464_v56, %v6561_v2  ;;  %8517 = vmatpush1.bf16.msra.mxu0 %v12317_v30  ;;  %v6567_v40 = vmul.f32 %v14440_v47, %v6470_v53  ;;  %vm6517_vm4 = vcmp.ge.f32.partialorder %v14488_v57, 0.0  ;;  %v12325_v30 = vld [vmem:[#allocation14 + $0x304] ss:$24 sps:$4 sm:$0xff]  }
 0x3ff   :  { %15978 = vst [vmem:[#allocation53_spill] sm:$0xff] %v14516_v29  ;;  %v6476_v16 = vadd.f32 %v14413_v8, %v6397_v50  ;;  %v14523_v19 = vmul.f32 0.5, %v6180_v21  ;;  %8518 = vmatprep.subr.bf16.mxu0 %v12322_v3  ;;  %v5705_v37 = vadd.f32 %v5704_v42, %v14444_v63  ;;  %v14529_v62 = vpack.c.bf16 %v6609_v31, %v6603_v51  ;;  %v15982_v63 = vld [vmem:[#allocation56_spill] sm:$0xff]  ;;  %v14543_v21 = vpop.f32.mrf.mxu1  ;;  %v12328_v42 = vld [vmem:[#allocation14 + $0x5d4] ss:$24 sps:$4 sm:$0xff]  }
 0x400   :  { %v6185_v0 = vadd.f32 %v5703_v39, %v15980_v24  ;;  %v5708_v56 = vpop.f32.mrf.mxu0  ;;  %vm6518_vm5 = vcmp.ge.f32.partialorder %v6470_v53, 0.0  ;;  %v6572_v17 = vmul.f32 %v14440_v47, %v6475_v12  ;;  %6145 = vmatmul.mubr.bf16.gmra.mxu0 %v14265_v35  ;;  %v6402_v3 = vmul.f32 %v14394_v1, %v14516_v29 }
 0x401   :  { %15979 = vst [vmem:[#allocation54_spill] sm:$0xff] %v14523_v19  ;;  %v6403_v27 = vmul.f32 %v14402_v38, %v14523_v19  ;;  %v5709_v45 = vadd.f32 %v5708_v56, %v14447_v5  ;;  %vm6524_vm6 = vcmp.ge.f32.partialorder %v6476_v16, 0.0  ;;  %v6186_v2 = vadd.f32 %v5705_v37, %v15982_v63  ;;  %8465 = vmatprep.mubr.bf16.mxu1 %v14529_v62  ;;  %v15985_v63 = vld [vmem:[#allocation59_spill] sm:$0xff] }
 0x402   :  { %v14538_v9 = vmul.f32 0.5, %v6185_v0  ;;  %v5710_v51 = vpop.f32.mrf.mxu0  ;;  %v6573_v50 = vmul.f32 %v14440_v47, %v6476_v16  ;;  %8519 = vmatpush1.bf16.msra.mxu0 %v12320_v18  ;;  %8466 = vmatmul.mubr.bf16.vlgmr.msra.gmra.mxu1 %v14506_v4  ;;  %v6615_v39 = vsel %vm6518_vm5, %v6470_v53, %v6567_v40  ;;  %vm6523_vm7 = vcmp.ge.f32.partialorder %v6475_v12, 0.0  ;;  %v15984_v0 = vld [vmem:[#allocation58_spill] sm:$0xff] }
 0x403   :  { %v6482_v35 = vadd.f32 %v14413_v8, %v6403_v27  ;;  %v5711_v5 = vadd.f32 %v5710_v51, %v14450_v54  ;;  %v14551_v24 = vmul.f32 0.5, %v6186_v2  ;;  %v6191_v18 = vadd.f32 %v5709_v45, %v15984_v0  ;;  %8520 = vmatprep.subr.bf16.mxu0 %v12325_v30  ;;  %v12326_v30 = vld [vmem:[#allocation14 + $0x5d0] ss:$24 sps:$4 sm:$0xff]  }
 0x404   :  { %15981 = vst [vmem:[#allocation55_spill] sm:$0xff] %v14538_v9  ;;  %v6408_v31 = vmul.f32 %v14394_v1, %v14538_v9  ;;  %v5712_v37 = vpop.f32.mrf.mxu0  ;;  %v6621_v56 = vsel %vm6524_vm6, %v6476_v16, %v6573_v50  ;;  %v5642_v27 = vadd.f32 %v14344_v41, %v14408_v52  ;;  %v14562_v51 = vadd.f32 %v14398_v20, %v6402_v3  ;;  %v12398_v41 = vld [vmem:[#allocation14 + $0x750] ss:$24 sps:$4 sm:$0xff]   ;;  %v12400_v52 = vld [vmem:[#allocation14 + $0x754] ss:$24 sps:$4 sm:$0xff]   ;;  %v14568_v50 = vpop.f32.mrf.mxu1 }
 0x405   :  { %15983 = vst [vmem:[#allocation56_spill] sm:$0xff] %v14551_v24  ;;  %v6192_v54 = vadd.f32 %v5711_v5, %v15985_v63  ;;  %v5713_v53 = vadd.f32 %v5712_v37, %v14461_v14  ;;  %v14559_v40 = vpack.c.bf16 %v6621_v56, %v6615_v39  ;;  %v6409_v45 = vmul.f32 %v14402_v38, %v14551_v24  ;;  %v15987_v5 = vld [vmem:[#allocation60_spill] sm:$0xff]  ;;  %v15990_v63 = vld [vmem:[#allocation61_spill] sm:$0xff] }
 0x406   :  { %v6487_v2 = vadd.f32 %v14398_v20, %v6408_v31  ;;  %v5714_v0 = vpop.f32.mrf.mxu0  ;;  %v6620_v16 = vsel %vm6523_vm7, %v6475_v12, %v6572_v17  ;;  %8521 = vmatpush1.bf16.msra.mxu0 %v12323_v59  ;;  %v6614_v31 = vsel %vm6517_vm4, %v14488_v57, %v14514_v22  ;;  %v12331_v12 = vld [vmem:[#allocation14 + $0x5a4] ss:$24 sps:$4 sm:$0xff]   ;;  %v14579_v59 = vmul.f32 0.5, %v6191_v18  ;;  %8579 = vmatprep.subr.bf16.mxu1 %v12400_v52  ;;  %v12329_v57 = vld [vmem:[#allocation14 + $0x5a0] ss:$24 sps:$4 sm:$0xff]  }
 0x407   :  { %v14570_v14 = vmul.f32 0.5, %v6192_v54  ;;  %v6197_v39 = vadd.f32 %v5713_v53, %v15987_v5  ;;  %v5715_v3 = vadd.f32 %v5714_v0, %v5642_v27  ;;  %8475 = vmatprep.mubr.bf16.mxu1 %v14559_v40  ;;  %8522 = vmatprep.subr.bf16.mxu0 %v12328_v42  ;;  %v6488_v17 = vadd.f32 %v14413_v8, %v6409_v45  ;;  %v12404_v18 = vld [vmem:[#allocation14 + $0x720] ss:$24 sps:$4 sm:$0xff]   ;;  %v12406_v45 = vld [vmem:[#allocation14 + $0x724] ss:$24 sps:$4 sm:$0xff]   ;;  %v14591_v0 = vpop.f32.mrf.mxu1 }
 0x408   :  { %15988 = vst [vmem:[#allocation59_spill] sm:$0xff] %v14579_v59  ;;  %vm6530_vm8 = vcmp.ge.f32.partialorder %v6482_v35, 0.0  ;;  %v6579_v37 = vmul.f32 %v14440_v47, %v6482_v35  ;;  %v14587_v53 = vpack.c.bf16 %v6620_v16, %v6614_v31  ;;  %8580 = vmatpush1.bf16.msra.mxu1 %v12398_v41  ;;  %v6584_v22 = vmul.f32 %v14440_v47, %v6487_v2  ;;  %v12334_v41 = vld [vmem:[#allocation14 + $0x574] ss:$24 sps:$4 sm:$0xff]   ;;  %v12458_v9 = vld [vmem:[#allocation14 + $0x870] ss:$24 sps:$4 sm:$0xff]  }
 0x409   :  { %15986 = vst [vmem:[#allocation58_spill] sm:$0xff] %v14570_v14  ;;  %v6415_v56 = vmul.f32 %v14402_v38, %v14570_v14  ;;  %v14584_v27 = vmul.f32 0.5, %v6197_v39  ;;  %v6198_v54 = vadd.f32 %v5715_v3, %v15990_v63  ;;  %vm6536_vm9 = vcmp.ge.f32.partialorder %v6488_v17, 0.0  ;;  %8581 = vmatprep.subr.bf16.mxu1 %v12406_v45  ;;  %v14604_v63 = vpop.f32.mrf.mxu1  ;;  %v12410_v14 = vld [vmem:[#allocation14 + $0x6f0] ss:$24 sps:$4 sm:$0xff]  }
 0x40a   :  { %v6585_v42 = vmul.f32 %v14440_v47, %v6488_v17  ;;  %8523 = vmatpush2.bf16.msra.mxu0 %v12326_v30  ;;  %v6578_v52 = vmul.f32 %v14440_v47, %v14562_v51  ;;  %8476 = vmatmul.mubr.bf16.gmra.mxu1 %v14587_v53  ;;  %v6414_v30 = vmul.f32 %v14394_v1, %v14579_v59  ;;  %vm6535_vm10 = vcmp.ge.f32.partialorder %v6487_v2, 0.0 }
 0x40b   :  { %15989 = vst [vmem:[#allocation60_spill] sm:$0xff] %v14584_v27  ;;  %v6494_v5 = vadd.f32 %v14413_v8, %v6415_v56  ;;  %v6420_v16 = vmul.f32 %v14394_v1, %v14584_v27  ;;  %v14598_v39 = vmul.f32 0.5, %v6198_v54  ;;  %8524 = vmatprep.subr.bf16.mxu0 %v12331_v12  ;;  %v6627_v3 = vsel %vm6530_vm8, %v6482_v35, %v6579_v37  ;;  %v12332_v1 = vld [vmem:[#allocation14 + $0x570] ss:$24 sps:$4 sm:$0xff]   ;;  %v12412_v35 = vld [vmem:[#allocation14 + $0x6f4] ss:$24 sps:$4 sm:$0xff]  }
 0x40c   :  { %v6633_v31 = vsel %vm6536_vm9, %v6488_v17, %v6585_v42  ;;  %vm6529_vm11 = vcmp.ge.f32.partialorder %v14562_v51, 0.0  ;;  %8582 = vmatpush1.bf16.msra.mxu1 %v12404_v18  ;;  %v6632_v54 = vsel %vm6535_vm10, %v6487_v2, %v6584_v22  ;;  %v6493_v42 = vadd.f32 %v14398_v20, %v6414_v30  ;;  %v14617_v18 = vpop.f32.mrf.mxu1  ;;  %v12335_v22 = vld [vmem:[#allocation14 + $0x540] ss:$24 sps:$4 sm:$0xff]  }
 0x40d   :  { %15991 = vst [vmem:[#allocation61_spill] sm:$0xff] %v14598_v39  ;;  %v6421_v56 = vmul.f32 %v14402_v38, %v14598_v39  ;;  %v14608_v27 = vpack.c.bf16 %v6633_v31, %v6627_v3  ;;  %v6499_v12 = vadd.f32 %v14398_v20, %v6420_v16  ;;  %v6591_v37 = vmul.f32 %v14440_v47, %v6494_v5  ;;  %v12337_v38 = vld [vmem:[#allocation14 + $0x544] ss:$24 sps:$4 sm:$0xff]   ;;  %v12416_v16 = vld [vmem:[#allocation14 + $0x6c0] ss:$24 sps:$4 sm:$0xff]  }
 0x40e   :  { %8525 = vmatpush2.bf16.msra.mxu0 %v12329_v57  ;;  %v6626_v45 = vsel %vm6529_vm11, %v14562_v51, %v6578_v52  ;;  %vm6542_vm12 = vcmp.ge.f32.partialorder %v6494_v5, 0.0  ;;  %8583 = vmatprep.subr.bf16.mxu1 %v12412_v35  ;;  %v12340_v52 = vld [vmem:[#allocation14 + $0x514] ss:$24 sps:$4 sm:$0xff]   ;;  %v6590_v30 = vmul.f32 %v14440_v47, %v6493_v42  ;;  %v14627_v31 = vpop.f32.mrf.mxu1  ;;  %vm6541_vm15 = vcmp.ge.f32.partialorder %v6493_v42, 0.0 }
 0x40f   :  { %v6500_v17 = vadd.f32 %v14413_v8, %v6421_v56  ;;  %8485 = vmatprep.mubr.bf16.mxu1 %v14608_v27  ;;  %8526 = vmatprep.subr.bf16.mxu0 %v12334_v41  ;;  %v14619_v2 = vpack.c.bf16 %v6632_v54, %v6626_v45  ;;  %v6596_v8 = vmul.f32 %v14440_v47, %v6499_v12  ;;  %v12418_v41 = vld [vmem:[#allocation14 + $0x6c4] ss:$24 sps:$4 sm:$0xff]   ;;  %vm6547_vm14 = vcmp.ge.f32.partialorder %v6499_v12, 0.0  ;;  %v12338_v56 = vld [vmem:[#allocation14 + $0x510] ss:$24 sps:$4 sm:$0xff]  }
 0x410   :  { %8584 = vmatpush1.bf16.msra.mxu1 %v12410_v14  ;;  %v6639_v20 = vsel %vm6542_vm12, %v6494_v5, %v6591_v37  ;;  %v12422_v54 = vld [vmem:[#allocation14 + $0x690] ss:$24 sps:$4 sm:$0xff]   ;;  %v12424_v5 = vld [vmem:[#allocation14 + $0x694] ss:$24 sps:$4 sm:$0xff]   ;;  %v6638_v35 = vsel %vm6541_vm15, %v6493_v42, %v6590_v30  ;;  %v12428_v45 = vld [vmem:[#allocation14 + $0x660] ss:$24 sps:$4 sm:$0xff]  }
 0x411   :  { %vm6548_vm13 = vcmp.ge.f32.partialorder %v6500_v17, 0.0  ;;  %v6597_v57 = vmul.f32 %v14440_v47, %v6500_v17  ;;  %8585 = vmatprep.subr.bf16.mxu1 %v12418_v41  ;;  %v6644_v14 = vsel %vm6547_vm14, %v6499_v12, %v6596_v8  ;;  %v12346_v12 = vld [vmem:[#allocation14 + $0x4b4] ss:$24 sps:$4 sm:$0xff]   ;;  %v12344_v42 = vld [vmem:[#allocation14 + $0x4b0] ss:$24 sps:$4 sm:$0xff]  }
 0x412   :  { %8527 = vmatpush2.bf16.msra.mxu0 %v12332_v1  ;;  %8486 = vmatmul.mubr.bf16.gmra.mxu1 %v14619_v2  ;;  %v12343_v1 = vld [vmem:[#allocation14 + $0x4e4] ss:$24 sps:$4 sm:$0xff]   ;;  %v14632_v37 = vpack.c.bf16 %v6644_v14, %v6638_v35 }
 0x413   :  { %v6645_v51 = vsel %vm6548_vm13, %v6500_v17, %v6597_v57  ;;  %8528 = vmatprep.subr.bf16.mxu0 %v12337_v38  ;;  %v14630_v17 = vpop.f32.mrf.mxu1  ;;  %v12341_v38 = vld [vmem:[#allocation14 + $0x4e0] ss:$24 sps:$4 sm:$0xff]   ;;  %v12430_v57 = vld [vmem:[#allocation14 + $0x664] ss:$24 sps:$4 sm:$0xff]  }
 0x414   :  { %v14625_v3 = vpack.c.bf16 %v6645_v51, %v6639_v20  ;;  %8586 = vmatpush1.bf16.msra.mxu1 %v12416_v16  ;;  %v12436_v16 = vld [vmem:[#allocation14 + $0x634] ss:$24 sps:$4 sm:$0xff]   ;;  %v12349_v41 = vld [vmem:[#allocation14 + $0x484] ss:$24 sps:$4 sm:$0xff]   ;;  %v12347_v51 = vld [vmem:[#allocation14 + $0x480] ss:$24 sps:$4 sm:$0xff]  }
 0x415   :  { %8587 = vmatprep.subr.bf16.mxu1 %v12424_v5  ;;  %v14635_v8 = vpop.f32.mrf.mxu1  ;;  %v12442_v30 = vld [vmem:[#allocation14 + $0x604] ss:$24 sps:$4 sm:$0xff]  }
 0x416   :  { %8495 = vmatprep.mubr.bf16.mxu1 %v14625_v3  ;;  %8529 = vmatpush2.bf16.msra.mxu0 %v12335_v22  ;;  %v12434_v22 = vld [vmem:[#allocation14 + $0x630] ss:$24 sps:$4 sm:$0xff]   ;;  %v12352_v14 = vld [vmem:[#allocation14 + $0x15c] ss:$24 sps:$4 sm:$0xff]  }
 0x417   :  { %8530 = vmatprep.subr.bf16.mxu0 %v12340_v52  ;;  %v14637_v20 = vpop.f32.mrf.mxu1  ;;  %v12440_v52 = vld [vmem:[#allocation14 + $0x600] ss:$24 sps:$4 sm:$0xff]  }
 0x418   :  { %8588 = vmatpush1.bf16.msra.mxu1 %v12422_v54 }
 0x419   :  { %8589 = vmatprep.subr.bf16.mxu1 %v12430_v57  ;;  %v14643_v5 = vpop.f32.mrf.mxu1 }
 0x41a   :  { %8531 = vmatpush2.bf16.msra.mxu0 %v12338_v56  ;;  %8496 = vmatmul.mubr.bf16.gmra.mxu1 %v14632_v37  ;;  %v15992_v56 = vld [vmem:[#allocation25_spill] sm:$0xff] }
 0x41b   :  { %8532 = vmatprep.subr.bf16.mxu0 %v12343_v1  ;;  %v14641_v54 = vrot.slane %v14356_v46, %v15992_v56  ;;  %v15993_v1 = vld [vmem:[#allocation27_spill] sm:$0xff]  ;;  %v14674_v19 = vrot.slane %v14378_v43, %v15992_v56 }
 0x41c   :  { %8590 = vmatpush1.bf16.msra.mxu1 %v12428_v45  ;;  %v14647_v35 = vrot.slane %v14356_v46, %v15993_v1  ;;  %v12448_v45 = vld [vmem:[#allocation14 + $0x8d4] ss:$24 sps:$4 sm:$0xff]  }
 0x41d   :  { %8591 = vmatprep.subr.bf16.mxu1 %v12436_v16  ;;  %v5752_v57 = vadd.f32 %v14348_v10, %v14641_v54 }
 0x41e   :  { %8533 = vmatpush2.bf16.msra.mxu0 %v12341_v38  ;;  %v12446_v38 = vld [vmem:[#allocation14 + $0x8d0] ss:$24 sps:$4 sm:$0xff]  }
 0x41f   :  { %8534 = vmatprep.subr.bf16.mxu0 %v12346_v12  ;;  %v14651_v12 = vpop.f32.mrf.mxu1 }
 0x420   :  { %8592 = vmatpush1.bf16.msra.mxu1 %v12434_v22  ;;  %v5754_v22 = vadd.f32 %v14350_v49, %v14647_v35  ;;  %v15994_v49 = vld [vmem:[#allocation57_spill] sm:$0xff] }
 0x421   :  { %8593 = vmatprep.subr.bf16.mxu1 %v12442_v30  ;;  %v14658_v10 = vpop.f32.mrf.mxu1 }
 0x422   :  { %8535 = vmatpush2.bf16.msra.mxu0 %v12344_v42 }
 0x423   :  { %8536 = vmatprep.subr.bf16.mxu0 %v12349_v41  ;;  %v12452_v41 = vld [vmem:[#allocation14 + $0x8a0] ss:$24 sps:$4 sm:$0xff]  }
 0x424   :  { %8594 = vmatpush1.bf16.msra.mxu1 %v12440_v52  ;;  %v12454_v52 = vld [vmem:[#allocation14 + $0x8a4] ss:$24 sps:$4 sm:$0xff]  }
 0x425   :  { %8595 = vmatprep.subr.bf16.mxu1 %v12448_v45  ;;  %v14662_v45 = vrot.slane %v14373_v48, %v15992_v56 }
 0x426   :  { %8537 = vmatpush2.bf16.msra.mxu0 %v12347_v51  ;;  %v5756_v51 = vadd.f32 %v14352_v23, %v14641_v54 }
 0x427   :  { %8652 = vmatprep.subr.bf16.mxu0 %v12352_v14 }
 0x428   :  { %v5824_v42 = vpop.f32.mrf.mxu0  ;;  %8596 = vmatpush2.bf16.msra.mxu1 %v12446_v38 }
 0x429   :  { %v5825_v16 = vadd.f32 %v5824_v42, %v5752_v57  ;;  %8597 = vmatprep.subr.bf16.mxu1 %v12454_v52  ;;  %v5758_v57 = vadd.f32 %v15994_v49, %v14647_v35  ;;  %v15995_v42 = vld [vmem:[#allocation29_spill] sm:$0xff]  ;;  %v15997_v52 = vld [vmem:[#allocation26_spill] sm:$0xff]  ;;  %v15999_v49 = vld [vmem:[#allocation32_spill] sm:$0xff] }
 0x42a   :  { %v5826_v30 = vpop.f32.mrf.mxu0 }
 0x42b   :  { %v5898_v14 = vadd.f32 %v14604_v63, %v5825_v16  ;;  %v5827_v39 = vadd.f32 %v5826_v30, %v5754_v22  ;;  %v12460_v63 = vld [vmem:[#allocation14 + $0x874] ss:$24 sps:$4 sm:$0xff]   ;;  %v15996_v22 = vld [vmem:[#allocation24_spill] sm:$0xff]  ;;  %v5764_v30 = vadd.f32 %v15997_v52, %v14647_v35  ;;  %v5774_v52 = vadd.f32 %v14452_v28, %v14647_v35 }
 0x42c   :  { %v5828_v38 = vpop.f32.mrf.mxu0  ;;  %8598 = vmatpush2.bf16.msra.mxu1 %v12452_v41  ;;  %v5762_v16 = vadd.f32 %v15996_v22, %v14641_v54  ;;  %v14688_v22 = vrot.slane %v14373_v48, %v15993_v1 }
 0x42d   :  { %v6157_v59 = vadd.f32 %v5898_v14, %v15995_v42  ;;  %v5900_v24 = vadd.f32 %v14617_v18, %v5827_v39  ;;  %v5829_v23 = vadd.f32 %v5828_v38, %v5756_v51  ;;  %8599 = vmatprep.subr.bf16.mxu1 %v12460_v63  ;;  %v5766_v51 = vadd.f32 %v14371_v34, %v14641_v54  ;;  %v14684_v42 = vpop.f32.mrf.mxu1  ;;  %v16001_v34 = vld [vmem:[#allocation34_spill] sm:$0xff] }
 0x42e   :  { %v5830_v41 = vpop.f32.mrf.mxu0  ;;  %v5768_v38 = vadd.f32 %v14389_v36, %v14647_v35  ;;  %v5772_v63 = vadd.f32 %v14415_v11, %v14641_v54  ;;  %v14718_v11 = vadd.f32 %v14520_v58, %v14641_v54  ;;  %v14735_v58 = vadd.f32 %v14591_v0, %v14647_v35 }
 0x42f   :  { %v14676_v29 = vmul.f32 0.5, %v6157_v59  ;;  %v6158_v14 = vadd.f32 %v5900_v24, %v15999_v49  ;;  %v5902_v39 = vadd.f32 %v14627_v31, %v5829_v23  ;;  %v5831_v18 = vadd.f32 %v5830_v41, %v5758_v57  ;;  %v14720_v28 = vpop.f32.mrf.mxu1 }
 0x430   :  { %v14692_v59 = vrot.slane %v14378_v43, %v15993_v1  ;;  %v5834_v24 = vpop.f32.mrf.mxu0  ;;  %8600 = vmatpush2.bf16.msra.mxu1 %v12458_v9  ;;  %v14706_v41 = vadd.f32 %v14472_v26, %v14641_v54  ;;  %v16006_v1 = vld [vmem:[#allocation38_spill] sm:$0xff] }
 0x431   :  { %15998 = vst [vmem:[#allocation57_spill] sm:$0xff] %v14676_v29  ;;  %v6380_v31 = vmul.f32 %v14662_v45, %v14676_v29  ;;  %v14696_v57 = vmul.f32 0.5, %v6158_v14  ;;  %v6163_v23 = vadd.f32 %v5902_v39, %v16001_v34  ;;  %v5904_v36 = vadd.f32 %v14630_v17, %v5831_v18  ;;  %v16003_v17 = vld [vmem:[#allocation36_spill] sm:$0xff] }
 0x432   :  { %v5835_v9 = vadd.f32 %v5834_v24, %v5762_v16  ;;  %v5836_v49 = vpop.f32.mrf.mxu0  ;;  %v14710_v14 = vadd.f32 %v14493_v60, %v14647_v35 }
 0x433   :  { %16000 = vst [vmem:[#allocation29_spill] sm:$0xff] %v14696_v57  ;;  %v6459_v39 = vadd.f32 %v14674_v19, %v6380_v31  ;;  %v14713_v34 = vmul.f32 0.5, %v6163_v23  ;;  %v6164_v18 = vadd.f32 %v5904_v36, %v16003_v17  ;;  %v6381_v26 = vmul.f32 %v14688_v22, %v14696_v57  ;;  %v12464_v17 = vld [vmem:[#allocation14 + $0x840] ss:$24 sps:$4 sm:$0xff]   ;;  %v12466_v57 = vld [vmem:[#allocation14 + $0x844] ss:$24 sps:$4 sm:$0xff]  }
 0x434   :  { %v5908_v16 = vadd.f32 %v14635_v8, %v5835_v9  ;;  %v5837_v24 = vadd.f32 %v5836_v49, %v5764_v30  ;;  %v5838_v60 = vpop.f32.mrf.mxu0  ;;  %v14727_v31 = vadd.f32 %v14543_v21, %v14647_v35  ;;  %v14731_v23 = vadd.f32 %v14568_v50, %v14641_v54  ;;  %v16005_v30 = vld [vmem:[#allocation37_spill] sm:$0xff]  ;;  %8601 = vmatprep.subr.bf16.mxu1 %v12466_v57  ;;  %v5923_v35 = vpop.f32.mrf.mxu1 }
 0x435   :  { %16002 = vst [vmem:[#allocation24_spill] sm:$0xff] %v14713_v34  ;;  %v6386_v36 = vmul.f32 %v14662_v45, %v14713_v34  ;;  %v14739_v8 = vmul.f32 0.5, %v6164_v18  ;;  %v5839_v49 = vadd.f32 %v5838_v60, %v5766_v51  ;;  %vm6507_vm0 = vcmp.ge.f32.partialorder %v6459_v39, 0.0  ;;  %8602 = vmatpush2.bf16.msra.mxu1 %v12464_v17  ;;  %v16010_v17 = vld [vmem:[#allocation40_spill] sm:$0xff] }
 0x436   :  { %v6169_v9 = vadd.f32 %v5908_v16, %v16005_v30  ;;  %v5910_v21 = vadd.f32 %v14637_v20, %v5837_v24  ;;  %v5840_v29 = vpop.f32.mrf.mxu0  ;;  %v6556_v50 = vmul.f32 %v14440_v47, %v6459_v39  ;;  %v14746_v34 = vadd.f32 %v14692_v59, %v6381_v26 }
 0x437   :  { %16004 = vst [vmem:[#allocation26_spill] sm:$0xff] %v14739_v8  ;;  %v6465_v54 = vadd.f32 %v14674_v19, %v6386_v36  ;;  %v5841_v0 = vadd.f32 %v5840_v29, %v5768_v38  ;;  %v6387_v18 = vmul.f32 %v14688_v22, %v14739_v8  ;;  %v5912_v20 = vadd.f32 %v14643_v5, %v5839_v49  ;;  %v12472_v38 = vld [vmem:[#allocation14 + $0x814] ss:$24 sps:$4 sm:$0xff]   ;;  %v16009_v36 = vld [vmem:[#allocation39_spill] sm:$0xff] }
 0x438   :  { %v6170_v16 = vadd.f32 %v5910_v21, %v16006_v1  ;;  %v5844_v51 = vpop.f32.mrf.mxu0  ;;  %v14754_v57 = vmul.f32 0.5, %v6169_v9  ;;  %v12470_v21 = vld [vmem:[#allocation14 + $0x810] ss:$24 sps:$4 sm:$0xff]   ;;  %v6604_v5 = vsel %vm6507_vm0, %v6459_v39, %v6556_v50  ;;  %8603 = vmatprep.subr.bf16.mxu1 %v12472_v38  ;;  %vm6508_vm2 = vcmp.ge.f32.partialorder %v14746_v34, 0.0 }
 0x439   :  { %vm6513_vm1 = vcmp.ge.f32.partialorder %v6465_v54, 0.0  ;;  %v6562_v24 = vmul.f32 %v14440_v47, %v6465_v54  ;;  %v5914_v60 = vadd.f32 %v14651_v12, %v5841_v0  ;;  %v5845_v29 = vadd.f32 %v5844_v51, %v5772_v63  ;;  %v5927_v12 = vpop.f32.mrf.mxu1  ;;  %8604 = vmatpush2.bf16.msra.mxu1 %v12470_v21  ;;  %v16013_v50 = vld [vmem:[#allocation41_spill] sm:$0xff] }
 0x43a   :  { %16007 = vst [vmem:[#allocation32_spill] sm:$0xff] %v14754_v57  ;;  %v14756_v26 = vmul.f32 0.5, %v6170_v16  ;;  %v6175_v30 = vadd.f32 %v5912_v20, %v16009_v36  ;;  %v5846_v8 = vpop.f32.mrf.mxu0  ;;  %v6466_v1 = vadd.f32 %v14692_v59, %v6387_v18  ;;  %v12476_v18 = vld [vmem:[#allocation14 + $0x7e0] ss:$24 sps:$4 sm:$0xff]  }
 0x43b   :  { %v6176_v49 = vadd.f32 %v5914_v60, %v16010_v17  ;;  %v5918_v56 = vadd.f32 %v14658_v10, %v5845_v29  ;;  %v5847_v32 = vadd.f32 %v5846_v8, %v5774_v52  ;;  %v6610_v63 = vsel %vm6513_vm1, %v6465_v54, %v6562_v24  ;;  %v12478_v8 = vld [vmem:[#allocation14 + $0x7e4] ss:$24 sps:$4 sm:$0xff]   ;;  %v5929_v38 = vpop.f32.mrf.mxu1 }
 0x43c   :  { %16008 = vst [vmem:[#allocation34_spill] sm:$0xff] %v14756_v26  ;;  %v6393_v9 = vmul.f32 %v14688_v22, %v14756_v26  ;;  %v14766_v0 = vmul.f32 0.5, %v6175_v30  ;;  %v5848_v16 = vpop.f32.mrf.mxu0  ;;  %v6392_v54 = vmul.f32 %v14662_v45, %v14754_v57  ;;  %vm6514_vm3 = vcmp.ge.f32.partialorder %v6466_v1, 0.0  ;;  %8605 = vmatprep.subr.bf16.mxu1 %v12478_v8 }
 0x43d   :  { %v14769_v39 = vmul.f32 0.5, %v6176_v49  ;;  %v6181_v20 = vadd.f32 %v5918_v56, %v16013_v50  ;;  %v5920_v10 = vadd.f32 %v14684_v42, %v5847_v32  ;;  %v5849_v52 = vadd.f32 %v5848_v16, %v14706_v41  ;;  %v16015_v32 = vld [vmem:[#allocation42_spill] sm:$0xff]  ;;  %8606 = vmatpush2.bf16.msra.mxu1 %v12476_v18 }
 0x43e   :  { %16011 = vst [vmem:[#allocation36_spill] sm:$0xff] %v14766_v0  ;;  %v6398_v51 = vmul.f32 %v14662_v45, %v14766_v0  ;;  %v5850_v24 = vpop.f32.mrf.mxu0  ;;  %v6557_v60 = vmul.f32 %v14440_v47, %v14746_v34  ;;  %v14786_v36 = vpack.c.bf16 %v6610_v63, %v6604_v5  ;;  %v6472_v30 = vadd.f32 %v14692_v59, %v6393_v9  ;;  %v12482_v16 = vld [vmem:[#allocation14 + $0x7b0] ss:$24 sps:$4 sm:$0xff]   ;;  %v12484_v50 = vld [vmem:[#allocation14 + $0x7b4] ss:$24 sps:$4 sm:$0xff]  }
 0x43f   :  { %16012 = vst [vmem:[#allocation37_spill] sm:$0xff] %v14769_v39  ;;  %v6399_v29 = vmul.f32 %v14688_v22, %v14769_v39  ;;  %v14782_v56 = vmul.f32 0.5, %v6181_v20  ;;  %v6182_v42 = vadd.f32 %v5920_v10, %v16015_v32  ;;  %v5922_v41 = vadd.f32 %v14720_v28, %v5849_v52  ;;  %v16017_v28 = vld [vmem:[#allocation43_spill] sm:$0xff]  ;;  %8607 = vmatprep.subr.bf16.mxu1 %v12484_v50  ;;  %v12443_v39 = vld [vmem:[#allocation14 + $0x608] ss:$24 sps:$4 sm:$0xff]  }
 0x440   :  { %v5851_v21 = vadd.f32 %v5850_v24, %v14710_v14  ;;  %v5854_v17 = vpop.f32.mrf.mxu0  ;;  %v6563_v49 = vmul.f32 %v14440_v47, %v6466_v1  ;;  %v14798_v63 = vadd.f32 %v14674_v19, %v6392_v54  ;;  %v14803_v24 = vadd.f32 %v14674_v19, %v6398_v51  ;;  %v16019_v54 = vld [vmem:[#allocation45_spill] sm:$0xff]  ;;  %v12490_v51 = vld [vmem:[#allocation14 + $0x784] ss:$24 sps:$4 sm:$0xff]  }
 0x441   :  { %16014 = vst [vmem:[#allocation38_spill] sm:$0xff] %v14782_v56  ;;  %v6404_v20 = vmul.f32 %v14662_v45, %v14782_v56  ;;  %v14793_v10 = vmul.f32 0.5, %v6182_v42  ;;  %v6187_v52 = vadd.f32 %v5922_v41, %v16017_v28  ;;  %v5855_v5 = vadd.f32 %v5854_v17, %v14718_v11  ;;  %v5931_v41 = vpop.f32.mrf.mxu1  ;;  %8608 = vmatpush2.bf16.msra.mxu1 %v12482_v16  ;;  %v12451_v0 = vld [vmem:[#allocation14 + $0x8dc] ss:$24 sps:$4 sm:$0xff]  }
 0x442   :  { %v5924_v9 = vadd.f32 %v5923_v35, %v5851_v21  ;;  %v6611_v14 = vsel %vm6514_vm3, %v6466_v1, %v6563_v49  ;;  %v5856_v8 = vpop.f32.mrf.mxu0  ;;  %v6478_v18 = vadd.f32 %v14692_v59, %v6399_v29  ;;  %v6605_v11 = vsel %vm6508_vm2, %v14746_v34, %v6557_v60  ;;  %v12350_v1 = vld [vmem:[#allocation14 + $0x158] ss:$24 sps:$4 sm:$0xff]   ;;  %v12355_v60 = vld [vmem:[#allocation14 + $0x12c] ss:$24 sps:$4 sm:$0xff]   ;;  %8609 = vmatprep.subr.bf16.mxu1 %v12490_v51 }
 0x443   :  { %16016 = vst [vmem:[#allocation39_spill] sm:$0xff] %v14793_v10  ;;  %v14805_v32 = vmul.f32 0.5, %v6187_v52  ;;  %v5928_v42 = vadd.f32 %v5927_v12, %v5855_v5  ;;  %v14811_v35 = vpack.c.bf16 %v6611_v14, %v6605_v11  ;;  %v5857_v21 = vadd.f32 %v5856_v8, %v14727_v31  ;;  %v12488_v5 = vld [vmem:[#allocation14 + $0x780] ss:$24 sps:$4 sm:$0xff]   ;;  %v5933_v11 = vpop.f32.mrf.mxu1 }
 0x444   :  { %v6188_v17 = vadd.f32 %v5924_v9, %v16019_v54  ;;  %v5858_v29 = vpop.f32.mrf.mxu0  ;;  %vm6520_vm4 = vcmp.ge.f32.partialorder %v6472_v30, 0.0  ;;  %v14815_v49 = vadd.f32 %v14674_v19, %v6404_v20  ;;  %v6405_v12 = vmul.f32 %v14688_v22, %v14793_v10  ;;  %v16021_v9 = vld [vmem:[#allocation46_spill] sm:$0xff]  ;;  %v16022_v54 = vld [vmem:[#allocation48_spill] sm:$0xff] }
 0x445   :  { %16018 = vst [vmem:[#allocation40_spill] sm:$0xff] %v14805_v32  ;;  %v5859_v34 = vadd.f32 %v5858_v29, %v14731_v23  ;;  %vm6526_vm5 = vcmp.ge.f32.partialorder %v6478_v18, 0.0  ;;  %8538 = vmatprep.mubr.bf16.mxu0 %v14811_v35  ;;  %v5930_v28 = vadd.f32 %v5929_v38, %v5857_v21  ;;  %v6569_v52 = vmul.f32 %v14440_v47, %v6472_v30  ;;  %v12353_v21 = vld [vmem:[#allocation14 + $0x128] ss:$24 sps:$4 sm:$0xff]  }
 0x446   :  { %v14820_v50 = vmul.f32 0.5, %v6188_v17  ;;  %v5860_v31 = vpop.f32.mrf.mxu0  ;;  %v6575_v16 = vmul.f32 %v14440_v47, %v6478_v18  ;;  %v6410_v20 = vmul.f32 %v14662_v45, %v14805_v32  ;;  %v6193_v14 = vadd.f32 %v5928_v42, %v16021_v9  ;;  %8539 = vmatmul.mubr.bf16.vlgmr.msra.gmra.mxu0 %v14786_v36  ;;  %v12496_v32 = vld [vmem:[#allocation14 + $0x45c] ss:$24 sps:$4 sm:$0xff]   ;;  %v16023_v9 = vld [vmem:[#allocation49_spill] sm:$0xff]  ;;  %8610 = vmatpush2.bf16.msra.mxu1 %v12488_v5 }
 0x447   :  { %v5932_v23 = vadd.f32 %v5931_v41, %v5859_v34  ;;  %v5861_v8 = vadd.f32 %v5860_v31, %v14735_v58  ;;  %8653 = vmatpush1.bf16.msra.mxu0 %v12350_v1  ;;  %v6194_v17 = vadd.f32 %v5930_v28, %v16022_v54  ;;  %v6617_v29 = vsel %vm6520_vm4, %v6472_v30, %v6569_v52  ;;  %v12358_v34 = vld [vmem:[#allocation14 + $0xfc] ss:$24 sps:$4 sm:$0xff]   ;;  %v12361_v54 = vld [vmem:[#allocation14 + $0xcc] ss:$24 sps:$4 sm:$0xff]  }
 0x448   :  { %16020 = vst [vmem:[#allocation41_spill] sm:$0xff] %v14820_v50  ;;  %v6411_v38 = vmul.f32 %v14688_v22, %v14820_v50  ;;  %v6623_v51 = vsel %vm6526_vm5, %v6478_v18, %v6575_v16  ;;  %v6484_v42 = vadd.f32 %v14692_v59, %v6405_v12  ;;  %8654 = vmatprep.subr.bf16.mxu0 %v12355_v60  ;;  %vm6519_vm6 = vcmp.ge.f32.partialorder %v14798_v63, 0.0  ;;  %v16027_v12 = vld [vmem:[#allocation51_spill] sm:$0xff] }
 0x449   :  { %v6199_v10 = vadd.f32 %v5932_v23, %v16023_v9  ;;  %v5934_v41 = vadd.f32 %v5933_v11, %v5861_v8  ;;  %v14837_v58 = vpack.c.bf16 %v6623_v51, %v6617_v29  ;;  %v14839_v31 = vmul.f32 0.5, %v6194_v17  ;;  %8725 = vmatprep.subr.bf16.mxu1 %v12496_v32  ;;  %v12356_v23 = vld [vmem:[#allocation14 + $0xf8] ss:$24 sps:$4 sm:$0xff]   ;;  %v12359_v9 = vld [vmem:[#allocation14 + $0xc8] ss:$24 sps:$4 sm:$0xff]  }
 0x44a   :  { %vm6525_vm7 = vcmp.ge.f32.partialorder %v14803_v24, 0.0  ;;  %v6568_v30 = vmul.f32 %v14440_v47, %v14798_v63  ;;  %v14845_v18 = vmul.f32 0.5, %v6193_v14  ;;  %v6574_v28 = vmul.f32 %v14440_v47, %v14803_v24  ;;  %v16029_v50 = vld [vmem:[#allocation63_spill] sm:$0xff] }
 0x44b   :  { %16024 = vst [vmem:[#allocation42_spill] sm:$0xff] %v14839_v31  ;;  %v14847_v1 = vmul.f32 0.5, %v6199_v10  ;;  %v6200_v60 = vadd.f32 %v5934_v41, %v16027_v12  ;;  %8548 = vmatprep.mubr.bf16.mxu0 %v14837_v58  ;;  %v6489_v52 = vadd.f32 %v14674_v19, %v6410_v20  ;;  %v6417_v16 = vmul.f32 %v14688_v22, %v14839_v31 }
 0x44c   :  { %16025 = vst [vmem:[#allocation43_spill] sm:$0xff] %v14845_v18  ;;  %8655 = vmatpush1.bf16.msra.mxu0 %v12353_v21  ;;  %v6616_v5 = vsel %vm6519_vm6, %v14798_v63, %v6568_v30  ;;  %v6490_v14 = vadd.f32 %v14692_v59, %v6411_v38  ;;  %v6622_v8 = vsel %vm6525_vm7, %v14803_v24, %v6574_v28  ;;  %vm6532_vm8 = vcmp.ge.f32.partialorder %v6484_v42, 0.0 }
 0x44d   :  { %16026 = vst [vmem:[#allocation45_spill] sm:$0xff] %v14847_v1  ;;  %v14858_v10 = vmul.f32 0.5, %v6200_v60  ;;  %8656 = vmatprep.subr.bf16.mxu0 %v12358_v34  ;;  %v6581_v32 = vmul.f32 %v14440_v47, %v6484_v42  ;;  %v6496_v20 = vadd.f32 %v14692_v59, %v6417_v16  ;;  %v14865_v11 = vpack.c.bf16 %v6622_v8, %v6616_v5  ;;  %v12362_v16 = vld [vmem:[#allocation14 + $0x98] ss:$24 sps:$4 sm:$0xff]   ;;  %v12367_v8 = vld [vmem:[#allocation14 + $0x6c] ss:$24 sps:$4 sm:$0xff]  }
 0x44e   :  { %vm6538_vm9 = vcmp.ge.f32.partialorder %v6490_v14, 0.0  ;;  %v6587_v63 = vmul.f32 %v14440_v47, %v6490_v14  ;;  %v6416_v38 = vmul.f32 %v14662_v45, %v14845_v18  ;;  %v6422_v17 = vmul.f32 %v14662_v45, %v14847_v1 }
 0x44f   :  { %16028 = vst [vmem:[#allocation46_spill] sm:$0xff] %v14858_v10  ;;  %v6423_v24 = vmul.f32 %v14688_v22, %v14858_v10  ;;  %8549 = vmatmul.mubr.bf16.gmra.mxu0 %v14865_v11  ;;  %v6629_v21 = vsel %vm6532_vm8, %v6484_v42, %v6581_v32  ;;  %vm6537_vm10 = vcmp.ge.f32.partialorder %v6489_v52, 0.0  ;;  %v6586_v51 = vmul.f32 %v14440_v47, %v6489_v52  ;;  %v12364_v22 = vld [vmem:[#allocation14 + $0x9c] ss:$24 sps:$4 sm:$0xff]  }
 0x450   :  { %v6635_v29 = vsel %vm6538_vm9, %v6490_v14, %v6587_v63  ;;  %8657 = vmatpush1.bf16.msra.mxu0 %v12356_v23  ;;  %v6580_v34 = vmul.f32 %v14440_v47, %v14815_v49  ;;  %v6593_v45 = vmul.f32 %v14440_v47, %v6496_v20  ;;  %vm6531_vm11 = vcmp.ge.f32.partialorder %v14815_v49, 0.0  ;;  %v12368_v63 = vld [vmem:[#allocation14 + $0x38] ss:$24 sps:$4 sm:$0xff]  }
 0x451   :  { %v14876_v41 = vpack.c.bf16 %v6635_v29, %v6629_v21  ;;  %v6502_v30 = vadd.f32 %v14692_v59, %v6423_v24  ;;  %8658 = vmatprep.subr.bf16.mxu0 %v12361_v54  ;;  %vm6544_vm12 = vcmp.ge.f32.partialorder %v6496_v20, 0.0  ;;  %v6501_v42 = vadd.f32 %v14674_v19, %v6422_v17  ;;  %v12373_v24 = vld [vmem:[#allocation14 + $0xc] ss:$24 sps:$4 sm:$0xff]   ;;  %v12371_v21 = vld [vmem:[#allocation14 + $0x8] ss:$24 sps:$4 sm:$0xff]  }
 0x452   :  { %v6634_v12 = vsel %vm6537_vm10, %v6489_v52, %v6586_v51  ;;  %v6495_v28 = vadd.f32 %v14674_v19, %v6416_v38  ;;  %v6628_v59 = vsel %vm6531_vm11, %v14815_v49, %v6580_v34  ;;  %v6641_v5 = vsel %vm6544_vm12, %v6496_v20, %v6593_v45  ;;  %v12365_v52 = vld [vmem:[#allocation14 + $0x68] ss:$24 sps:$4 sm:$0xff]   ;;  %v12370_v49 = vld [vmem:[#allocation14 + $0x3c] ss:$24 sps:$4 sm:$0xff]   ;;  %v12374_v51 = vld [vmem:[#allocation14 + $0x2d8] ss:$24 sps:$4 sm:$0xff]  }
 0x453   :  { %8558 = vmatprep.mubr.bf16.mxu0 %v14876_v41  ;;  %vm6550_vm13 = vcmp.ge.f32.partialorder %v6502_v30, 0.0  ;;  %v6599_v60 = vmul.f32 %v14440_v47, %v6502_v30  ;;  %v14888_v23 = vpack.c.bf16 %v6634_v12, %v6628_v59  ;;  %v6598_v54 = vmul.f32 %v14440_v47, %v6501_v42  ;;  %v12376_v29 = vld [vmem:[#allocation14 + $0x2dc] ss:$24 sps:$4 sm:$0xff]   ;;  %v12377_v34 = vld [vmem:[#allocation14 + $0x2a8] ss:$24 sps:$4 sm:$0xff]  }
 0x454   :  { %8659 = vmatpush1.bf16.msra.mxu0 %v12359_v9  ;;  %vm6549_vm14 = vcmp.ge.f32.partialorder %v6501_v42, 0.0  ;;  %v6592_v19 = vmul.f32 %v14440_v47, %v6495_v28  ;;  %vm6543_vm15 = vcmp.ge.f32.partialorder %v6495_v28, 0.0  ;;  %v12379_v9 = vld [vmem:[#allocation14 + $0x2ac] ss:$24 sps:$4 sm:$0xff]   ;;  %v12382_v45 = vld [vmem:[#allocation14 + $0x27c] ss:$24 sps:$4 sm:$0xff]   ;;  %v14952_v56 = vrot.slane %v14356_v46, %v16029_v50 }
 0x455   :  { %v6647_v14 = vsel %vm6550_vm13, %v6502_v30, %v6599_v60  ;;  %8660 = vmatprep.subr.bf16.mxu0 %v12364_v22  ;;  %v6646_v20 = vsel %vm6549_vm14, %v6501_v42, %v6598_v54  ;;  %v12380_v22 = vld [vmem:[#allocation14 + $0x278] ss:$24 sps:$4 sm:$0xff]   ;;  %v12385_v12 = vld [vmem:[#allocation14 + $0x24c] ss:$24 sps:$4 sm:$0xff]   ;;  %v12383_v60 = vld [vmem:[#allocation14 + $0x248] ss:$24 sps:$4 sm:$0xff]  }
 0x456   :  { %v14890_v32 = vpack.c.bf16 %v6647_v14, %v6641_v5  ;;  %v6640_v38 = vsel %vm6543_vm15, %v6495_v28, %v6592_v19  ;;  %v12386_v59 = vld [vmem:[#allocation14 + $0x218] ss:$24 sps:$4 sm:$0xff]   ;;  %v12391_v14 = vld [vmem:[#allocation14 + $0x1ec] ss:$24 sps:$4 sm:$0xff]  }
 0x457   :  { %8559 = vmatmul.mubr.bf16.gmra.mxu0 %v14888_v23  ;;  %v14896_v17 = vpack.c.bf16 %v6646_v20, %v6640_v38  ;;  %v12392_v19 = vld [vmem:[#allocation14 + $0x1b8] ss:$24 sps:$4 sm:$0xff]   ;;  %v12397_v20 = vld [vmem:[#allocation14 + $0x18c] ss:$24 sps:$4 sm:$0xff]   ;;  %v12395_v38 = vld [vmem:[#allocation14 + $0x188] ss:$24 sps:$4 sm:$0xff]  }
 0x458   :  { %8661 = vmatpush1.bf16.msra.mxu0 %v12362_v16  ;;  %8568 = vmatprep.mubr.bf16.mxu0 %v14890_v32  ;;  %v12388_v16 = vld [vmem:[#allocation14 + $0x21c] ss:$24 sps:$4 sm:$0xff]  }
 0x459   :  { %8662 = vmatprep.subr.bf16.mxu0 %v12367_v8  ;;  %v12389_v8 = vld [vmem:[#allocation14 + $0x1e8] ss:$24 sps:$4 sm:$0xff]  }
 0x45c   :  { %8663 = vmatpush1.bf16.msra.mxu0 %v12365_v52  ;;  %v12394_v52 = vld [vmem:[#allocation14 + $0x1bc] ss:$24 sps:$4 sm:$0xff]  }
 0x45d   :  { %8664 = vmatprep.subr.bf16.mxu0 %v12370_v49 }
 0x45f   :  { %8569 = vmatmul.mubr.bf16.gmra.mxu0 %v14896_v17 }
 0x460   :  { %8665 = vmatpush1.bf16.msra.mxu0 %v12368_v63  ;;  %8684 = vmatprep.mubr.bf16.mxu0 %v14529_v62  ;;  %v14912_v63 = vpop.f32.mrf.mxu1 }
 0x461   :  { %8666 = vmatprep.subr.bf16.mxu0 %v12373_v24 }
 0x464   :  { %8667 = vmatpush1.bf16.msra.mxu0 %v12371_v21  ;;  %v12403_v21 = vld [vmem:[#allocation14 + $0x75c] ss:$24 sps:$4 sm:$0xff]  }
 0x465   :  { %8668 = vmatprep.subr.bf16.mxu0 %v12376_v29  ;;  %v14916_v29 = vpop.f32.mrf.mxu1 }
 0x468   :  { %8669 = vmatpush2.bf16.msra.mxu0 %v12374_v51  ;;  %v14900_v30 = vpop.f32.mrf.mxu0  ;;  %v12401_v51 = vld [vmem:[#allocation14 + $0x758] ss:$24 sps:$4 sm:$0xff]  }
 0x469   :  { %8670 = vmatprep.subr.bf16.mxu0 %v12379_v9  ;;  %v5971_v26 = vadd.f32 %v14900_v30, %v14952_v56  ;;  %v12455_v30 = vld [vmem:[#allocation14 + $0x8a8] ss:$24 sps:$4 sm:$0xff]  }
 0x46a   :  { %v14902_v42 = vpop.f32.mrf.mxu0 }
 0x46c   :  { %8671 = vmatpush2.bf16.msra.mxu0 %v12377_v34  ;;  %v14904_v28 = vpop.f32.mrf.mxu0  ;;  %v12409_v34 = vld [vmem:[#allocation14 + $0x72c] ss:$24 sps:$4 sm:$0xff]  }
 0x46d   :  { %8672 = vmatprep.subr.bf16.mxu0 %v12382_v45  ;;  %v14920_v45 = vpop.f32.mrf.mxu1  ;;  %v5975_v13 = vadd.f32 %v14904_v28, %v14952_v56  ;;  %v12463_v28 = vld [vmem:[#allocation14 + $0x87c] ss:$24 sps:$4 sm:$0xff]  }
 0x46e   :  { %v14906_v5 = vpop.f32.mrf.mxu0 }
 0x470   :  { %8673 = vmatpush2.bf16.msra.mxu0 %v12380_v22  ;;  %v14908_v54 = vpop.f32.mrf.mxu0  ;;  %v12407_v22 = vld [vmem:[#allocation14 + $0x728] ss:$24 sps:$4 sm:$0xff]  }
 0x471   :  { %8674 = vmatprep.subr.bf16.mxu0 %v12385_v12 }
 0x472   :  { %v14910_v49 = vpop.f32.mrf.mxu0 }
 0x474   :  { %8675 = vmatpush2.bf16.msra.mxu0 %v12383_v60  ;;  %v14914_v24 = vpop.f32.mrf.mxu0  ;;  %v12415_v60 = vld [vmem:[#allocation14 + $0x6fc] ss:$24 sps:$4 sm:$0xff]  }
 0x475   :  { %8676 = vmatprep.subr.bf16.mxu0 %v12388_v16  ;;  %v14926_v16 = vpop.f32.mrf.mxu1 }
 0x476   :  { %v14918_v9 = vpop.f32.mrf.mxu0 }
 0x478   :  { %8677 = vmatpush2.bf16.msra.mxu0 %v12386_v59  ;;  %v14924_v12 = vpop.f32.mrf.mxu0  ;;  %v12413_v59 = vld [vmem:[#allocation14 + $0x6f8] ss:$24 sps:$4 sm:$0xff]  }
 0x479   :  { %8678 = vmatprep.subr.bf16.mxu0 %v12391_v14 }
 0x47a   :  { %v14928_v14 = vpop.f32.mrf.mxu0 }
 0x47c   :  { %8679 = vmatpush2.bf16.msra.mxu0 %v12389_v8  ;;  %v12421_v8 = vld [vmem:[#allocation14 + $0x6cc] ss:$24 sps:$4 sm:$0xff]  }
 0x47d   :  { %8680 = vmatprep.subr.bf16.mxu0 %v12394_v52  ;;  %v14930_v52 = vpop.f32.mrf.mxu1 }
 0x480   :  { %8681 = vmatpush2.bf16.msra.mxu0 %v12392_v19  ;;  %v12419_v19 = vld [vmem:[#allocation14 + $0x6c8] ss:$24 sps:$4 sm:$0xff]  }
 0x481   :  { %8682 = vmatprep.subr.bf16.mxu0 %v12397_v20  ;;  %v14934_v20 = vpop.f32.mrf.mxu0 }
 0x484   :  { %8683 = vmatpush2.bf16.msra.mxu0 %v12395_v38  ;;  %v12427_v38 = vld [vmem:[#allocation14 + $0x69c] ss:$24 sps:$4 sm:$0xff]  }
 0x485   :  { %8798 = vmatprep.subr.bf16.mxu0 %v12403_v21  ;;  %v14936_v21 = vpop.f32.mrf.mxu1 }
 0x487   :  { %8685 = vmatmul.mubr.bf16.vlgmr.msra.gmra.mxu0 %v14506_v4 }
 0x488   :  { %8694 = vmatprep.mubr.bf16.mxu0 %v14559_v40  ;;  %8799 = vmatpush1.bf16.msra.mxu0 %v12401_v51  ;;  %v12425_v51 = vld [vmem:[#allocation14 + $0x698] ss:$24 sps:$4 sm:$0xff]  }
 0x489   :  { %8800 = vmatprep.subr.bf16.mxu0 %v12409_v34  ;;  %v14938_v34 = vpop.f32.mrf.mxu0 }
 0x48b   :  { %v6000_v10 = vpop.f32.mrf.mxu0 }
 0x48c   :  { %8801 = vmatpush1.bf16.msra.mxu0 %v12407_v22  ;;  %v12433_v22 = vld [vmem:[#allocation14 + $0x66c] ss:$24 sps:$4 sm:$0xff]  }
 0x48d   :  { %8802 = vmatprep.subr.bf16.mxu0 %v12415_v60  ;;  %v14940_v60 = vpop.f32.mrf.mxu1  ;;  %v14946_v31 = vpop.f32.mrf.mxu0 }
 0x48f   :  { %8695 = vmatmul.mubr.bf16.gmra.mxu0 %v14587_v53  ;;  %v14944_v1 = vpop.f32.mrf.mxu1 }
 0x490   :  { %8704 = vmatprep.mubr.bf16.mxu0 %v14608_v27  ;;  %8803 = vmatpush1.bf16.msra.mxu0 %v12413_v59  ;;  %v12431_v59 = vld [vmem:[#allocation14 + $0x668] ss:$24 sps:$4 sm:$0xff]  }
 0x491   :  { %8804 = vmatprep.subr.bf16.mxu0 %v12421_v8  ;;  %v12439_v8 = vld [vmem:[#allocation14 + $0x63c] ss:$24 sps:$4 sm:$0xff]   ;;  %v14948_v18 = vpop.f32.mrf.mxu1 }
 0x494   :  { %8805 = vmatpush1.bf16.msra.mxu0 %v12419_v19  ;;  %v12437_v19 = vld [vmem:[#allocation14 + $0x638] ss:$24 sps:$4 sm:$0xff]  }
 0x495   :  { %8806 = vmatprep.subr.bf16.mxu0 %v12427_v38  ;;  %v12445_v38 = vld [vmem:[#allocation14 + $0x60c] ss:$24 sps:$4 sm:$0xff]  }
 0x497   :  { %8705 = vmatmul.mubr.bf16.gmra.mxu0 %v14619_v2 }
 0x498   :  { %8714 = vmatprep.mubr.bf16.mxu0 %v14625_v3  ;;  %8807 = vmatpush1.bf16.msra.mxu0 %v12425_v51  ;;  %v16030_v51 = vld [vmem:[#allocation30_spill] sm:$0xff] }
 0x499   :  { %8808 = vmatprep.subr.bf16.mxu0 %v12433_v22  ;;  %v14957_v22 = vrot.slane %v14356_v46, %v16030_v51  ;;  %v12457_v46 = vld [vmem:[#allocation14 + $0x8ac] ss:$24 sps:$4 sm:$0xff]  }
 0x49b   :  { %v5973_v57 = vadd.f32 %v14902_v42, %v14957_v22  ;;  %v5977_v61 = vadd.f32 %v14906_v5, %v14957_v22  ;;  %v14981_v42 = vrot.slane %v14378_v43, %v16029_v50  ;;  %v14985_v5 = vrot.slane %v14373_v48, %v16030_v51 }
 0x49c   :  { %8809 = vmatpush1.bf16.msra.mxu0 %v12431_v59  ;;  %v14959_v59 = vpop.f32.mrf.mxu0  ;;  %v5987_v55 = vadd.f32 %v14918_v9, %v14957_v22  ;;  %v5997_v9 = vadd.f32 %v14938_v34, %v14957_v22 }
 0x49d   :  { %8810 = vmatprep.subr.bf16.mxu0 %v12439_v8  ;;  %v14961_v8 = vpop.f32.mrf.mxu1 }
 0x49e   :  { %v14967_v6 = vpop.f32.mrf.mxu0 }
 0x49f   :  { %8715 = vmatmul.mubr.bf16.gmra.mxu0 %v14632_v37 }
 0x4a0   :  { %8811 = vmatpush1.bf16.msra.mxu0 %v12437_v19  ;;  %v6067_v19 = vpop.f32.mrf.mxu1 }
 0x4a1   :  { %8812 = vmatprep.subr.bf16.mxu0 %v12445_v38  ;;  %v6044_v38 = vadd.f32 %v14912_v63, %v5971_v26  ;;  %v16031_v63 = vld [vmem:[#allocation65_spill] sm:$0xff] }
 0x4a4   :  { %8813 = vmatpush1.bf16.msra.mxu0 %v12443_v39  ;;  %v6046_v39 = vadd.f32 %v14916_v29, %v5973_v57  ;;  %v5981_v57 = vadd.f32 %v14908_v54, %v14952_v56  ;;  %v5991_v54 = vadd.f32 %v14924_v12, %v14952_v56  ;;  %v12469_v12 = vld [vmem:[#allocation14 + $0x84c] ss:$24 sps:$4 sm:$0xff]  }
 0x4a5   :  { %8814 = vmatprep.subr.bf16.mxu0 %v12451_v0  ;;  %v14977_v0 = vrot.slane %v14373_v48, %v16029_v50  ;;  %v5983_v50 = vadd.f32 %v14910_v49, %v14957_v22  ;;  %v5985_v48 = vadd.f32 %v14914_v24, %v14952_v56  ;;  %v5993_v49 = vadd.f32 %v14928_v14, %v14957_v22 }
 0x4a6   :  { %v5995_v24 = vadd.f32 %v14934_v20, %v14952_v56 }
 0x4a7   :  { %v6058_v34 = vadd.f32 %v14940_v60, %v5985_v48 }
 0x4a8   :  { %v6116_v44 = vpop.f32.mrf.mxu0  ;;  %8815 = vmatpush2.bf16.msra.mxu0 %v12449_v7  ;;  %v6069_v7 = vpop.f32.mrf.mxu1 }
 0x4a9   :  { %v6117_v15 = vadd.f32 %v6116_v44, %v6044_v38  ;;  %8816 = vmatprep.subr.bf16.mxu0 %v12457_v46  ;;  %v14989_v44 = vrot.slane %v14378_v43, %v16030_v51  ;;  %v6048_v38 = vadd.f32 %v14920_v45, %v5975_v13  ;;  %v6050_v51 = vadd.f32 %v14926_v16, %v5977_v61  ;;  %v16033_v13 = vld [vmem:[#allocation62_spill] sm:$0xff] }
 0x4aa   :  { %v6118_v26 = vpop.f32.mrf.mxu0  ;;  %v6001_v61 = vadd.f32 %v6000_v10, %v14952_v56  ;;  %v6060_v10 = vadd.f32 %v14944_v1, %v5987_v55  ;;  %v6066_v55 = vadd.f32 %v14961_v8, %v5993_v49  ;;  %v15032_v1 = vadd.f32 %v6067_v19, %v5995_v24 }
 0x4ab   :  { %v6159_v29 = vadd.f32 %v6117_v15, %v16031_v63  ;;  %v6119_v46 = vadd.f32 %v6118_v26, %v6046_v39  ;;  %v12461_v39 = vld [vmem:[#allocation14 + $0x878] ss:$24 sps:$4 sm:$0xff]   ;;  %v6005_v49 = vadd.f32 %v14959_v59, %v14952_v56  ;;  %v6007_v24 = vadd.f32 %v14967_v6, %v14957_v22 }
 0x4ac   :  { %v6120_v43 = vpop.f32.mrf.mxu0  ;;  %8817 = vmatpush2.bf16.msra.mxu0 %v12455_v30  ;;  %v6073_v30 = vpop.f32.mrf.mxu1 }
 0x4ad   :  { %v15004_v15 = vmul.f32 0.5, %v6159_v29  ;;  %v6160_v45 = vadd.f32 %v6119_v46, %v16033_v13  ;;  %v6121_v26 = vadd.f32 %v6120_v43, %v6048_v38  ;;  %8818 = vmatprep.subr.bf16.mxu0 %v12463_v28  ;;  %v16035_v46 = vld [vmem:[#allocation66_spill] sm:$0xff]  ;;  %v6054_v43 = vadd.f32 %v14930_v52, %v5981_v57 }
 0x4ae   :  { %v6122_v16 = vpop.f32.mrf.mxu0  ;;  %v6056_v13 = vadd.f32 %v14936_v21, %v5983_v50  ;;  %v6003_v28 = vadd.f32 %v14946_v31, %v14957_v22  ;;  %v12475_v57 = vld [vmem:[#allocation14 + $0x81c] ss:$24 sps:$4 sm:$0xff]   ;;  %v6064_v21 = vadd.f32 %v14948_v18, %v5991_v54  ;;  %v6075_v31 = vpop.f32.mrf.mxu1  ;;  %v16039_v18 = vld [vmem:[#allocation69_spill] sm:$0xff] }
 0x4af   :  { %16032 = vst [vmem:[#allocation48_spill] sm:$0xff] %v15004_v15  ;;  %v6382_v63 = vmul.f32 %v14977_v0, %v15004_v15  ;;  %v15016_v29 = vmul.f32 0.5, %v6160_v45  ;;  %v6165_v38 = vadd.f32 %v6121_v26, %v16035_v46  ;;  %v6123_v14 = vadd.f32 %v6122_v16, %v6050_v51  ;;  %v12467_v26 = vld [vmem:[#allocation14 + $0x848] ss:$24 sps:$4 sm:$0xff]   ;;  %v16042_v22 = vld [vmem:[#allocation70_spill] sm:$0xff] }
 0x4b0   :  { %v6126_v20 = vpop.f32.mrf.mxu0  ;;  %8819 = vmatpush2.bf16.msra.mxu0 %v12461_v39  ;;  %v16037_v51 = vld [vmem:[#allocation64_spill] sm:$0xff]  ;;  %v15037_v39 = vadd.f32 %v6069_v7, %v5997_v9  ;;  %v15039_v46 = vadd.f32 %v6073_v30, %v6001_v61  ;;  %v12473_v7 = vld [vmem:[#allocation14 + $0x818] ss:$24 sps:$4 sm:$0xff]   ;;  %v15051_v61 = vadd.f32 %v6075_v31, %v6003_v28  ;;  %v6077_v59 = vpop.f32.mrf.mxu1 }
 0x4b1   :  { %16034 = vst [vmem:[#allocation49_spill] sm:$0xff] %v15016_v29  ;;  %v6383_v45 = vmul.f32 %v14985_v5, %v15016_v29  ;;  %v15027_v15 = vmul.f32 0.5, %v6165_v38  ;;  %v6166_v16 = vadd.f32 %v6123_v14, %v16037_v51  ;;  %8820 = vmatprep.subr.bf16.mxu0 %v12469_v12  ;;  %v6127_v52 = vadd.f32 %v6126_v20, %v6054_v43  ;;  %v16041_v43 = vld [vmem:[#allocation67_spill] sm:$0xff]  ;;  %v16045_v31 = vld [vmem:[#allocation68_spill] sm:$0xff] }
 0x4b2   :  { %v6128_v50 = vpop.f32.mrf.mxu0  ;;  %v6461_v60 = vadd.f32 %v14981_v42, %v6382_v63 }
 0x4b3   :  { %16036 = vst [vmem:[#allocation51_spill] sm:$0xff] %v15027_v15  ;;  %v6388_v48 = vmul.f32 %v14977_v0, %v15027_v15  ;;  %v15042_v12 = vadd.f32 %v14989_v44, %v6383_v45  ;;  %v15044_v38 = vmul.f32 0.5, %v6166_v16  ;;  %v6171_v54 = vadd.f32 %v6127_v52, %v16039_v18 }
 0x4b4   :  { %v6129_v8 = vadd.f32 %v6128_v50, %v6056_v13  ;;  %v6130_v19 = vpop.f32.mrf.mxu0  ;;  %8821 = vmatpush2.bf16.msra.mxu0 %v12467_v26  ;;  %v12481_v13 = vld [vmem:[#allocation14 + $0x7ec] ss:$24 sps:$4 sm:$0xff]   ;;  %vm6509_vm0 = vcmp.ge.f32.partialorder %v6461_v60, 0.0  ;;  %v6558_v6 = vmul.f32 %v14440_v47, %v6461_v60  ;;  %v12479_v50 = vld [vmem:[#allocation14 + $0x7e8] ss:$24 sps:$4 sm:$0xff]  }
 0x4b5   :  { %16038 = vst [vmem:[#allocation65_spill] sm:$0xff] %v15044_v38  ;;  %v6131_v9 = vadd.f32 %v6130_v19, %v6058_v34  ;;  %v6467_v30 = vadd.f32 %v14981_v42, %v6388_v48  ;;  %v6389_v63 = vmul.f32 %v14985_v5, %v15044_v38  ;;  %v15056_v14 = vmul.f32 0.5, %v6171_v54  ;;  %8822 = vmatprep.subr.bf16.mxu0 %v12475_v57 }
 0x4b6   :  { %v6172_v20 = vadd.f32 %v6129_v8, %v16041_v43  ;;  %v6132_v56 = vpop.f32.mrf.mxu0  ;;  %vm6510_vm1 = vcmp.ge.f32.partialorder %v15042_v12, 0.0  ;;  %v6559_v16 = vmul.f32 %v14440_v47, %v15042_v12  ;;  %v12487_v8 = vld [vmem:[#allocation14 + $0x7bc] ss:$24 sps:$4 sm:$0xff]   ;;  %v16047_v43 = vld [vmem:[#allocation73_spill] sm:$0xff] }
 0x4b7   :  { %16040 = vst [vmem:[#allocation62_spill] sm:$0xff] %v15056_v14  ;;  %v6177_v34 = vadd.f32 %v6131_v9, %v16042_v22  ;;  %v6133_v28 = vadd.f32 %v6132_v56, %v6060_v10  ;;  %v6468_v45 = vadd.f32 %v14989_v44, %v6389_v63  ;;  %v6394_v52 = vmul.f32 %v14977_v0, %v15056_v14  ;;  %v6079_v9 = vpop.f32.mrf.mxu1  ;;  %v178_v14 = vld [vmem:[#allocation8 + $0x31] ss:$8 sm:$0x30] }
 0x4b8   :  { %v15062_v26 = vmul.f32 0.5, %v6172_v20  ;;  %v6136_v51 = vpop.f32.mrf.mxu0  ;;  %8823 = vmatpush2.bf16.msra.mxu0 %v12473_v7  ;;  %vm6515_vm2 = vcmp.ge.f32.partialorder %v6467_v30, 0.0  ;;  %v6564_v18 = vmul.f32 %v14440_v47, %v6467_v30 }
 0x4b9   :  { %v15069_v57 = vmul.f32 0.5, %v6177_v34  ;;  %v6178_v48 = vadd.f32 %v6133_v28, %v16045_v31  ;;  %v6137_v10 = vadd.f32 %v6136_v51, %v6064_v21  ;;  %8824 = vmatprep.subr.bf16.mxu0 %v12481_v13  ;;  %vm6516_vm3 = vcmp.ge.f32.partialorder %v6468_v45, 0.0 }
 0x4ba   :  { %16043 = vst [vmem:[#allocation66_spill] sm:$0xff] %v15062_v26  ;;  %v6395_v54 = vmul.f32 %v14985_v5, %v15062_v26  ;;  %v6138_v19 = vpop.f32.mrf.mxu0  ;;  %v6565_v34 = vmul.f32 %v14440_v47, %v6468_v45  ;;  %v6078_v28 = vadd.f32 %v6077_v59, %v6005_v49  ;;  %v15082_v51 = vadd.f32 %v6079_v9, %v6007_v24  ;;  %v12493_v49 = vld [vmem:[#allocation14 + $0x78c] ss:$24 sps:$4 sm:$0xff]   ;;  %v177_v26 = vld [vmem:[#allocation8 + $0x31] ss:$8 sm:$0xf] }
 0x4bb   :  { %16044 = vst [vmem:[#allocation64_spill] sm:$0xff] %v15069_v57  ;;  %v6400_v7 = vmul.f32 %v14977_v0, %v15069_v57  ;;  %v15077_v63 = vmul.f32 0.5, %v6178_v48  ;;  %v6183_v20 = vadd.f32 %v6137_v10, %v16047_v43  ;;  %v6139_v56 = vadd.f32 %v6138_v19, %v6066_v55  ;;  %v12485_v57 = vld [vmem:[#allocation14 + $0x7b8] ss:$24 sps:$4 sm:$0xff]  }
 0x4bc   :  { %v6474_v21 = vadd.f32 %v14989_v44, %v6395_v54  ;;  %v6140_v22 = vpop.f32.mrf.mxu0  ;;  %v6606_v13 = vsel %vm6509_vm0, %v6461_v60, %v6558_v6  ;;  %v15086_v31 = vadd.f32 %v14981_v42, %v6394_v52  ;;  %8825 = vmatpush2.bf16.msra.mxu0 %v12479_v50  ;;  %v16048_v10 = vld [vmem:[#allocation71_spill] sm:$0xff]  ;;  %v6612_v54 = vsel %vm6515_vm2, %v6467_v30, %v6564_v18  ;;  %v16051_v30 = vld [vmem:[#allocation74_spill] sm:$0xff] }
 0x4bd   :  { %16046 = vst [vmem:[#allocation69_spill] sm:$0xff] %v15077_v63  ;;  %v6401_v48 = vmul.f32 %v14985_v5, %v15077_v63  ;;  %v6184_v55 = vadd.f32 %v6139_v56, %v16048_v10  ;;  %8826 = vmatprep.subr.bf16.mxu0 %v12487_v8  ;;  %v6141_v19 = vadd.f32 %v6140_v22, %v15032_v1  ;;  %v15101_v50 = vmul.f32 0.5, %v6183_v20  ;;  %v12494_v43 = vld [vmem:[#allocation14 + $0x458] ss:$24 sps:$4 sm:$0xff]   ;;  %v12502_v22 = vld [vmem:[#allocation14 + $0x42c] ss:$24 sps:$4 sm:$0xff]  }
 0x4be   :  { %v6142_v24 = vpop.f32.mrf.mxu0  ;;  %v6607_v60 = vsel %vm6510_vm1, %v15042_v12, %v6559_v16  ;;  %v6613_v59 = vsel %vm6516_vm3, %v6468_v45, %v6565_v34  ;;  %v15098_v6 = vadd.f32 %v14981_v42, %v6400_v7  ;;  %v6571_v12 = vmul.f32 %v14440_v47, %v6474_v21  ;;  %v12491_v7 = vld [vmem:[#allocation14 + $0x788] ss:$24 sps:$4 sm:$0xff]   ;;  %v12499_v10 = vld [vmem:[#allocation14 + $0x464] ss:$24 sps:$4 sm:$0xff]  }
 0x4bf   :  { %v6480_v52 = vadd.f32 %v14989_v44, %v6401_v48  ;;  %16049 = vst [vmem:[#allocation67_spill] sm:$0xff] %v15101_v50  ;;  %v15103_v9 = vmul.f32 0.5, %v6184_v55  ;;  %v6189_v18 = vadd.f32 %v6141_v19, %v16051_v30  ;;  %v6143_v1 = vadd.f32 %v6142_v24, %v15037_v39  ;;  %v16053_v39 = vld [vmem:[#allocation72_spill] sm:$0xff] }
 0x4c0   :  { %v15107_v8 = vpack.c.bf16 %v6613_v59, %v6607_v60  ;;  %v6146_v56 = vpop.f32.mrf.mxu0  ;;  %v15110_v45 = vpack.c.bf16 %v6612_v54, %v6606_v13  ;;  %v6570_v16 = vmul.f32 %v14440_v47, %v15086_v31  ;;  %8827 = vmatpush2.bf16.msra.mxu0 %v12485_v57  ;;  %vm6522_vm4 = vcmp.ge.f32.partialorder %v6474_v21, 0.0  ;;  %v12500_v60 = vld [vmem:[#allocation14 + $0x428] ss:$24 sps:$4 sm:$0xff]  }
 0x4c1   :  { %16050 = vst [vmem:[#allocation70_spill] sm:$0xff] %v15103_v9  ;;  %v6147_v20 = vadd.f32 %v6146_v56, %v15039_v46  ;;  %v15115_v34 = vmul.f32 0.5, %v6189_v18  ;;  %8828 = vmatprep.subr.bf16.mxu0 %v12493_v49  ;;  %v6190_v48 = vadd.f32 %v6143_v1, %v16053_v39  ;;  %vm6528_vm5 = vcmp.ge.f32.partialorder %v6480_v52, 0.0  ;;  %v16055_v18 = vld [vmem:[#allocation77_spill] sm:$0xff]  ;;  %v12497_v56 = vld [vmem:[#allocation14 + $0x460] ss:$24 sps:$4 sm:$0xff]  }
 0x4c2   :  { %8611 = vmatprep.mubr.bf16.mxu1 %v15107_v8  ;;  %v6148_v55 = vpop.f32.mrf.mxu0  ;;  %v6577_v13 = vmul.f32 %v14440_v47, %v6480_v52  ;;  %v6576_v57 = vmul.f32 %v14440_v47, %v15098_v6  ;;  %v6406_v46 = vmul.f32 %v14977_v0, %v15101_v50  ;;  %v6407_v54 = vmul.f32 %v14985_v5, %v15103_v9 }
 0x4c3   :  { %16052 = vst [vmem:[#allocation68_spill] sm:$0xff] %v15115_v34  ;;  %8830 = vmatprep.mubr.bf16.mxu0 %v15107_v8  ;;  %8612 = vmatmul.mubr.bf16.vlgmr.msra.gmra.mxu1 %v15110_v45  ;;  %v6412_v19 = vmul.f32 %v14977_v0, %v15115_v34  ;;  %v15130_v49 = vmul.f32 0.5, %v6190_v48  ;;  %v6149_v24 = vadd.f32 %v6148_v55, %v15051_v61  ;;  %vm6521_vm6 = vcmp.ge.f32.partialorder %v15086_v31, 0.0 }
 0x4c4   :  { %8726 = vmatpush1.bf16.msra.mxu1 %v12494_v43  ;;  %v6150_v59 = vpop.f32.mrf.mxu0  ;;  %v6619_v30 = vsel %vm6522_vm4, %v6474_v21, %v6571_v12  ;;  %8829 = vmatpush2.bf16.msra.mxu0 %v12491_v7  ;;  %v6195_v1 = vadd.f32 %v6147_v20, %v16055_v18  ;;  %v6625_v9 = vsel %vm6528_vm5, %v6480_v52, %v6577_v13  ;;  %v16056_v43 = vld [vmem:[#allocation75_spill] sm:$0xff]  ;;  %v12505_v21 = vld [vmem:[#allocation14 + $0x434] ss:$24 sps:$4 sm:$0xff]   ;;  %vm6527_vm7 = vcmp.ge.f32.partialorder %v15098_v6, 0.0 }
 0x4c5   :  { %16054 = vst [vmem:[#allocation73_spill] sm:$0xff] %v15130_v49  ;;  %8727 = vmatprep.subr.bf16.mxu1 %v12502_v22  ;;  %v6151_v39 = vadd.f32 %v6150_v59, %v6078_v28  ;;  %v15138_v48 = vadd.f32 %v14981_v42, %v6412_v19  ;;  %v6413_v61 = vmul.f32 %v14985_v5, %v15130_v49  ;;  %v12508_v20 = vld [vmem:[#allocation14 + $0x3fc] ss:$24 sps:$4 sm:$0xff]  }
 0x4c6   :  { %8944 = vmatprep.subr.bf16.mxu0 %v12499_v10  ;;  %v6196_v55 = vadd.f32 %v6149_v24, %v16056_v43  ;;  %v6152_v12 = vpop.f32.mrf.mxu0  ;;  %v15143_v7 = vpack.c.bf16 %v6625_v9, %v6619_v30  ;;  %v6486_v28 = vadd.f32 %v14989_v44, %v6407_v54  ;;  %v16057_v22 = vld [vmem:[#allocation78_spill] sm:$0xff]  ;;  %v6485_v9 = vadd.f32 %v14981_v42, %v6406_v46  ;;  %v12514_v43 = vld [vmem:[#allocation14 + $0x3cc] ss:$24 sps:$4 sm:$0xff]  }
 0x4c7   :  { %v6201_v52 = vadd.f32 %v6151_v39, %v16057_v22  ;;  %v6153_v13 = vadd.f32 %v6152_v12, %v15082_v51  ;;  %v6492_v19 = vadd.f32 %v14989_v44, %v6413_v61  ;;  %8831 = vmatmul.mubr.bf16.vlgmr.msra.gmra.mxu0 %v15110_v45  ;;  %v12506_v24 = vld [vmem:[#allocation14 + $0x3f8] ss:$24 sps:$4 sm:$0xff]   ;;  %v6588_v59 = vmul.f32 %v14440_v47, %v15138_v48  ;;  %v16060_v51 = vld [vmem:[#allocation76_spill] sm:$0xff] }
 0x4c8   :  { %v15151_v10 = vmul.f32 0.5, %v6196_v55  ;;  %8728 = vmatpush1.bf16.msra.mxu1 %v12500_v60  ;;  %8945 = vmatpush1.bf16.msra.mxu0 %v12497_v56  ;;  %v12503_v30 = vld [vmem:[#allocation14 + $0x430] ss:$24 sps:$4 sm:$0xff]   ;;  %v15160_v39 = vmul.f32 0.5, %v6195_v1  ;;  %v6618_v46 = vsel %vm6521_vm6, %v15086_v31, %v6570_v16  ;;  %v6624_v60 = vsel %vm6527_vm7, %v15098_v6, %v6576_v57  ;;  %v12511_v56 = vld [vmem:[#allocation14 + $0x404] ss:$24 sps:$4 sm:$0xff]  }
 0x4c9   :  { %v15156_v54 = vmul.f32 0.5, %v6201_v52  ;;  %v6202_v18 = vadd.f32 %v6153_v13, %v16060_v51  ;;  %8621 = vmatprep.mubr.bf16.mxu1 %v15143_v7  ;;  %8946 = vmatprep.subr.bf16.mxu0 %v12505_v21  ;;  %v15173_v1 = vpack.c.bf16 %v6624_v60, %v6618_v46  ;;  %vm6534_vm8 = vcmp.ge.f32.partialorder %v6486_v28, 0.0  ;;  %v12512_v31 = vld [vmem:[#allocation14 + $0x3c8] ss:$24 sps:$4 sm:$0xff]   ;;  %v12517_v13 = vld [vmem:[#allocation14 + $0x3d4] ss:$24 sps:$4 sm:$0xff]  }
 0x4ca   :  { %16058 = vst [vmem:[#allocation71_spill] sm:$0xff] %v15151_v10  ;;  %16061 = vst [vmem:[#allocation72_spill] sm:$0xff] %v15160_v39  ;;  %v6419_v61 = vmul.f32 %v14985_v5, %v15151_v10  ;;  %8729 = vmatprep.subr.bf16.mxu1 %v12508_v20  ;;  %8840 = vmatprep.mubr.bf16.mxu0 %v15143_v7  ;;  %vm6540_vm9 = vcmp.ge.f32.partialorder %v6492_v19, 0.0  ;;  %v6583_v16 = vmul.f32 %v14440_v47, %v6486_v28  ;;  %v12509_v22 = vld [vmem:[#allocation14 + $0x400] ss:$24 sps:$4 sm:$0xff]  }
 0x4cb   :  { %16059 = vst [vmem:[#allocation74_spill] sm:$0xff] %v15156_v54  ;;  %v15170_v55 = vmul.f32 0.5, %v6202_v18  ;;  %v6424_v12 = vmul.f32 %v14977_v0, %v15156_v54  ;;  %v6589_v6 = vmul.f32 %v14440_v47, %v6492_v19  ;;  %v6582_v57 = vmul.f32 %v14440_v47, %v6485_v9  ;;  %8622 = vmatmul.mubr.bf16.gmra.mxu1 %v15173_v1  ;;  %v12520_v18 = vld [vmem:[#allocation14 + $0x39c] ss:$24 sps:$4 sm:$0xff]   ;;  %v12518_v46 = vld [vmem:[#allocation14 + $0x398] ss:$24 sps:$4 sm:$0xff]  }
 0x4cc   :  { %v6498_v21 = vadd.f32 %v14989_v44, %v6419_v61  ;;  %8730 = vmatpush1.bf16.msra.mxu1 %v12506_v24  ;;  %8947 = vmatpush1.bf16.msra.mxu0 %v12503_v30  ;;  %vm6539_vm10 = vcmp.ge.f32.partialorder %v15138_v48, 0.0  ;;  %v6418_v52 = vmul.f32 %v14977_v0, %v15160_v39  ;;  %v6631_v24 = vsel %vm6534_vm8, %v6486_v28, %v6583_v16  ;;  %v12515_v28 = vld [vmem:[#allocation14 + $0x3d0] ss:$24 sps:$4 sm:$0xff]   ;;  %v12687_v10 = vld [vmem:[#allocation14 + $0x794] ss:$24 sps:$4 sm:$0xff]  }
 0x4cd   :  { %16062 = vst [vmem:[#allocation77_spill] sm:$0xff] %v15170_v55  ;;  %v6425_v20 = vmul.f32 %v14985_v5, %v15170_v55  ;;  %8948 = vmatprep.subr.bf16.mxu0 %v12511_v56  ;;  %8731 = vmatprep.subr.bf16.mxu1 %v12514_v43  ;;  %v6637_v51 = vsel %vm6540_vm9, %v6492_v19, %v6589_v6  ;;  %vm6533_vm11 = vcmp.ge.f32.partialorder %v6485_v9, 0.0  ;;  %v12523_v43 = vld [vmem:[#allocation14 + $0x3a4] ss:$24 sps:$4 sm:$0xff]   ;;  %v12524_v6 = vld [vmem:[#allocation14 + $0x368] ss:$24 sps:$4 sm:$0xff]  }
 0x4ce   :  { %v15190_v61 = vpack.c.bf16 %v6637_v51, %v6631_v24  ;;  %v6503_v5 = vadd.f32 %v14981_v42, %v6424_v12  ;;  %v6636_v0 = vsel %vm6539_vm10, %v15138_v48, %v6588_v59  ;;  %vm6546_vm12 = vcmp.ge.f32.partialorder %v6498_v21, 0.0  ;;  %v12526_v12 = vld [vmem:[#allocation14 + $0x36c] ss:$24 sps:$4 sm:$0xff]  }
 0x4cf   :  { %v6504_v30 = vadd.f32 %v14989_v44, %v6425_v20  ;;  %8841 = vmatmul.mubr.bf16.gmra.mxu0 %v15173_v1  ;;  %v6595_v60 = vmul.f32 %v14440_v47, %v6498_v21  ;;  %v6497_v19 = vadd.f32 %v14981_v42, %v6418_v52  ;;  %v6630_v56 = vsel %vm6533_vm11, %v6485_v9, %v6582_v57  ;;  %v12521_v42 = vld [vmem:[#allocation14 + $0x3a0] ss:$24 sps:$4 sm:$0xff]   ;;  %v12529_v57 = vld [vmem:[#allocation14 + $0x374] ss:$24 sps:$4 sm:$0xff]   ;;  %v12535_v51 = vld [vmem:[#allocation14 + $0x344] ss:$24 sps:$4 sm:$0xff]  }
 0x4d0   :  { %8732 = vmatpush1.bf16.msra.mxu1 %v12512_v31  ;;  %8949 = vmatpush1.bf16.msra.mxu0 %v12509_v22  ;;  %v15201_v48 = vpack.c.bf16 %v6636_v0, %v6630_v56  ;;  %v6600_v16 = vmul.f32 %v14440_v47, %v6503_v5  ;;  %v12532_v22 = vld [vmem:[#allocation14 + $0x33c] ss:$24 sps:$4 sm:$0xff]   ;;  %vm6551_vm14 = vcmp.ge.f32.partialorder %v6503_v5, 0.0  ;;  %v12548_v56 = vld [vmem:[#allocation14 + $0x5a8] ss:$24 sps:$4 sm:$0xff]  }
 0x4d1   :  { %8631 = vmatprep.mubr.bf16.mxu1 %v15190_v61  ;;  %vm6552_vm13 = vcmp.ge.f32.partialorder %v6504_v30, 0.0  ;;  %v6601_v44 = vmul.f32 %v14440_v47, %v6504_v30  ;;  %8950 = vmatprep.subr.bf16.mxu0 %v12517_v13  ;;  %v6643_v59 = vsel %vm6546_vm12, %v6498_v21, %v6595_v60  ;;  %v6594_v9 = vmul.f32 %v14440_v47, %v6497_v19  ;;  %v12530_v21 = vld [vmem:[#allocation14 + $0x338] ss:$24 sps:$4 sm:$0xff]   ;;  %v12544_v0 = vld [vmem:[#allocation14 + $0x5dc] ss:$24 sps:$4 sm:$0xff]  }
 0x4d2   :  { %8733 = vmatprep.subr.bf16.mxu1 %v12520_v18  ;;  %8850 = vmatprep.mubr.bf16.mxu0 %v15190_v61  ;;  %vm6545_vm15 = vcmp.ge.f32.partialorder %v6497_v19, 0.0  ;;  %v6648_v52 = vsel %vm6551_vm14, %v6503_v5, %v6600_v16  ;;  %v12527_v13 = vld [vmem:[#allocation14 + $0x370] ss:$24 sps:$4 sm:$0xff]   ;;  %v12538_v18 = vld [vmem:[#allocation14 + $0x30c] ss:$24 sps:$4 sm:$0xff]  }
 0x4d3   :  { %v6649_v31 = vsel %vm6552_vm13, %v6504_v30, %v6601_v44  ;;  %8632 = vmatmul.mubr.bf16.gmra.mxu1 %v15201_v48  ;;  %v6642_v24 = vsel %vm6545_vm15, %v6497_v19, %v6594_v9  ;;  %v12536_v30 = vld [vmem:[#allocation14 + $0x308] ss:$24 sps:$4 sm:$0xff]   ;;  %v12541_v5 = vld [vmem:[#allocation14 + $0x314] ss:$24 sps:$4 sm:$0xff]   ;;  %v12542_v60 = vld [vmem:[#allocation14 + $0x5d8] ss:$24 sps:$4 sm:$0xff]  }
 0x4d4   :  { %8734 = vmatpush1.bf16.msra.mxu1 %v12518_v46  ;;  %v15204_v20 = vpack.c.bf16 %v6649_v31, %v6643_v59  ;;  %8951 = vmatpush1.bf16.msra.mxu0 %v12515_v28  ;;  %v15211_v47 = vpack.c.bf16 %v6648_v52, %v6642_v24  ;;  %v12533_v46 = vld [vmem:[#allocation14 + $0x340] ss:$24 sps:$4 sm:$0xff]   ;;  %v12539_v28 = vld [vmem:[#allocation14 + $0x310] ss:$24 sps:$4 sm:$0xff]   ;;  %v12550_v44 = vld [vmem:[#allocation14 + $0x5ac] ss:$24 sps:$4 sm:$0xff]  }
 0x4d5   :  { %8952 = vmatprep.subr.bf16.mxu0 %v12523_v43  ;;  %8735 = vmatprep.subr.bf16.mxu1 %v12526_v12  ;;  %v12547_v19 = vld [vmem:[#allocation14 + $0x5e4] ss:$24 sps:$4 sm:$0xff]   ;;  %v12545_v43 = vld [vmem:[#allocation14 + $0x5e0] ss:$24 sps:$4 sm:$0xff]   ;;  %v12553_v59 = vld [vmem:[#allocation14 + $0x5b4] ss:$24 sps:$4 sm:$0xff]  }
 0x4d6   :  { %8641 = vmatprep.mubr.bf16.mxu1 %v15204_v20  ;;  %v12556_v12 = vld [vmem:[#allocation14 + $0x57c] ss:$24 sps:$4 sm:$0xff]   ;;  %v12554_v31 = vld [vmem:[#allocation14 + $0x578] ss:$24 sps:$4 sm:$0xff]  }
 0x4d7   :  { %8851 = vmatmul.mubr.bf16.gmra.mxu0 %v15201_v48  ;;  %v12551_v16 = vld [vmem:[#allocation14 + $0x5b0] ss:$24 sps:$4 sm:$0xff]   ;;  %v12568_v9 = vld [vmem:[#allocation14 + $0x51c] ss:$24 sps:$4 sm:$0xff]  }
 0x4d8   :  { %8736 = vmatpush1.bf16.msra.mxu1 %v12524_v6  ;;  %8953 = vmatpush1.bf16.msra.mxu0 %v12521_v42  ;;  %v12562_v6 = vld [vmem:[#allocation14 + $0x54c] ss:$24 sps:$4 sm:$0xff]   ;;  %v12560_v42 = vld [vmem:[#allocation14 + $0x548] ss:$24 sps:$4 sm:$0xff]  }
 0x4d9   :  { %8737 = vmatprep.subr.bf16.mxu1 %v12532_v22  ;;  %8954 = vmatprep.subr.bf16.mxu0 %v12529_v57  ;;  %v12557_v22 = vld [vmem:[#allocation14 + $0x580] ss:$24 sps:$4 sm:$0xff]   ;;  %v12565_v57 = vld [vmem:[#allocation14 + $0x554] ss:$24 sps:$4 sm:$0xff]   ;;  %v12563_v52 = vld [vmem:[#allocation14 + $0x550] ss:$24 sps:$4 sm:$0xff]  }
 0x4da   :  { %8860 = vmatprep.mubr.bf16.mxu0 %v15204_v20  ;;  %v12571_v24 = vld [vmem:[#allocation14 + $0x524] ss:$24 sps:$4 sm:$0xff]  }
 0x4db   :  { %8642 = vmatmul.mubr.bf16.gmra.mxu1 %v15211_v47 }
 0x4dc   :  { %8738 = vmatpush1.bf16.msra.mxu1 %v12530_v21  ;;  %8955 = vmatpush1.bf16.msra.mxu0 %v12527_v13  ;;  %v12566_v21 = vld [vmem:[#allocation14 + $0x518] ss:$24 sps:$4 sm:$0xff]   ;;  %v12574_v13 = vld [vmem:[#allocation14 + $0x4ec] ss:$24 sps:$4 sm:$0xff]  }
 0x4dd   :  { %8757 = vmatprep.mubr.bf16.mxu1 %v14811_v35  ;;  %8956 = vmatprep.subr.bf16.mxu0 %v12535_v51  ;;  %v12572_v51 = vld [vmem:[#allocation14 + $0x4e8] ss:$24 sps:$4 sm:$0xff]  }
 0x4de   :  { %8739 = vmatprep.subr.bf16.mxu1 %v12538_v18  ;;  %v12569_v18 = vld [vmem:[#allocation14 + $0x520] ss:$24 sps:$4 sm:$0xff]  }
 0x4df   :  { %8861 = vmatmul.mubr.bf16.gmra.mxu0 %v15211_v47 }
 0x4e0   :  { %8740 = vmatpush1.bf16.msra.mxu1 %v12536_v30  ;;  %8957 = vmatpush1.bf16.msra.mxu0 %v12533_v46  ;;  %v12580_v30 = vld [vmem:[#allocation14 + $0x4bc] ss:$24 sps:$4 sm:$0xff]  }
 0x4e1   :  { %8976 = vmatprep.mubr.bf16.mxu0 %v14811_v35  ;;  %8958 = vmatprep.subr.bf16.mxu0 %v12541_v5  ;;  %v12559_v35 = vld [vmem:[#allocation14 + $0x584] ss:$24 sps:$4 sm:$0xff]   ;;  %v12577_v46 = vld [vmem:[#allocation14 + $0x4f4] ss:$24 sps:$4 sm:$0xff]   ;;  %v12578_v5 = vld [vmem:[#allocation14 + $0x4b8] ss:$24 sps:$4 sm:$0xff]  }
 0x4e2   :  { %8741 = vmatprep.subr.bf16.mxu1 %v12544_v0  ;;  %v12575_v0 = vld [vmem:[#allocation14 + $0x4f0] ss:$24 sps:$4 sm:$0xff]  }
 0x4e4   :  { %8742 = vmatpush2.bf16.msra.mxu1 %v12542_v60  ;;  %8959 = vmatpush1.bf16.msra.mxu0 %v12539_v28  ;;  %v12586_v60 = vld [vmem:[#allocation14 + $0x48c] ss:$24 sps:$4 sm:$0xff]  }
 0x4e5   :  { %8743 = vmatprep.subr.bf16.mxu1 %v12550_v44  ;;  %8960 = vmatprep.subr.bf16.mxu0 %v12547_v19  ;;  %v12583_v28 = vld [vmem:[#allocation14 + $0x4c4] ss:$24 sps:$4 sm:$0xff]   ;;  %v12584_v44 = vld [vmem:[#allocation14 + $0x488] ss:$24 sps:$4 sm:$0xff]  }
 0x4e6   :  { %v12581_v19 = vld [vmem:[#allocation14 + $0x4c0] ss:$24 sps:$4 sm:$0xff]  }
 0x4e8   :  { %8744 = vmatpush2.bf16.msra.mxu1 %v12548_v56  ;;  %8961 = vmatpush2.bf16.msra.mxu0 %v12545_v43  ;;  %v12592_v56 = vld [vmem:[#allocation14 + $0x164] ss:$24 sps:$4 sm:$0xff]   ;;  %v12589_v43 = vld [vmem:[#allocation14 + $0x494] ss:$24 sps:$4 sm:$0xff]  }
 0x4e9   :  { %8745 = vmatprep.subr.bf16.mxu1 %v12556_v12  ;;  %8962 = vmatprep.subr.bf16.mxu0 %v12553_v59  ;;  %v12590_v12 = vld [vmem:[#allocation14 + $0x160] ss:$24 sps:$4 sm:$0xff]   ;;  %v12587_v59 = vld [vmem:[#allocation14 + $0x490] ss:$24 sps:$4 sm:$0xff]  }
 0x4ec   :  { %8746 = vmatpush2.bf16.msra.mxu1 %v12554_v31  ;;  %8963 = vmatpush2.bf16.msra.mxu0 %v12551_v16  ;;  %v12595_v31 = vld [vmem:[#allocation14 + $0x134] ss:$24 sps:$4 sm:$0xff]   ;;  %v12683_v16 = vld [vmem:[#allocation16 + $0x78] sm:$0xff]  }
 0x4ed   :  { %8747 = vmatprep.subr.bf16.mxu1 %v12562_v6  ;;  %8964 = vmatprep.subr.bf16.mxu0 %v12559_v35  ;;  %v12593_v6 = vld [vmem:[#allocation14 + $0x130] ss:$24 sps:$4 sm:$0xff]   ;;  %v12598_v35 = vld [vmem:[#allocation14 + $0x104] ss:$24 sps:$4 sm:$0xff]  }
 0x4f0   :  { %8748 = vmatpush2.bf16.msra.mxu1 %v12560_v42  ;;  %8965 = vmatpush2.bf16.msra.mxu0 %v12557_v22  ;;  %v12684_v42 = vld [vmem:[#allocation16 + $0x38] sm:$0xff]   ;;  %v12688_v22 = vld [vmem:[#allocation16 + $0x70] sm:$0xff]  }
 0x4f1   :  { %8749 = vmatprep.subr.bf16.mxu1 %v12568_v9  ;;  %8966 = vmatprep.subr.bf16.mxu0 %v12565_v57  ;;  %v12596_v9 = vld [vmem:[#allocation14 + $0x100] ss:$24 sps:$4 sm:$0xff]   ;;  %v12601_v57 = vld [vmem:[#allocation14 + $0xd4] ss:$24 sps:$4 sm:$0xff]  }
 0x4f4   :  { %8750 = vmatpush2.bf16.msra.mxu1 %v12566_v21  ;;  %8967 = vmatpush2.bf16.msra.mxu0 %v12563_v52  ;;  %v12689_v21 = vld [vmem:[#allocation16 + $0x30] sm:$0xff]   ;;  %v12690_v52 = vld [vmem:[#allocation16 + $0x68] sm:$0xff]  }
 0x4f5   :  { %8751 = vmatprep.subr.bf16.mxu1 %v12574_v13  ;;  %8968 = vmatprep.subr.bf16.mxu0 %v12571_v24  ;;  %v12599_v13 = vld [vmem:[#allocation14 + $0xd0] ss:$24 sps:$4 sm:$0xff]   ;;  %v12604_v24 = vld [vmem:[#allocation14 + $0xa4] ss:$24 sps:$4 sm:$0xff]  }
 0x4f8   :  { %8752 = vmatpush2.bf16.msra.mxu1 %v12572_v51  ;;  %8969 = vmatpush2.bf16.msra.mxu0 %v12569_v18  ;;  %v12692_v51 = vld [vmem:[#allocation16 + $0x60] sm:$0xff]   ;;  %v12607_v18 = vld [vmem:[#allocation14 + $0x74] ss:$24 sps:$4 sm:$0xff]  }
 0x4f9   :  { %8753 = vmatprep.subr.bf16.mxu1 %v12580_v30  ;;  %8970 = vmatprep.subr.bf16.mxu0 %v12577_v46  ;;  %v12693_v30 = vld [vmem:[#allocation16 + $0x20] sm:$0xff]   ;;  %v12694_v46 = vld [vmem:[#allocation16 + $0x58] sm:$0xff]  }
 0x4fc   :  { %8754 = vmatpush2.bf16.msra.mxu1 %v12578_v5  ;;  %8971 = vmatpush2.bf16.msra.mxu0 %v12575_v0  ;;  %v12605_v5 = vld [vmem:[#allocation14 + $0x70] ss:$24 sps:$4 sm:$0xff]   ;;  %v12610_v0 = vld [vmem:[#allocation14 + $0x44] ss:$24 sps:$4 sm:$0xff]  }
 0x4fd   :  { %8755 = vmatprep.subr.bf16.mxu1 %v12586_v60  ;;  %8972 = vmatprep.subr.bf16.mxu0 %v12583_v28  ;;  %v12696_v60 = vld [vmem:[#allocation16 + $0x50] sm:$0xff]  }
 0x4fe   :  { %v12613_v28 = vld [vmem:[#allocation14 + $0x14] ss:$24 sps:$4 sm:$0xff]  }
 0x500   :  { %8756 = vmatpush2.bf16.msra.mxu1 %v12584_v44  ;;  %8973 = vmatpush2.bf16.msra.mxu0 %v12581_v19  ;;  %v12697_v44 = vld [vmem:[#allocation16 + $0x10] sm:$0xff]   ;;  %v12698_v19 = vld [vmem:[#allocation16 + $0x48] sm:$0xff]  }
 0x501   :  { %8871 = vmatprep.subr.bf16.mxu1 %v12592_v56  ;;  %8974 = vmatprep.subr.bf16.mxu0 %v12589_v43  ;;  %v12611_v56 = vld [vmem:[#allocation14 + $0x10] ss:$24 sps:$4 sm:$0xff]   ;;  %v12616_v43 = vld [vmem:[#allocation14 + $0x2e4] ss:$24 sps:$4 sm:$0xff]  }
 0x503   :  { %8758 = vmatmul.mubr.bf16.vlgmr.msra.gmra.mxu1 %v14786_v36 }
 0x504   :  { %8767 = vmatprep.mubr.bf16.mxu1 %v14837_v58  ;;  %8872 = vmatpush1.bf16.msra.mxu1 %v12590_v12  ;;  %v12700_v12 = vld [vmem:[#allocation16 + $0x40] sm:$0xff]  }
 0x505   :  { %8975 = vmatpush2.bf16.msra.mxu0 %v12587_v59  ;;  %8873 = vmatprep.subr.bf16.mxu1 %v12595_v31  ;;  %v12619_v59 = vld [vmem:[#allocation14 + $0x2b4] ss:$24 sps:$4 sm:$0xff]   ;;  %v12701_v31 = vld [vmem:[#allocation16] sm:$0xff]  }
 0x506   :  { %11180 = vmatprep.subr.bf16.mxu0 %v12683_v16  ;;  %v12617_v16 = vld [vmem:[#allocation14 + $0x2b0] ss:$24 sps:$4 sm:$0xff]  }
 0x508   :  { %8977 = vmatmul.mubr.bf16.vlgmr.msra.gmra.mxu0 %v14786_v36  ;;  %8874 = vmatpush1.bf16.msra.mxu1 %v12593_v6  ;;  %v12691_v36 = vld [vmem:[#allocation16 + $0x28] sm:$0xff]   ;;  %v12620_v6 = vld [vmem:[#allocation14 + $0x280] ss:$24 sps:$4 sm:$0xff]  }
 0x509   :  { %8986 = vmatprep.mubr.bf16.mxu0 %v14837_v58  ;;  %8875 = vmatprep.subr.bf16.mxu1 %v12598_v35  ;;  %v12602_v58 = vld [vmem:[#allocation14 + $0xa0] ss:$24 sps:$4 sm:$0xff]   ;;  %v12625_v35 = vld [vmem:[#allocation14 + $0x254] ss:$24 sps:$4 sm:$0xff]  }
 0x50a   :  { %11181 = vmatpush3.bf16.msra.mxu0 %v12684_v42  ;;  %v15232_v42 = vpop.f32.mrf.mxu0 }
 0x50b   :  { %8768 = vmatmul.mubr.bf16.gmra.mxu1 %v14865_v11  ;;  %11182 = vmatprep.subr.bf16.mxu0 %v12688_v22  ;;  %v12628_v22 = vld [vmem:[#allocation14 + $0x224] ss:$24 sps:$4 sm:$0xff]  }
 0x50c   :  { %8777 = vmatprep.mubr.bf16.mxu1 %v14876_v41  ;;  %8876 = vmatpush1.bf16.msra.mxu1 %v12596_v9  ;;  %v15234_v9 = vpop.f32.mrf.mxu0 }
 0x50d   :  { %8877 = vmatprep.subr.bf16.mxu1 %v12601_v57  ;;  %v12626_v57 = vld [vmem:[#allocation14 + $0x220] ss:$24 sps:$4 sm:$0xff]  }
 0x50e   :  { %11183 = vmatpush3.bf16.msra.mxu0 %v12689_v21  ;;  %v12631_v21 = vld [vmem:[#allocation14 + $0x1f4] ss:$24 sps:$4 sm:$0xff]  }
 0x50f   :  { %11184 = vmatprep.subr.bf16.mxu0 %v12690_v52  ;;  %v15236_v52 = vpop.f32.mrf.mxu0 }
 0x510   :  { %8987 = vmatmul.mubr.bf16.gmra.mxu0 %v14865_v11  ;;  %8878 = vmatpush1.bf16.msra.mxu1 %v12599_v13  ;;  %v12695_v11 = vld [vmem:[#allocation16 + $0x18] sm:$0xff]   ;;  %v12629_v13 = vld [vmem:[#allocation14 + $0x1f0] ss:$24 sps:$4 sm:$0xff]  }
 0x511   :  { %8996 = vmatprep.mubr.bf16.mxu0 %v14876_v41  ;;  %8879 = vmatprep.subr.bf16.mxu1 %v12604_v24  ;;  %v12608_v41 = vld [vmem:[#allocation14 + $0x40] ss:$24 sps:$4 sm:$0xff]   ;;  %v12634_v24 = vld [vmem:[#allocation14 + $0x1c4] ss:$24 sps:$4 sm:$0xff]  }
 0x512   :  { %11185 = vmatpush3.bf16.msra.mxu0 %v12691_v36  ;;  %v12702_v36 = vld [vmem:[#allocation16 + $0xf8] sm:$0xff]  }
 0x513   :  { %8778 = vmatmul.mubr.bf16.gmra.mxu1 %v14888_v23  ;;  %11186 = vmatprep.subr.bf16.mxu0 %v12692_v51  ;;  %v15238_v51 = vpop.f32.mrf.mxu0 }
 0x514   :  { %8787 = vmatprep.mubr.bf16.mxu1 %v14890_v32  ;;  %8880 = vmatpush1.bf16.msra.mxu1 %v12602_v58  ;;  %v12632_v58 = vld [vmem:[#allocation14 + $0x1c0] ss:$24 sps:$4 sm:$0xff]  }
 0x515   :  { %8881 = vmatprep.subr.bf16.mxu1 %v12607_v18  ;;  %v12637_v18 = vld [vmem:[#allocation14 + $0x194] ss:$24 sps:$4 sm:$0xff]  }
 0x516   :  { %11187 = vmatpush3.bf16.msra.mxu0 %v12693_v30  ;;  %v15240_v30 = vpop.f32.mrf.mxu0 }
 0x517   :  { %11188 = vmatprep.subr.bf16.mxu0 %v12694_v46  ;;  %v12635_v46 = vld [vmem:[#allocation14 + $0x190] ss:$24 sps:$4 sm:$0xff]  }
 0x518   :  { %8997 = vmatmul.mubr.bf16.gmra.mxu0 %v14888_v23  ;;  %8882 = vmatpush1.bf16.msra.mxu1 %v12605_v5  ;;  %v12699_v23 = vld [vmem:[#allocation16 + $0x8] sm:$0xff]   ;;  %v12640_v5 = vld [vmem:[#allocation14 + $0x764] ss:$24 sps:$4 sm:$0xff]  }
 0x519   :  { %9006 = vmatprep.mubr.bf16.mxu0 %v14890_v32  ;;  %8883 = vmatprep.subr.bf16.mxu1 %v12610_v0  ;;  %v12614_v32 = vld [vmem:[#allocation14 + $0x2e0] ss:$24 sps:$4 sm:$0xff]   ;;  %v15242_v0 = vpop.f32.mrf.mxu0 }
 0x51a   :  { %11189 = vmatpush3.bf16.msra.mxu0 %v12695_v11  ;;  %v12638_v11 = vld [vmem:[#allocation14 + $0x760] ss:$24 sps:$4 sm:$0xff]  }
 0x51b   :  { %8788 = vmatmul.mubr.bf16.gmra.mxu1 %v14896_v17  ;;  %11190 = vmatprep.subr.bf16.mxu0 %v12696_v60  ;;  %v12643_v60 = vld [vmem:[#allocation14 + $0x734] ss:$24 sps:$4 sm:$0xff]  }
 0x51c   :  { %8884 = vmatpush1.bf16.msra.mxu1 %v12608_v41  ;;  %8903 = vmatprep.mubr.bf16.mxu1 %v14529_v62  ;;  %v12622_v62 = vld [vmem:[#allocation14 + $0x284] ss:$24 sps:$4 sm:$0xff]   ;;  %v15244_v41 = vpop.f32.mrf.mxu0 }
 0x51d   :  { %8885 = vmatprep.subr.bf16.mxu1 %v12613_v28  ;;  %v12641_v28 = vld [vmem:[#allocation14 + $0x730] ss:$24 sps:$4 sm:$0xff]  }
 0x51e   :  { %11191 = vmatpush3.bf16.msra.mxu0 %v12697_v44  ;;  %v15248_v44 = vpop.f32.mrf.mxu1 }
 0x51f   :  { %11192 = vmatprep.subr.bf16.mxu0 %v12698_v19  ;;  %v12646_v19 = vld [vmem:[#allocation14 + $0x704] ss:$24 sps:$4 sm:$0xff]  }
 0x520   :  { %9007 = vmatmul.mubr.bf16.gmra.mxu0 %v14896_v17  ;;  %8886 = vmatpush1.bf16.msra.mxu1 %v12611_v56  ;;  %v12623_v17 = vld [vmem:[#allocation14 + $0x250] ss:$24 sps:$4 sm:$0xff]   ;;  %v15250_v56 = vpop.f32.mrf.mxu0 }
 0x521   :  { %8887 = vmatprep.subr.bf16.mxu1 %v12616_v43  ;;  %v12644_v43 = vld [vmem:[#allocation14 + $0x700] ss:$24 sps:$4 sm:$0xff]  }
 0x522   :  { %11193 = vmatpush3.bf16.msra.mxu0 %v12699_v23  ;;  %v15252_v23 = vpop.f32.mrf.mxu1 }
 0x523   :  { %11194 = vmatprep.subr.bf16.mxu0 %v12700_v12  ;;  %v12649_v12 = vld [vmem:[#allocation14 + $0x6d4] ss:$24 sps:$4 sm:$0xff]  }
 0x524   :  { %8888 = vmatpush2.bf16.msra.mxu1 %v12614_v32  ;;  %v15254_v32 = vpop.f32.mrf.mxu0 }
 0x525   :  { %8889 = vmatprep.subr.bf16.mxu1 %v12619_v59  ;;  %v12652_v59 = vld [vmem:[#allocation14 + $0x6a4] ss:$24 sps:$4 sm:$0xff]  }
 0x526   :  { %11195 = vmatpush3.bf16.msra.mxu0 %v12701_v31  ;;  %v15260_v31 = vpop.f32.mrf.mxu0 }
 0x527   :  { %11220 = vmatprep.subr.bf16.mxu0 %v12702_v36  ;;  %v12664_v36 = vld [vmem:[#allocation14 + $0x8e4] ss:$24 sps:$4 sm:$0xff]  }
 0x528   :  { %8890 = vmatpush2.bf16.msra.mxu1 %v12617_v16  ;;  %v12650_v16 = vld [vmem:[#allocation14 + $0x6a0] ss:$24 sps:$4 sm:$0xff]  }
 0x529   :  { %8891 = vmatprep.subr.bf16.mxu1 %v12622_v62 }
 0x52c   :  { %8892 = vmatpush2.bf16.msra.mxu1 %v12620_v6  ;;  %v12655_v6 = vld [vmem:[#allocation14 + $0x674] ss:$24 sps:$4 sm:$0xff]  }
 0x52d   :  { %8893 = vmatprep.subr.bf16.mxu1 %v12625_v35  ;;  %v15264_v35 = vpop.f32.mrf.mxu0 }
 0x530   :  { %8894 = vmatpush2.bf16.msra.mxu1 %v12623_v17  ;;  %v12658_v17 = vld [vmem:[#allocation14 + $0x644] ss:$24 sps:$4 sm:$0xff]  }
 0x531   :  { %8895 = vmatprep.subr.bf16.mxu1 %v12628_v22  ;;  %v15270_v22 = vpop.f32.mrf.mxu0 }
 0x534   :  { %8896 = vmatpush2.bf16.msra.mxu1 %v12626_v57  ;;  %v12656_v57 = vld [vmem:[#allocation14 + $0x640] ss:$24 sps:$4 sm:$0xff]  }
 0x535   :  { %8897 = vmatprep.subr.bf16.mxu1 %v12631_v21 }
 0x538   :  { %8898 = vmatpush2.bf16.msra.mxu1 %v12629_v13  ;;  %v12661_v13 = vld [vmem:[#allocation14 + $0x614] ss:$24 sps:$4 sm:$0xff]  }
 0x539   :  { %8899 = vmatprep.subr.bf16.mxu1 %v12634_v24  ;;  %v15274_v24 = vpop.f32.mrf.mxu0 }
 0x53c   :  { %8900 = vmatpush2.bf16.msra.mxu1 %v12632_v58  ;;  %v15280_v58 = vpop.f32.mrf.mxu0 }
 0x53d   :  { %8901 = vmatprep.subr.bf16.mxu1 %v12637_v18  ;;  %v12662_v18 = vld [vmem:[#allocation14 + $0x8e0] ss:$24 sps:$4 sm:$0xff]  }
 0x540   :  { %8902 = vmatpush2.bf16.msra.mxu1 %v12635_v46 }
 0x541   :  { %9017 = vmatprep.subr.bf16.mxu1 %v12640_v5  ;;  %v12667_v5 = vld [vmem:[#allocation14 + $0x8b4] ss:$24 sps:$4 sm:$0xff]  }
 0x543   :  { %8904 = vmatmul.mubr.bf16.vlgmr.msra.gmra.mxu1 %v14506_v4  ;;  %v12647_v4 = vld [vmem:[#allocation14 + $0x6d0] ss:$24 sps:$4 sm:$0xff]  }
 0x544   :  { %8913 = vmatprep.mubr.bf16.mxu1 %v14559_v40  ;;  %9018 = vmatpush1.bf16.msra.mxu1 %v12638_v11  ;;  %v15258_v40 = vpop.f32.mrf.mxu1  ;;  %v15284_v11 = vpop.f32.mrf.mxu0 }
 0x545   :  { %9019 = vmatprep.subr.bf16.mxu1 %v12643_v60 }
 0x546   :  { %v15262_v62 = vpop.f32.mrf.mxu1 }
 0x548   :  { %9020 = vmatpush1.bf16.msra.mxu1 %v12641_v28  ;;  %v15288_v28 = vpop.f32.mrf.mxu0 }
 0x549   :  { %9021 = vmatprep.subr.bf16.mxu1 %v12646_v19  ;;  %v12668_v19 = vld [vmem:[#allocation14 + $0x880] ss:$24 sps:$4 sm:$0xff]  }
 0x54b   :  { %8914 = vmatmul.mubr.bf16.gmra.mxu1 %v14587_v53  ;;  %v15268_v53 = vpop.f32.mrf.mxu1 }
 0x54c   :  { %8923 = vmatprep.mubr.bf16.mxu1 %v14608_v27  ;;  %9022 = vmatpush1.bf16.msra.mxu1 %v12644_v43  ;;  %v12653_v27 = vld [vmem:[#allocation14 + $0x670] ss:$24 sps:$4 sm:$0xff]  }
 0x54d   :  { %9023 = vmatprep.subr.bf16.mxu1 %v12649_v12  ;;  %v15272_v21 = vpop.f32.mrf.mxu1  ;;  %v15292_v12 = vpop.f32.mrf.mxu0 }
 0x550   :  { %9024 = vmatpush1.bf16.msra.mxu1 %v12647_v4  ;;  %v12673_v4 = vld [vmem:[#allocation14 + $0x854] ss:$24 sps:$4 sm:$0xff]  }
 0x551   :  { %9025 = vmatprep.subr.bf16.mxu1 %v12652_v59  ;;  %v12671_v59 = vld [vmem:[#allocation14 + $0x850] ss:$24 sps:$4 sm:$0xff]  }
 0x553   :  { %8924 = vmatmul.mubr.bf16.gmra.mxu1 %v14619_v2  ;;  %v12659_v2 = vld [vmem:[#allocation14 + $0x610] ss:$24 sps:$4 sm:$0xff]  }
 0x554   :  { %8933 = vmatprep.mubr.bf16.mxu1 %v14625_v3  ;;  %9026 = vmatpush1.bf16.msra.mxu1 %v12650_v16  ;;  %v15278_v3 = vpop.f32.mrf.mxu1 }
 0x555   :  { %9027 = vmatprep.subr.bf16.mxu1 %v12655_v6  ;;  %v15296_v6 = vpop.f32.mrf.mxu0 }
 0x556   :  { %v15282_v46 = vpop.f32.mrf.mxu1 }
 0x558   :  { %9028 = vmatpush1.bf16.msra.mxu1 %v12653_v27  ;;  %v15286_v60 = vpop.f32.mrf.mxu1  ;;  %v12676_v27 = vld [vmem:[#allocation14 + $0x824] ss:$24 sps:$4 sm:$0xff]  }
 0x559   :  { %9029 = vmatprep.subr.bf16.mxu1 %v12658_v17  ;;  %v12674_v17 = vld [vmem:[#allocation14 + $0x820] ss:$24 sps:$4 sm:$0xff]  }
 0x55a   :  { %v15290_v43 = vpop.f32.mrf.mxu1 }
 0x55b   :  { %8934 = vmatmul.mubr.bf16.gmra.mxu1 %v14632_v37  ;;  %v12665_v37 = vld [vmem:[#allocation14 + $0x8b0] ss:$24 sps:$4 sm:$0xff]  }
 0x55c   :  { %9030 = vmatpush1.bf16.msra.mxu1 %v12656_v57  ;;  %9049 = vmatprep.mubr.bf16.mxu1 %v15107_v8  ;;  %v12670_v8 = vld [vmem:[#allocation14 + $0x884] ss:$24 sps:$4 sm:$0xff]   ;;  %v15294_v16 = vpop.f32.mrf.mxu1 }
 0x55d   :  { %9031 = vmatprep.subr.bf16.mxu1 %v12661_v13  ;;  %v15300_v13 = vpop.f32.mrf.mxu0 }
 0x55e   :  { %v15298_v57 = vpop.f32.mrf.mxu1 }
 0x560   :  { %9032 = vmatpush1.bf16.msra.mxu1 %v12659_v2  ;;  %v12679_v2 = vld [vmem:[#allocation14 + $0x7f4] ss:$24 sps:$4 sm:$0xff]  }
 0x561   :  { %9033 = vmatprep.subr.bf16.mxu1 %v12664_v36  ;;  %v169_v36 = vld [vmem:[#allocation8 + $0x7] ss:$8 sm:$0xf] }
 0x564   :  { %9034 = vmatpush2.bf16.msra.mxu1 %v12662_v18  ;;  %v12677_v18 = vld [vmem:[#allocation14 + $0x7f0] ss:$24 sps:$4 sm:$0xff]  }
 0x565   :  { %9035 = vmatprep.subr.bf16.mxu1 %v12667_v5  ;;  %v170_v5 = vld [vmem:[#allocation8 + $0x7] ss:$8 sm:$0x30] }
 0x566   :  { %v15304_v55 = vor.u32 %v170_v5, %v169_v36  ;;  %v173_v36 = vld [vmem:[#allocation8 + $0x30] ss:$8 sm:$0xf] }
 0x568   :  { %9036 = vmatpush2.bf16.msra.mxu1 %v12665_v37  ;;  %v8497_v37 = vpop.f32.mrf.mxu1 }
 0x569   :  { %9037 = vmatprep.subr.bf16.mxu1 %v12670_v8  ;;  %v15302_v8 = vpop.f32.mrf.mxu0 }
 0x56b   :  { %v15306_v54 = vpop.f32.mrf.mxu0 }
 0x56c   :  { %9038 = vmatpush2.bf16.msra.mxu1 %v12668_v19  ;;  %v12682_v19 = vld [vmem:[#allocation14 + $0x7c4] ss:$24 sps:$4 sm:$0xff]  }
 0x56d   :  { %9039 = vmatprep.subr.bf16.mxu1 %v12673_v4  ;;  %v12680_v4 = vld [vmem:[#allocation14 + $0x7c0] ss:$24 sps:$4 sm:$0xff]   ;;  %v15310_v49 = vpop.f32.mrf.mxu0 }
 0x570   :  { %9040 = vmatpush2.bf16.msra.mxu1 %v12671_v59  ;;  %v8499_v59 = vpop.f32.mrf.mxu1 }
 0x571   :  { %9041 = vmatprep.subr.bf16.mxu1 %v12676_v27  ;;  %v6966_v27 = vrot.slane %v15304_v55, %v15953_v33 }
 0x572   :  { %v8501_v39 = vpop.f32.mrf.mxu1 }
 0x573   :  { %v8468_v5 = vadd.f32 %v15248_v44, %v6966_v27  ;;  %v8472_v38 = vadd.f32 %v15258_v40, %v6966_v27 }
 0x574   :  { %9042 = vmatpush2.bf16.msra.mxu1 %v12674_v17  ;;  %v12685_v17 = vld [vmem:[#allocation14 + $0x790] ss:$24 sps:$4 sm:$0xff]   ;;  %v8503_v34 = vpop.f32.mrf.mxu1 }
 0x575   :  { %9043 = vmatprep.subr.bf16.mxu1 %v12679_v2  ;;  %v6970_v2 = vrot.slane %v15304_v55, %v15958_v25 }
 0x577   :  { %v8470_v50 = vadd.f32 %v15252_v23, %v6970_v2  ;;  %v8474_v15 = vadd.f32 %v15262_v62, %v6970_v2  ;;  %v8480_v23 = vadd.f32 %v15272_v21, %v6970_v2  ;;  %v8545_v62 = vadd.f32 %v15236_v52, %v8472_v38 }
 0x578   :  { %9044 = vmatpush2.bf16.msra.mxu1 %v12677_v18  ;;  %v174_v18 = vld [vmem:[#allocation8 + $0x30] ss:$8 sm:$0x30]  ;;  %v8488_v21 = vadd.f32 %v15286_v60, %v6966_v27 }
 0x579   :  { %9045 = vmatprep.subr.bf16.mxu1 %v12682_v19  ;;  %v15315_v19 = vpop.f32.mrf.mxu0  ;;  %v15319_v63 = vor.u32 %v174_v18, %v173_v36  ;;  %v8543_v44 = vadd.f32 %v15234_v9, %v8470_v50  ;;  %v8482_v36 = vadd.f32 %v15278_v3, %v6966_v27  ;;  %v8490_v3 = vadd.f32 %v15290_v43, %v6970_v2 }
 0x57b   :  { %v15331_v18 = vpop.f32.mrf.mxu0  ;;  %v15339_v9 = vrot.slane %v15319_v63, %v15953_v33  ;;  %v15348_v38 = vrot.slane %v15319_v63, %v15958_v25 }
 0x57c   :  { %9046 = vmatpush2.bf16.msra.mxu1 %v12680_v4  ;;  %v8541_v4 = vadd.f32 %v15232_v42, %v8468_v5  ;;  %v8478_v42 = vadd.f32 %v15268_v53, %v6966_v27  ;;  %v16063_v5 = vld [vmem:[#allocation28_spill] sm:$0xff]  ;;  %v8484_v53 = vadd.f32 %v15282_v46, %v6970_v2  ;;  %v8494_v46 = vadd.f32 %v15298_v57, %v6970_v2 }
 0x57d   :  { %9047 = vmatprep.subr.bf16.mxu1 %v12687_v10  ;;  %v15352_v60 = vpop.f32.mrf.mxu0 }
 0x580   :  { %9048 = vmatpush2.bf16.msra.mxu1 %v12685_v17 }
 0x583   :  { %9050 = vmatmul.mubr.bf16.vlgmr.msra.gmra.mxu1 %v15110_v45  ;;  %v8613_v10 = vpop.f32.mrf.mxu1  ;;  %v15333_v45 = vor.u32 %v178_v14, %v177_v26 }
 0x584   :  { %v8614_v17 = vadd.f32 %v8613_v10, %v8541_v4  ;;  %9059 = vmatprep.mubr.bf16.mxu1 %v15143_v7  ;;  %v8547_v4 = vadd.f32 %v15238_v51, %v8474_v15  ;;  %v16064_v10 = vld [vmem:[#allocation31_spill] sm:$0xff] }
 0x585   :  { %v8615_v40 = vpop.f32.mrf.mxu1  ;;  %v15356_v15 = vrot.slane %v15333_v45, %v15953_v33  ;;  %v15366_v57 = vrot.slane %v15333_v45, %v15958_v25  ;;  %v15370_v33 = vstv %s15325_s18 }
 0x586   :  { %v9090_v50 = vadd.f32 %v8614_v17, %v16063_v5  ;;  %v8616_v7 = vadd.f32 %v8615_v40, %v8543_v44  ;;  %v8492_v44 = vadd.f32 %v15294_v16, %v6966_v27  ;;  %v8498_v17 = vadd.f32 %v8497_v37, %v6966_v27  ;;  %v16065_v5 = vld [vmem:[#allocation33_spill] sm:$0xff] }
 0x587   :  { %v8617_v14 = vpop.f32.mrf.mxu1  ;;  %v15362_v16 = vadd.f32 %v8503_v34, %v6970_v2  ;;  %v8553_v34 = vadd.f32 %v15242_v0, %v8480_v23  ;;  %v15388_v23 = vadd.f32 %v15270_v22, %v8494_v46  ;;  %v16068_v46 = vld [vmem:[#allocation47_spill] sm:$0xff] }
 0x588   :  { %v9138_v26 = vmul.f32 0.5, %v9090_v50  ;;  %v9091_v29 = vadd.f32 %v8616_v7, %v16064_v10  ;;  %v8618_v52 = vadd.f32 %v8617_v14, %v8545_v62  ;;  %v8500_v62 = vadd.f32 %v8499_v59, %v6970_v2 }
 0x589   :  { %v8619_v51 = vpop.f32.mrf.mxu1  ;;  %v15360_v14 = vadd.f32 %v8501_v39, %v6966_v27  ;;  %v8551_v39 = vadd.f32 %v15240_v30, %v8478_v42  ;;  %v8555_v59 = vadd.f32 %v15244_v41, %v8482_v36  ;;  %v15378_v27 = vpop.f32.mrf.mxu0  ;;  %v8557_v2 = vadd.f32 %v15250_v56, %v8484_v53 }
 0x58a   :  { %v9313_v43 = vmul.f32 %v15339_v9, %v9138_v26  ;;  %v9139_v40 = vmul.f32 0.5, %v9091_v29  ;;  %v9096_v50 = vadd.f32 %v8618_v52, %v16065_v5  ;;  %v8620_v7 = vadd.f32 %v8619_v51, %v8547_v4  ;;  %v16066_v29 = vld [vmem:[#allocation35_spill] sm:$0xff] }
 0x58b   :  { %9060 = vmatmul.mubr.bf16.gmra.mxu1 %v15173_v1  ;;  %v8623_v1 = vpop.f32.mrf.mxu1  ;;  %v8561_v4 = vadd.f32 %v15254_v32, %v8488_v21  ;;  %v8563_v52 = vadd.f32 %v15260_v31, %v8490_v3  ;;  %v15391_v36 = vadd.f32 %v15274_v24, %v8498_v17  ;;  %v15395_v31 = vadd.f32 %v15280_v58, %v8500_v62  ;;  %v15397_v53 = vpop.f32.mrf.mxu0  ;;  %v16067_v21 = vld [vmem:[#allocation44_spill] sm:$0xff]  ;;  %v16069_v62 = vld [vmem:[#allocation50_spill] sm:$0xff] }
 0x58c   :  { %v9314_v37 = vmul.f32 %v15348_v38, %v9139_v40  ;;  %v9144_v26 = vmul.f32 0.5, %v9096_v50  ;;  %v9097_v10 = vadd.f32 %v8620_v7, %v16066_v29  ;;  %9069 = vmatprep.mubr.bf16.mxu1 %v15190_v61  ;;  %v9392_v25 = vadd.f32 %v15356_v15, %v9313_v43 }
 0x58d   :  { %v8565_v61 = vadd.f32 %v15264_v35, %v8492_v44  ;;  %v8624_v42 = vadd.f32 %v8623_v1, %v8551_v39  ;;  %v8625_v41 = vpop.f32.mrf.mxu1  ;;  %v15409_v29 = vpop.f32.mrf.mxu0 }
 0x58e   :  { %v9319_v51 = vmul.f32 %v15339_v9, %v9144_v26  ;;  %v9393_v30 = vadd.f32 %v15366_v57, %v9314_v37  ;;  %v9145_v0 = vmul.f32 0.5, %v9097_v10  ;;  %v8626_v32 = vadd.f32 %v8625_v41, %v8553_v34 }
 0x58f   :  { %vm9440_vm0 = vcmp.ge.f32.partialorder %v9392_v25, 0.0  ;;  %v9102_v3 = vadd.f32 %v8624_v42, %v16067_v21  ;;  %v8627_v44 = vpop.f32.mrf.mxu1  ;;  %v9489_v43 = vmul.f32 %v15370_v33, %v9392_v25 }
 0x590   :  { %v9398_v56 = vadd.f32 %v15356_v15, %v9319_v51  ;;  %v9320_v35 = vmul.f32 %v15348_v38, %v9145_v0  ;;  %v9103_v24 = vadd.f32 %v8626_v32, %v16068_v46  ;;  %v8628_v17 = vadd.f32 %v8627_v44, %v8555_v59  ;;  %v16070_v51 = vld [vmem:[#allocation52_spill] sm:$0xff]  ;;  %v16071_v44 = vld [vmem:[#allocation53_spill] sm:$0xff] }
 0x591   :  { %v9150_v58 = vmul.f32 0.5, %v9102_v3  ;;  %v8629_v5 = vpop.f32.mrf.mxu1  ;;  %v9490_v50 = vmul.f32 %v15370_v33, %v9393_v30  ;;  %vm9441_vm2 = vcmp.ge.f32.partialorder %v9393_v30, 0.0  ;;  %v8575_v46 = vadd.f32 %v15284_v11, %v15360_v14  ;;  %v16072_v14 = vld [vmem:[#allocation54_spill] sm:$0xff] }
 0x592   :  { %vm9446_vm1 = vcmp.ge.f32.partialorder %v9398_v56, 0.0  ;;  %v9495_v22 = vmul.f32 %v15370_v33, %v9398_v56  ;;  %v9399_v40 = vadd.f32 %v15366_v57, %v9320_v35  ;;  %v9151_v7 = vmul.f32 0.5, %v9103_v24  ;;  %v15425_v24 = vpop.f32.mrf.mxu0 }
 0x593   :  { %9070 = vmatmul.mubr.bf16.gmra.mxu1 %v15201_v48  ;;  %v9108_v37 = vadd.f32 %v8628_v17, %v16069_v62  ;;  %v8630_v26 = vadd.f32 %v8629_v5, %v8557_v2  ;;  %v9325_v39 = vmul.f32 %v15339_v9, %v9150_v58  ;;  %v8633_v34 = vpop.f32.mrf.mxu1  ;;  %v9537_v2 = vsel %vm9440_vm0, %v9392_v25, %v9489_v43  ;;  %v12703_v58 = vld [vmem:[#allocation16 + $0xb8] sm:$0xff]  }
 0x594   :  { %9079 = vmatprep.mubr.bf16.mxu1 %v15204_v20  ;;  %v9543_v10 = vsel %vm9446_vm1, %v9398_v56, %v9495_v22  ;;  %vm9447_vm3 = vcmp.ge.f32.partialorder %v9399_v40, 0.0  ;;  %v9496_v59 = vmul.f32 %v15370_v33, %v9399_v40  ;;  %v9326_v48 = vmul.f32 %v15348_v38, %v9151_v7  ;;  %v12704_v7 = vld [vmem:[#allocation16 + $0xf0] sm:$0xff]  }
 0x595   :  { %v9156_v1 = vmul.f32 0.5, %v9108_v37  ;;  %v9109_v0 = vadd.f32 %v8630_v26, %v16070_v51  ;;  %v8634_v42 = vadd.f32 %v8633_v34, %v8561_v4  ;;  %v15418_v20 = vadd.f32 %v15356_v15, %v9325_v39  ;;  %v8635_v41 = vpop.f32.mrf.mxu1  ;;  %v15440_v34 = vpop.f32.mrf.mxu0 }
 0x596   :  { %v9538_v32 = vsel %vm9441_vm2, %v9393_v30, %v9490_v50  ;;  %v9544_v56 = vsel %vm9447_vm3, %v9399_v40, %v9496_v59  ;;  %v9405_v35 = vadd.f32 %v15366_v57, %v9326_v48  ;;  %v9585_v4 = vpack.c.bf16 %v9543_v10, %v9537_v2  ;;  %v16073_v10 = vld [vmem:[#allocation55_spill] sm:$0xff] }
 0x597   :  { %v9331_v21 = vmul.f32 %v15339_v9, %v9156_v1  ;;  %v9157_v3 = vmul.f32 0.5, %v9109_v0  ;;  %v9114_v22 = vadd.f32 %v8634_v42, %v16071_v44  ;;  %v8636_v25 = vadd.f32 %v8635_v41, %v8563_v52  ;;  %v8637_v17 = vpop.f32.mrf.mxu1  ;;  %v12706_v42 = vld [vmem:[#allocation16 + $0xe8] sm:$0xff]   ;;  %v16074_v41 = vld [vmem:[#allocation56_spill] sm:$0xff] }
 0x598   :  { %v9586_v43 = vpack.c.bf16 %v9544_v56, %v9538_v32  ;;  %v8638_v50 = vadd.f32 %v8637_v17, %v8565_v61  ;;  %v15431_v62 = vadd.f32 %v15288_v28, %v15362_v16  ;;  %v9501_v11 = vmul.f32 %v15370_v33, %v15418_v20 }
 0x599   :  { %v9410_v30 = vadd.f32 %v15356_v15, %v9331_v21  ;;  %v9332_v40 = vmul.f32 %v15348_v38, %v9157_v3  ;;  %v9162_v5 = vmul.f32 0.5, %v9114_v22  ;;  %v9115_v37 = vadd.f32 %v8636_v25, %v16072_v14  ;;  %v8639_v52 = vpop.f32.mrf.mxu1  ;;  %v16075_v3 = vld [vmem:[#allocation59_spill] sm:$0xff]  ;;  %v16076_v14 = vld [vmem:[#allocation58_spill] sm:$0xff] }
 0x59a   :  { %10025 = vmatprep.mubr.bf16.mxu0 %v9586_v43  ;;  %v9120_v39 = vadd.f32 %v8638_v50, %v16073_v10  ;;  %vm9453_vm4 = vcmp.ge.f32.partialorder %v9405_v35, 0.0  ;;  %v9502_v61 = vmul.f32 %v15370_v33, %v9405_v35  ;;  %v8640_v48 = vadd.f32 %v8639_v52, %v15388_v23  ;;  %v12718_v52 = vld [vmem:[#allocation16 + $0x178] sm:$0xff]  }
 0x59b   :  { %9080 = vmatmul.mubr.bf16.gmra.mxu1 %v15211_v47  ;;  %v9411_v26 = vadd.f32 %v15366_v57, %v9332_v40  ;;  %10026 = vmatmul.mubr.bf16.vlgmr.msra.gmra.mxu0 %v9585_v4  ;;  %v9507_v28 = vmul.f32 %v15370_v33, %v9410_v30  ;;  %v9337_v16 = vmul.f32 %v15339_v9, %v9162_v5  ;;  %v9163_v59 = vmul.f32 0.5, %v9115_v37  ;;  %v8643_v1 = vpop.f32.mrf.mxu1  ;;  %v12705_v47 = vld [vmem:[#allocation16 + $0xb0] sm:$0xff]   ;;  %v15454_v4 = vpop.f32.mrf.mxu0  ;;  %v12707_v5 = vld [vmem:[#allocation16 + $0xa8] sm:$0xff]  }
 0x59c   :  { %11221 = vmatpush3.bf16.msra.mxu0 %v12703_v58  ;;  %v9168_v51 = vmul.f32 0.5, %v9120_v39  ;;  %v8644_v0 = vadd.f32 %v8643_v1, %v15391_v36  ;;  %vm9458_vm6 = vcmp.ge.f32.partialorder %v9410_v30, 0.0  ;;  %v9121_v32 = vadd.f32 %v8640_v48, %v16074_v41  ;;  %11260 = vmatprep.subr.bf16.mxu1 %v12718_v52  ;;  %v12712_v52 = vld [vmem:[#allocation16 + $0xd0] sm:$0xff]  }
 0x59d   :  { %vm9459_vm5 = vcmp.ge.f32.partialorder %v9411_v26, 0.0  ;;  %11222 = vmatprep.subr.bf16.mxu0 %v12704_v7  ;;  %v9338_v2 = vmul.f32 %v15348_v38, %v9163_v59  ;;  %v8645_v56 = vpop.f32.mrf.mxu1  ;;  %v9508_v21 = vmul.f32 %v15370_v33, %v9411_v26  ;;  %vm9452_vm7 = vcmp.ge.f32.partialorder %v15418_v20, 0.0 }
 0x59e   :  { %v9343_v23 = vmul.f32 %v15339_v9, %v9168_v51  ;;  %v9126_v44 = vadd.f32 %v8644_v0, %v16075_v3  ;;  %v8646_v22 = vadd.f32 %v8645_v56, %v15395_v31  ;;  %v9550_v36 = vsel %vm9453_vm4, %v9405_v35, %v9502_v61  ;;  %v12708_v35 = vld [vmem:[#allocation16 + $0xe0] sm:$0xff]   ;;  %v15468_v51 = vpop.f32.mrf.mxu0  ;;  %v12710_v56 = vld [vmem:[#allocation16 + $0xd8] sm:$0xff]   ;;  %v16078_v3 = vld [vmem:[#allocation61_spill] sm:$0xff] }
 0x59f   :  { %v9417_v25 = vadd.f32 %v15366_v57, %v9338_v2  ;;  %v9169_v17 = vmul.f32 0.5, %v9121_v32  ;;  %v8647_v43 = vpop.f32.mrf.mxu1  ;;  %v9556_v58 = vsel %vm9459_vm5, %v9411_v26, %v9508_v21  ;;  %v9555_v40 = vsel %vm9458_vm6, %v9410_v30, %v9507_v28  ;;  %v12719_v26 = vld [vmem:[#allocation16 + $0x138] sm:$0xff]  }
 0x5a0   :  { %11223 = vmatpush3.bf16.msra.mxu0 %v12705_v47  ;;  %v9416_v50 = vadd.f32 %v15356_v15, %v9337_v16  ;;  %v9422_v7 = vadd.f32 %v15356_v15, %v9343_v23  ;;  %v9127_v31 = vadd.f32 %v8646_v22, %v16076_v14  ;;  %v8648_v37 = vadd.f32 %v8647_v43, %v8575_v46  ;;  %v16077_v16 = vld [vmem:[#allocation60_spill] sm:$0xff]  ;;  %v12720_v46 = vld [vmem:[#allocation16 + $0x170] sm:$0xff]   ;;  %v15475_v21 = vpop.f32.mrf.mxu0  ;;  %v12722_v43 = vld [vmem:[#allocation16 + $0x168] sm:$0xff]  }
 0x5a1   :  { %11224 = vmatprep.subr.bf16.mxu0 %v12706_v42  ;;  %v9344_v10 = vmul.f32 %v15348_v38, %v9169_v17  ;;  %v9174_v39 = vmul.f32 0.5, %v9126_v44  ;;  %v8649_v61 = vpop.f32.mrf.mxu1  ;;  %v9592_v59 = vpack.c.bf16 %v9556_v58, %v9550_v36  ;;  %v9549_v30 = vsel %vm9452_vm7, %v15418_v20, %v9501_v11  ;;  %v12709_v20 = vld [vmem:[#allocation16 + $0xa0] sm:$0xff]   ;;  %11261 = vmatpush3.bf16.msra.mxu1 %v12719_v26  ;;  %v12721_v22 = vld [vmem:[#allocation16 + $0x130] sm:$0xff]  }
 0x5a2   :  { %v9175_v28 = vmul.f32 0.5, %v9127_v31  ;;  %v9132_v48 = vadd.f32 %v8648_v37, %v16077_v16  ;;  %v9591_v1 = vpack.c.bf16 %v9555_v40, %v9549_v30  ;;  %v9514_v47 = vmul.f32 %v15370_v33, %v9417_v25  ;;  %11262 = vmatprep.subr.bf16.mxu1 %v12720_v46  ;;  %v12711_v31 = vld [vmem:[#allocation16 + $0x98] sm:$0xff]  }
 0x5a3   :  { %v9519_v0 = vmul.f32 %v15370_v33, %v9422_v7  ;;  %v9423_v42 = vadd.f32 %v15366_v57, %v9344_v10  ;;  %v8650_v2 = vadd.f32 %v8649_v61, %v15431_v62  ;;  %10033 = vmatprep.mubr.bf16.mxu0 %v9592_v59  ;;  %vm9465_vm8 = vcmp.ge.f32.partialorder %v9417_v25, 0.0  ;;  %v8834_v10 = vpop.f32.mrf.mxu0  ;;  %v12723_v61 = vld [vmem:[#allocation16 + $0x128] sm:$0xff]  }
 0x5a4   :  { %11225 = vmatpush3.bf16.msra.mxu0 %v12707_v5  ;;  %v9513_v11 = vmul.f32 %v15370_v33, %v9416_v50  ;;  %v9350_v41 = vmul.f32 %v15348_v38, %v9175_v28  ;;  %v9180_v32 = vmul.f32 0.5, %v9132_v48  ;;  %vm9470_vm9 = vcmp.ge.f32.partialorder %v9422_v7, 0.0  ;;  %v12713_v28 = vld [vmem:[#allocation16 + $0x90] sm:$0xff]  }
 0x5a5   :  { %10034 = vmatmul.mubr.bf16.gmra.mxu0 %v9591_v1  ;;  %11226 = vmatprep.subr.bf16.mxu0 %v12708_v35  ;;  %v9349_v23 = vmul.f32 %v15339_v9, %v9174_v39  ;;  %v9133_v44 = vadd.f32 %v8650_v2, %v16078_v3  ;;  %vm9471_vm10 = vcmp.ge.f32.partialorder %v9423_v42, 0.0  ;;  %v9520_v62 = vmul.f32 %v15370_v33, %v9423_v42 }
 0x5a6   :  { %v9355_v36 = vmul.f32 %v15339_v9, %v9180_v32  ;;  %v9562_v17 = vsel %vm9465_vm8, %v9417_v25, %v9514_v47  ;;  %vm9464_vm11 = vcmp.ge.f32.partialorder %v9416_v50, 0.0  ;;  %v9429_v58 = vadd.f32 %v15366_v57, %v9350_v41  ;;  %11263 = vmatpush3.bf16.msra.mxu1 %v12721_v22  ;;  %v12715_v47 = vld [vmem:[#allocation16 + $0x88] sm:$0xff]  }
 0x5a7   :  { %v9181_v40 = vmul.f32 0.5, %v9133_v44  ;;  %v9568_v5 = vsel %vm9471_vm10, %v9423_v42, %v9520_v62  ;;  %v9567_v14 = vsel %vm9470_vm9, %v9422_v7, %v9519_v0  ;;  %v9428_v9 = vadd.f32 %v15356_v15, %v9349_v23  ;;  %11264 = vmatprep.subr.bf16.mxu1 %v12722_v43  ;;  %v12716_v0 = vld [vmem:[#allocation16 + $0xc0] sm:$0xff]   ;;  %v16080_v44 = vld [vmem:[#allocation27_spill] sm:$0xff] }
 0x5a8   :  { %11227 = vmatpush3.bf16.msra.mxu0 %v12709_v20  ;;  %v9434_v37 = vadd.f32 %v15356_v15, %v9355_v36  ;;  %v9598_v35 = vpack.c.bf16 %v9568_v5, %v9562_v17  ;;  %v9561_v39 = vsel %vm9464_vm11, %v9416_v50, %v9513_v11  ;;  %v9526_v26 = vmul.f32 %v15370_v33, %v9429_v58  ;;  %v8836_v15 = vpop.f32.mrf.mxu0  ;;  %v12717_v11 = vld [vmem:[#allocation16 + $0x80] sm:$0xff]  }
 0x5a9   :  { %11228 = vmatprep.subr.bf16.mxu0 %v12710_v56  ;;  %v9356_v25 = vmul.f32 %v15348_v38, %v9181_v40  ;;  %v9597_v59 = vpack.c.bf16 %v9567_v14, %v9561_v39  ;;  %vm9477_vm12 = vcmp.ge.f32.partialorder %v9429_v58, 0.0  ;;  %v12714_v38 = vld [vmem:[#allocation16 + $0xc8] sm:$0xff]   ;;  %v9525_v50 = vmul.f32 %v15370_v33, %v9428_v9 }
 0x5aa   :  { %10041 = vmatprep.mubr.bf16.mxu0 %v9598_v35  ;;  %v9531_v7 = vmul.f32 %v15370_v33, %v9434_v37  ;;  %vm9482_vm13 = vcmp.ge.f32.partialorder %v9434_v37, 0.0  ;;  %11265 = vmatpush3.bf16.msra.mxu1 %v12723_v61  ;;  %vm9476_vm15 = vcmp.ge.f32.partialorder %v9428_v9, 0.0  ;;  %v9574_v48 = vsel %vm9477_vm12, %v9429_v58, %v9526_v26  ;;  %v8838_v42 = vpop.f32.mrf.mxu0  ;;  %v16079_v56 = vld [vmem:[#allocation25_spill] sm:$0xff] }
 0x5ab   :  { %v9435_v30 = vadd.f32 %v15366_v57, %v9356_v25  ;;  %v9573_v2 = vsel %vm9476_vm15, %v9428_v9, %v9525_v50  ;;  %v6974_v23 = vrot.slane %v15304_v55, %v16079_v56  ;;  %v6978_v62 = vrot.slane %v15304_v55, %v16080_v44  ;;  %v16081_v9 = vld [vmem:[#allocation57_spill] sm:$0xff] }
 0x5ac   :  { %11229 = vmatpush3.bf16.msra.mxu0 %v12711_v31  ;;  %v9579_v57 = vsel %vm9482_vm13, %v9434_v37, %v9531_v7  ;;  %v8842_v41 = vpop.f32.mrf.mxu0  ;;  %v15509_v35 = vrot.slane %v15319_v63, %v16079_v56 }
 0x5ad   :  { %10042 = vmatmul.mubr.bf16.gmra.mxu0 %v9597_v59  ;;  %11230 = vmatprep.subr.bf16.mxu0 %v12712_v52  ;;  %vm9483_vm14 = vcmp.ge.f32.partialorder %v9435_v30, 0.0  ;;  %v9532_v16 = vmul.f32 %v15370_v33, %v9435_v30  ;;  %v9603_v20 = vpack.c.bf16 %v9579_v57, %v9573_v2  ;;  %v8687_v22 = vadd.f32 %v15292_v12, %v6974_v23 }
 0x5ae   :  { %v8844_v32 = vpop.f32.mrf.mxu0  ;;  %v8689_v43 = vadd.f32 %v15296_v6, %v6978_v62  ;;  %v8691_v5 = vadd.f32 %v15300_v13, %v6974_v23  ;;  %v8693_v12 = vadd.f32 %v15302_v8, %v6978_v62  ;;  %v8697_v61 = vadd.f32 %v15306_v54, %v6974_v23 }
 0x5af   :  { %v9580_v1 = vsel %vm9483_vm14, %v9435_v30, %v9532_v16  ;;  %v15516_v13 = vrot.slane %v15333_v45, %v16079_v56  ;;  %v16082_v30 = vld [vmem:[#allocation29_spill] sm:$0xff]  ;;  %v8703_v54 = vadd.f32 %v15331_v18, %v6978_v62  ;;  %v15530_v16 = vrot.slane %v15333_v45, %v16080_v44 }
 0x5b0   :  { %11231 = vmatpush3.bf16.msra.mxu0 %v12713_v28  ;;  %v9604_v46 = vpack.c.bf16 %v9580_v1, %v9574_v48  ;;  %v15495_v3 = vpop.f32.mrf.mxu0 }
 0x5b1   :  { %11232 = vmatprep.subr.bf16.mxu0 %v12714_v38  ;;  %v8699_v38 = vadd.f32 %v15310_v49, %v6978_v62  ;;  %v8709_v49 = vadd.f32 %v15378_v27, %v6978_v62 }
 0x5b2   :  { %10049 = vmatprep.mubr.bf16.mxu0 %v9604_v46  ;;  %v15500_v36 = vpop.f32.mrf.mxu0 }
 0x5b4   :  { %11233 = vmatpush3.bf16.msra.mxu0 %v12715_v47  ;;  %v15505_v37 = vpop.f32.mrf.mxu0  ;;  %v16083_v47 = vld [vmem:[#allocation24_spill] sm:$0xff] }
 0x5b5   :  { %10050 = vmatmul.mubr.bf16.gmra.mxu0 %v9603_v20  ;;  %11234 = vmatprep.subr.bf16.mxu0 %v12716_v0  ;;  %v8707_v0 = vadd.f32 %v15352_v60, %v6974_v23  ;;  %v15538_v20 = vadd.f32 %v15409_v29, %v6978_v62  ;;  %v15554_v29 = vadd.f32 %v15468_v51, %v6978_v62 }
 0x5b6   :  { %v15526_v50 = vpop.f32.mrf.mxu0 }
 0x5b8   :  { %11235 = vmatpush3.bf16.msra.mxu0 %v12717_v11  ;;  %v15548_v60 = vpop.f32.mrf.mxu0 }
 0x5ba   :  { %v8858_v51 = vpop.f32.mrf.mxu0 }
 0x5c3   :  { %v8759_v17 = vpop.f32.mrf.mxu1 }
 0x5c4   :  { %v8760_v58 = vadd.f32 %v8759_v17, %v8687_v22  ;;  %v15543_v17 = vadd.f32 %v15425_v24, %v6974_v23  ;;  %v12724_v24 = vld [vmem:[#allocation16 + $0x160] sm:$0xff]  }
 0x5c5   :  { %v8761_v40 = vpop.f32.mrf.mxu1  ;;  %11266 = vmatprep.subr.bf16.mxu1 %v12724_v24 }
 0x5c6   :  { %v8833_v14 = vadd.f32 %v15475_v21, %v8760_v58  ;;  %v8762_v31 = vadd.f32 %v8761_v40, %v8689_v43  ;;  %v15520_v21 = vrot.slane %v15319_v63, %v16080_v44  ;;  %v16084_v44 = vld [vmem:[#allocation26_spill] sm:$0xff]  ;;  %v15551_v58 = vadd.f32 %v15454_v4, %v6974_v23 }
 0x5c7   :  { %v8763_v52 = vpop.f32.mrf.mxu1 }
 0x5c8   :  { %v9092_v25 = vadd.f32 %v8833_v14, %v16081_v9  ;;  %v8835_v39 = vadd.f32 %v8834_v10, %v8762_v31  ;;  %v8764_v6 = vadd.f32 %v8763_v52, %v8691_v5  ;;  %v8701_v10 = vadd.f32 %v15315_v19, %v6974_v23  ;;  %v12725_v14 = vld [vmem:[#allocation16 + $0x120] sm:$0xff]  }
 0x5c9   :  { %v8765_v59 = vpop.f32.mrf.mxu1  ;;  %v8711_v19 = vadd.f32 %v15397_v53, %v6974_v23  ;;  %11267 = vmatpush3.bf16.msra.mxu1 %v12725_v14 }
 0x5ca   :  { %v9140_v7 = vmul.f32 0.5, %v9092_v25  ;;  %v9093_v26 = vadd.f32 %v8835_v39, %v16082_v30  ;;  %v8837_v28 = vadd.f32 %v8836_v15, %v8764_v6  ;;  %v8766_v8 = vadd.f32 %v8765_v59, %v8693_v12  ;;  %v16086_v6 = vld [vmem:[#allocation34_spill] sm:$0xff] }
 0x5cb   :  { %v8769_v48 = vpop.f32.mrf.mxu1 }
 0x5cc   :  { %v9315_v1 = vmul.f32 %v15509_v35, %v9140_v7  ;;  %v9141_v57 = vmul.f32 0.5, %v9093_v26  ;;  %v9098_v46 = vadd.f32 %v8837_v28, %v16083_v47  ;;  %v8839_v15 = vadd.f32 %v8838_v42, %v8766_v8 }
 0x5cd   :  { %v8770_v18 = vadd.f32 %v8769_v48, %v8697_v61  ;;  %v8771_v2 = vpop.f32.mrf.mxu1  ;;  %v15546_v42 = vadd.f32 %v15440_v34, %v6978_v62  ;;  %v16085_v34 = vld [vmem:[#allocation32_spill] sm:$0xff] }
 0x5ce   :  { %v9394_v11 = vadd.f32 %v15516_v13, %v9315_v1  ;;  %v9146_v56 = vmul.f32 0.5, %v9098_v46  ;;  %v9099_v22 = vadd.f32 %v8839_v15, %v16084_v44  ;;  %v8772_v53 = vadd.f32 %v8771_v2, %v8699_v38  ;;  %v12726_v1 = vld [vmem:[#allocation16 + $0x158] sm:$0xff]   ;;  %v8862_v2 = vpop.f32.mrf.mxu0 }
 0x5cf   :  { %v8843_v27 = vadd.f32 %v8842_v41, %v8770_v18  ;;  %v8773_v43 = vpop.f32.mrf.mxu1  ;;  %v9316_v40 = vmul.f32 %v15520_v21, %v9141_v57  ;;  %v12727_v57 = vld [vmem:[#allocation16 + $0x118] sm:$0xff]   ;;  %11268 = vmatprep.subr.bf16.mxu1 %v12726_v1 }
 0x5d0   :  { %v9321_v5 = vmul.f32 %v15509_v35, %v9146_v56  ;;  %v9147_v31 = vmul.f32 0.5, %v9099_v22  ;;  %v8845_v12 = vadd.f32 %v8844_v32, %v8772_v53  ;;  %v8774_v9 = vadd.f32 %v8773_v43, %v8701_v10  ;;  %v16087_v10 = vld [vmem:[#allocation36_spill] sm:$0xff]  ;;  %v16089_v43 = vld [vmem:[#allocation38_spill] sm:$0xff]  ;;  %11269 = vmatpush3.bf16.msra.mxu1 %v12727_v57 }
 0x5d1   :  { %v9104_v52 = vadd.f32 %v8843_v27, %v16085_v34  ;;  %v8775_v41 = vpop.f32.mrf.mxu1  ;;  %vm9442_vm0 = vcmp.ge.f32.partialorder %v9394_v11, 0.0  ;;  %v9491_v25 = vmul.f32 %v15370_v33, %v9394_v11  ;;  %v9395_v28 = vadd.f32 %v15530_v16, %v9316_v40  ;;  %v12728_v27 = vld [vmem:[#allocation16 + $0x150] sm:$0xff]   ;;  %v12732_v57 = vld [vmem:[#allocation16 + $0x140] sm:$0xff]  }
 0x5d2   :  { %v9400_v4 = vadd.f32 %v15516_v13, %v9321_v5  ;;  %v8776_v23 = vadd.f32 %v8775_v41, %v8703_v54  ;;  %v9322_v62 = vmul.f32 %v15520_v21, %v9147_v31  ;;  %v9105_v61 = vadd.f32 %v8845_v12, %v16086_v6  ;;  %11270 = vmatprep.subr.bf16.mxu1 %v12728_v27 }
 0x5d3   :  { %v9152_v39 = vmul.f32 0.5, %v9104_v52  ;;  %v8847_v59 = vadd.f32 %v15495_v3, %v8774_v9  ;;  %v8779_v7 = vpop.f32.mrf.mxu1  ;;  %v16088_v3 = vld [vmem:[#allocation37_spill] sm:$0xff]  ;;  %vm9443_vm2 = vcmp.ge.f32.partialorder %v9395_v28, 0.0  ;;  %v9492_v31 = vmul.f32 %v15370_v33, %v9395_v28  ;;  %v16090_v52 = vld [vmem:[#allocation39_spill] sm:$0xff] }
 0x5d4   :  { %vm9448_vm1 = vcmp.ge.f32.partialorder %v9400_v4, 0.0  ;;  %v9497_v32 = vmul.f32 %v15370_v33, %v9400_v4  ;;  %v8849_v30 = vadd.f32 %v15500_v36, %v8776_v23  ;;  %v8780_v26 = vadd.f32 %v8779_v7, %v8707_v0 }
 0x5d5   :  { %v9401_v8 = vadd.f32 %v15530_v16, %v9322_v62  ;;  %v9153_v38 = vmul.f32 0.5, %v9105_v61  ;;  %v9110_v54 = vadd.f32 %v8847_v59, %v16087_v10  ;;  %v8781_v48 = vpop.f32.mrf.mxu1  ;;  %v9539_v36 = vsel %vm9442_vm0, %v9394_v11, %v9491_v25  ;;  %v16091_v59 = vld [vmem:[#allocation40_spill] sm:$0xff] }
 0x5d6   :  { %v15569_v47 = vsel %vm9448_vm1, %v9400_v4, %v9497_v32  ;;  %v9111_v46 = vadd.f32 %v8849_v30, %v16088_v3  ;;  %v8853_v15 = vadd.f32 %v15505_v37, %v8780_v26  ;;  %v8782_v18 = vadd.f32 %v8781_v48, %v8709_v49  ;;  %v12729_v37 = vld [vmem:[#allocation16 + $0x110] sm:$0xff]  }
 0x5d7   :  { %v9327_v0 = vmul.f32 %v15509_v35, %v9152_v39  ;;  %v9328_v56 = vmul.f32 %v15520_v21, %v9153_v38  ;;  %v9158_v44 = vmul.f32 0.5, %v9110_v54  ;;  %v8783_v22 = vpop.f32.mrf.mxu1  ;;  %v9587_v49 = vpack.c.bf16 %v15569_v47, %v9539_v36  ;;  %11271 = vmatpush3.bf16.msra.mxu1 %v12729_v37 }
 0x5d8   :  { %v9159_v53 = vmul.f32 0.5, %v9111_v46  ;;  %v9116_v40 = vadd.f32 %v8853_v15, %v16089_v43  ;;  %v8855_v5 = vadd.f32 %v15526_v50, %v8782_v18  ;;  %v8784_v24 = vadd.f32 %v8783_v22, %v8711_v19  ;;  %v12730_v50 = vld [vmem:[#allocation16 + $0x148] sm:$0xff]   ;;  %v8864_v19 = vpop.f32.mrf.mxu0 }
 0x5d9   :  { %v9333_v11 = vmul.f32 %v15509_v35, %v9158_v44  ;;  %v8785_v14 = vpop.f32.mrf.mxu1  ;;  %vm9449_vm3 = vcmp.ge.f32.partialorder %v9401_v8, 0.0  ;;  %v15585_v41 = vadd.f32 %v15516_v13, %v9327_v0  ;;  %v9498_v62 = vmul.f32 %v15370_v33, %v9401_v8  ;;  %11272 = vmatprep.subr.bf16.mxu1 %v12730_v50  ;;  %v16093_v0 = vld [vmem:[#allocation43_spill] sm:$0xff] }
 0x5da   :  { %v9334_v34 = vmul.f32 %v15520_v21, %v9159_v53  ;;  %v9117_v12 = vadd.f32 %v8855_v5, %v16090_v52  ;;  %v8857_v9 = vadd.f32 %v15548_v60, %v8784_v24  ;;  %v9164_v25 = vmul.f32 0.5, %v9116_v40  ;;  %v8866_v47 = vpop.f32.mrf.mxu0  ;;  %v16094_v24 = vld [vmem:[#allocation42_spill] sm:$0xff] }
 0x5db   :  { %v8786_v4 = vadd.f32 %v8785_v14, %v15538_v20  ;;  %v8789_v23 = vpop.f32.mrf.mxu1  ;;  %v9407_v39 = vadd.f32 %v15530_v16, %v9328_v56  ;;  %v9540_v30 = vsel %vm9443_vm2, %v9395_v28, %v9492_v31  ;;  %v9546_v26 = vsel %vm9449_vm3, %v9401_v8, %v9498_v62  ;;  %v12731_v20 = vld [vmem:[#allocation16 + $0x108] sm:$0xff]  }
 0x5dc   :  { %v9413_v6 = vadd.f32 %v15530_v16, %v9334_v34  ;;  %v9165_v61 = vmul.f32 0.5, %v9117_v12  ;;  %v9122_v7 = vadd.f32 %v8857_v9, %v16091_v59  ;;  %v8790_v32 = vadd.f32 %v8789_v23, %v15543_v17  ;;  %11273 = vmatpush3.bf16.msra.mxu1 %v12731_v20  ;;  %v8868_v40 = vpop.f32.mrf.mxu0  ;;  %v16095_v31 = vld [vmem:[#allocation45_spill] sm:$0xff] }
 0x5dd   :  { %v8859_v60 = vadd.f32 %v8858_v51, %v8786_v4  ;;  %v8791_v38 = vpop.f32.mrf.mxu1  ;;  %v9412_v10 = vadd.f32 %v15516_v13, %v9333_v11  ;;  %v9588_v1 = vpack.c.bf16 %v9546_v26, %v9540_v30  ;;  %v9339_v3 = vmul.f32 %v15509_v35, %v9164_v25  ;;  %v16092_v51 = vld [vmem:[#allocation41_spill] sm:$0xff]  ;;  %11274 = vmatprep.subr.bf16.mxu1 %v12732_v57 }
 0x5de   :  { %v9340_v54 = vmul.f32 %v15520_v21, %v9165_v61  ;;  %v9170_v48 = vmul.f32 0.5, %v9122_v7  ;;  %v8863_v17 = vadd.f32 %v8862_v2, %v8790_v32  ;;  %v8792_v28 = vadd.f32 %v8791_v38, %v15546_v42  ;;  %v12733_v2 = vld [vmem:[#allocation16 + $0x100] sm:$0xff]  }
 0x5df   :  { %v9123_v46 = vadd.f32 %v8859_v60, %v16092_v51  ;;  %v8793_v15 = vpop.f32.mrf.mxu1  ;;  %10090 = vmatprep.mubr.bf16.mxu0 %v9588_v1  ;;  %vm9455_vm4 = vcmp.ge.f32.partialorder %v9407_v39, 0.0  ;;  %vm9461_vm5 = vcmp.ge.f32.partialorder %v9413_v6, 0.0  ;;  %v9504_v18 = vmul.f32 %v15370_v33, %v9407_v39 }
 0x5e0   :  { %v8794_v8 = vadd.f32 %v8793_v15, %v15551_v58  ;;  %v9128_v56 = vadd.f32 %v8863_v17, %v16093_v0  ;;  %10091 = vmatmul.mubr.bf16.vlgmr.msra.gmra.mxu0 %v9587_v49  ;;  %v8865_v44 = vadd.f32 %v8864_v19, %v8792_v28  ;;  %v9510_v27 = vmul.f32 %v15370_v33, %v9413_v6  ;;  %v16096_v19 = vld [vmem:[#allocation46_spill] sm:$0xff] }
 0x5e1   :  { %v9171_v36 = vmul.f32 0.5, %v9123_v46  ;;  %v8795_v22 = vpop.f32.mrf.mxu1  ;;  %v9419_v42 = vadd.f32 %v15530_v16, %v9340_v54  ;;  %v9345_v53 = vmul.f32 %v15509_v35, %v9170_v48  ;;  %v9552_v49 = vsel %vm9455_vm4, %v9407_v39, %v9504_v18  ;;  %11275 = vmatpush3.bf16.msra.mxu1 %v12733_v2 }
 0x5e2   :  { %v8867_v43 = vadd.f32 %v8866_v47, %v8794_v8  ;;  %v8796_v58 = vadd.f32 %v8795_v22, %v15554_v29  ;;  %v9129_v37 = vadd.f32 %v8865_v44, %v16094_v24  ;;  %v9558_v11 = vsel %vm9461_vm5, %v9413_v6, %v9510_v27 }
 0x5e3   :  { %v9346_v5 = vmul.f32 %v15520_v21, %v9171_v36  ;;  %v9176_v14 = vmul.f32 0.5, %v9128_v56  ;;  %v9594_v12 = vpack.c.bf16 %v9558_v11, %v9552_v49  ;;  %vm9454_vm6 = vcmp.ge.f32.partialorder %v15585_v41, 0.0 }
 0x5e4   :  { %v9134_v34 = vadd.f32 %v8867_v43, %v16095_v31  ;;  %v8869_v52 = vadd.f32 %v8868_v40, %v8796_v58  ;;  %v9177_v50 = vmul.f32 0.5, %v9129_v37  ;;  %vm9460_vm7 = vcmp.ge.f32.partialorder %v9412_v10, 0.0 }
 0x5e5   :  { %v9425_v9 = vadd.f32 %v15530_v16, %v9346_v5  ;;  %10098 = vmatprep.mubr.bf16.mxu0 %v9594_v12  ;;  %v9503_v4 = vmul.f32 %v15370_v33, %v15585_v41  ;;  %v9509_v23 = vmul.f32 %v15370_v33, %v9412_v10  ;;  %v9418_v62 = vadd.f32 %v15516_v13, %v9339_v3 }
 0x5e6   :  { %v9182_v29 = vmul.f32 0.5, %v9134_v34  ;;  %v9135_v25 = vadd.f32 %v8869_v52, %v16096_v19  ;;  %v9424_v39 = vadd.f32 %v15516_v13, %v9345_v53  ;;  %v9352_v6 = vmul.f32 %v15520_v21, %v9177_v50  ;;  %v8978_v53 = vpop.f32.mrf.mxu0 }
 0x5e7   :  { %vm9467_vm8 = vcmp.ge.f32.partialorder %v9419_v42, 0.0  ;;  %v9551_v59 = vsel %vm9454_vm6, %v15585_v41, %v9503_v4  ;;  %v9557_v7 = vsel %vm9460_vm7, %v9412_v10, %v9509_v23  ;;  %vm9473_vm9 = vcmp.ge.f32.partialorder %v9425_v9, 0.0 }
 0x5e8   :  { %v9183_v61 = vmul.f32 0.5, %v9135_v25  ;;  %v9431_v60 = vadd.f32 %v15530_v16, %v9352_v6  ;;  %v9593_v32 = vpack.c.bf16 %v9557_v7, %v9551_v59  ;;  %v9516_v30 = vmul.f32 %v15370_v33, %v9419_v42  ;;  %v8980_v58 = vpop.f32.mrf.mxu0  ;;  %v16097_v25 = vld [vmem:[#allocation63_spill] sm:$0xff] }
 0x5e9   :  { %v9522_v26 = vmul.f32 %v15370_v33, %v9425_v9  ;;  %v9351_v38 = vmul.f32 %v15509_v35, %v9176_v14  ;;  %v9357_v20 = vmul.f32 %v15509_v35, %v9182_v29  ;;  %vm9472_vm10 = vcmp.ge.f32.partialorder %v9424_v39, 0.0 }
 0x5ea   :  { %v9358_v54 = vmul.f32 %v15520_v21, %v9183_v61  ;;  %10099 = vmatmul.mubr.bf16.gmra.mxu0 %v9593_v32  ;;  %v9564_v48 = vsel %vm9467_vm8, %v9419_v42, %v9516_v30  ;;  %v9521_v41 = vmul.f32 %v15370_v33, %v9424_v39  ;;  %v9515_v47 = vmul.f32 %v15370_v33, %v9418_v62  ;;  %v8982_v5 = vpop.f32.mrf.mxu0 }
 0x5eb   :  { %v9570_v1 = vsel %vm9473_vm9, %v9425_v9, %v9522_v26  ;;  %v9528_v3 = vmul.f32 %v15370_v33, %v9431_v60  ;;  %vm9466_vm11 = vcmp.ge.f32.partialorder %v9418_v62, 0.0  ;;  %vm9479_vm12 = vcmp.ge.f32.partialorder %v9431_v60, 0.0 }
 0x5ec   :  { %v9437_v10 = vadd.f32 %v15530_v16, %v9358_v54  ;;  %v9600_v57 = vpack.c.bf16 %v9570_v1, %v9564_v48  ;;  %v9436_v51 = vadd.f32 %v15516_v13, %v9357_v20  ;;  %v9569_v35 = vsel %vm9472_vm10, %v9424_v39, %v9521_v41  ;;  %v8984_v37 = vpop.f32.mrf.mxu0 }
 0x5ed   :  { %v9430_v46 = vadd.f32 %v15516_v13, %v9351_v38  ;;  %v9563_v17 = vsel %vm9466_vm11, %v9418_v62, %v9515_v47  ;;  %v9576_v28 = vsel %vm9479_vm12, %v9431_v60, %v9528_v3  ;;  %v6982_v4 = vrot.slane %v15304_v55, %v16097_v25  ;;  %v16098_v62 = vld [vmem:[#allocation30_spill] sm:$0xff]  ;;  %v16099_v3 = vld [vmem:[#allocation48_spill] sm:$0xff] }
 0x5ee   :  { %10106 = vmatprep.mubr.bf16.mxu0 %v9600_v57  ;;  %vm9485_vm13 = vcmp.ge.f32.partialorder %v9437_v10, 0.0  ;;  %v9534_v21 = vmul.f32 %v15370_v33, %v9437_v10  ;;  %v9599_v16 = vpack.c.bf16 %v9569_v35, %v9563_v17  ;;  %v9533_v18 = vmul.f32 %v15370_v33, %v9436_v51  ;;  %v8988_v11 = vpop.f32.mrf.mxu0 }
 0x5ef   :  { %vm9484_vm14 = vcmp.ge.f32.partialorder %v9436_v51, 0.0  ;;  %v9527_v36 = vmul.f32 %v15370_v33, %v9430_v46  ;;  %vm9478_vm15 = vcmp.ge.f32.partialorder %v9430_v46, 0.0  ;;  %v15641_v39 = vrot.slane %v15304_v55, %v16098_v62 }
 0x5f0   :  { %v9582_v15 = vsel %vm9485_vm13, %v9437_v10, %v9534_v21  ;;  %v9581_v0 = vsel %vm9484_vm14, %v9436_v51, %v9533_v18  ;;  %v8990_v31 = vpop.f32.mrf.mxu0  ;;  %v15647_v41 = vrot.slane %v15319_v63, %v16097_v25  ;;  %v15651_v55 = vrot.slane %v15333_v45, %v16097_v25 }
 0x5f1   :  { %v9606_v8 = vpack.c.bf16 %v9582_v15, %v9576_v28  ;;  %v9575_v56 = vsel %vm9478_vm15, %v9430_v46, %v9527_v36  ;;  %v15655_v57 = vrot.slane %v15319_v63, %v16098_v62  ;;  %v15659_v47 = vrot.slane %v15333_v45, %v16098_v62 }
 0x5f2   :  { %10107 = vmatmul.mubr.bf16.gmra.mxu0 %v9599_v16  ;;  %v9605_v44 = vpack.c.bf16 %v9581_v0, %v9575_v56  ;;  %v8992_v52 = vpop.f32.mrf.mxu0  ;;  %v16100_v0 = vld [vmem:[#allocation49_spill] sm:$0xff] }
 0x5f3   :  { %10114 = vmatprep.mubr.bf16.mxu0 %v9606_v8 }
 0x5f4   :  { %v8994_v9 = vpop.f32.mrf.mxu0 }
 0x5f6   :  { %v8998_v29 = vpop.f32.mrf.mxu0 }
 0x5f8   :  { %v9000_v23 = vpop.f32.mrf.mxu0 }
 0x5fa   :  { %10115 = vmatmul.mubr.bf16.gmra.mxu0 %v9605_v44  ;;  %v9002_v59 = vpop.f32.mrf.mxu0 }
 0x5fc   :  { %v9004_v38 = vpop.f32.mrf.mxu0 }
 0x5fe   :  { %v9008_v17 = vpop.f32.mrf.mxu0 }
 0x603   :  { %v8905_v22 = vpop.f32.mrf.mxu1 }
 0x604   :  { %v8906_v61 = vadd.f32 %v8905_v22, %v6982_v4 }
 0x605   :  { %v8907_v27 = vpop.f32.mrf.mxu1 }
 0x606   :  { %v8908_v7 = vadd.f32 %v8907_v27, %v15641_v39  ;;  %v8979_v26 = vadd.f32 %v8978_v53, %v8906_v61 }
 0x607   :  { %v8909_v13 = vpop.f32.mrf.mxu1 }
 0x608   :  { %v8910_v32 = vadd.f32 %v8909_v13, %v6982_v4  ;;  %v8981_v1 = vadd.f32 %v8980_v58, %v8908_v7 }
 0x609   :  { %v8911_v2 = vpop.f32.mrf.mxu1 }
 0x60a   :  { %v8912_v30 = vadd.f32 %v8911_v2, %v15641_v39  ;;  %v8983_v21 = vadd.f32 %v8982_v5, %v8910_v32  ;;  %v9010_v5 = vpop.f32.mrf.mxu0 }
 0x60b   :  { %v8915_v42 = vpop.f32.mrf.mxu1 }
 0x60c   :  { %v8916_v20 = vadd.f32 %v8915_v42, %v6982_v4  ;;  %v8985_v46 = vadd.f32 %v8984_v37, %v8912_v30 }
 0x60d   :  { %v8917_v43 = vpop.f32.mrf.mxu1 }
 0x60e   :  { %v8918_v28 = vadd.f32 %v8917_v43, %v15641_v39  ;;  %v8989_v18 = vadd.f32 %v8988_v11, %v8916_v20  ;;  %v16101_v43 = vld [vmem:[#allocation51_spill] sm:$0xff] }
 0x60f   :  { %v8919_v40 = vpop.f32.mrf.mxu1 }
 0x610   :  { %v8920_v15 = vadd.f32 %v8919_v40, %v6982_v4 }
 0x611   :  { %v8921_v24 = vpop.f32.mrf.mxu1 }
 0x612   :  { %v8922_v16 = vadd.f32 %v8921_v24, %v15641_v39  ;;  %v8993_v11 = vadd.f32 %v8992_v52, %v8920_v15  ;;  %v16105_v15 = vld [vmem:[#allocation64_spill] sm:$0xff] }
 0x613   :  { %v8925_v49 = vpop.f32.mrf.mxu1 }
 0x614   :  { %v8926_v36 = vadd.f32 %v8925_v49, %v6982_v4  ;;  %v8991_v49 = vadd.f32 %v8990_v31, %v8918_v28  ;;  %v8995_v25 = vadd.f32 %v8994_v9, %v8922_v16  ;;  %v9012_v31 = vpop.f32.mrf.mxu0 }
 0x615   :  { %v8927_v14 = vpop.f32.mrf.mxu1 }
 0x616   :  { %v8928_v45 = vadd.f32 %v8927_v14, %v15641_v39  ;;  %v8999_v32 = vadd.f32 %v8998_v29, %v8926_v36 }
 0x617   :  { %v8929_v34 = vpop.f32.mrf.mxu1 }
 0x618   :  { %v8930_v22 = vadd.f32 %v8929_v34, %v6982_v4  ;;  %v9001_v30 = vadd.f32 %v9000_v23, %v8928_v45 }
 0x619   :  { %v8931_v12 = vpop.f32.mrf.mxu1 }
 0x61a   :  { %v8932_v27 = vadd.f32 %v8931_v12, %v15641_v39  ;;  %v16102_v12 = vld [vmem:[#allocation65_spill] sm:$0xff] }
 0x61b   :  { %v8935_v50 = vpop.f32.mrf.mxu1 }
 0x61c   :  { %v8936_v13 = vadd.f32 %v8935_v50, %v6982_v4 }
 0x61d   :  { %v8937_v19 = vpop.f32.mrf.mxu1 }
 0x61e   :  { %v8938_v24 = vadd.f32 %v8937_v19, %v15641_v39  ;;  %v9005_v19 = vadd.f32 %v9004_v38, %v8932_v27 }
 0x61f   :  { %v8939_v6 = vpop.f32.mrf.mxu1 }
 0x620   :  { %v8940_v62 = vadd.f32 %v8939_v6, %v6982_v4  ;;  %v16103_v4 = vld [vmem:[#allocation62_spill] sm:$0xff]  ;;  %v15679_v23 = vadd.f32 %v9010_v5, %v8938_v24 }
 0x621   :  { %v8941_v60 = vpop.f32.mrf.mxu1 }
 0x643   :  { %v9051_v54 = vpop.f32.mrf.mxu1 }
 0x644   :  { %v9052_v48 = vadd.f32 %v9051_v54, %v8979_v26  ;;  %v9003_v26 = vadd.f32 %v9002_v59, %v8930_v22  ;;  %v15681_v59 = vadd.f32 %v9012_v31, %v8940_v62 }
 0x645   :  { %v9053_v10 = vpop.f32.mrf.mxu1 }
 0x646   :  { %v9094_v51 = vadd.f32 %v9052_v48, %v16099_v3  ;;  %v9054_v35 = vadd.f32 %v9053_v10, %v8981_v1  ;;  %v15674_v48 = vadd.f32 %v9008_v17, %v8936_v13  ;;  %v8942_v3 = vadd.f32 %v8941_v60, %v15641_v39 }
 0x647   :  { %v9055_v8 = vpop.f32.mrf.mxu1 }
 0x648   :  { %v9142_v63 = vmul.f32 0.5, %v9094_v51  ;;  %v9095_v56 = vadd.f32 %v9054_v35, %v16100_v0  ;;  %v9056_v44 = vadd.f32 %v9055_v8, %v8983_v21  ;;  %v16104_v21 = vld [vmem:[#allocation66_spill] sm:$0xff] }
 0x649   :  { %v9057_v2 = vpop.f32.mrf.mxu1 }
 0x64a   :  { %v9317_v42 = vmul.f32 %v15647_v41, %v9142_v63  ;;  %v9143_v53 = vmul.f32 0.5, %v9095_v56  ;;  %v9100_v58 = vadd.f32 %v9056_v44, %v16101_v43  ;;  %v9058_v40 = vadd.f32 %v9057_v2, %v8985_v46  ;;  %v16106_v56 = vld [vmem:[#allocation69_spill] sm:$0xff]  ;;  %v9014_v2 = vpop.f32.mrf.mxu0  ;;  %v16107_v43 = vld [vmem:[#allocation67_spill] sm:$0xff] }
 0x64b   :  { %v9061_v37 = vpop.f32.mrf.mxu1 }
 0x64c   :  { %v9318_v14 = vmul.f32 %v15655_v57, %v9143_v53  ;;  %v9148_v34 = vmul.f32 0.5, %v9100_v58  ;;  %v9101_v50 = vadd.f32 %v9058_v40, %v16102_v12  ;;  %v9062_v61 = vadd.f32 %v9061_v37, %v8989_v18 }
 0x64d   :  { %v9063_v7 = vpop.f32.mrf.mxu1  ;;  %v9396_v20 = vadd.f32 %v15651_v55, %v9317_v42 }
 0x64e   :  { %v9323_v54 = vmul.f32 %v15647_v41, %v9148_v34  ;;  %v9397_v52 = vadd.f32 %v15659_v47, %v9318_v14  ;;  %v9149_v9 = vmul.f32 0.5, %v9101_v50  ;;  %v9106_v6 = vadd.f32 %v9062_v61, %v16103_v4  ;;  %v16108_v14 = vld [vmem:[#allocation70_spill] sm:$0xff]  ;;  %v16109_v4 = vld [vmem:[#allocation68_spill] sm:$0xff] }
 0x64f   :  { %v9064_v1 = vadd.f32 %v9063_v7, %v8991_v49  ;;  %v9065_v10 = vpop.f32.mrf.mxu1  ;;  %vm9444_vm0 = vcmp.ge.f32.partialorder %v9396_v20, 0.0  ;;  %v9493_v28 = vmul.f32 %v15370_v33, %v9396_v20 }
 0x650   :  { %v9066_v29 = vadd.f32 %v9065_v10, %v8993_v11  ;;  %v9402_v51 = vadd.f32 %v15651_v55, %v9323_v54  ;;  %v9324_v38 = vmul.f32 %v15655_v57, %v9149_v9  ;;  %v9154_v35 = vmul.f32 0.5, %v9106_v6 }
 0x651   :  { %v9107_v46 = vadd.f32 %v9064_v1, %v16104_v21  ;;  %v9067_v17 = vpop.f32.mrf.mxu1  ;;  %vm9445_vm1 = vcmp.ge.f32.partialorder %v9397_v52, 0.0  ;;  %v9494_v36 = vmul.f32 %v15370_v33, %v9397_v52  ;;  %v9541_v5 = vsel %vm9444_vm0, %v9396_v20, %v9493_v28 }
 0x652   :  { %v9112_v16 = vadd.f32 %v9066_v29, %v16105_v15  ;;  %v9068_v8 = vadd.f32 %v9067_v17, %v8995_v25  ;;  %v9403_v39 = vadd.f32 %v15659_v47, %v9324_v38  ;;  %v9329_v63 = vmul.f32 %v15647_v41, %v9154_v35  ;;  %v16110_v35 = vld [vmem:[#allocation73_spill] sm:$0xff] }
 0x653   :  { %v9155_v60 = vmul.f32 0.5, %v9107_v46  ;;  %v9071_v18 = vpop.f32.mrf.mxu1  ;;  %vm9450_vm2 = vcmp.ge.f32.partialorder %v9402_v51, 0.0  ;;  %v9499_v22 = vmul.f32 %v15370_v33, %v9402_v51  ;;  %v9015_v11 = vadd.f32 %v9014_v2, %v8942_v3  ;;  %v16113_v2 = vld [vmem:[#allocation74_spill] sm:$0xff] }
 0x654   :  { %v9160_v0 = vmul.f32 0.5, %v9112_v16  ;;  %v9113_v44 = vadd.f32 %v9068_v8, %v16106_v56  ;;  %v9072_v45 = vadd.f32 %v9071_v18, %v8999_v32  ;;  %vm9451_vm3 = vcmp.ge.f32.partialorder %v9403_v39, 0.0 }
 0x655   :  { %v9330_v27 = vmul.f32 %v15655_v57, %v9155_v60  ;;  %v9073_v13 = vpop.f32.mrf.mxu1  ;;  %v9500_v49 = vmul.f32 %v15370_v33, %v9403_v39  ;;  %v9408_v25 = vadd.f32 %v15651_v55, %v9329_v63  ;;  %v9542_v12 = vsel %vm9445_vm1, %v9397_v52, %v9494_v36  ;;  %v16112_v63 = vld [vmem:[#allocation71_spill] sm:$0xff] }
 0x656   :  { %v9335_v42 = vmul.f32 %v15647_v41, %v9160_v0  ;;  %v9161_v53 = vmul.f32 0.5, %v9113_v44  ;;  %v9118_v58 = vadd.f32 %v9072_v45, %v16107_v43  ;;  %v9074_v40 = vadd.f32 %v9073_v13, %v9001_v30 }
 0x657   :  { %v9409_v24 = vadd.f32 %v15659_v47, %v9330_v27  ;;  %v9075_v37 = vpop.f32.mrf.mxu1  ;;  %v9547_v50 = vsel %vm9450_vm2, %v9402_v51, %v9499_v22  ;;  %v9548_v30 = vsel %vm9451_vm3, %v9403_v39, %v9500_v49  ;;  %v9505_v29 = vmul.f32 %v15370_v33, %v9408_v25  ;;  %v16111_v39 = vld [vmem:[#allocation72_spill] sm:$0xff] }
 0x658   :  { %v9336_v62 = vmul.f32 %v15655_v57, %v9161_v53  ;;  %v9119_v34 = vadd.f32 %v9074_v40, %v16108_v14  ;;  %v9414_v61 = vadd.f32 %v15651_v55, %v9335_v42  ;;  %v9076_v7 = vadd.f32 %v9075_v37, %v9003_v26  ;;  %v16114_v37 = vld [vmem:[#allocation77_spill] sm:$0xff] }
 0x659   :  { %v9077_v32 = vpop.f32.mrf.mxu1  ;;  %v9166_v54 = vmul.f32 0.5, %v9118_v58  ;;  %v9506_v9 = vmul.f32 %v15370_v33, %v9409_v24  ;;  %v9590_v10 = vpack.c.bf16 %v9548_v30, %v9542_v12  ;;  %vm9457_vm4 = vcmp.ge.f32.partialorder %v9409_v24, 0.0 }
 0x65a   :  { %v9415_v20 = vadd.f32 %v15659_v47, %v9336_v62  ;;  %v9167_v31 = vmul.f32 0.5, %v9119_v34  ;;  %v9124_v6 = vadd.f32 %v9076_v7, %v16109_v4  ;;  %v9078_v1 = vadd.f32 %v9077_v32, %v9005_v19 }
 0x65b   :  { %v9081_v3 = vpop.f32.mrf.mxu1  ;;  %v9589_v52 = vpack.c.bf16 %v9547_v50, %v9541_v5  ;;  %v9511_v51 = vmul.f32 %v15370_v33, %v9414_v61  ;;  %10155 = vmatprep.mubr.bf16.mxu1 %v9590_v10  ;;  %v9341_v19 = vmul.f32 %v15647_v41, %v9166_v54  ;;  %v9554_v16 = vsel %vm9457_vm4, %v9409_v24, %v9506_v9 }
 0x65c   :  { %v9082_v26 = vadd.f32 %v9081_v3, %v15674_v48  ;;  %vm9463_vm5 = vcmp.ge.f32.partialorder %v9415_v20, 0.0  ;;  %v9172_v38 = vmul.f32 0.5, %v9124_v6  ;;  %v9125_v21 = vadd.f32 %v9078_v1, %v16110_v35 }
 0x65d   :  { %v9083_v46 = vpop.f32.mrf.mxu1  ;;  %v9512_v17 = vmul.f32 %v15370_v33, %v9415_v20  ;;  %v9342_v28 = vmul.f32 %v15655_v57, %v9167_v31  ;;  %10156 = vmatmul.mubr.bf16.vlgmr.msra.gmra.mxu1 %v9589_v52  ;;  %vm9462_vm6 = vcmp.ge.f32.partialorder %v9414_v61, 0.0  ;;  %vm9456_vm7 = vcmp.ge.f32.partialorder %v9408_v25, 0.0 }
 0x65e   :  { %v9084_v15 = vadd.f32 %v9083_v46, %v15679_v23  ;;  %v9347_v48 = vmul.f32 %v15647_v41, %v9172_v38  ;;  %v9173_v8 = vmul.f32 0.5, %v9125_v21  ;;  %v9130_v60 = vadd.f32 %v9082_v26, %v16111_v39  ;;  %v11196_v21 = vpop.f32.mrf.mxu0 }
 0x65f   :  { %v9085_v18 = vpop.f32.mrf.mxu1  ;;  %v9560_v36 = vsel %vm9463_vm5, %v9415_v20, %v9512_v17  ;;  %v9421_v27 = vadd.f32 %v15659_v47, %v9342_v28  ;;  %v9420_v43 = vadd.f32 %v15651_v55, %v9341_v19  ;;  %v9559_v40 = vsel %vm9462_vm6, %v9414_v61, %v9511_v51 }
 0x660   :  { %v9131_v0 = vadd.f32 %v9084_v15, %v16112_v63  ;;  %v9086_v56 = vadd.f32 %v9085_v18, %v15681_v59  ;;  %v9596_v44 = vpack.c.bf16 %v9560_v36, %v9554_v16  ;;  %v9426_v45 = vadd.f32 %v15651_v55, %v9347_v48  ;;  %v11197_v46 = vpop.f32.mrf.mxu0 }
 0x661   :  { %v9348_v22 = vmul.f32 %v15655_v57, %v9173_v8  ;;  %v9087_v23 = vpop.f32.mrf.mxu1  ;;  %v9178_v59 = vmul.f32 0.5, %v9130_v60  ;;  %v9553_v62 = vsel %vm9456_vm7, %v9408_v25, %v9505_v29  ;;  %vm9469_vm8 = vcmp.ge.f32.partialorder %v9421_v27, 0.0 }
 0x662   :  { %v9179_v13 = vmul.f32 0.5, %v9131_v0  ;;  %v9136_v42 = vadd.f32 %v9086_v56, %v16113_v2  ;;  %v9088_v53 = vadd.f32 %v9087_v23, %v9015_v11  ;;  %10163 = vmatprep.mubr.bf16.mxu1 %v9596_v44  ;;  %v9523_v14 = vmul.f32 %v15370_v33, %v9426_v45  ;;  %v11199_v17 = vpop.f32.mrf.mxu0 }
 0x663   :  { %v9427_v58 = vadd.f32 %v15659_v47, %v9348_v22  ;;  %v9595_v34 = vpack.c.bf16 %v9559_v40, %v9553_v62  ;;  %v9518_v7 = vmul.f32 %v15370_v33, %v9421_v27  ;;  %vm9474_vm10 = vcmp.ge.f32.partialorder %v9426_v45, 0.0 }
 0x664   :  { %v9354_v5 = vmul.f32 %v15655_v57, %v9179_v13  ;;  %v9184_v24 = vmul.f32 0.5, %v9136_v42  ;;  %v9137_v49 = vadd.f32 %v9088_v53, %v16114_v37  ;;  %v9517_v32 = vmul.f32 %v15370_v33, %v9420_v43  ;;  %v11200_v19 = vpop.f32.mrf.mxu0 }
 0x665   :  { %vm9475_vm9 = vcmp.ge.f32.partialorder %v9427_v58, 0.0  ;;  %10164 = vmatmul.mubr.bf16.gmra.mxu1 %v9595_v34  ;;  %v9524_v61 = vmul.f32 %v15370_v33, %v9427_v58  ;;  %v9353_v25 = vmul.f32 %v15647_v41, %v9178_v59  ;;  %v9566_v20 = vsel %vm9469_vm8, %v9421_v27, %v9518_v7 }
 0x666   :  { %v9359_v12 = vmul.f32 %v15647_v41, %v9184_v24  ;;  %v9185_v50 = vmul.f32 0.5, %v9137_v49  ;;  %v9433_v11 = vadd.f32 %v15659_v47, %v9354_v5  ;;  %vm9468_vm11 = vcmp.ge.f32.partialorder %v9420_v43, 0.0  ;;  %v11202_v28 = vpop.f32.mrf.mxu0 }
 0x667   :  { %v9572_v54 = vsel %vm9475_vm9, %v9427_v58, %v9524_v61  ;;  %v9571_v6 = vsel %vm9474_vm10, %v9426_v45, %v9523_v14  ;;  %v9432_v10 = vadd.f32 %v15651_v55, %v9353_v25  ;;  %v9565_v3 = vsel %vm9468_vm11, %v9420_v43, %v9517_v32  ;;  %v15753_v43 = vld [vmem:[#allocation8 + $0x32] ss:$0 sm:$0xff] }
 0x668   :  { %v9360_v30 = vmul.f32 %v15655_v57, %v9185_v50  ;;  %v9438_v31 = vadd.f32 %v15651_v55, %v9359_v12  ;;  %v9602_v4 = vpack.c.bf16 %v9572_v54, %v9566_v20  ;;  %vm9481_vm12 = vcmp.ge.f32.partialorder %v9433_v11, 0.0  ;;  %v11203_v15 = vpop.f32.mrf.mxu0 }
 0x669   :  { %v9530_v1 = vmul.f32 %v15370_v33, %v9433_v11  ;;  %v9601_v57 = vpack.c.bf16 %v9571_v6, %v9565_v3  ;;  %vm9480_vm15 = vcmp.ge.f32.partialorder %v9432_v10, 0.0  ;;  %v11198_v42 = vadd.f32 %v11197_v46, %v11196_v21 }
 0x66a   :  { %v9439_v9 = vadd.f32 %v15659_v47, %v9360_v30  ;;  %10171 = vmatprep.mubr.bf16.mxu1 %v9602_v4  ;;  %v9535_v52 = vmul.f32 %v15370_v33, %v9438_v31  ;;  %vm9486_vm14 = vcmp.ge.f32.partialorder %v9438_v31, 0.0  ;;  %v9529_v47 = vmul.f32 %v15370_v33, %v9432_v10  ;;  %v11205_v16 = vpop.f32.mrf.mxu0 }
 0x66b   :  { %v9578_v29 = vsel %vm9481_vm12, %v9433_v11, %v9530_v1  ;;  %v10028_v40 = vadd.f32 %v11198_v42, %v15753_v43  ;;  %v11201_v5 = vadd.f32 %v11200_v19, %v11199_v17  ;;  %v11204_v7 = vadd.f32 %v11203_v15, %v11202_v28 }
 0x66c   :  { %vm9487_vm13 = vcmp.ge.f32.partialorder %v9439_v9, 0.0  ;;  %v9536_v41 = vmul.f32 %v15370_v33, %v9439_v9  ;;  %v9583_v38 = vsel %vm9486_vm14, %v9438_v31, %v9535_v52  ;;  %v9577_v35 = vsel %vm9480_vm15, %v9432_v10, %v9529_v47  ;;  %v11206_v48 = vpop.f32.mrf.mxu0 }
 0x66d   :  { %10172 = vmatmul.mubr.bf16.gmra.mxu1 %v9601_v57  ;;  %v9607_v55 = vpack.c.bf16 %v9583_v38, %v9577_v35  ;;  %v10031_v12 = vadd.f32 %v11201_v5, %v15753_v43  ;;  %v11207_v4 = vadd.f32 %v11206_v48, %v11205_v16 }
 0x66e   :  { %v9584_v26 = vsel %vm9487_vm13, %v9439_v9, %v9536_v41  ;;  %v11208_v8 = vpop.f32.mrf.mxu0  ;;  %v10036_v9 = vadd.f32 %v11204_v7, %v15753_v43 }
 0x66f   :  { %v9608_v51 = vpack.c.bf16 %v9584_v26, %v9578_v29  ;;  %v10039_v52 = vadd.f32 %v11207_v4, %v15753_v43 }
 0x670   :  { %v11209_v39 = vpop.f32.mrf.mxu0 }
 0x671   :  { %10179 = vmatprep.mubr.bf16.mxu1 %v9608_v51  ;;  %v11210_v29 = vadd.f32 %v11209_v39, %v11208_v8 }
 0x672   :  { %v11211_v60 = vpop.f32.mrf.mxu0 }
 0x673   :  { %v10044_v46 = vadd.f32 %v11210_v29, %v15753_v43 }
 0x674   :  { %v11212_v18 = vpop.f32.mrf.mxu0 }
 0x675   :  { %10180 = vmatmul.mubr.bf16.gmra.mxu1 %v9607_v55  ;;  %v11213_v17 = vadd.f32 %v11212_v18, %v11211_v60 }
 0x676   :  { %v15745_v36 = vpop.f32.mrf.mxu0 }
 0x677   :  { %v10047_v8 = vadd.f32 %v11213_v17, %v15753_v43 }
 0x678   :  { %v15747_v33 = vpop.f32.mrf.mxu0 }
 0x679   :  { %v11216_v39 = vadd.f32 %v15747_v33, %v15745_v36 }
 0x67a   :  { %v15749_v63 = vpop.f32.mrf.mxu0 }
 0x67c   :  { %v15751_v0 = vpop.f32.mrf.mxu0 }
 0x67d   :  { %v11219_v42 = vadd.f32 %v15751_v0, %v15749_v63 }
 0x67f   :  { %v10055_v33 = vadd.f32 %v11219_v42, %v15753_v43 }
 0x6a0   :  { %v11236_v56 = vpop.f32.mrf.mxu0 }
 0x6a2   :  { %v11237_v44 = vpop.f32.mrf.mxu0 }
 0x6a3   :  { %v11238_v58 = vadd.f32 %v11237_v44, %v11236_v56 }
 0x6a4   :  { %v11239_v45 = vpop.f32.mrf.mxu0 }
 0x6a5   :  { %v10093_v49 = vadd.f32 %v11238_v58, %v10028_v40 }
 0x6a6   :  { %v11240_v22 = vpop.f32.mrf.mxu0 }
 0x6a7   :  { %v11241_v62 = vadd.f32 %v11240_v22, %v11239_v45 }
 0x6a9   :  { %v10096_v32 = vadd.f32 %v11241_v62, %v10031_v12 }
 0x6aa   :  { %v11242_v23 = vpop.f32.mrf.mxu0 }
 0x6ac   :  { %v11243_v27 = vpop.f32.mrf.mxu0 }
 0x6ad   :  { %v11244_v30 = vadd.f32 %v11243_v27, %v11242_v23 }
 0x6ae   :  { %v11245_v13 = vpop.f32.mrf.mxu0 }
 0x6af   :  { %v10101_v1 = vadd.f32 %v11244_v30, %v10036_v9 }
 0x6b0   :  { %v11246_v2 = vpop.f32.mrf.mxu0 }
 0x6b1   :  { %v11247_v10 = vadd.f32 %v11246_v2, %v11245_v13  ;;  %v10052_v2 = vadd.f32 %v11216_v39, %v15753_v43 }
 0x6b2   :  { %v11248_v53 = vpop.f32.mrf.mxu0 }
 0x6b3   :  { %v10104_v47 = vadd.f32 %v11247_v10, %v10039_v52 }
 0x6b4   :  { %v11249_v24 = vpop.f32.mrf.mxu0 }
 0x6b5   :  { %v11250_v38 = vadd.f32 %v11249_v24, %v11248_v53 }
 0x6b6   :  { %v11251_v50 = vpop.f32.mrf.mxu0 }
 0x6b7   :  { %v10109_v15 = vadd.f32 %v11250_v38, %v10044_v46 }
 0x6b8   :  { %v11252_v20 = vpop.f32.mrf.mxu0 }
 0x6b9   :  { %v11253_v16 = vadd.f32 %v11252_v20, %v11251_v50 }
 0x6ba   :  { %v11254_v41 = vpop.f32.mrf.mxu0 }
 0x6bb   :  { %v10112_v23 = vadd.f32 %v11253_v16, %v10047_v8 }
 0x6bc   :  { %v11255_v55 = vpop.f32.mrf.mxu0 }
 0x6bd   :  { %v11256_v27 = vadd.f32 %v11255_v55, %v11254_v41 }
 0x6be   :  { %v11257_v56 = vpop.f32.mrf.mxu0 }
 0x6c0   :  { %v11258_v60 = vpop.f32.mrf.mxu0 }
 0x6c1   :  { %v11259_v40 = vadd.f32 %v11258_v60, %v11257_v56 }
 0x71d   :  { %v11276_v59 = vpop.f32.mrf.mxu1 }
 0x71f   :  { %v11277_v37 = vpop.f32.mrf.mxu1 }
 0x720   :  { %v11278_v14 = vadd.f32 %v11277_v37, %v11276_v59  ;;  %v10117_v59 = vadd.f32 %v11256_v27, %v10052_v2 }
 0x721   :  { %v11279_v34 = vpop.f32.mrf.mxu1 }
 0x722   :  { %v10158_v11 = vadd.f32 %v11278_v14, %v10093_v49  ;;  %v10120_v49 = vadd.f32 %v11259_v40, %v10055_v33 }
 0x723   :  { %v11280_v61 = vpop.f32.mrf.mxu1 }
 0x724   :  { %10188 = vst [vmem:[#allocation17] sm:$0xff] %v10158_v11  ;;  %v11281_v25 = vadd.f32 %v11280_v61, %v11279_v34 }
 0x725   :  { %v11282_v31 = vpop.f32.mrf.mxu1 }
 0x726   :  { %v10161_v54 = vadd.f32 %v11281_v25, %v10096_v32 }
 0x727   :  { %v11283_v6 = vpop.f32.mrf.mxu1 }
 0x728   :  { %10189 = vst [vmem:[#allocation17 + $0x8] sm:$0xff] %v10161_v54  ;;  %v11284_v3 = vadd.f32 %v11283_v6, %v11282_v31 }
 0x729   :  { %v11285_v57 = vpop.f32.mrf.mxu1 }
 0x72a   :  { %v10166_v26 = vadd.f32 %v11284_v3, %v10101_v1 }
 0x72b   :  { %v11286_v51 = vpop.f32.mrf.mxu1 }
 0x72c   :  { %10190 = vst [vmem:[#allocation17 + $0x10] sm:$0xff] %v10166_v26  ;;  %v11287_v35 = vadd.f32 %v11286_v51, %v11285_v57 }
 0x72d   :  { %v11288_v21 = vpop.f32.mrf.mxu1 }
 0x72e   :  { %v10169_v19 = vadd.f32 %v11287_v35, %v10104_v47 }
 0x72f   :  { %v11289_v28 = vpop.f32.mrf.mxu1 }
 0x730   :  { %10191 = vst [vmem:[#allocation17 + $0x18] sm:$0xff] %v10169_v19  ;;  %v11290_v48 = vadd.f32 %v11289_v28, %v11288_v21 }
 0x731   :  { %v11291_v44 = vpop.f32.mrf.mxu1 }
 0x732   :  { %v10174_v45 = vadd.f32 %v11290_v48, %v10109_v15 }
 0x733   :  { %v11292_v22 = vpop.f32.mrf.mxu1 }
 0x734   :  { %10192 = vst [vmem:[#allocation17 + $0x20] sm:$0xff] %v10174_v45  ;;  %v11293_v13 = vadd.f32 %v11292_v22, %v11291_v44 }
 0x735   :  { %v11294_v18 = vpop.f32.mrf.mxu1 }
 0x736   :  { %v10177_v53 = vadd.f32 %v11293_v13, %v10112_v23 }
 0x737   :  { %v11295_v58 = vpop.f32.mrf.mxu1 }
 0x738   :  { %10193 = vst [vmem:[#allocation17 + $0x28] sm:$0xff] %v10177_v53  ;;  %v11296_v5 = vadd.f32 %v11295_v58, %v11294_v18 }
 0x739   :  { %v11297_v36 = vpop.f32.mrf.mxu1 }
 0x73a   :  { %v10182_v24 = vadd.f32 %v11296_v5, %v10117_v59 }
 0x73b   :  { %v11298_v37 = vpop.f32.mrf.mxu1 }
 0x73c   :  { %10194 = vst [vmem:[#allocation17 + $0x30] sm:$0xff] %v10182_v24  ;;  %v11299_v62 = vadd.f32 %v11298_v37, %v11297_v36 }
 0x73e   :  { %v10185_v14 = vadd.f32 %v11299_v62, %v10120_v49 }
 0x740   :  { %10195 = vst [vmem:[#allocation17 + $0x38] sm:$0xff] %v10185_v14 }
 0x741   :  { %12893 = shalt.err (!%p12890_p11)
}
 0x742   :  { %10207 = dma.vmem_to_hbm [thread:$0]  %s10202_s25, 1024, %s15781_s8, [#allocation5], %s12923_s28, %s12923_s28, %s12924_s29  }
 0x743   :  { %12912 = dma.done.wait [#allocation5], 1024  }
 0x744   :  { %12913 = vsyncadd [#allocation5], 4294966272 }
 0x745   :  { %10211 = vsyncpa [#allocation4], 1 }
 0x746   :  { %10212 = vsyncpa [#allocation9], 1 }
 0x747   :  { %10213 = vsyncpa [#allocation12], 1 }
 0x748   :  { %10214 = vsyncpa [#allocation15], 1 }
 0x749   :  { %10215 = vsyncpa [#allocation5], 1 }
 0x74a   :  { %10216 = vsyncpa [#allocation6], 1 }

</bundles_post_ra>
